<compile_context>
chip_gen: v7x
topology: tpu7x:2x2x1
jax: 0.10.0
libtpu: 0.0.40
codegen_flags: <defaults>
</compile_context>

<pallas_src>
import functools

import jax
import jax.numpy as jnp
import numpy as np
from jax.experimental import pallas as pl
from jax.experimental.pallas import tpu as pltpu


def _pixel_shuffle_kernel(x_ref, o_ref, *, r, H, W, cblk):
    """One grid step: cblk output channels of one batch element.

    x_ref block: (1, cblk*r*r, H*W)   lane-dense flattened spatial input.
    o_ref block: (1, cblk, H*r*W*r)   lane-dense flattened spatial output.
    """
    if r == 1:  # static Python branch: pure copy
        o_ref[0] = x_ref[0].astype(o_ref.dtype)
        return

    Wr = W * r
    # Single lane-splitting reshape: flat spatial lanes -> (H, W).  Everything
    # after this point only slices leading dims / merges trailing dims (the
    # previously validated relayout chain, vectorized over all cblk channels).
    x = x_ref[0].reshape(cblk, r, r, H, W)

    rows = []
    for i in range(r):  # static unroll over tiny r
        # Width interleave: q[c, h, w*r + j] = x[c, i, j, h, w]
        cols = [x[:, i, j] for j in range(r)]                        # r x (cblk, H, W)
        rows.append(jnp.stack(cols, axis=-1).reshape(cblk, H, Wr))   # (cblk, H, W*r)

    # Height interleave in flat index space: concatenating the r row-planes
    # along lanes gives index (h, i*Wr + m); collapsing (H, r*Wr) -> H*r*Wr
    # gives h*r*Wr + i*Wr + w*r + j == (h*r+i)*Wr + (w*r+j), i.e. exactly the
    # row-major (H*r, W*r) output.
    out = jnp.concatenate(rows, axis=-1)                             # (cblk, H, r*W*r)
    o_ref[0] = out.reshape(cblk, H * r * Wr).astype(o_ref.dtype)


def _lane_pad(n):
    return -(-n // 128) * 128


def _sub_pad(n, m=8):
    return -(-n // m) * m


def _vmem_caps():
    """(physical VMEM bytes, vmem_limit_bytes, nominal data-block cap bytes)."""
    try:
        cap = int(getattr(pltpu.get_tpu_info(), "vmem_capacity_bytes", 0)) or (64 << 20)
    except Exception:  # unknown target: be conservative (v7x-like)
        cap = 64 << 20
    if cap >= (96 << 20):            # v5e / v6e class: 128 MiB physical VMEM
        return cap, 80 << 20, 8 << 20
    # v7x class: 64 MiB per TensorCore -> smaller blocks, relayout headroom
    return cap, 44 << 20, 2 << 20


def _per_channel_bytes(r, H, W, itemsize):
    """Conservative VMEM bytes per output channel for one grid step:
    double-buffered in/out blocks + padded in-kernel relayout temporaries."""
    in_b = r * r * _lane_pad(H * W) * itemsize           # lane-dense input block
    out_b = _lane_pad(H * r * W * r) * itemsize          # lane-dense output block
    tmp = itemsize * (
        r * r * H * _lane_pad(W)                         # (c, r, r, H, W) split view
        + H * _sub_pad(W) * _lane_pad(r)                 # widest stack temp (.., W, r)
        + r * H * _lane_pad(W * r)                       # rows
        + H * _lane_pad(r * W * r)                       # concat
    )
    nominal = 2 * r * r * H * W * itemsize               # unpadded in+out bytes
    return 2 * (in_b + out_b) + tmp, nominal


def _choose_cblk(c_out, batch, per_ch_total, per_ch_nominal, budget, data_cap, sub_mult):
    """Largest divisor of c_out that (a) satisfies the dtype sublane rule
    (cblk % sub_mult == 0 or cblk == c_out), (b) fits the VMEM budget, and
    (c) when possible leaves >= 4 grid steps (megacore / pipeline overlap)."""
    valid = [d for d in range(1, c_out + 1)
             if c_out % d == 0 and (d == c_out or d % sub_mult == 0)]
    fitting = [d for d in valid
               if d * per_ch_total <= budget and d * per_ch_nominal <= data_cap]
    if not fitting:
        # TODO(synk): nothing fits (very large H*W) -> would need spatial
        # tiling; take the smallest legal block and rely on the raised limit.
        fitting = [min(valid)]
    stepped = [d for d in fitting if batch * (c_out // d) >= 4]
    return max(stepped) if stepped else max(fitting)


def pixel_shuffle(x, scale_factor):
    # TODO(synk): scale_factor < 1 (pixel-unshuffle) branch of the PyTorch
    # reference is not implemented here; only the upscale (r >= 1) path.
    r = int(scale_factor)
    assert r >= 1 and r == scale_factor, "only integer scale_factor >= 1 supported"
    B, C, H, W = x.shape
    assert C % (r * r) == 0, "channels must be divisible by scale_factor**2"
    Cout = C // (r * r)
    HW = H * W
    HrWr = HW * r * r
    itemsize = jnp.dtype(x.dtype).itemsize

    cap, vmem_limit, data_cap = _vmem_caps()
    per_ch_total, per_ch_nominal = _per_channel_bytes(r, H, W, itemsize)
    sub_mult = max(8, 32 // itemsize)        # f32: 8, bf16: 16, int8/fp8: 32
    budget = (vmem_limit * 3) // 4           # headroom for Mosaic-internal scratch
    cblk = _choose_cblk(Cout, B, per_ch_total, per_ch_nominal,
                        budget, data_cap, sub_mult)

    # Make sure the limit covers the block actually picked (fallback path),
    # without exceeding physical VMEM.
    needed = cblk * per_ch_total + (4 << 20)
    vmem_limit = int(min(max(vmem_limit, needed), max(cap - (16 << 20), 32 << 20)))

    # Free contiguous views: lane-dense input (B, C, H*W); lane-dense output
    # (B, Cout, H*r*W*r) reshaped back to NCHW spatial layout after the call.
    x_flat = x.reshape(B, C, HW)

    kernel = functools.partial(_pixel_shuffle_kernel, r=r, H=H, W=W, cblk=cblk)

    out_flat = pl.pallas_call(
        kernel,
        out_shape=jax.ShapeDtypeStruct((B, Cout, HrWr), x.dtype),
        grid_spec=pltpu.PrefetchScalarGridSpec(
            num_scalar_prefetch=0,
            grid=(B, Cout // cblk),
            in_specs=[
                pl.BlockSpec((1, cblk * r * r, HW), lambda b, c: (b, c, 0)),
            ],
            out_specs=pl.BlockSpec((1, cblk, HrWr), lambda b, c: (b, c, 0)),
        ),
        compiler_params=pltpu.CompilerParams(
            dimension_semantics=("parallel", "parallel"),
            vmem_limit_bytes=vmem_limit,
        ),
        cost_estimate=pl.CostEstimate(
            flops=0, transcendentals=0,
            bytes_accessed=2 * x.size * itemsize),
    )(x_flat)

    return out_flat.reshape(B, Cout, H * r, W * r)


def _reference(x, r):
    # Pure-JAX mirror of the PyTorch view/permute/view for correctness checks.
    B, C, H, W = x.shape
    Cout = C // (r * r)
    v = x.reshape(B, Cout, r, r, H, W)
    v = jnp.transpose(v, (0, 1, 4, 2, 5, 3))
    return v.reshape(B, Cout, H * r, W * r)


if __name__ == "__main__":
    key = jax.random.PRNGKey(0)
    B, C, H, W = 2, 16, 16, 16
    scale_factor = 2

    x = jax.random.normal(key, (B, C, H, W), dtype=jnp.float32)

    out = pixel_shuffle(x, scale_factor)
    out = jax.block_until_ready(out)

    ref = _reference(x, scale_factor)
    assert out.shape == (B, C // (scale_factor * scale_factor),
                         H * scale_factor, W * scale_factor)
    np.testing.assert_allclose(np.asarray(out), np.asarray(ref), rtol=0, atol=0)

    print("KERNEL_OK")
</pallas_src>

<mosaic_0001>
module attributes {stable_mosaic.version = 11 : i64} {
  func.func @_pixel_shuffle_kernel(%arg0: i32, %arg1: i32, %arg2: memref<1x16x256xf32, #tpu.memory_space<vmem>>, %arg3: memref<1x4x1024xf32, #tpu.memory_space<vmem>>) attributes {dimension_semantics = [#tpu.dimension_semantics<parallel>, #tpu.dimension_semantics<parallel>], iteration_bounds = array<i64: 2, 1>, scalar_prefetch = 0 : i64, scratch_operands = 0 : i64, tpu.core_type = #tpu.core_type<tc>, window_params = [{transform_indices = @transform_0, window_bounds = array<i64: 1, 16, 256>}, {transform_indices = @transform_1, window_bounds = array<i64: 1, 4, 1024>}]} {
    %c0 = arith.constant 0 : index
    %c0_0 = arith.constant 0 : index
    %c0_1 = arith.constant 0 : index
    %0 = vector.load %arg2[%c0, %c0_0, %c0_1] : memref<1x16x256xf32, #tpu.memory_space<vmem>>, vector<1x16x256xf32>
    %1 = vector.shape_cast %0 : vector<1x16x256xf32> to vector<16x256xf32>
    %2 = vector.shape_cast %1 : vector<16x256xf32> to vector<4x2x2x16x16xf32>
    %3 = vector.extract_strided_slice %2 {offsets = [0, 0, 0, 0, 0], sizes = [4, 1, 1, 16, 16], strides = [1, 1, 1, 1, 1]} : vector<4x2x2x16x16xf32> to vector<4x1x1x16x16xf32>
    %4 = vector.shape_cast %3 : vector<4x1x1x16x16xf32> to vector<4x16x16xf32>
    %5 = vector.extract_strided_slice %2 {offsets = [0, 0, 1, 0, 0], sizes = [4, 1, 1, 16, 16], strides = [1, 1, 1, 1, 1]} : vector<4x2x2x16x16xf32> to vector<4x1x1x16x16xf32>
    %6 = vector.shape_cast %5 : vector<4x1x1x16x16xf32> to vector<4x16x16xf32>
    %7 = vector.shape_cast %4 : vector<4x16x16xf32> to vector<4x16x16x1xf32>
    %8 = vector.shape_cast %6 : vector<4x16x16xf32> to vector<4x16x16x1xf32>
    %9 = tpu.concatenate %7, %8 in 3 : vector<4x16x16x1xf32>, vector<4x16x16x1xf32> -> vector<4x16x16x2xf32>
    %10 = vector.shape_cast %9 : vector<4x16x16x2xf32> to vector<4x16x32xf32>
    %11 = vector.extract_strided_slice %2 {offsets = [0, 1, 0, 0, 0], sizes = [4, 1, 1, 16, 16], strides = [1, 1, 1, 1, 1]} : vector<4x2x2x16x16xf32> to vector<4x1x1x16x16xf32>
    %12 = vector.shape_cast %11 : vector<4x1x1x16x16xf32> to vector<4x16x16xf32>
    %13 = vector.extract_strided_slice %2 {offsets = [0, 1, 1, 0, 0], sizes = [4, 1, 1, 16, 16], strides = [1, 1, 1, 1, 1]} : vector<4x2x2x16x16xf32> to vector<4x1x1x16x16xf32>
    %14 = vector.shape_cast %13 : vector<4x1x1x16x16xf32> to vector<4x16x16xf32>
    %15 = vector.shape_cast %12 : vector<4x16x16xf32> to vector<4x16x16x1xf32>
    %16 = vector.shape_cast %14 : vector<4x16x16xf32> to vector<4x16x16x1xf32>
    %17 = tpu.concatenate %15, %16 in 3 : vector<4x16x16x1xf32>, vector<4x16x16x1xf32> -> vector<4x16x16x2xf32>
    %18 = vector.shape_cast %17 : vector<4x16x16x2xf32> to vector<4x16x32xf32>
    %19 = tpu.concatenate %10, %18 in 2 : vector<4x16x32xf32>, vector<4x16x32xf32> -> vector<4x16x64xf32>
    %20 = vector.shape_cast %19 : vector<4x16x64xf32> to vector<4x1024xf32>
    %c0_2 = arith.constant 0 : index
    %c0_3 = arith.constant 0 : index
    %c0_4 = arith.constant 0 : index
    %21 = vector.load %arg3[%c0_2, %c0_3, %c0_4] : memref<1x4x1024xf32, #tpu.memory_space<vmem>>, vector<1x4x1024xf32>
    %22 = vector.shape_cast %21 : vector<1x4x1024xf32> to vector<4x1024xf32>
    %23 = vector.shape_cast %20 : vector<4x1024xf32> to vector<1x4x1024xf32>
    tpu.vector_store %arg3[%c0_2, %c0_3, %c0_4], %23 {strides = array<i32>} : memref<1x4x1024xf32, #tpu.memory_space<vmem>>, vector<1x4x1024xf32>,
    return
  }
  func.func @transform_0(%arg0: i32, %arg1: i32) -> (i32, i32, i32) {
    %c0_i32 = arith.constant 0 : i32
    %c0_i32_0 = arith.constant 0 : i32
    return %arg0, %arg1, %c0_i32 : i32, i32, i32
  }
  func.func @transform_1(%arg0: i32, %arg1: i32) -> (i32, i32, i32) {
    %c0_i32 = arith.constant 0 : i32
    %c0_i32_0 = arith.constant 0 : i32
    return %arg0, %arg1, %c0_i32 : i32, i32, i32
  }
}

</mosaic_0001>

<bundles_post_ra>
// kernel: tpu_custom_call.1
= control target key start
LH: loop header
LB: loop body
LE: loop exit
PB: predicated region body
PF: predicated region fallthrough
CT: control target
= control target key end

     0   :  { %6 = vsyncpa [#allocation3], 0  ;;  %s15992_s0 = inlined_call_operand.hbm [shape: f32[2,16,256], index: 0, kind: input, shape index: {}]   ;;  %s15993_s1 = inlined_call_operand.hbm [shape: f32[2,4,1024], index: 1, kind: output, shape index: {}]  }
   0x1   :  { %8 = vsyncpa [#allocation3 + $0x1], 0 }
   0x2   :  { %9 = vsyncpa [#allocation4], 0 }
   0x3   :  { %11 = vsyncpa [#allocation4 + $0x1], 0  ;;  %s10027_s6 = smov 0   ;;  %s10029_s7 = smov 0  }
   0x4   :  { %s10031_s8 = smov 0   ;;  %s10033_s9 = smov 0  }
   0x5   :  { %s10035_s10 = smov 0   ;;  %s10037_s11 = smov 0  }
   0x6 LB: > { %s9770_s12 = sadd.s32 4294967295, %s9987_s11   ;;  %s9771_s13 = sadd.s32 4294967294, %s9987_s11   ;;  %s9987_s11 = sphi %s10037_s11, %s17_s11   ;;  %s9983_s10 = sphi %s10035_s10, %s17621_s10   ;;  %s9979_s9 = sphi %s10033_s9, %s17620_s9   ;;  %s9975_s8 = sphi %s10031_s8, %s17619_s8   ;;  %s9971_s7 = sphi %s10029_s7, %s17618_s7   ;;  %s9967_s6 = sphi %s10027_s6, %s17617_s6  }
   0x7   : > { %s29_s14 = sadd.s32 1, %s9983_s10  ;;  %s38_s15 = sadd.s32 1, %s9975_s8 }
   0x8   : > { %p31_p0 = scmp.ge.s32.totalorder %s29_s14, 2  ;;  %p45_p1 = scmp.ne.s32.totalorder %s9975_s8, %s9971_s7 }
   0x9   : > { %p46_p2 = scmp.eq.s32.totalorder %s9987_s11, 0  ;;  %p51_p3 = scmp.ne.s32.totalorder %s9971_s7, %s9967_s6 }
   0xa   : > { %s17623_s14 = smov (%p31_p0, %s29_s14), 0  ;;  %p52_p5 = scmp.eq.s32.totalorder %s9770_s12, 0 }
   0xb   : > { %p10068_p4 = por %p46_p2, %p45_p1  ;;  %s33_s17 = ssub.s32 %s9983_s10, %s17623_s14 }
   0xc   : > { %p77_p6 = scmp.eq.s32.totalorder %s9770_s12, 1  ;;  %p36_p7 = scmp.eq.s32.totalorder %s33_s17, 0 }
   0xd   : > { %p10074_p8 = por %p52_p5, %p51_p3  ;;  %p83_p10 = scmp.eq.s32.totalorder %s9771_s13, 1 }
   0xe   : > { %p10078_p9 = por %p77_p6, %p45_p1  ;;  %p9799_p13 = scmp.lt.s32.totalorder %s9987_s11, 2 }
   0xf   : > { %s10083_s20 = scalar_select %p36_p7, %s9975_s8, %s38_s15  }
  0x10   : > { %s16333_s19 = scalar_select %p10078_p9, 1, 0 }
  0x11   : > { %p10085_p11 = por %p83_p10, %p51_p3  ;;  %s103_s22 = sand.u32 1, %s9975_s8  }
  0x12   : > { %s9774_s23 = sshll.u32 %s103_s22, 5  ;;  %s9785_s24 = sshll.u32 %s9983_s10, 9 }
  0x13   : > { %s16334_s21 = scalar_select %p10085_p11, 1, 0 }
  0x14   : > { %s10096_s27 = scalar_lea.hbm %s15992_s0, %s9785_s24  ;;  %s107_s28 = scalar_lea.vmem [#allocation2], %s9774_s23 }
  0x15   : > { %s117_s29 = sshll.u32 %s107_s28, 4  ;;  %p10102_p0 = pnand %p9799_p13, %p10068_p4  ;;  %s10098_s29 = int_to_ptr.vmem [resolvable:$true] %s117_s29 }
  0x16   : > { %s10107_s2 = scalar_lea.sflag [#allocation3], %s103_s22  ;;  %s9875_s3 = scalar_lea.hbm %s10096_s27, 512 }
  0x17   : > { %p9876_p2 = scmp.ne.s32.totalorder %s10096_s27, %s9875_s3  ;;  %p9877_p3 = pneg %p10102_p0 }
  0x18   : > { %s9880_s12 = scalar_lea.hbm %s15992_s0, 1024  ;;  %p9881_p4 = scmp.lt.u32.totalorder %s10096_s27, %s15992_s0 }
  0x19   : > { %p9878_p5 = pnand %p9877_p3, %p9876_p2  ;;  %p9882_p7 = scmp.lt.u32.totalorder %s9880_s12, %s9875_s3 }
  0x1a   : > { %p9884_p13 = scmp.lt.u32.totalorder %s9875_s3, %s10096_s27 }
  0x1b   : > { %p9879_p6 = pneg %p9878_p5  ;;  %p9883_p10 = por %p9882_p7, %p9881_p4 }
  0x1d   : > { %p9885_p12 = por %p9884_p13, %p9883_p10 }
  0x1f   : > { %p9886_p1 = pnand %p9885_p12, %p9879_p6 }
  0x21   : > { %9889 = shalt.err (!%p9886_p1)
}
  0x22   : > { %s9890_s16 = scalar_lea.vmem %s10098_s29, 512  ;;  %s9989_s17 = smov [#allocation2]  }
  0x23   : > { %p9891_p2 = scmp.ne.s32.totalorder %s10098_s29, %s9890_s16  ;;  %s9895_s22 = sshll.u32 %s9989_s17, 4  ;;  %s9896_s22 = int_to_ptr.vmem [resolvable:$false] %s9895_s22 }
  0x24   : > { %s9897_s23 = scalar_lea.vmem %s9896_s22, 1024  ;;  %p9898_p9 = scmp.lt.s32.totalorder %s10098_s29, %s9896_s22 }
  0x25   : > { %p9893_p5 = pnand %p9891_p2, %p9877_p3  ;;  %p9899_p4 = scmp.lt.s32.totalorder %s9897_s23, %s9890_s16 }
  0x27   : > { %p9894_p11 = pneg %p9893_p5  ;;  %p9900_p7 = por %p9899_p4, %p9898_p9 }
  0x29   : > { %p9901_p10 = pnand %p9900_p7, %p9894_p11 }
  0x2b   : > { %9904 = shalt.err (!%p9901_p10)
}
  0x2c   : > { %s9990_s24 = smov 256   ;;  %s9991_s25 = smov 16  }
  0x2d   : > { %9794 = dma.hbm_to_vmem [thread:$0]  (!%p10102_p0), %s10096_s27, 512, %s10098_s29, %s10107_s2, %s9990_s24, %s9990_s24, %s9991_s25  }
  0x2e   : > { %p125_p12 = scmp.lt.s32.totalorder %s9987_s11, 3  ;;  %p16336_p1 = scmp.ge.s32.totalorder %s9987_s11, 1 }
  0x30   : > { %p126_p3 = pnand %p16336_p1, %p125_p12 }
  0x32   : > { %129 = sbr.rel (%p126_p3) target bundleno = 2284 (0x8ec), region = 24 }
  0x39   : > { %s10139_s26 = sand.u32 1, %s9971_s7  }
  0x3a   : > { %s9778_s28 = sshll.u32 %s10139_s26, 5  ;;  %s132_s3 = scalar_lea.sflag [#allocation3], %s10139_s26 }
  0x3b   : > { %s135_s4 = scalar_lea.vmem [#allocation2], %s9778_s28 }
  0x3c   : > { %9958 = dma.done.wait (%p10074_p8), %s132_s3, 512  }
  0x3d   : > { %9960 = vsyncadd (%p10074_p8), %s132_s3, 4294966784  ;;  %v10149_v0 = vld [vmem:[%s135_s4] sm:$0xff]  ;;  %s9992_s27 = smov 96   ;;  %s9993_s29 = smov 112   ;;  %v157_v1 = vld [vmem:[%s135_s4 + $0x10] sm:$0xff]  ;;  %v252_v6 = vlaneseq  ;;  %vm2199_vm0 = vcmask 7168  }
  0x3e   : > { %167 = vrot.lane.b32.xlu1 %v10149_v0, %s9992_s27  ;;  %161 = vrot.lane.b32.xlu0 %v10149_v0, %s9993_s29  ;;  %s9994_s30 = smov 80   ;;  %s9995_s2 = smov 64   ;;  %v10164_v2 = vld [vmem:[%s135_s4 + $0x8] sm:$0xff]  ;;  %v10166_v3 = vld [vmem:[%s135_s4 + $0x18] sm:$0xff]  ;;  %v9999_v4 = vmov 1983009808  }
  0x3f   : > { %s9996_s18 = smov 48   ;;  %s9997_s5 = smov 32   ;;  %v250_v5 = vunpack.c.l.s4 %v9999_v4  ;;  %v10188_v8 = vshrl.u32 %v252_v6, 7  ;;  %v10000_v36 = vmov 1934713408   ;;  %vm4984_vm1 = vcmask 15360  }
  0x40   : > { %s9998_s12 = smov 16   ;;  %v314_v37 = vunpack.c.l.s4 %v10000_v36  ;;  %s10001_s13 = smov 2   ;;  %vm4993_vm2 = vcmask 31744   ;;  %vm5002_vm3 = vcmask 48128   ;;  %vm5011_vm4 = vcmask 64512  }
  0x41   : > { %v251_v7 = vunpack.c.0.s8 %v250_v5  ;;  %v10215_v52 = vsub.s32 0, %v10188_v8  ;;  %s10002_s15 = smov 4   ;;  %s10003_s16 = smov 6   ;;  %vm5020_vm5 = vcmask 80896   ;;  %vm5029_vm6 = vcmask 97280  }
  0x42   : > { %169 = vrot.lane.b32.xlu1 %v157_v1, %s9992_s27  ;;  %163 = vrot.lane.b32.xlu0 %v157_v1, %s9993_s29  ;;  %v315_v42 = vunpack.c.0.s8 %v314_v37  ;;  %s10004_s17 = smov 8   ;;  %s10005_s22 = smov 10   ;;  %vm5038_vm7 = vcmask 113664   ;;  %vm5047_vm8 = vcmask 130048   ;;  %vm5056_vm9 = vcmask 146432  }
  0x43   : > { %v10191_v11 = vsub.s32 %v251_v7, %v10188_v8  ;;  %16337 = vst [vmem:[#allocation8_spill] sm:$0xff] %v10215_v52  ;;  %s10006_s23 = smov 12   ;;  %s10007_s24 = smov 14   ;;  %vm5065_vm10 = vcmask 162816   ;;  %vm5074_vm11 = vcmask 179200   ;;  %vm5083_vm12 = vcmask 195584  }
  0x44   : > { %v10210_v47 = vsub.s32 %v315_v42, %v10188_v8  ;;  %s10008_s25 = smov 18   ;;  %s10009_s3 = smov 20   ;;  %vm5092_vm13 = vcmask 211968   ;;  %vm5101_vm14 = vcmask 228352   ;;  %vm5110_vm15 = vcmask 244736  }
  0x45   : > { %s10010_s4 = smov 22   ;;  %p17614_p9 = scmp.ne.s32.totalorder %s16333_s19, 0 }
  0x46   : > { %175 = vrot.lane.b32.xlu1 %v157_v1, %s9994_s30  ;;  %173 = vrot.lane.b32.xlu0 %v10149_v0, %s9994_s30 }
  0x4a   : > { %181 = vrot.lane.b32.xlu1 %v157_v1, %s9995_s2  ;;  %179 = vrot.lane.b32.xlu0 %v10149_v0, %s9995_s2 }
  0x4e   : > { %187 = vrot.lane.b32.xlu1 %v157_v1, %s9996_s18  ;;  %185 = vrot.lane.b32.xlu0 %v10149_v0, %s9996_s18 }
  0x52   : > { %193 = vrot.lane.b32.xlu1 %v157_v1, %s9997_s5  ;;  %191 = vrot.lane.b32.xlu0 %v10149_v0, %s9997_s5 }
  0x56   : > { %199 = vrot.lane.b32.xlu1 %v157_v1, %s9998_s12  ;;  %197 = vrot.lane.b32.xlu0 %v10149_v0, %s9998_s12 }
  0x5a   : > { %205 = vrot.lane.b32.xlu0 %v10164_v2, %s9993_s29  ;;  %207 = vrot.lane.b32.xlu1 %v10166_v3, %s9993_s29  ;;  %s10012_s29 = smov 26  }
  0x5e   : > { %211 = vrot.lane.b32.xlu0 %v10164_v2, %s9992_s27  ;;  %213 = vrot.lane.b32.xlu1 %v10166_v3, %s9992_s27  ;;  %s10011_s27 = smov 24  }
  0x62   : > { %217 = vrot.lane.b32.xlu0 %v10164_v2, %s9994_s30  ;;  %219 = vrot.lane.b32.xlu1 %v10166_v3, %s9994_s30  ;;  %s10013_s30 = smov 28  }
  0x66   : > { %223 = vrot.lane.b32.xlu0 %v10164_v2, %s9995_s2  ;;  %225 = vrot.lane.b32.xlu1 %v10166_v3, %s9995_s2 }
  0x6a   : > { %229 = vrot.lane.b32.xlu0 %v10164_v2, %s9996_s18  ;;  %231 = vrot.lane.b32.xlu1 %v10166_v3, %s9996_s18  ;;  %s10014_s18 = smov 30  }
  0x6e   : > { %235 = vrot.lane.b32.xlu0 %v10164_v2, %s9997_s5  ;;  %237 = vrot.lane.b32.xlu1 %v10166_v3, %s9997_s5 }
  0x72   : > { %241 = vrot.lane.b32.xlu0 %v10164_v2, %s9998_s12  ;;  %243 = vrot.lane.b32.xlu1 %v10166_v3, %s9998_s12 }
  0xb0   : > { %v168_v9 = vpop.permute.xlu1 %167  ;;  %v162_v10 = vpop.permute.xlu0 %161 }
  0xb1   : > { %v247_v16 = vcombine.low %v10149_v0, %v168_v9  ;;  %v248_v17 = vcombine.high %v10149_v0, %v168_v9 }
  0xb3   : > { %v255_v26 = vrot.slane %v247_v16, %v10191_v11  ;;  %v10199_v27 = vrot.slane %v248_v17, %v10191_v11 }
  0xb4   : > { %v170_v12 = vpop.permute.xlu1 %169  ;;  %v164_v13 = vpop.permute.xlu0 %163 }
  0xb5   : > { %v519_v14 = vcombine.low %v157_v1, %v170_v12  ;;  %v520_v15 = vcombine.high %v157_v1, %v170_v12 }
  0xb7   : > { %v527_v18 = vrot.slane %v519_v14, %v10191_v11  ;;  %v534_v19 = vrot.slane %v520_v15, %v10191_v11 }
  0xb8   : > { %v176_v20 = vpop.permute.xlu1 %175  ;;  %v174_v21 = vpop.permute.xlu0 %173 }
  0xb9   : > { %v535_v22 = vcombine.low %v164_v13, %v176_v20  ;;  %v536_v23 = vcombine.high %v164_v13, %v176_v20  ;;  %v263_v24 = vcombine.low %v162_v10, %v174_v21  ;;  %v264_v25 = vcombine.high %v162_v10, %v174_v21 }
  0xbb   : > { %v543_v28 = vrot.slane %v535_v22, %v10191_v11  ;;  %v550_v29 = vrot.slane %v536_v23, %v10191_v11  ;;  %v271_v30 = vrot.slane %v263_v24, %v10191_v11  ;;  %v10205_v31 = vrot.slane %v264_v25, %v10191_v11 }
  0xbc   : > { %v182_v32 = vpop.permute.xlu1 %181  ;;  %v180_v33 = vpop.permute.xlu0 %179 }
  0xbd   : > { %v584_v34 = vcombine.high %v527_v18, %v543_v28  ;;  %v600_v35 = vcombine.high %v534_v19, %v550_v29  ;;  %v312_v38 = vcombine.high %v255_v26, %v271_v30  ;;  %v328_v39 = vcombine.high %v10199_v27, %v10205_v31 }
  0xbe   : > { %v583_v48 = vcombine.low %v527_v18, %v543_v28  ;;  %v599_v49 = vcombine.low %v534_v19, %v550_v29  ;;  %v311_v50 = vcombine.low %v255_v26, %v271_v30  ;;  %v327_v51 = vcombine.low %v10199_v27, %v10205_v31 }
  0xbf   : > { %v598_v0 = vrot.slane %v584_v34, %v10210_v47  ;;  %v614_v4 = vrot.slane %v600_v35, %v10210_v47  ;;  %v326_v12 = vrot.slane %v312_v38, %v10210_v47 }
  0xc0   : > { %v188_v40 = vpop.permute.xlu1 %187  ;;  %v186_v41 = vpop.permute.xlu0 %185  ;;  %v10220_v63 = vrot.slane %v583_v48, %v10210_v47  ;;  %v10224_v1 = vrot.slane %v599_v49, %v10210_v47  ;;  %v319_v10 = vrot.slane %v311_v50, %v10210_v47  ;;  %v10252_v35 = vrot.slane %v327_v51, %v10210_v47 }
  0xc4   : > { %v194_v43 = vpop.permute.xlu1 %193  ;;  %v192_v44 = vpop.permute.xlu0 %191 }
  0xc5   : > { %v551_v45 = vcombine.low %v182_v32, %v194_v43  ;;  %v552_v46 = vcombine.high %v182_v32, %v194_v43  ;;  %v279_v55 = vcombine.low %v180_v33, %v192_v44  ;;  %v280_v56 = vcombine.high %v180_v33, %v192_v44 }
  0xc7   : > { %v559_v53 = vrot.slane %v551_v45, %v10191_v11  ;;  %v566_v54 = vrot.slane %v552_v46, %v10191_v11  ;;  %v287_v13 = vrot.slane %v279_v55, %v10191_v11  ;;  %v294_v14 = vrot.slane %v280_v56, %v10191_v11 }
  0xc8   : > { %v200_v57 = vpop.permute.xlu1 %199  ;;  %v198_v58 = vpop.permute.xlu0 %197 }
  0xc9   : > { %v567_v59 = vcombine.low %v188_v40, %v200_v57  ;;  %v568_v60 = vcombine.high %v188_v40, %v200_v57  ;;  %v295_v61 = vcombine.low %v186_v41, %v198_v58  ;;  %v296_v62 = vcombine.high %v186_v41, %v198_v58 }
  0xca   : > { %v342_v40 = vrot.slane %v328_v39, %v10210_v47 }
  0xcb   : > { %v575_v5 = vrot.slane %v567_v59, %v10191_v11  ;;  %v582_v6 = vrot.slane %v568_v60, %v10191_v11  ;;  %v303_v7 = vrot.slane %v295_v61, %v10191_v11  ;;  %v310_v9 = vrot.slane %v296_v62, %v10191_v11 }
  0xcc   : > { %v206_v15 = vpop.permute.xlu0 %205  ;;  %v10235_v16 = vpop.permute.xlu1 %207  ;;  %v10292_v59 = vsub.s32 1, %v10188_v8 }
  0xcd   : > { %v615_v17 = vcombine.low %v559_v53, %v575_v5  ;;  %v616_v18 = vcombine.high %v559_v53, %v575_v5  ;;  %v631_v19 = vcombine.low %v566_v54, %v582_v6  ;;  %v632_v20 = vcombine.high %v566_v54, %v582_v6 }
  0xce   : > { %v343_v21 = vcombine.low %v287_v13, %v303_v7  ;;  %v344_v22 = vcombine.high %v287_v13, %v303_v7  ;;  %v359_v23 = vcombine.low %v294_v14, %v310_v9  ;;  %v360_v24 = vcombine.high %v294_v14, %v310_v9  ;;  %16347 = vst [vmem:[#allocation18_spill] sm:$0xff] %v10292_v59 }
  0xcf   : > { %v10238_v25 = vrot.slane %v615_v17, %v10210_v47  ;;  %v630_v26 = vrot.slane %v616_v18, %v10210_v47  ;;  %v10242_v27 = vrot.slane %v631_v19, %v10210_v47  ;;  %v646_v28 = vrot.slane %v632_v20, %v10210_v47 }
  0xd0   : > { %v351_v29 = vrot.slane %v343_v21, %v10210_v47  ;;  %v358_v30 = vrot.slane %v344_v22, %v10210_v47  ;;  %v10248_v31 = vrot.slane %v359_v23, %v10210_v47  ;;  %v374_v32 = vrot.slane %v360_v24, %v10210_v47  ;;  %v212_v33 = vpop.permute.xlu0 %211  ;;  %v214_v34 = vpop.permute.xlu1 %213 }
  0xd1   : > { %v10256_v36 = vcombine.high %v10220_v63, %v10238_v25  ;;  %v10258_v37 = vcombine.low %v598_v0, %v630_v26  ;;  %v10260_v38 = vcombine.high %v598_v0, %v630_v26  ;;  %v10265_v41 = vcombine.high %v10224_v1, %v10242_v27 }
  0xd2   : > { %v10267_v42 = vcombine.low %v614_v4, %v646_v28  ;;  %v10269_v43 = vcombine.high %v614_v4, %v646_v28  ;;  %v10271_v44 = vcombine.low %v319_v10, %v351_v29  ;;  %v10273_v45 = vcombine.high %v319_v10, %v351_v29 }
  0xd3   : > { %16338 = vst [vmem:[#allocation9_spill] sm:$0xff] %v10258_v37  ;;  %16339 = vst [vmem:[#allocation10_spill] sm:$0xff] %v10260_v38  ;;  %v10275_v46 = vcombine.low %v326_v12, %v358_v30  ;;  %v10277_v48 = vcombine.high %v326_v12, %v358_v30  ;;  %v10281_v49 = vcombine.high %v10252_v35, %v10248_v31  ;;  %v10307_v9 = vsub.s32 2, %v10188_v8 }
  0xd4   : > { %16340 = vst [vmem:[#allocation11_spill] sm:$0xff] %v10265_v41  ;;  %16341 = vst [vmem:[#allocation12_spill] sm:$0xff] %v10267_v42  ;;  %v10283_v39 = vcombine.low %v342_v40, %v374_v32  ;;  %v10285_v50 = vcombine.high %v342_v40, %v374_v32  ;;  %v218_v51 = vpop.permute.xlu0 %217  ;;  %v220_v53 = vpop.permute.xlu1 %219  ;;  %v383_v54 = vcombine.low %v10164_v2, %v212_v33  ;;  %v10310_v13 = vsub.s32 3, %v10188_v8 }
  0xd5   : > { %16342 = vst [vmem:[#allocation13_spill] sm:$0xff] %v10269_v43  ;;  %16343 = vst [vmem:[#allocation14_spill] sm:$0xff] %v10275_v46  ;;  %v384_v55 = vcombine.high %v10164_v2, %v212_v33  ;;  %v399_v56 = vcombine.low %v206_v15, %v218_v51  ;;  %v400_v57 = vcombine.high %v206_v15, %v218_v51  ;;  %v10319_v20 = vsub.s32 4, %v10188_v8 }
  0xd6   : > { %16344 = vst [vmem:[#allocation15_spill] sm:$0xff] %v10277_v48  ;;  %16345 = vst [vmem:[#allocation16_spill] sm:$0xff] %v10283_v39  ;;  %v794_v58 = vrot.slane %v10271_v44, %v10215_v52  ;;  %v391_v60 = vrot.slane %v383_v54, %v10191_v11  ;;  %v805_v7 = vrot.slane %v10271_v44, %v10292_v59  ;;  %v10328_v24 = vsub.s32 5, %v10188_v8 }
  0xd7   : > { %16346 = vst [vmem:[#allocation17_spill] sm:$0xff] %v10285_v50  ;;  %v10296_v61 = vrot.slane %v384_v55, %v10191_v11  ;;  %v407_v62 = vrot.slane %v399_v56, %v10191_v11  ;;  %v10300_v0 = vrot.slane %v400_v57, %v10191_v11  ;;  %16348 = vst [vmem:[#allocation19_spill] sm:$0xff] %v10307_v9 }
  0xd8   : > { %800 = vbcast.lane.b32.xlu1 %v794_v58, 264  ;;  %796 = vbcast.lane.b32.xlu0 %v794_v58, 256  ;;  %v224_v2 = vpop.permute.xlu0 %223  ;;  %v226_v4 = vpop.permute.xlu1 %225  ;;  %16349 = vst [vmem:[#allocation20_spill] sm:$0xff] %v10310_v13  ;;  %v655_v14 = vcombine.low %v10166_v3, %v214_v34  ;;  %v656_v15 = vcombine.high %v10166_v3, %v214_v34  ;;  %16350 = vst [vmem:[#allocation21_spill] sm:$0xff] %v10319_v20 }
  0xd9   : > { %v448_v5 = vcombine.high %v391_v60, %v407_v62  ;;  %v464_v6 = vcombine.high %v10296_v61, %v10300_v0  ;;  %v816_v17 = vrot.slane %v10271_v44, %v10307_v9  ;;  %v671_v18 = vcombine.low %v10235_v16, %v220_v53  ;;  %16351 = vst [vmem:[#allocation22_spill] sm:$0xff] %v10328_v24 }
  0xda   : > { %v672_v19 = vcombine.high %v10235_v16, %v220_v53  ;;  %v10322_v21 = vrot.slane %v655_v14, %v10191_v11  ;;  %v10325_v22 = vrot.slane %v656_v15, %v10191_v11  ;;  %v447_v23 = vcombine.low %v391_v60, %v407_v62 }
  0xdb   : > { %v10331_v26 = vrot.slane %v671_v18, %v10191_v11  ;;  %v827_v30 = vrot.slane %v10271_v44, %v10310_v13  ;;  %v838_v53 = vrot.slane %v10271_v44, %v10319_v20  ;;  %v463_v55 = vcombine.low %v10296_v61, %v10300_v0 }
  0xdc   : > { %811 = vbcast.lane.b32.xlu1 %v805_v7, 264  ;;  %807 = vbcast.lane.b32.xlu0 %v805_v7, 256  ;;  %v230_v10 = vpop.permute.xlu0 %229  ;;  %v232_v12 = vpop.permute.xlu1 %231  ;;  %v10334_v16 = vrot.slane %v672_v19, %v10191_v11  ;;  %v455_v54 = vrot.slane %v447_v23, %v10210_v47  ;;  %v849_v57 = vrot.slane %v10271_v44, %v10328_v24 }
  0xdd   : > { %v720_v32 = vcombine.high %v10322_v21, %v10331_v26  ;;  %v462_v60 = vrot.slane %v448_v5, %v10210_v47  ;;  %v10358_v5 = vsub.s32 6, %v10188_v8 }
  0xde   : > { %v736_v33 = vcombine.high %v10325_v22, %v10334_v16 }
  0xdf   : > { %16352 = vst [vmem:[#allocation23_spill] sm:$0xff] %v10358_v5 }
  0xe0   : > { %822 = vbcast.lane.b32.xlu1 %v816_v17, 264  ;;  %818 = vbcast.lane.b32.xlu0 %v816_v17, 256  ;;  %v236_v3 = vpop.permute.xlu0 %235  ;;  %v238_v28 = vpop.permute.xlu1 %237 }
  0xe1   : > { %v415_v29 = vcombine.low %v224_v2, %v236_v3  ;;  %v687_v34 = vcombine.low %v226_v4, %v238_v28  ;;  %v688_v40 = vcombine.high %v226_v4, %v238_v28  ;;  %v416_v51 = vcombine.high %v224_v2, %v236_v3 }
  0xe2   : > { %v735_v28 = vcombine.low %v10325_v22, %v10334_v16  ;;  %v10372_v22 = vrot.slane %v463_v55, %v10210_v47  ;;  %v860_v16 = vrot.slane %v10271_v44, %v10358_v5 }
  0xe3   : > { %v423_v7 = vrot.slane %v415_v29, %v10191_v11  ;;  %v695_v14 = vrot.slane %v687_v34, %v10191_v11  ;;  %v702_v15 = vrot.slane %v688_v40, %v10191_v11  ;;  %v430_v18 = vrot.slane %v416_v51, %v10191_v11 }
  0xe4   : > { %833 = vbcast.lane.b32.xlu1 %v827_v30, 264  ;;  %829 = vbcast.lane.b32.xlu0 %v827_v30, 256  ;;  %v242_v56 = vpop.permute.xlu0 %241  ;;  %v244_v58 = vpop.permute.xlu1 %243 }
  0xe5   : > { %v431_v62 = vcombine.low %v230_v10, %v242_v56  ;;  %v432_v4 = vcombine.high %v230_v10, %v242_v56  ;;  %v703_v2 = vcombine.low %v232_v12, %v244_v58  ;;  %v704_v17 = vcombine.high %v232_v12, %v244_v58 }
  0xe6   : > { %v719_v10 = vcombine.low %v10322_v21, %v10331_v26  ;;  %v478_v26 = vrot.slane %v464_v6, %v10210_v47 }
  0xe7   : > { %v439_v19 = vrot.slane %v431_v62, %v10191_v11  ;;  %v446_v23 = vrot.slane %v432_v4, %v10191_v11  ;;  %v711_v3 = vrot.slane %v703_v2, %v10191_v11  ;;  %v718_v12 = vrot.slane %v704_v17, %v10191_v11 }
  0xe8   : > { %844 = vbcast.lane.b32.xlu1 %v838_v53, 264  ;;  %840 = vbcast.lane.b32.xlu0 %v838_v53, 256  ;;  %v10390_v55 = vrot.slane %v719_v10, %v10210_v47 }
  0xe9   : > { %v479_v29 = vcombine.low %v423_v7, %v439_v19  ;;  %v480_v30 = vcombine.high %v423_v7, %v439_v19  ;;  %v495_v34 = vcombine.low %v430_v18, %v446_v23  ;;  %v496_v40 = vcombine.high %v430_v18, %v446_v23 }
  0xea   : > { %v751_v51 = vcombine.low %v695_v14, %v711_v3  ;;  %v752_v56 = vcombine.high %v695_v14, %v711_v3  ;;  %v767_v58 = vcombine.low %v702_v15, %v718_v12  ;;  %v768_v62 = vcombine.high %v702_v15, %v718_v12 }
  0xeb   : > { %v487_v53 = vrot.slane %v479_v29, %v10210_v47  ;;  %v494_v4 = vrot.slane %v480_v30, %v10210_v47  ;;  %v10368_v2 = vrot.slane %v495_v34, %v10210_v47  ;;  %v510_v21 = vrot.slane %v496_v40, %v10210_v47 }
  0xec   : > { %855 = vbcast.lane.b32.xlu1 %v849_v57, 264  ;;  %851 = vbcast.lane.b32.xlu0 %v849_v57, 256  ;;  %v10381_v7 = vsub.s32 7, %v10188_v8  ;;  %v10401_v8 = vrot.slane %v751_v51, %v10210_v47  ;;  %v734_v57 = vrot.slane %v720_v32, %v10210_v47  ;;  %v10405_v18 = vrot.slane %v735_v28, %v10210_v47 }
  0xed   : > { %v10383_v14 = vcombine.high %v455_v54, %v487_v53  ;;  %v10385_v15 = vcombine.low %v462_v60, %v494_v4  ;;  %v10387_v17 = vcombine.high %v462_v60, %v494_v4  ;;  %v10394_v61 = vcombine.high %v10372_v22, %v10368_v2 }
  0xee   : > { %16353 = vst [vmem:[#allocation24_spill] sm:$0xff] %v10381_v7  ;;  %v10396_v0 = vcombine.low %v478_v26, %v510_v21  ;;  %v10398_v6 = vcombine.high %v478_v26, %v510_v21  ;;  %v766_v60 = vrot.slane %v752_v56, %v10210_v47  ;;  %v10409_v19 = vrot.slane %v767_v58, %v10210_v47 }
  0xef   : > { %16354 = vst [vmem:[#allocation25_spill] sm:$0xff] %v10385_v15  ;;  %16355 = vst [vmem:[#allocation26_spill] sm:$0xff] %v10387_v17  ;;  %v750_v23 = vrot.slane %v736_v33, %v10210_v47  ;;  %v511_v3 = vcombine.low %v455_v54, %v487_v53  ;;  %v871_v10 = vrot.slane %v10271_v44, %v10381_v7 }
  0xf0   : > { %16356 = vst [vmem:[#allocation27_spill] sm:$0xff] %v10396_v0  ;;  %16357 = vst [vmem:[#allocation28_spill] sm:$0xff] %v10398_v6  ;;  %866 = vbcast.lane.b32.xlu1 %v860_v16, 264  ;;  %862 = vbcast.lane.b32.xlu0 %v860_v16, 256  ;;  %v782_v12 = vrot.slane %v768_v62, %v10210_v47  ;;  %v10417_v32 = vcombine.high %v10390_v55, %v10401_v8 }
  0xf1   : > { %v10419_v28 = vcombine.low %v734_v57, %v766_v60  ;;  %v10421_v29 = vcombine.high %v734_v57, %v766_v60  ;;  %v10425_v30 = vcombine.high %v10405_v18, %v10409_v19  ;;  %v882_v44 = vrot.slane %v511_v3, %v10215_v52 }
  0xf2   : > { %v10427_v33 = vcombine.low %v750_v23, %v782_v12  ;;  %v10429_v54 = vcombine.high %v750_v23, %v782_v12  ;;  %v893_v34 = vrot.slane %v511_v3, %v10292_v59  ;;  %v904_v40 = vrot.slane %v511_v3, %v10307_v9 }
  0xf3   : > { %16358 = vst [vmem:[#allocation29_spill] sm:$0xff] %v10419_v28  ;;  %16359 = vst [vmem:[#allocation30_spill] sm:$0xff] %v10421_v29  ;;  %v915_v51 = vrot.slane %v511_v3, %v10310_v13  ;;  %v926_v56 = vrot.slane %v511_v3, %v10319_v20  ;;  %v937_v58 = vrot.slane %v511_v3, %v10328_v24 }
  0xf4   : > { %16360 = vst [vmem:[#allocation31_spill] sm:$0xff] %v10425_v30  ;;  %877 = vbcast.lane.b32.xlu1 %v871_v10, 264  ;;  %873 = vbcast.lane.b32.xlu0 %v871_v10, 256  ;;  %16361 = vst [vmem:[#allocation32_spill] sm:$0xff] %v10427_v33  ;;  %v948_v62 = vrot.slane %v511_v3, %v10358_v5  ;;  %v379_v53 = vcombine.low %v10252_v35, %v10248_v31 }
  0xf5   : > { %16362 = vst [vmem:[#allocation33_spill] sm:$0xff] %v10429_v54  ;;  %v959_v4 = vrot.slane %v511_v3, %v10381_v7  ;;  %v515_v23 = vcombine.low %v10372_v22, %v10368_v2  ;;  %v783_v54 = vcombine.low %v10390_v55, %v10401_v8  ;;  %v651_v15 = vcombine.low %v10224_v1, %v10242_v27 }
  0xf6   : > { %v970_v21 = vrot.slane %v379_v53, %v10215_v52  ;;  %v981_v26 = vrot.slane %v379_v53, %v10292_v59  ;;  %v992_v16 = vrot.slane %v379_v53, %v10307_v9  ;;  %v1003_v57 = vrot.slane %v379_v53, %v10310_v13 }
  0xf7   : > { %v1014_v31 = vrot.slane %v379_v53, %v10319_v20  ;;  %v1025_v35 = vrot.slane %v379_v53, %v10328_v24  ;;  %v1036_v60 = vrot.slane %v379_v53, %v10358_v5  ;;  %v1047_v3 = vrot.slane %v379_v53, %v10381_v7 }
  0xf8   : > { %888 = vbcast.lane.b32.xlu1 %v882_v44, 264  ;;  %884 = vbcast.lane.b32.xlu0 %v882_v44, 256  ;;  %v1058_v10 = vrot.slane %v515_v23, %v10215_v52  ;;  %v1069_v12 = vrot.slane %v515_v23, %v10292_v59  ;;  %v1080_v44 = vrot.slane %v515_v23, %v10307_v9 }
  0xf9   : > { %v1102_v2 = vrot.slane %v515_v23, %v10319_v20  ;;  %v647_v53 = vcombine.low %v10220_v63, %v10238_v25  ;;  %v1234_v6 = vrot.slane %v783_v54, %v10215_v52  ;;  %v1245_v55 = vrot.slane %v783_v54, %v10292_v59 }
  0xfa   : > { %v1311_v30 = vrot.slane %v783_v54, %v10381_v7  ;;  %v1333_v1 = vrot.slane %v651_v15, %v10292_v59 }
  0xfb   : > { %v1157_v63 = vrot.slane %v647_v53, %v10292_v59  ;;  %v1223_v29 = vrot.slane %v647_v53, %v10381_v7 }
  0xfc   : > { %899 = vbcast.lane.b32.xlu1 %v893_v34, 264  ;;  %895 = vbcast.lane.b32.xlu0 %v893_v34, 256  ;;  %v1091_v34 = vrot.slane %v515_v23, %v10310_v13 }
 0x100   : > { %910 = vbcast.lane.b32.xlu1 %v904_v40, 264  ;;  %906 = vbcast.lane.b32.xlu0 %v904_v40, 256 }
 0x104   : > { %921 = vbcast.lane.b32.xlu1 %v915_v51, 264  ;;  %917 = vbcast.lane.b32.xlu0 %v915_v51, 256  ;;  %v1113_v51 = vrot.slane %v515_v23, %v10328_v24 }
 0x108   : > { %932 = vbcast.lane.b32.xlu1 %v926_v56, 264  ;;  %928 = vbcast.lane.b32.xlu0 %v926_v56, 256 }
 0x10c   : > { %943 = vbcast.lane.b32.xlu1 %v937_v58, 264  ;;  %939 = vbcast.lane.b32.xlu0 %v937_v58, 256 }
 0x110   : > { %954 = vbcast.lane.b32.xlu1 %v948_v62, 264  ;;  %950 = vbcast.lane.b32.xlu0 %v948_v62, 256  ;;  %v1124_v62 = vrot.slane %v515_v23, %v10358_v5 }
 0x114   : > { %965 = vbcast.lane.b32.xlu1 %v959_v4, 264  ;;  %961 = vbcast.lane.b32.xlu0 %v959_v4, 256 }
 0x118   : > { %976 = vbcast.lane.b32.xlu1 %v970_v21, 264  ;;  %972 = vbcast.lane.b32.xlu0 %v970_v21, 256 }
 0x11c   : > { %987 = vbcast.lane.b32.xlu1 %v981_v26, 264  ;;  %983 = vbcast.lane.b32.xlu0 %v981_v26, 256  ;;  %v1135_v26 = vrot.slane %v515_v23, %v10381_v7 }
 0x120   : > { %998 = vbcast.lane.b32.xlu1 %v992_v16, 264  ;;  %994 = vbcast.lane.b32.xlu0 %v992_v16, 256 }
 0x124   : > { %1009 = vbcast.lane.b32.xlu1 %v1003_v57, 264  ;;  %1005 = vbcast.lane.b32.xlu0 %v1003_v57, 256 }
 0x128   : > { %1020 = vbcast.lane.b32.xlu1 %v1014_v31, 264  ;;  %1016 = vbcast.lane.b32.xlu0 %v1014_v31, 256  ;;  %v1146_v31 = vrot.slane %v647_v53, %v10215_v52 }
 0x12c   : > { %1031 = vbcast.lane.b32.xlu1 %v1025_v35, 264  ;;  %1027 = vbcast.lane.b32.xlu0 %v1025_v35, 256 }
 0x130   : > { %1042 = vbcast.lane.b32.xlu1 %v1036_v60, 264  ;;  %1038 = vbcast.lane.b32.xlu0 %v1036_v60, 256 }
 0x134   : > { %1053 = vbcast.lane.b32.xlu1 %v1047_v3, 264  ;;  %1049 = vbcast.lane.b32.xlu0 %v1047_v3, 256  ;;  %v1168_v3 = vrot.slane %v647_v53, %v10307_v9 }
 0x138   : > { %1064 = vbcast.lane.b32.xlu1 %v1058_v10, 264  ;;  %1060 = vbcast.lane.b32.xlu0 %v1058_v10, 256 }
 0x13c   : > { %1075 = vbcast.lane.b32.xlu1 %v1069_v12, 264  ;;  %1071 = vbcast.lane.b32.xlu0 %v1069_v12, 256 }
 0x140   : > { %1086 = vbcast.lane.b32.xlu1 %v1080_v44, 264  ;;  %1082 = vbcast.lane.b32.xlu0 %v1080_v44, 256  ;;  %v1179_v44 = vrot.slane %v647_v53, %v10310_v13 }
 0x144   : > { %1097 = vbcast.lane.b32.xlu1 %v1091_v34, 264  ;;  %1093 = vbcast.lane.b32.xlu0 %v1091_v34, 256 }
 0x148   : > { %1108 = vbcast.lane.b32.xlu1 %v1102_v2, 264  ;;  %1104 = vbcast.lane.b32.xlu0 %v1102_v2, 256 }
 0x14a   : > { %v10456_v22 = vpop.permute.xlu1 %800  ;;  %v10458_v40 = vpop.permute.xlu0 %796 }
 0x14c   : > { %1119 = vbcast.lane.b32.xlu1 %v1113_v51, 264  ;;  %1115 = vbcast.lane.b32.xlu0 %v1113_v51, 256  ;;  %v1190_v51 = vrot.slane %v647_v53, %v10319_v20 }
 0x14e   : > { %v10461_v56 = vpop.permute.xlu1 %811  ;;  %v10463_v58 = vpop.permute.xlu0 %807 }
 0x150   : > { %1130 = vbcast.lane.b32.xlu1 %v1124_v62, 264  ;;  %1126 = vbcast.lane.b32.xlu0 %v1124_v62, 256 }
 0x152   : > { %v10468_v4 = vpop.permute.xlu1 %822  ;;  %v10470_v21 = vpop.permute.xlu0 %818 }
 0x154   : > { %1141 = vbcast.lane.b32.xlu1 %v1135_v26, 264  ;;  %1137 = vbcast.lane.b32.xlu0 %v1135_v26, 256 }
 0x156   : > { %v10473_v16 = vpop.permute.xlu1 %833  ;;  %v10475_v57 = vpop.permute.xlu0 %829 }
 0x158   : > { %1152 = vbcast.lane.b32.xlu1 %v1146_v31, 264  ;;  %1148 = vbcast.lane.b32.xlu0 %v1146_v31, 256  ;;  %v1201_v31 = vrot.slane %v647_v53, %v10328_v24 }
 0x15a   : > { %v10478_v35 = vpop.permute.xlu1 %844  ;;  %v10480_v60 = vpop.permute.xlu0 %840 }
 0x15c   : > { %1163 = vbcast.lane.b32.xlu1 %v1157_v63, 264  ;;  %1159 = vbcast.lane.b32.xlu0 %v1157_v63, 256 }
 0x15e   : > { %v10483_v25 = vpop.permute.xlu1 %855  ;;  %v10485_v23 = vpop.permute.xlu0 %851 }
 0x160   : > { %1174 = vbcast.lane.b32.xlu1 %v1168_v3, 264  ;;  %1170 = vbcast.lane.b32.xlu0 %v1168_v3, 256 }
 0x162   : > { %v10488_v10 = vpop.permute.xlu1 %866  ;;  %v10490_v12 = vpop.permute.xlu0 %862 }
 0x164   : > { %1185 = vbcast.lane.b32.xlu1 %v1179_v44, 264  ;;  %1181 = vbcast.lane.b32.xlu0 %v1179_v44, 256  ;;  %v1212_v44 = vrot.slane %v647_v53, %v10358_v5 }
 0x166   : > { %v10493_v34 = vpop.permute.xlu1 %877  ;;  %v10495_v2 = vpop.permute.xlu0 %873 }
 0x168   : > { %1196 = vbcast.lane.b32.xlu1 %v1190_v51, 264  ;;  %1192 = vbcast.lane.b32.xlu0 %v1190_v51, 256 }
 0x16a   : > { %v10498_v62 = vpop.permute.xlu1 %888  ;;  %v10500_v26 = vpop.permute.xlu0 %884 }
 0x16c   : > { %1207 = vbcast.lane.b32.xlu1 %v1201_v31, 264  ;;  %1203 = vbcast.lane.b32.xlu0 %v1201_v31, 256 }
 0x16e   : > { %v10503_v63 = vpop.permute.xlu1 %899  ;;  %v10505_v3 = vpop.permute.xlu0 %895 }
 0x170   : > { %1218 = vbcast.lane.b32.xlu1 %v1212_v44, 264  ;;  %1214 = vbcast.lane.b32.xlu0 %v1212_v44, 256 }
 0x172   : > { %v10510_v51 = vpop.permute.xlu1 %910  ;;  %v10512_v43 = vpop.permute.xlu0 %906 }
 0x174   : > { %1229 = vbcast.lane.b32.xlu1 %v1223_v29, 264  ;;  %1225 = vbcast.lane.b32.xlu0 %v1223_v29, 256  ;;  %v1256_v29 = vrot.slane %v783_v54, %v10307_v9 }
 0x176   : > { %v10515_v31 = vpop.permute.xlu1 %921  ;;  %v10517_v38 = vpop.permute.xlu0 %917 }
 0x178   : > { %1240 = vbcast.lane.b32.xlu1 %v1234_v6, 264  ;;  %1236 = vbcast.lane.b32.xlu0 %v1234_v6, 256  ;;  %v1267_v6 = vrot.slane %v783_v54, %v10310_v13 }
 0x17a   : > { %v10520_v44 = vpop.permute.xlu1 %932  ;;  %v10522_v50 = vpop.permute.xlu0 %928 }
 0x17c   : > { %1251 = vbcast.lane.b32.xlu1 %v1245_v55, 264  ;;  %1247 = vbcast.lane.b32.xlu0 %v1245_v55, 256  ;;  %v1278_v55 = vrot.slane %v783_v54, %v10319_v20 }
 0x17e   : > { %v10525_v8 = vpop.permute.xlu1 %943  ;;  %v10527_v53 = vpop.permute.xlu0 %939 }
 0x180   : > { %1262 = vbcast.lane.b32.xlu1 %v1256_v29, 264  ;;  %1258 = vbcast.lane.b32.xlu0 %v1256_v29, 256  ;;  %v1289_v29 = vrot.slane %v783_v54, %v10328_v24 }
 0x182   : > { %v10530_v17 = vpop.permute.xlu1 %954  ;;  %v10532_v48 = vpop.permute.xlu0 %950 }
 0x184   : > { %1273 = vbcast.lane.b32.xlu1 %v1267_v6, 264  ;;  %1269 = vbcast.lane.b32.xlu0 %v1267_v6, 256  ;;  %v1300_v6 = vrot.slane %v783_v54, %v10358_v5 }
 0x186   : > { %v10535_v33 = vpop.permute.xlu1 %965  ;;  %v10537_v42 = vpop.permute.xlu0 %961 }
 0x188   : > { %1284 = vbcast.lane.b32.xlu1 %v1278_v55, 264  ;;  %1280 = vbcast.lane.b32.xlu0 %v1278_v55, 256 }
 0x18a   : > { %v10540_v28 = vpop.permute.xlu1 %976  ;;  %v10542_v37 = vpop.permute.xlu0 %972 }
 0x18c   : > { %1295 = vbcast.lane.b32.xlu1 %v1289_v29, 264  ;;  %1291 = vbcast.lane.b32.xlu0 %v1289_v29, 256 }
 0x18e   : > { %v10545_v0 = vpop.permute.xlu1 %987  ;;  %v10547_v39 = vpop.permute.xlu0 %983 }
 0x18f   : > { %16363 = vst [vmem:[#allocation34_spill] sm:$0xff] %v10545_v0  ;;  %16364 = vst [vmem:[#allocation35_spill] sm:$0xff] %v10547_v39  ;;  %v1322_v39 = vrot.slane %v651_v15, %v10215_v52 }
 0x190   : > { %1306 = vbcast.lane.b32.xlu1 %v1300_v6, 264  ;;  %1302 = vbcast.lane.b32.xlu0 %v1300_v6, 256 }
 0x192   : > { %v10552_v55 = vpop.permute.xlu1 %998  ;;  %v10554_v46 = vpop.permute.xlu0 %994 }
 0x194   : > { %1317 = vbcast.lane.b32.xlu1 %v1311_v30, 264  ;;  %1313 = vbcast.lane.b32.xlu0 %v1311_v30, 256  ;;  %v1344_v30 = vrot.slane %v651_v15, %v10307_v9 }
 0x196   : > { %v10557_v29 = vpop.permute.xlu1 %1009  ;;  %v10559_v41 = vpop.permute.xlu0 %1005 }
 0x197   : > { %16365 = vst [vmem:[#allocation36_spill] sm:$0xff] %v10557_v29  ;;  %16366 = vst [vmem:[#allocation37_spill] sm:$0xff] %v10559_v41 }
 0x198   : > { %1328 = vbcast.lane.b32.xlu1 %v1322_v39, 264  ;;  %1324 = vbcast.lane.b32.xlu0 %v1322_v39, 256  ;;  %v1355_v39 = vrot.slane %v651_v15, %v10310_v13 }
 0x19a   : > { %v10562_v6 = vpop.permute.xlu1 %1020  ;;  %v10564_v0 = vpop.permute.xlu0 %1016 }
 0x19b   : > { %16367 = vst [vmem:[#allocation38_spill] sm:$0xff] %v10562_v6  ;;  %16368 = vst [vmem:[#allocation39_spill] sm:$0xff] %v10564_v0 }
 0x19c   : > { %1339 = vbcast.lane.b32.xlu1 %v1333_v1, 264  ;;  %1335 = vbcast.lane.b32.xlu0 %v1333_v1, 256  ;;  %v1366_v1 = vrot.slane %v651_v15, %v10319_v20 }
 0x19e   : > { %v10567_v27 = vpop.permute.xlu1 %1031  ;;  %v10569_v54 = vpop.permute.xlu0 %1027 }
 0x19f   : > { %16369 = vst [vmem:[#allocation40_spill] sm:$0xff] %v10567_v27  ;;  %16370 = vst [vmem:[#allocation41_spill] sm:$0xff] %v10569_v54 }
 0x1a0   : > { %1350 = vbcast.lane.b32.xlu1 %v1344_v30, 264  ;;  %1346 = vbcast.lane.b32.xlu0 %v1344_v30, 256  ;;  %v1377_v30 = vrot.slane %v651_v15, %v10328_v24 }
 0x1a2   : > { %v10572_v41 = vpop.permute.xlu1 %1042  ;;  %v10574_v29 = vpop.permute.xlu0 %1038 }
 0x1a3   : > { %16371 = vst [vmem:[#allocation42_spill] sm:$0xff] %v10572_v41  ;;  %16372 = vst [vmem:[#allocation43_spill] sm:$0xff] %v10574_v29 }
 0x1a4   : > { %1361 = vbcast.lane.b32.xlu1 %v1355_v39, 264  ;;  %1357 = vbcast.lane.b32.xlu0 %v1355_v39, 256  ;;  %v1388_v39 = vrot.slane %v651_v15, %v10358_v5 }
 0x1a6   : > { %v10577_v0 = vpop.permute.xlu1 %1053  ;;  %v10579_v6 = vpop.permute.xlu0 %1049 }
 0x1a7   : > { %16373 = vst [vmem:[#allocation44_spill] sm:$0xff] %v10577_v0  ;;  %16374 = vst [vmem:[#allocation45_spill] sm:$0xff] %v10579_v6  ;;  %v787_v6 = vcombine.low %v10405_v18, %v10409_v19 }
 0x1a8   : > { %1372 = vbcast.lane.b32.xlu1 %v1366_v1, 264  ;;  %1368 = vbcast.lane.b32.xlu0 %v1366_v1, 256 }
 0x1a9   : > { %v1421_v18 = vrot.slane %v787_v6, %v10292_v59 }
 0x1aa   : > { %v10582_v54 = vpop.permute.xlu1 %1064  ;;  %v10584_v27 = vpop.permute.xlu0 %1060 }
 0x1ab   : > { %16375 = vst [vmem:[#allocation46_spill] sm:$0xff] %v10582_v54  ;;  %16376 = vst [vmem:[#allocation47_spill] sm:$0xff] %v10584_v27  ;;  %v1399_v27 = vrot.slane %v651_v15, %v10381_v7 }
 0x1ac   : > { %1383 = vbcast.lane.b32.xlu1 %v1377_v30, 264  ;;  %1379 = vbcast.lane.b32.xlu0 %v1377_v30, 256 }
 0x1ae   : > { %v10587_v29 = vpop.permute.xlu1 %1075  ;;  %v10589_v41 = vpop.permute.xlu0 %1071 }
 0x1af   : > { %16377 = vst [vmem:[#allocation48_spill] sm:$0xff] %v10587_v29  ;;  %16378 = vst [vmem:[#allocation49_spill] sm:$0xff] %v10589_v41  ;;  %v1410_v41 = vrot.slane %v787_v6, %v10215_v52 }
 0x1b0   : > { %1394 = vbcast.lane.b32.xlu1 %v1388_v39, 264  ;;  %1390 = vbcast.lane.b32.xlu0 %v1388_v39, 256 }
 0x1b2   : > { %v10594_v1 = vpop.permute.xlu1 %1086  ;;  %v10596_v54 = vpop.permute.xlu0 %1082 }
 0x1b4   : > { %1405 = vbcast.lane.b32.xlu1 %v1399_v27, 264  ;;  %1401 = vbcast.lane.b32.xlu0 %v1399_v27, 256  ;;  %v1432_v27 = vrot.slane %v787_v6, %v10307_v9 }
 0x1b6   : > { %v10599_v30 = vpop.permute.xlu1 %1097  ;;  %v10601_v29 = vpop.permute.xlu0 %1093 }
 0x1b7   : > { %16379 = vst [vmem:[#allocation50_spill] sm:$0xff] %v10599_v30  ;;  %16380 = vst [vmem:[#allocation51_spill] sm:$0xff] %v10601_v29 }
 0x1b8   : > { %1416 = vbcast.lane.b32.xlu1 %v1410_v41, 264  ;;  %1412 = vbcast.lane.b32.xlu0 %v1410_v41, 256  ;;  %v1443_v41 = vrot.slane %v787_v6, %v10310_v13 }
 0x1ba   : > { %v10604_v39 = vpop.permute.xlu1 %1108  ;;  %v10606_v0 = vpop.permute.xlu0 %1104 }
 0x1bb   : > { %16381 = vst [vmem:[#allocation52_spill] sm:$0xff] %v10604_v39  ;;  %16382 = vst [vmem:[#allocation53_spill] sm:$0xff] %v10606_v0 }
 0x1bc   : > { %1427 = vbcast.lane.b32.xlu1 %v1421_v18, 264  ;;  %1423 = vbcast.lane.b32.xlu0 %v1421_v18, 256  ;;  %v1454_v18 = vrot.slane %v787_v6, %v10319_v20 }
 0x1be   : > { %v10609_v19 = vpop.permute.xlu1 %1119  ;;  %v10611_v15 = vpop.permute.xlu0 %1115 }
 0x1bf   : > { %16383 = vst [vmem:[#allocation54_spill] sm:$0xff] %v10609_v19  ;;  %16384 = vst [vmem:[#allocation55_spill] sm:$0xff] %v10611_v15 }
 0x1c0   : > { %1438 = vbcast.lane.b32.xlu1 %v1432_v27, 264  ;;  %1434 = vbcast.lane.b32.xlu0 %v1432_v27, 256  ;;  %v1465_v27 = vrot.slane %v787_v6, %v10328_v24 }
 0x1c2   : > { %v10614_v29 = vpop.permute.xlu1 %1130  ;;  %v10616_v30 = vpop.permute.xlu0 %1126 }
 0x1c3   : > { %16385 = vst [vmem:[#allocation56_spill] sm:$0xff] %v10614_v29  ;;  %16386 = vst [vmem:[#allocation57_spill] sm:$0xff] %v10616_v30 }
 0x1c4   : > { %1449 = vbcast.lane.b32.xlu1 %v1443_v41, 264  ;;  %1445 = vbcast.lane.b32.xlu0 %v1443_v41, 256  ;;  %v1476_v41 = vrot.slane %v787_v6, %v10358_v5 }
 0x1c6   : > { %v10619_v0 = vpop.permute.xlu1 %1141  ;;  %v10621_v39 = vpop.permute.xlu0 %1137 }
 0x1c7   : > { %16387 = vst [vmem:[#allocation58_spill] sm:$0xff] %v10619_v0  ;;  %16388 = vst [vmem:[#allocation59_spill] sm:$0xff] %v10621_v39 }
 0x1c8   : > { %1460 = vbcast.lane.b32.xlu1 %v1454_v18, 264  ;;  %1456 = vbcast.lane.b32.xlu0 %v1454_v18, 256  ;;  %v1487_v18 = vrot.slane %v787_v6, %v10381_v7 }
 0x1ca   : > { %v10624_v15 = vpop.permute.xlu1 %1152  ;;  %v10626_v19 = vpop.permute.xlu0 %1148 }
 0x1cb   : > { %16389 = vst [vmem:[#allocation60_spill] sm:$0xff] %v10624_v15  ;;  %16390 = vst [vmem:[#allocation61_spill] sm:$0xff] %v10626_v19 }
 0x1cc   : > { %1471 = vbcast.lane.b32.xlu1 %v1465_v27, 264  ;;  %1467 = vbcast.lane.b32.xlu0 %v1465_v27, 256  ;;  %v1498_v27 = vrot.slane %v10273_v45, %v10215_v52 }
 0x1ce   : > { %v10629_v30 = vpop.permute.xlu1 %1163  ;;  %v10631_v29 = vpop.permute.xlu0 %1159 }
 0x1cf   : > { %16391 = vst [vmem:[#allocation62_spill] sm:$0xff] %v10629_v30  ;;  %16392 = vst [vmem:[#allocation63_spill] sm:$0xff] %v10631_v29  ;;  %v1509_v30 = vrot.slane %v10273_v45, %v10292_v59 }
 0x1d0   : > { %1482 = vbcast.lane.b32.xlu1 %v1476_v41, 264  ;;  %1478 = vbcast.lane.b32.xlu0 %v1476_v41, 256 }
 0x1d2   : > { %v10634_v39 = vpop.permute.xlu1 %1174  ;;  %v10636_v0 = vpop.permute.xlu0 %1170 }
 0x1d3   : > { %16393 = vst [vmem:[#allocation64_spill] sm:$0xff] %v10634_v39  ;;  %16394 = vst [vmem:[#allocation65_spill] sm:$0xff] %v10636_v0 }
 0x1d4   : > { %1493 = vbcast.lane.b32.xlu1 %v1487_v18, 264  ;;  %1489 = vbcast.lane.b32.xlu0 %v1487_v18, 256 }
 0x1d6   : > { %v10639_v19 = vpop.permute.xlu1 %1185  ;;  %v10641_v15 = vpop.permute.xlu0 %1181 }
 0x1d7   : > { %16395 = vst [vmem:[#allocation66_spill] sm:$0xff] %v10639_v19  ;;  %16396 = vst [vmem:[#allocation67_spill] sm:$0xff] %v10641_v15  ;;  %v1520_v15 = vrot.slane %v10273_v45, %v10307_v9 }
 0x1d8   : > { %1504 = vbcast.lane.b32.xlu1 %v1498_v27, 264  ;;  %1500 = vbcast.lane.b32.xlu0 %v1498_v27, 256 }
 0x1da   : > { %v10645_v29 = vpop.permute.xlu1 %1196  ;;  %v10647_v41 = vpop.permute.xlu0 %1192 }
 0x1db   : > { %16397 = vst [vmem:[#allocation68_spill] sm:$0xff] %v10645_v29  ;;  %16398 = vst [vmem:[#allocation69_spill] sm:$0xff] %v10647_v41  ;;  %v1531_v41 = vrot.slane %v10273_v45, %v10310_v13 }
 0x1dc   : > { %1515 = vbcast.lane.b32.xlu1 %v1509_v30, 264  ;;  %1511 = vbcast.lane.b32.xlu0 %v1509_v30, 256 }
 0x1de   : > { %v10651_v6 = vpop.permute.xlu1 %1207  ;;  %v10653_v18 = vpop.permute.xlu0 %1203 }
 0x1df   : > { %16399 = vst [vmem:[#allocation70_spill] sm:$0xff] %v10651_v6  ;;  %16400 = vst [vmem:[#allocation71_spill] sm:$0xff] %v10653_v18  ;;  %v1542_v18 = vrot.slane %v10273_v45, %v10319_v20 }
 0x1e0   : > { %1526 = vbcast.lane.b32.xlu1 %v1520_v15, 264  ;;  %1522 = vbcast.lane.b32.xlu0 %v1520_v15, 256 }
 0x1e2   : > { %v10657_v19 = vpop.permute.xlu1 %1218  ;;  %v10659_v27 = vpop.permute.xlu0 %1214 }
 0x1e3   : > { %16401 = vst [vmem:[#allocation72_spill] sm:$0xff] %v10657_v19  ;;  %16402 = vst [vmem:[#allocation73_spill] sm:$0xff] %v10659_v27  ;;  %v1553_v27 = vrot.slane %v10273_v45, %v10328_v24 }
 0x1e4   : > { %1537 = vbcast.lane.b32.xlu1 %v1531_v41, 264  ;;  %1533 = vbcast.lane.b32.xlu0 %v1531_v41, 256 }
 0x1e6   : > { %v10663_v29 = vpop.permute.xlu1 %1229  ;;  %v10665_v30 = vpop.permute.xlu0 %1225 }
 0x1e7   : > { %16403 = vst [vmem:[#allocation74_spill] sm:$0xff] %v10663_v29  ;;  %16404 = vst [vmem:[#allocation75_spill] sm:$0xff] %v10665_v30  ;;  %v1564_v30 = vrot.slane %v10273_v45, %v10358_v5 }
 0x1e8   : > { %1548 = vbcast.lane.b32.xlu1 %v1542_v18, 264  ;;  %1544 = vbcast.lane.b32.xlu0 %v1542_v18, 256 }
 0x1ea   : > { %v10669_v6 = vpop.permute.xlu1 %1240  ;;  %v10671_v15 = vpop.permute.xlu0 %1236 }
 0x1eb   : > { %16405 = vst [vmem:[#allocation76_spill] sm:$0xff] %v10669_v6  ;;  %16406 = vst [vmem:[#allocation77_spill] sm:$0xff] %v10671_v15  ;;  %v1575_v15 = vrot.slane %v10273_v45, %v10381_v7 }
 0x1ec   : > { %1559 = vbcast.lane.b32.xlu1 %v1553_v27, 264  ;;  %1555 = vbcast.lane.b32.xlu0 %v1553_v27, 256 }
 0x1ee   : > { %v10675_v19 = vpop.permute.xlu1 %1251  ;;  %v10677_v41 = vpop.permute.xlu0 %1247 }
 0x1ef   : > { %16407 = vst [vmem:[#allocation78_spill] sm:$0xff] %v10675_v19  ;;  %16408 = vst [vmem:[#allocation79_spill] sm:$0xff] %v10677_v41  ;;  %v1586_v41 = vrot.slane %v10383_v14, %v10215_v52 }
 0x1f0   : > { %1570 = vbcast.lane.b32.xlu1 %v1564_v30, 264  ;;  %1566 = vbcast.lane.b32.xlu0 %v1564_v30, 256 }
 0x1f2   : > { %v10681_v29 = vpop.permute.xlu1 %1262  ;;  %v10683_v18 = vpop.permute.xlu0 %1258 }
 0x1f3   : > { %16409 = vst [vmem:[#allocation80_spill] sm:$0xff] %v10681_v29  ;;  %16410 = vst [vmem:[#allocation81_spill] sm:$0xff] %v10683_v18  ;;  %v1597_v18 = vrot.slane %v10383_v14, %v10292_v59 }
 0x1f4   : > { %1581 = vbcast.lane.b32.xlu1 %v1575_v15, 264  ;;  %1577 = vbcast.lane.b32.xlu0 %v1575_v15, 256 }
 0x1f6   : > { %v10687_v6 = vpop.permute.xlu1 %1273  ;;  %v10689_v27 = vpop.permute.xlu0 %1269 }
 0x1f7   : > { %16411 = vst [vmem:[#allocation82_spill] sm:$0xff] %v10687_v6  ;;  %16412 = vst [vmem:[#allocation83_spill] sm:$0xff] %v10689_v27  ;;  %v1608_v27 = vrot.slane %v10383_v14, %v10307_v9 }
 0x1f8   : > { %1592 = vbcast.lane.b32.xlu1 %v1586_v41, 264  ;;  %1588 = vbcast.lane.b32.xlu0 %v1586_v41, 256 }
 0x1fa   : > { %v10693_v19 = vpop.permute.xlu1 %1284  ;;  %v10695_v30 = vpop.permute.xlu0 %1280 }
 0x1fb   : > { %16413 = vst [vmem:[#allocation84_spill] sm:$0xff] %v10693_v19  ;;  %16414 = vst [vmem:[#allocation85_spill] sm:$0xff] %v10695_v30  ;;  %v1619_v30 = vrot.slane %v10383_v14, %v10310_v13 }
 0x1fc   : > { %1603 = vbcast.lane.b32.xlu1 %v1597_v18, 264  ;;  %1599 = vbcast.lane.b32.xlu0 %v1597_v18, 256 }
 0x1fe   : > { %v10699_v45 = vpop.permute.xlu1 %1295  ;;  %v10701_v15 = vpop.permute.xlu0 %1291 }
 0x1ff   : > { %16415 = vst [vmem:[#allocation86_spill] sm:$0xff] %v10699_v45  ;;  %16416 = vst [vmem:[#allocation87_spill] sm:$0xff] %v10701_v15  ;;  %v1630_v15 = vrot.slane %v10383_v14, %v10319_v20 }
 0x200   : > { %1614 = vbcast.lane.b32.xlu1 %v1608_v27, 264  ;;  %1610 = vbcast.lane.b32.xlu0 %v1608_v27, 256 }
 0x202   : > { %v10705_v6 = vpop.permute.xlu1 %1306  ;;  %v10707_v41 = vpop.permute.xlu0 %1302 }
 0x203   : > { %16417 = vst [vmem:[#allocation88_spill] sm:$0xff] %v10705_v6  ;;  %16418 = vst [vmem:[#allocation89_spill] sm:$0xff] %v10707_v41  ;;  %v1641_v41 = vrot.slane %v10383_v14, %v10328_v24 }
 0x204   : > { %1625 = vbcast.lane.b32.xlu1 %v1619_v30, 264  ;;  %1621 = vbcast.lane.b32.xlu0 %v1619_v30, 256 }
 0x206   : > { %v10711_v19 = vpop.permute.xlu1 %1317  ;;  %v10713_v18 = vpop.permute.xlu0 %1313 }
 0x207   : > { %16419 = vst [vmem:[#allocation90_spill] sm:$0xff] %v10711_v19  ;;  %16420 = vst [vmem:[#allocation91_spill] sm:$0xff] %v10713_v18  ;;  %v1652_v18 = vrot.slane %v10383_v14, %v10358_v5 }
 0x208   : > { %1636 = vbcast.lane.b32.xlu1 %v1630_v15, 264  ;;  %1632 = vbcast.lane.b32.xlu0 %v1630_v15, 256 }
 0x20a   : > { %v10717_v45 = vpop.permute.xlu1 %1328  ;;  %v10719_v27 = vpop.permute.xlu0 %1324 }
 0x20b   : > { %16421 = vst [vmem:[#allocation92_spill] sm:$0xff] %v10717_v45  ;;  %16422 = vst [vmem:[#allocation93_spill] sm:$0xff] %v10719_v27  ;;  %v1663_v27 = vrot.slane %v10383_v14, %v10381_v7 }
 0x20c   : > { %1647 = vbcast.lane.b32.xlu1 %v1641_v41, 264  ;;  %1643 = vbcast.lane.b32.xlu0 %v1641_v41, 256 }
 0x20e   : > { %v10723_v6 = vpop.permute.xlu1 %1339  ;;  %v10725_v30 = vpop.permute.xlu0 %1335 }
 0x20f   : > { %16423 = vst [vmem:[#allocation94_spill] sm:$0xff] %v10723_v6  ;;  %16424 = vst [vmem:[#allocation95_spill] sm:$0xff] %v10725_v30  ;;  %v1674_v30 = vrot.slane %v10281_v49, %v10215_v52 }
 0x210   : > { %1658 = vbcast.lane.b32.xlu1 %v1652_v18, 264  ;;  %1654 = vbcast.lane.b32.xlu0 %v1652_v18, 256 }
 0x212   : > { %v10729_v19 = vpop.permute.xlu1 %1350  ;;  %v10731_v15 = vpop.permute.xlu0 %1346 }
 0x213   : > { %16425 = vst [vmem:[#allocation96_spill] sm:$0xff] %v10729_v19  ;;  %16426 = vst [vmem:[#allocation97_spill] sm:$0xff] %v10731_v15  ;;  %v1685_v15 = vrot.slane %v10281_v49, %v10292_v59 }
 0x214   : > { %1669 = vbcast.lane.b32.xlu1 %v1663_v27, 264  ;;  %1665 = vbcast.lane.b32.xlu0 %v1663_v27, 256 }
 0x216   : > { %v10735_v45 = vpop.permute.xlu1 %1361  ;;  %v10737_v41 = vpop.permute.xlu0 %1357 }
 0x217   : > { %16427 = vst [vmem:[#allocation98_spill] sm:$0xff] %v10735_v45  ;;  %16428 = vst [vmem:[#allocation99_spill] sm:$0xff] %v10737_v41  ;;  %v1696_v41 = vrot.slane %v10281_v49, %v10307_v9 }
 0x218   : > { %1680 = vbcast.lane.b32.xlu1 %v1674_v30, 264  ;;  %1676 = vbcast.lane.b32.xlu0 %v1674_v30, 256 }
 0x21a   : > { %v10741_v6 = vpop.permute.xlu1 %1372  ;;  %v10743_v18 = vpop.permute.xlu0 %1368 }
 0x21b   : > { %16429 = vst [vmem:[#allocation100_spill] sm:$0xff] %v10741_v6  ;;  %16430 = vst [vmem:[#allocation101_spill] sm:$0xff] %v10743_v18  ;;  %v1707_v18 = vrot.slane %v10281_v49, %v10310_v13 }
 0x21c   : > { %1691 = vbcast.lane.b32.xlu1 %v1685_v15, 264  ;;  %1687 = vbcast.lane.b32.xlu0 %v1685_v15, 256 }
 0x21e   : > { %v10747_v14 = vpop.permute.xlu1 %1383  ;;  %v10749_v27 = vpop.permute.xlu0 %1379 }
 0x21f   : > { %16431 = vst [vmem:[#allocation102_spill] sm:$0xff] %v10747_v14  ;;  %16432 = vst [vmem:[#allocation103_spill] sm:$0xff] %v10749_v27  ;;  %v1718_v27 = vrot.slane %v10281_v49, %v10319_v20 }
 0x220   : > { %1702 = vbcast.lane.b32.xlu1 %v1696_v41, 264  ;;  %1698 = vbcast.lane.b32.xlu0 %v1696_v41, 256 }
 0x222   : > { %v10753_v45 = vpop.permute.xlu1 %1394  ;;  %v10755_v30 = vpop.permute.xlu0 %1390 }
 0x223   : > { %16433 = vst [vmem:[#allocation104_spill] sm:$0xff] %v10753_v45  ;;  %16434 = vst [vmem:[#allocation105_spill] sm:$0xff] %v10755_v30  ;;  %v1729_v30 = vrot.slane %v10281_v49, %v10328_v24 }
 0x224   : > { %1713 = vbcast.lane.b32.xlu1 %v1707_v18, 264  ;;  %1709 = vbcast.lane.b32.xlu0 %v1707_v18, 256 }
 0x226   : > { %v10759_v6 = vpop.permute.xlu1 %1405  ;;  %v10761_v15 = vpop.permute.xlu0 %1401 }
 0x227   : > { %16435 = vst [vmem:[#allocation106_spill] sm:$0xff] %v10759_v6  ;;  %16436 = vst [vmem:[#allocation107_spill] sm:$0xff] %v10761_v15  ;;  %v1740_v15 = vrot.slane %v10281_v49, %v10358_v5 }
 0x228   : > { %1724 = vbcast.lane.b32.xlu1 %v1718_v27, 264  ;;  %1720 = vbcast.lane.b32.xlu0 %v1718_v27, 256 }
 0x22a   : > { %v10765_v14 = vpop.permute.xlu1 %1416  ;;  %v10767_v41 = vpop.permute.xlu0 %1412 }
 0x22b   : > { %16437 = vst [vmem:[#allocation108_spill] sm:$0xff] %v10765_v14  ;;  %16438 = vst [vmem:[#allocation109_spill] sm:$0xff] %v10767_v41  ;;  %v1751_v41 = vrot.slane %v10281_v49, %v10381_v7 }
 0x22c   : > { %1735 = vbcast.lane.b32.xlu1 %v1729_v30, 264  ;;  %1731 = vbcast.lane.b32.xlu0 %v1729_v30, 256 }
 0x22e   : > { %v10771_v45 = vpop.permute.xlu1 %1427  ;;  %v10773_v18 = vpop.permute.xlu0 %1423 }
 0x22f   : > { %16439 = vst [vmem:[#allocation110_spill] sm:$0xff] %v10771_v45  ;;  %16440 = vst [vmem:[#allocation111_spill] sm:$0xff] %v10773_v18  ;;  %v1762_v18 = vrot.slane %v10394_v61, %v10215_v52 }
 0x230   : > { %1746 = vbcast.lane.b32.xlu1 %v1740_v15, 264  ;;  %1742 = vbcast.lane.b32.xlu0 %v1740_v15, 256 }
 0x232   : > { %v10777_v6 = vpop.permute.xlu1 %1438  ;;  %v10779_v27 = vpop.permute.xlu0 %1434 }
 0x233   : > { %16441 = vst [vmem:[#allocation112_spill] sm:$0xff] %v10777_v6  ;;  %16442 = vst [vmem:[#allocation113_spill] sm:$0xff] %v10779_v27  ;;  %v1773_v27 = vrot.slane %v10394_v61, %v10292_v59 }
 0x234   : > { %1757 = vbcast.lane.b32.xlu1 %v1751_v41, 264  ;;  %1753 = vbcast.lane.b32.xlu0 %v1751_v41, 256 }
 0x236   : > { %v10783_v14 = vpop.permute.xlu1 %1449  ;;  %v10785_v30 = vpop.permute.xlu0 %1445 }
 0x237   : > { %16443 = vst [vmem:[#allocation114_spill] sm:$0xff] %v10783_v14  ;;  %16444 = vst [vmem:[#allocation115_spill] sm:$0xff] %v10785_v30  ;;  %v1784_v30 = vrot.slane %v10394_v61, %v10307_v9 }
 0x238   : > { %1768 = vbcast.lane.b32.xlu1 %v1762_v18, 264  ;;  %1764 = vbcast.lane.b32.xlu0 %v1762_v18, 256 }
 0x23a   : > { %v10789_v45 = vpop.permute.xlu1 %1460  ;;  %v10791_v15 = vpop.permute.xlu0 %1456 }
 0x23b   : > { %16445 = vst [vmem:[#allocation116_spill] sm:$0xff] %v10789_v45  ;;  %16446 = vst [vmem:[#allocation117_spill] sm:$0xff] %v10791_v15  ;;  %v1795_v15 = vrot.slane %v10394_v61, %v10310_v13 }
 0x23c   : > { %1779 = vbcast.lane.b32.xlu1 %v1773_v27, 264  ;;  %1775 = vbcast.lane.b32.xlu0 %v1773_v27, 256 }
 0x23e   : > { %v10795_v49 = vpop.permute.xlu1 %1471  ;;  %v10797_v41 = vpop.permute.xlu0 %1467 }
 0x23f   : > { %16447 = vst [vmem:[#allocation118_spill] sm:$0xff] %v10795_v49  ;;  %16448 = vst [vmem:[#allocation119_spill] sm:$0xff] %v10797_v41  ;;  %v1806_v41 = vrot.slane %v10394_v61, %v10319_v20 }
 0x240   : > { %1790 = vbcast.lane.b32.xlu1 %v1784_v30, 264  ;;  %1786 = vbcast.lane.b32.xlu0 %v1784_v30, 256 }
 0x242   : > { %v10801_v14 = vpop.permute.xlu1 %1482  ;;  %v10803_v18 = vpop.permute.xlu0 %1478 }
 0x243   : > { %16449 = vst [vmem:[#allocation120_spill] sm:$0xff] %v10801_v14  ;;  %16450 = vst [vmem:[#allocation121_spill] sm:$0xff] %v10803_v18  ;;  %v1817_v14 = vrot.slane %v10394_v61, %v10328_v24 }
 0x244   : > { %1801 = vbcast.lane.b32.xlu1 %v1795_v15, 264  ;;  %1797 = vbcast.lane.b32.xlu0 %v1795_v15, 256  ;;  %v1828_v15 = vrot.slane %v10394_v61, %v10358_v5 }
 0x246   : > { %v10807_v45 = vpop.permute.xlu1 %1493  ;;  %v10809_v27 = vpop.permute.xlu0 %1489 }
 0x247   : > { %16451 = vst [vmem:[#allocation122_spill] sm:$0xff] %v10807_v45  ;;  %16452 = vst [vmem:[#allocation123_spill] sm:$0xff] %v10809_v27 }
 0x248   : > { %1812 = vbcast.lane.b32.xlu1 %v1806_v41, 264  ;;  %1808 = vbcast.lane.b32.xlu0 %v1806_v41, 256  ;;  %v1839_v41 = vrot.slane %v10394_v61, %v10381_v7 }
 0x24a   : > { %v1505_v49 = vpop.permute.xlu1 %1504  ;;  %v1501_v30 = vpop.permute.xlu0 %1500 }
 0x24b   : > { %v10821_v19 = vsel %vm2199_vm0, %v10456_v22, %v1505_v49 }
 0x24c   : > { %1823 = vbcast.lane.b32.xlu1 %v1817_v14, 264  ;;  %1819 = vbcast.lane.b32.xlu0 %v1817_v14, 256  ;;  %16453 = vst [vmem:[#allocation124_spill] sm:$0xff] %v10821_v19  ;;  %v2200_v14 = vsel %vm2199_vm0, %v10458_v40, %v1501_v30  ;;  %v1850_v40 = vrot.slane %v10256_v36, %v10215_v52 }
 0x24e   : > { %v1516_v18 = vpop.permute.xlu1 %1515  ;;  %v1512_v6 = vpop.permute.xlu0 %1511 }
 0x24f   : > { %v10835_v61 = vsel %vm2199_vm0, %v10461_v56, %v1516_v18 }
 0x250   : > { %1834 = vbcast.lane.b32.xlu1 %v1828_v15, 264  ;;  %1830 = vbcast.lane.b32.xlu0 %v1828_v15, 256  ;;  %16455 = vst [vmem:[#allocation126_spill] sm:$0xff] %v10835_v61 }
 0x252   : > { %v1527_v27 = vpop.permute.xlu1 %1526  ;;  %v1523_v45 = vpop.permute.xlu0 %1522 }
 0x253   : > { %v10827_v29 = vsel %vm2199_vm0, %v10468_v4, %v1527_v27  ;;  %v2204_v0 = vsel %vm2199_vm0, %v10470_v21, %v1523_v45  ;;  %v2202_v4 = vsel %vm2199_vm0, %v10463_v58, %v1512_v6 }
 0x254   : > { %16454 = vst [vmem:[#allocation125_spill] sm:$0xff] %v10827_v29  ;;  %v2601_v15 = vcombine.high %v10821_v19, %v10827_v29  ;;  %v2329_v39 = vcombine.high %v2200_v14, %v2204_v0  ;;  %1845 = vbcast.lane.b32.xlu1 %v1839_v41, 264  ;;  %1841 = vbcast.lane.b32.xlu0 %v1839_v41, 256 }
 0x255   : > { %v2328_v27 = vcombine.low %v2200_v14, %v2204_v0  ;;  %v1861_v41 = vrot.slane %v10256_v36, %v10292_v59 }
 0x256   : > { %v1538_v22 = vpop.permute.xlu1 %1537  ;;  %v1534_v49 = vpop.permute.xlu0 %1533  ;;  %v10852_v58 = vrot.slane %v2601_v15, %v10191_v11 }
 0x257   : > { %v10843_v21 = vsel %vm2199_vm0, %v10473_v16, %v1538_v22  ;;  %v2206_v45 = vsel %vm2199_vm0, %v10475_v57, %v1534_v49  ;;  %v2336_v22 = vrot.slane %v2328_v27, %v10191_v11  ;;  %v10865_v49 = vrot.slane %v2329_v39, %v10191_v11 }
 0x258   : > { %16456 = vst [vmem:[#allocation127_spill] sm:$0xff] %v10843_v21  ;;  %v2617_v56 = vcombine.high %v10835_v61, %v10843_v21  ;;  %v2344_v18 = vcombine.low %v2202_v4, %v2206_v45  ;;  %v2345_v30 = vcombine.high %v2202_v4, %v2206_v45  ;;  %1856 = vbcast.lane.b32.xlu1 %v1850_v40, 264 }
 0x259   : > { %1852 = vbcast.lane.b32.xlu0 %v1850_v40, 256  ;;  %v1872_v39 = vrot.slane %v10256_v36, %v10307_v9  ;;  %v1883_v40 = vrot.slane %v10256_v36, %v10310_v13 }
 0x25a   : > { %v10855_v0 = vrot.slane %v2617_v56, %v10191_v11  ;;  %v10858_v16 = vrot.slane %v2344_v18, %v10191_v11  ;;  %v10861_v57 = vrot.slane %v2345_v30, %v10191_v11  ;;  %v1549_v6 = vpop.permute.xlu1 %1548  ;;  %v1545_v14 = vpop.permute.xlu0 %1544 }
 0x25b   : > { %v10882_v29 = vsel %vm2199_vm0, %v10478_v35, %v1549_v6 }
 0x25c   : > { %v2680_v15 = vcombine.low %v10852_v58, %v10855_v0  ;;  %1867 = vbcast.lane.b32.xlu1 %v1861_v41, 264  ;;  %v2393_v4 = vcombine.high %v2336_v22, %v10858_v16  ;;  %v2408_v45 = vcombine.low %v10865_v49, %v10861_v57  ;;  %v2409_v56 = vcombine.high %v10865_v49, %v10861_v57 }
 0x25d   : > { %1863 = vbcast.lane.b32.xlu0 %v1861_v41, 256  ;;  %16457 = vst [vmem:[#allocation128_spill] sm:$0xff] %v10882_v29  ;;  %v2208_v57 = vsel %vm2199_vm0, %v10480_v60, %v1545_v14  ;;  %v1894_v60 = vrot.slane %v10256_v36, %v10319_v20 }
 0x25e   : > { %v1560_v27 = vpop.permute.xlu1 %1559  ;;  %v1556_v18 = vpop.permute.xlu0 %1555 }
 0x25f   : > { %v10896_v35 = vsel %vm2199_vm0, %v10483_v25, %v1560_v27 }
 0x260   : > { %1878 = vbcast.lane.b32.xlu1 %v1872_v39, 264  ;;  %16459 = vst [vmem:[#allocation130_spill] sm:$0xff] %v10896_v35 }
 0x261   : > { %1874 = vbcast.lane.b32.xlu0 %v1872_v39, 256 }
 0x262   : > { %v1571_v30 = vpop.permute.xlu1 %1570  ;;  %v1567_v19 = vpop.permute.xlu0 %1566 }
 0x263   : > { %v10888_v41 = vsel %vm2199_vm0, %v10488_v10, %v1571_v30  ;;  %v2212_v49 = vsel %vm2199_vm0, %v10490_v12, %v1567_v19  ;;  %v2210_v10 = vsel %vm2199_vm0, %v10485_v23, %v1556_v18  ;;  %v2392_v30 = vcombine.low %v2336_v22, %v10858_v16 }
 0x264   : > { %16458 = vst [vmem:[#allocation129_spill] sm:$0xff] %v10888_v41  ;;  %v2633_v39 = vcombine.high %v10882_v29, %v10888_v41  ;;  %v2361_v61 = vcombine.high %v2208_v57, %v2212_v49  ;;  %1889 = vbcast.lane.b32.xlu1 %v1883_v40, 264  ;;  %v2360_v14 = vcombine.low %v2208_v57, %v2212_v49 }
 0x265   : > { %1885 = vbcast.lane.b32.xlu0 %v1883_v40, 256  ;;  %v1905_v23 = vrot.slane %v10256_v36, %v10328_v24  ;;  %v1916_v22 = vrot.slane %v10256_v36, %v10358_v5 }
 0x266   : > { %v1582_v6 = vpop.permute.xlu1 %1581  ;;  %v1578_v21 = vpop.permute.xlu0 %1577  ;;  %v2647_v18 = vrot.slane %v2633_v39, %v10191_v11 }
 0x267   : > { %v10904_v12 = vsel %vm2199_vm0, %v10493_v34, %v1582_v6  ;;  %v2214_v19 = vsel %vm2199_vm0, %v10495_v2, %v1578_v21  ;;  %v2368_v6 = vrot.slane %v2360_v14, %v10191_v11  ;;  %v10928_v14 = vrot.slane %v2393_v4, %v10210_v47 }
 0x268   : > { %16460 = vst [vmem:[#allocation131_spill] sm:$0xff] %v10904_v12  ;;  %v2649_v25 = vcombine.high %v10896_v35, %v10904_v12  ;;  %v2376_v40 = vcombine.low %v2210_v10, %v2214_v19  ;;  %v2377_v27 = vcombine.high %v2210_v10, %v2214_v19  ;;  %1900 = vbcast.lane.b32.xlu1 %v1894_v60, 264  ;;  %v16643_v35 = vld [vmem:[#allocation112_spill] sm:$0xff] }
 0x269   : > { %1896 = vbcast.lane.b32.xlu0 %v1894_v60, 256  ;;  %v2375_v10 = vrot.slane %v2361_v61, %v10191_v11  ;;  %v16464_v4 = vcombine.high %v10852_v58, %v10855_v0  ;;  %v1971_v58 = vrot.slane %v10417_v32, %v10310_v13 }
 0x26a   : > { %v2663_v34 = vrot.slane %v2649_v25, %v10191_v11  ;;  %v2384_v57 = vrot.slane %v2376_v40, %v10191_v11  ;;  %v2391_v2 = vrot.slane %v2377_v27, %v10191_v11  ;;  %v1593_v21 = vpop.permute.xlu1 %1592  ;;  %v1589_v49 = vpop.permute.xlu0 %1588  ;;  %v10922_v40 = vrot.slane %v2680_v15, %v10210_v47 }
 0x26b   : > { %v10925_v27 = vrot.slane %v2392_v30, %v10210_v47 }
 0x26c   : > { %v2712_v19 = vcombine.low %v2647_v18, %v2663_v34  ;;  %v2713_v16 = vcombine.high %v2647_v18, %v2663_v34  ;;  %1911 = vbcast.lane.b32.xlu1 %v1905_v23, 264  ;;  %v2424_v60 = vcombine.low %v2368_v6, %v2384_v57  ;;  %v2425_v39 = vcombine.high %v2368_v6, %v2384_v57 }
 0x26d   : > { %v2440_v29 = vcombine.low %v2375_v10, %v2391_v2  ;;  %v2441_v25 = vcombine.high %v2375_v10, %v2391_v2  ;;  %1907 = vbcast.lane.b32.xlu0 %v1905_v23, 256  ;;  %16461 = vst [vmem:[#allocation132_spill] sm:$0xff] %v10922_v40  ;;  %16462 = vst [vmem:[#allocation133_spill] sm:$0xff] %v10925_v27  ;;  %v1927_v34 = vrot.slane %v10256_v36, %v10381_v7 }
 0x26e   : > { %v1604_v61 = vpop.permute.xlu1 %1603  ;;  %v1600_v18 = vpop.permute.xlu0 %1599  ;;  %v10933_v41 = vrot.slane %v2424_v60, %v10210_v47  ;;  %v10936_v57 = vrot.slane %v2425_v39, %v10210_v47  ;;  %v10948_v23 = vrot.slane %v16464_v4, %v10210_v47  ;;  %v10951_v36 = vrot.slane %v2408_v45, %v10210_v47 }
 0x26f   : > { %v10939_v15 = vrot.slane %v2440_v29, %v10210_v47  ;;  %v10942_v30 = vrot.slane %v2441_v25, %v10210_v47  ;;  %v10954_v2 = vrot.slane %v2409_v56, %v10210_v47  ;;  %v10957_v6 = vrot.slane %v2712_v19, %v10210_v47 }
 0x270   : > { %16463 = vst [vmem:[#allocation134_spill] sm:$0xff] %v10933_v41  ;;  %16465 = vst [vmem:[#allocation135_spill] sm:$0xff] %v10948_v23  ;;  %1922 = vbcast.lane.b32.xlu1 %v1916_v22, 264  ;;  %v10960_v29 = vrot.slane %v2713_v16, %v10210_v47  ;;  %v10978_v39 = vsel %vm2199_vm0, %v10498_v62, %v1593_v21  ;;  %v2216_v25 = vsel %vm2199_vm0, %v10500_v26, %v1589_v49 }
 0x271   : > { %16466 = vst [vmem:[#allocation136_spill] sm:$0xff] %v10957_v6  ;;  %1918 = vbcast.lane.b32.xlu0 %v1916_v22, 256  ;;  %16468 = vst [vmem:[#allocation138_spill] sm:$0xff] %v10978_v39  ;;  %v1949_v22 = vrot.slane %v10417_v32, %v10292_v59 }
 0x272   : > { %16467 = vst [vmem:[#allocation137_spill] sm:$0xff] %v10960_v29  ;;  %v1615_v45 = vpop.permute.xlu1 %1614  ;;  %v1611_v56 = vpop.permute.xlu0 %1610 }
 0x273   : > { %v10984_v4 = vsel %vm2199_vm0, %v10510_v51, %v1615_v45  ;;  %v2220_v0 = vsel %vm2199_vm0, %v10512_v43, %v1611_v56  ;;  %v11000_v43 = vsel %vm2199_vm0, %v10503_v63, %v1604_v61  ;;  %v2218_v56 = vsel %vm2199_vm0, %v10505_v3, %v1600_v18 }
 0x274   : > { %16469 = vst [vmem:[#allocation139_spill] sm:$0xff] %v10984_v4  ;;  %v2737_v16 = vcombine.high %v10978_v39, %v10984_v4  ;;  %v2465_v60 = vcombine.high %v2216_v25, %v2220_v0  ;;  %1933 = vbcast.lane.b32.xlu1 %v1927_v34, 264  ;;  %16470 = vst [vmem:[#allocation140_spill] sm:$0xff] %v11000_v43  ;;  %v2464_v62 = vcombine.low %v2216_v25, %v2220_v0  ;;  %v16496_v39 = vld [vmem:[#allocation39_spill] sm:$0xff] }
 0x275   : > { %1929 = vbcast.lane.b32.xlu0 %v1927_v34, 256  ;;  %v1938_v34 = vrot.slane %v10417_v32, %v10215_v52  ;;  %v16499_v4 = vld [vmem:[#allocation43_spill] sm:$0xff] }
 0x276   : > { %v1626_v49 = vpop.permute.xlu1 %1625  ;;  %v1622_v45 = vpop.permute.xlu0 %1621  ;;  %v11017_v3 = vrot.slane %v2737_v16, %v10191_v11 }
 0x277   : > { %v11008_v21 = vsel %vm2199_vm0, %v10515_v31, %v1626_v49  ;;  %v2222_v51 = vsel %vm2199_vm0, %v10517_v38, %v1622_v45  ;;  %v11030_v49 = vrot.slane %v2465_v60, %v10191_v11  ;;  %v1960_v60 = vrot.slane %v10417_v32, %v10307_v9 }
 0x278   : > { %16471 = vst [vmem:[#allocation141_spill] sm:$0xff] %v11008_v21  ;;  %v2753_v63 = vcombine.high %v11000_v43, %v11008_v21  ;;  %v2480_v61 = vcombine.low %v2218_v56, %v2222_v51  ;;  %v2481_v26 = vcombine.high %v2218_v56, %v2222_v51  ;;  %1944 = vbcast.lane.b32.xlu1 %v1938_v34, 264 }
 0x279   : > { %1940 = vbcast.lane.b32.xlu0 %v1938_v34, 256  ;;  %v2472_v51 = vrot.slane %v2464_v62, %v10191_v11 }
 0x27a   : > { %v11020_v18 = vrot.slane %v2753_v63, %v10191_v11  ;;  %v11023_v31 = vrot.slane %v2480_v61, %v10191_v11  ;;  %v11026_v38 = vrot.slane %v2481_v26, %v10191_v11  ;;  %v1637_v0 = vpop.permute.xlu1 %1636  ;;  %v1633_v25 = vpop.permute.xlu0 %1632 }
 0x27b   : > { %v11047_v10 = vsel %vm2199_vm0, %v10520_v44, %v1637_v0 }
 0x27c   : > { %v2816_v16 = vcombine.low %v11017_v3, %v11020_v18  ;;  %1955 = vbcast.lane.b32.xlu1 %v1949_v22, 264  ;;  %v2529_v34 = vcombine.high %v2472_v51, %v11023_v31  ;;  %v2544_v26 = vcombine.low %v11030_v49, %v11026_v38  ;;  %v2545_v56 = vcombine.high %v11030_v49, %v11026_v38 }
 0x27d   : > { %1951 = vbcast.lane.b32.xlu0 %v1949_v22, 256  ;;  %16472 = vst [vmem:[#allocation142_spill] sm:$0xff] %v11047_v10  ;;  %v2224_v38 = vsel %vm2199_vm0, %v10522_v50, %v1633_v25  ;;  %v1982_v50 = vrot.slane %v10417_v32, %v10319_v20 }
 0x27e   : > { %v1648_v62 = vpop.permute.xlu1 %1647  ;;  %v1644_v63 = vpop.permute.xlu0 %1643 }
 0x27f   : > { %v11061_v44 = vsel %vm2199_vm0, %v10525_v8, %v1648_v62 }
 0x280   : > { %1966 = vbcast.lane.b32.xlu1 %v1960_v60, 264  ;;  %16474 = vst [vmem:[#allocation144_spill] sm:$0xff] %v11061_v44 }
 0x281   : > { %1962 = vbcast.lane.b32.xlu0 %v1960_v60, 256 }
 0x282   : > { %v1659_v61 = vpop.permute.xlu1 %1658  ;;  %v1655_v19 = vpop.permute.xlu0 %1654 }
 0x283   : > { %v11053_v22 = vsel %vm2199_vm0, %v10530_v17, %v1659_v61  ;;  %v2228_v49 = vsel %vm2199_vm0, %v10532_v48, %v1655_v19  ;;  %v2226_v17 = vsel %vm2199_vm0, %v10527_v53, %v1644_v63  ;;  %v2528_v61 = vcombine.low %v2472_v51, %v11023_v31 }
 0x284   : > { %16473 = vst [vmem:[#allocation143_spill] sm:$0xff] %v11053_v22  ;;  %v2769_v60 = vcombine.high %v11047_v10, %v11053_v22  ;;  %v2497_v45 = vcombine.high %v2224_v38, %v2228_v49  ;;  %1977 = vbcast.lane.b32.xlu1 %v1971_v58, 264  ;;  %v2496_v25 = vcombine.low %v2224_v38, %v2228_v49  ;;  %v16500_v10 = vld [vmem:[#allocation40_spill] sm:$0xff] }
 0x285   : > { %1973 = vbcast.lane.b32.xlu0 %v1971_v58, 256  ;;  %v1993_v53 = vrot.slane %v10417_v32, %v10328_v24  ;;  %v2004_v51 = vrot.slane %v10417_v32, %v10358_v5 }
 0x286   : > { %v1670_v0 = vpop.permute.xlu1 %1669  ;;  %v1666_v29 = vpop.permute.xlu0 %1665  ;;  %v2783_v63 = vrot.slane %v2769_v60, %v10191_v11 }
 0x287   : > { %v11069_v48 = vsel %vm2199_vm0, %v10535_v33, %v1670_v0  ;;  %v2230_v58 = vsel %vm2199_vm0, %v10537_v42, %v1666_v29  ;;  %v2504_v0 = vrot.slane %v2496_v25, %v10191_v11  ;;  %v11093_v25 = vrot.slane %v2529_v34, %v10210_v47 }
 0x288   : > { %16475 = vst [vmem:[#allocation145_spill] sm:$0xff] %v11069_v48  ;;  %v2785_v8 = vcombine.high %v11061_v44, %v11069_v48  ;;  %v2512_v19 = vcombine.low %v2226_v17, %v2230_v58  ;;  %v2513_v62 = vcombine.high %v2226_v17, %v2230_v58  ;;  %1988 = vbcast.lane.b32.xlu1 %v1982_v50, 264  ;;  %v16505_v44 = vld [vmem:[#allocation45_spill] sm:$0xff] }
 0x289   : > { %1984 = vbcast.lane.b32.xlu0 %v1982_v50, 256  ;;  %v2511_v17 = vrot.slane %v2497_v45, %v10191_v11  ;;  %v16480_v34 = vcombine.high %v11017_v3, %v11020_v18 }
 0x28a   : > { %v2799_v33 = vrot.slane %v2785_v8, %v10191_v11  ;;  %v2520_v38 = vrot.slane %v2512_v19, %v10191_v11  ;;  %v2527_v42 = vrot.slane %v2513_v62, %v10191_v11  ;;  %v1681_v29 = vpop.permute.xlu1 %1680  ;;  %v1677_v49 = vpop.permute.xlu0 %1676  ;;  %v11087_v19 = vrot.slane %v2816_v16, %v10210_v47 }
 0x28b   : > { %v11090_v62 = vrot.slane %v2528_v61, %v10210_v47 }
 0x28c   : > { %v2848_v58 = vcombine.low %v2783_v63, %v2799_v33  ;;  %v2849_v31 = vcombine.high %v2783_v63, %v2799_v33  ;;  %1999 = vbcast.lane.b32.xlu1 %v1993_v53, 264  ;;  %v2560_v50 = vcombine.low %v2504_v0, %v2520_v38  ;;  %v2561_v60 = vcombine.high %v2504_v0, %v2520_v38 }
 0x28d   : > { %v2576_v23 = vcombine.low %v2511_v17, %v2527_v42  ;;  %v2577_v8 = vcombine.high %v2511_v17, %v2527_v42  ;;  %1995 = vbcast.lane.b32.xlu0 %v1993_v53, 256  ;;  %16476 = vst [vmem:[#allocation146_spill] sm:$0xff] %v11087_v19  ;;  %16477 = vst [vmem:[#allocation147_spill] sm:$0xff] %v11090_v62  ;;  %v2015_v33 = vrot.slane %v10417_v32, %v10381_v7  ;;  %v16494_v19 = vld [vmem:[#allocation38_spill] sm:$0xff] }
 0x28e   : > { %v1692_v45 = vpop.permute.xlu1 %1691  ;;  %v1688_v63 = vpop.permute.xlu0 %1687  ;;  %v11098_v6 = vrot.slane %v2560_v50, %v10210_v47  ;;  %v11101_v38 = vrot.slane %v2561_v60, %v10210_v47  ;;  %v11113_v53 = vrot.slane %v16480_v34, %v10210_v47  ;;  %v11116_v32 = vrot.slane %v2544_v26, %v10210_v47 }
 0x28f   : > { %v11104_v16 = vrot.slane %v2576_v23, %v10210_v47  ;;  %v11107_v61 = vrot.slane %v2577_v8, %v10210_v47  ;;  %v11119_v42 = vrot.slane %v2545_v56, %v10210_v47  ;;  %v11122_v0 = vrot.slane %v2848_v58, %v10210_v47  ;;  %v16490_v58 = vld [vmem:[#allocation35_spill] sm:$0xff] }
 0x290   : > { %16478 = vst [vmem:[#allocation148_spill] sm:$0xff] %v11098_v6  ;;  %16481 = vst [vmem:[#allocation150_spill] sm:$0xff] %v11113_v53  ;;  %2010 = vbcast.lane.b32.xlu1 %v2004_v51, 264  ;;  %v11125_v23 = vrot.slane %v2849_v31, %v10210_v47  ;;  %v11143_v60 = vsel %vm2199_vm0, %v10540_v28, %v1681_v29  ;;  %v2232_v8 = vsel %vm2199_vm0, %v10542_v37, %v1677_v49  ;;  %v16487_v49 = vld [vmem:[#allocation34_spill] sm:$0xff]  ;;  %v16491_v29 = vld [vmem:[#allocation36_spill] sm:$0xff] }
 0x291   : > { %16479 = vst [vmem:[#allocation149_spill] sm:$0xff] %v11107_v61  ;;  %16482 = vst [vmem:[#allocation151_spill] sm:$0xff] %v11119_v42  ;;  %2006 = vbcast.lane.b32.xlu0 %v2004_v51, 256  ;;  %v2234_v28 = vsel %vm2199_vm0, %v16490_v58, %v1688_v63  ;;  %v16493_v37 = vld [vmem:[#allocation37_spill] sm:$0xff] }
 0x292   : > { %16483 = vst [vmem:[#allocation152_spill] sm:$0xff] %v11122_v0  ;;  %16484 = vst [vmem:[#allocation153_spill] sm:$0xff] %v11125_v23  ;;  %v1703_v26 = vpop.permute.xlu1 %1702  ;;  %v1699_v56 = vpop.permute.xlu0 %1698 }
 0x293   : > { %16485 = vst [vmem:[#allocation154_spill] sm:$0xff] %v11143_v60  ;;  %v11149_v34 = vsel %vm2199_vm0, %v10552_v55, %v1703_v26  ;;  %v2236_v17 = vsel %vm2199_vm0, %v10554_v46, %v1699_v56  ;;  %v11165_v46 = vsel %vm2199_vm0, %v16487_v49, %v1692_v45 }
 0x294   : > { %16486 = vst [vmem:[#allocation155_spill] sm:$0xff] %v11149_v34  ;;  %v3145_v31 = vcombine.high %v11143_v60, %v11149_v34  ;;  %v2873_v50 = vcombine.high %v2232_v8, %v2236_v17  ;;  %2021 = vbcast.lane.b32.xlu1 %v2015_v33, 264  ;;  %16488 = vst [vmem:[#allocation34_spill] sm:$0xff] %v11165_v46  ;;  %v2872_v18 = vcombine.low %v2232_v8, %v2236_v17 }
 0x295   : > { %2017 = vbcast.lane.b32.xlu0 %v2015_v33, 256  ;;  %v16489_v33 = vld [vmem:[#allocation11_spill] sm:$0xff] }
 0x296   : > { %v1714_v26 = vpop.permute.xlu1 %1713  ;;  %v1710_v56 = vpop.permute.xlu0 %1709  ;;  %v2026_v51 = vrot.slane %v16489_v33, %v10215_v52  ;;  %v2037_v53 = vrot.slane %v16489_v33, %v10292_v59  ;;  %v11182_v63 = vrot.slane %v3145_v31, %v10191_v11 }
 0x297   : > { %v11173_v3 = vsel %vm2199_vm0, %v16491_v29, %v1714_v26  ;;  %v2238_v55 = vsel %vm2199_vm0, %v16493_v37, %v1710_v56 }
 0x298   : > { %16492 = vst [vmem:[#allocation11_spill] sm:$0xff] %v11173_v3  ;;  %v3161_v45 = vcombine.high %v11165_v46, %v11173_v3  ;;  %v2888_v49 = vcombine.low %v2234_v28, %v2238_v55  ;;  %v2889_v23 = vcombine.high %v2234_v28, %v2238_v55  ;;  %2032 = vbcast.lane.b32.xlu1 %v2026_v51, 264 }
 0x299   : > { %2028 = vbcast.lane.b32.xlu0 %v2026_v51, 256  ;;  %v2880_v28 = vrot.slane %v2872_v18, %v10191_v11  ;;  %v11195_v51 = vrot.slane %v2873_v50, %v10191_v11  ;;  %v2048_v50 = vrot.slane %v16489_v33, %v10307_v9  ;;  %v2059_v55 = vrot.slane %v16489_v33, %v10310_v13 }
 0x29a   : > { %v11185_v17 = vrot.slane %v3161_v45, %v10191_v11  ;;  %v11188_v58 = vrot.slane %v2888_v49, %v10191_v11  ;;  %v11191_v8 = vrot.slane %v2889_v23, %v10191_v11  ;;  %v1725_v29 = vpop.permute.xlu1 %1724  ;;  %v1721_v37 = vpop.permute.xlu0 %1720 }
 0x29b   : > { %v11212_v40 = vsel %vm2199_vm0, %v16494_v19, %v1725_v29 }
 0x29c   : > { %v3224_v31 = vcombine.low %v11182_v63, %v11185_v17  ;;  %2043 = vbcast.lane.b32.xlu1 %v2037_v53, 264  ;;  %v2937_v26 = vcombine.high %v2880_v28, %v11188_v58  ;;  %v2952_v23 = vcombine.low %v11195_v51, %v11191_v8  ;;  %v2953_v56 = vcombine.high %v11195_v51, %v11191_v8 }
 0x29d   : > { %2039 = vbcast.lane.b32.xlu0 %v2037_v53, 256  ;;  %16495 = vst [vmem:[#allocation35_spill] sm:$0xff] %v11212_v40  ;;  %v2240_v8 = vsel %vm2199_vm0, %v16496_v39, %v1721_v37  ;;  %v16497_v53 = vld [vmem:[#allocation42_spill] sm:$0xff]  ;;  %v2070_v39 = vrot.slane %v16489_v33, %v10319_v20  ;;  %v16502_v37 = vld [vmem:[#allocation41_spill] sm:$0xff]  ;;  %v2936_v61 = vcombine.low %v2880_v28, %v11188_v58 }
 0x29e   : > { %v1736_v18 = vpop.permute.xlu1 %1735  ;;  %v1732_v45 = vpop.permute.xlu0 %1731  ;;  %v2092_v28 = vrot.slane %v16489_v33, %v10358_v5 }
 0x29f   : > { %v11226_v19 = vsel %vm2199_vm0, %v16500_v10, %v1736_v18 }
 0x2a0   : > { %2054 = vbcast.lane.b32.xlu1 %v2048_v50, 264  ;;  %16501 = vst [vmem:[#allocation37_spill] sm:$0xff] %v11226_v19 }
 0x2a1   : > { %2050 = vbcast.lane.b32.xlu0 %v2048_v50, 256 }
 0x2a2   : > { %v1747_v49 = vpop.permute.xlu1 %1746  ;;  %v1743_v0 = vpop.permute.xlu0 %1742 }
 0x2a3   : > { %v11218_v51 = vsel %vm2199_vm0, %v16497_v53, %v1747_v49  ;;  %v2244_v43 = vsel %vm2199_vm0, %v16499_v4, %v1743_v0  ;;  %v2242_v49 = vsel %vm2199_vm0, %v16502_v37, %v1732_v45  ;;  %v16503_v4 = vld [vmem:[#allocation44_spill] sm:$0xff]  ;;  %v2081_v45 = vrot.slane %v16489_v33, %v10328_v24 }
 0x2a4   : > { %16498 = vst [vmem:[#allocation36_spill] sm:$0xff] %v11218_v51  ;;  %v3177_v50 = vcombine.high %v11212_v40, %v11218_v51  ;;  %v2905_v21 = vcombine.high %v2240_v8, %v2244_v43  ;;  %2065 = vbcast.lane.b32.xlu1 %v2059_v55, 264  ;;  %v2904_v53 = vcombine.low %v2240_v8, %v2244_v43 }
 0x2a5   : > { %2061 = vbcast.lane.b32.xlu0 %v2059_v55, 256 }
 0x2a6   : > { %v1758_v29 = vpop.permute.xlu1 %1757  ;;  %v1754_v22 = vpop.permute.xlu0 %1753  ;;  %v3191_v43 = vrot.slane %v3177_v50, %v10191_v11 }
 0x2a7   : > { %v11234_v0 = vsel %vm2199_vm0, %v16503_v4, %v1758_v29  ;;  %v2246_v55 = vsel %vm2199_vm0, %v16505_v44, %v1754_v22  ;;  %v2912_v4 = vrot.slane %v2904_v53, %v10191_v11  ;;  %v11258_v53 = vrot.slane %v2937_v26, %v10210_v47 }
 0x2a8   : > { %16504 = vst [vmem:[#allocation38_spill] sm:$0xff] %v11234_v0  ;;  %v3193_v10 = vcombine.high %v11226_v19, %v11234_v0  ;;  %v2920_v18 = vcombine.low %v2242_v49, %v2246_v55  ;;  %v2921_v48 = vcombine.high %v2242_v49, %v2246_v55  ;;  %2076 = vbcast.lane.b32.xlu1 %v2070_v39, 264 }
 0x2a9   : > { %2072 = vbcast.lane.b32.xlu0 %v2070_v39, 256  ;;  %v2919_v49 = vrot.slane %v2905_v21, %v10191_v11  ;;  %v16509_v26 = vcombine.high %v11182_v63, %v11185_v17 }
 0x2aa   : > { %v3207_v8 = vrot.slane %v3193_v10, %v10191_v11  ;;  %v2928_v29 = vrot.slane %v2920_v18, %v10191_v11  ;;  %v2935_v22 = vrot.slane %v2921_v48, %v10191_v11  ;;  %v1769_v44 = vpop.permute.xlu1 %1768  ;;  %v1765_v37 = vpop.permute.xlu0 %1764  ;;  %v11252_v18 = vrot.slane %v3224_v31, %v10210_v47 }
 0x2ab   : > { %v11255_v48 = vrot.slane %v2936_v61, %v10210_v47 }
 0x2ac   : > { %v3256_v55 = vcombine.low %v3191_v43, %v3207_v8  ;;  %v3257_v58 = vcombine.high %v3191_v43, %v3207_v8  ;;  %2087 = vbcast.lane.b32.xlu1 %v2081_v45, 264  ;;  %v2968_v39 = vcombine.low %v2912_v4, %v2928_v29  ;;  %v2969_v50 = vcombine.high %v2912_v4, %v2928_v29 }
 0x2ad   : > { %v2984_v42 = vcombine.low %v2919_v49, %v2935_v22  ;;  %v2985_v10 = vcombine.high %v2919_v49, %v2935_v22  ;;  %2083 = vbcast.lane.b32.xlu0 %v2081_v45, 256  ;;  %16506 = vst [vmem:[#allocation39_spill] sm:$0xff] %v11252_v18  ;;  %16507 = vst [vmem:[#allocation42_spill] sm:$0xff] %v11255_v48  ;;  %v2103_v8 = vrot.slane %v16489_v33, %v10381_v7  ;;  %v16520_v49 = vld [vmem:[#allocation49_spill] sm:$0xff] }
 0x2ae   : > { %v1780_v21 = vpop.permute.xlu1 %1779  ;;  %v1776_v43 = vpop.permute.xlu0 %1775  ;;  %v11263_v60 = vrot.slane %v2968_v39, %v10210_v47  ;;  %v11266_v29 = vrot.slane %v2969_v50, %v10210_v47  ;;  %v11278_v45 = vrot.slane %v16509_v26, %v10210_v47  ;;  %v11281_v33 = vrot.slane %v2952_v23, %v10210_v47  ;;  %v16513_v50 = vld [vmem:[#allocation46_spill] sm:$0xff]  ;;  %v16515_v26 = vld [vmem:[#allocation47_spill] sm:$0xff]  ;;  %v16526_v18 = vld [vmem:[#allocation53_spill] sm:$0xff] }
 0x2af   : > { %v11269_v31 = vrot.slane %v2984_v42, %v10210_v47  ;;  %v11272_v61 = vrot.slane %v2985_v10, %v10210_v47  ;;  %v11284_v22 = vrot.slane %v2953_v56, %v10210_v47  ;;  %v11287_v4 = vrot.slane %v3256_v55, %v10210_v47 }
 0x2b0   : > { %16508 = vst [vmem:[#allocation43_spill] sm:$0xff] %v11263_v60  ;;  %16510 = vst [vmem:[#allocation40_spill] sm:$0xff] %v11278_v45  ;;  %2098 = vbcast.lane.b32.xlu1 %v2092_v28, 264  ;;  %v11290_v42 = vrot.slane %v3257_v58, %v10210_v47  ;;  %v11308_v10 = vsel %vm2199_vm0, %v16513_v50, %v1769_v44  ;;  %v2248_v17 = vsel %vm2199_vm0, %v16515_v26, %v1765_v37  ;;  %v16521_v50 = vld [vmem:[#allocation50_spill] sm:$0xff]  ;;  %v16523_v37 = vld [vmem:[#allocation51_spill] sm:$0xff] }
 0x2b1   : > { %16511 = vst [vmem:[#allocation41_spill] sm:$0xff] %v11287_v4  ;;  %2094 = vbcast.lane.b32.xlu0 %v2092_v28, 256  ;;  %16514 = vst [vmem:[#allocation45_spill] sm:$0xff] %v11308_v10  ;;  %v2250_v44 = vsel %vm2199_vm0, %v16520_v49, %v1776_v43 }
 0x2b2   : > { %16512 = vst [vmem:[#allocation44_spill] sm:$0xff] %v11290_v42  ;;  %v1791_v23 = vpop.permute.xlu1 %1790  ;;  %v1787_v56 = vpop.permute.xlu0 %1786 }
 0x2b3   : > { %v11314_v63 = vsel %vm2199_vm0, %v10594_v1, %v1791_v23  ;;  %v2252_v39 = vsel %vm2199_vm0, %v10596_v54, %v1787_v56  ;;  %v16517_v23 = vld [vmem:[#allocation48_spill] sm:$0xff] }
 0x2b4   : > { %16516 = vst [vmem:[#allocation46_spill] sm:$0xff] %v11314_v63  ;;  %v3281_v58 = vcombine.high %v11308_v10, %v11314_v63  ;;  %v3009_v55 = vcombine.high %v2248_v17, %v2252_v39  ;;  %2109 = vbcast.lane.b32.xlu1 %v2103_v8, 264  ;;  %v11330_v54 = vsel %vm2199_vm0, %v16517_v23, %v1780_v21  ;;  %v16529_v63 = vld [vmem:[#allocation57_spill] sm:$0xff] }
 0x2b5   : > { %2105 = vbcast.lane.b32.xlu0 %v2103_v8, 256  ;;  %16518 = vst [vmem:[#allocation47_spill] sm:$0xff] %v11330_v54  ;;  %v16519_v8 = vld [vmem:[#allocation31_spill] sm:$0xff]  ;;  %v3008_v10 = vcombine.low %v2248_v17, %v2252_v39 }
 0x2b6   : > { %v1802_v56 = vpop.permute.xlu1 %1801  ;;  %v1798_v26 = vpop.permute.xlu0 %1797  ;;  %v2114_v28 = vrot.slane %v16519_v8, %v10215_v52  ;;  %v2125_v52 = vrot.slane %v16519_v8, %v10292_v59  ;;  %v11347_v43 = vrot.slane %v3281_v58, %v10191_v11  ;;  %v2147_v58 = vrot.slane %v16519_v8, %v10310_v13  ;;  %v16524_v59 = vld [vmem:[#allocation52_spill] sm:$0xff] }
 0x2b7   : > { %v11338_v4 = vsel %vm2199_vm0, %v16521_v50, %v1802_v56  ;;  %v2254_v1 = vsel %vm2199_vm0, %v16523_v37, %v1798_v26 }
 0x2b8   : > { %16522 = vst [vmem:[#allocation48_spill] sm:$0xff] %v11338_v4  ;;  %v3297_v21 = vcombine.high %v11330_v54, %v11338_v4  ;;  %v3024_v23 = vcombine.low %v2250_v44, %v2254_v1  ;;  %v3025_v42 = vcombine.high %v2250_v44, %v2254_v1  ;;  %2120 = vbcast.lane.b32.xlu1 %v2114_v28, 264 }
 0x2b9   : > { %2116 = vbcast.lane.b32.xlu0 %v2114_v28, 256  ;;  %v3016_v44 = vrot.slane %v3008_v10, %v10191_v11  ;;  %v11358_v28 = vrot.slane %v3009_v55, %v10191_v11  ;;  %v2136_v55 = vrot.slane %v16519_v8, %v10307_v9 }
 0x2ba   : > { %v11350_v49 = vrot.slane %v3297_v21, %v10191_v11  ;;  %v3032_v17 = vrot.slane %v3024_v23, %v10191_v11  ;;  %v11354_v39 = vrot.slane %v3025_v42, %v10191_v11  ;;  %v1813_v50 = vpop.permute.xlu1 %1812  ;;  %v1809_v37 = vpop.permute.xlu0 %1808 }
 0x2bb   : > { %v11374_v45 = vsel %vm2199_vm0, %v16524_v59, %v1813_v50  ;;  %v2158_v59 = vrot.slane %v16519_v8, %v10319_v20  ;;  %v16530_v50 = vld [vmem:[#allocation54_spill] sm:$0xff] }
 0x2bc   : > { %2131 = vbcast.lane.b32.xlu1 %v2125_v52, 264  ;;  %v3073_v56 = vcombine.high %v3016_v44, %v3032_v17  ;;  %v3088_v26 = vcombine.low %v11358_v28, %v11354_v39  ;;  %v3089_v42 = vcombine.high %v11358_v28, %v11354_v39  ;;  %16525 = vst [vmem:[#allocation31_spill] sm:$0xff] %v11374_v45 }
 0x2bd   : > { %2127 = vbcast.lane.b32.xlu0 %v2125_v52, 256  ;;  %v2256_v39 = vsel %vm2199_vm0, %v16526_v18, %v1809_v37  ;;  %v16527_v52 = vld [vmem:[#allocation56_spill] sm:$0xff] }
 0x2be   : > { %v1824_v21 = vpop.permute.xlu1 %1823  ;;  %v1820_v10 = vpop.permute.xlu0 %1819 }
 0x2bf   : > { %v11390_v18 = vsel %vm2199_vm0, %v16530_v50, %v1824_v21  ;;  %v3072_v21 = vcombine.low %v3016_v44, %v3032_v17  ;;  %v2169_v50 = vrot.slane %v16519_v8, %v10328_v24  ;;  %v16551_v24 = vld [vmem:[#allocation65_spill] sm:$0xff] }
 0x2c0   : > { %2142 = vbcast.lane.b32.xlu1 %v2136_v55, 264  ;;  %16531 = vst [vmem:[#allocation50_spill] sm:$0xff] %v11390_v18 }
 0x2c1   : > { %2138 = vbcast.lane.b32.xlu0 %v2136_v55, 256 }
 0x2c2   : > { %v1835_v23 = vpop.permute.xlu1 %1834  ;;  %v1831_v1 = vpop.permute.xlu0 %1830 }
 0x2c3   : > { %v11380_v28 = vsel %vm2199_vm0, %v16527_v52, %v1835_v23  ;;  %v2260_v9 = vsel %vm2199_vm0, %v16529_v63, %v1831_v1  ;;  %v16532_v23 = vld [vmem:[#allocation58_spill] sm:$0xff]  ;;  %v16534_v1 = vld [vmem:[#allocation55_spill] sm:$0xff] }
 0x2c4   : > { %16528 = vst [vmem:[#allocation49_spill] sm:$0xff] %v11380_v28  ;;  %v3313_v55 = vcombine.high %v11374_v45, %v11380_v28  ;;  %v3041_v54 = vcombine.high %v2256_v39, %v2260_v9  ;;  %2153 = vbcast.lane.b32.xlu1 %v2147_v58, 264  ;;  %v3040_v37 = vcombine.low %v2256_v39, %v2260_v9  ;;  %v16535_v28 = vld [vmem:[#allocation59_spill] sm:$0xff] }
 0x2c5   : > { %2149 = vbcast.lane.b32.xlu0 %v2147_v58, 256  ;;  %v2258_v45 = vsel %vm2199_vm0, %v16534_v1, %v1820_v10 }
 0x2c6   : > { %v1846_v13 = vpop.permute.xlu1 %1845  ;;  %v1842_v63 = vpop.permute.xlu0 %1841  ;;  %v3327_v9 = vrot.slane %v3313_v55, %v10191_v11  ;;  %v3048_v10 = vrot.slane %v3040_v37, %v10191_v11  ;;  %v11414_v37 = vrot.slane %v3073_v56, %v10210_v47  ;;  %v11431_v56 = vrot.slane %v3088_v26, %v10210_v47 }
 0x2c7   : > { %v11394_v52 = vsel %vm2199_vm0, %v16532_v23, %v1846_v13  ;;  %v2262_v4 = vsel %vm2199_vm0, %v16535_v28, %v1842_v63  ;;  %v3055_v23 = vrot.slane %v3041_v54, %v10191_v11 }
 0x2c8   : > { %16533 = vst [vmem:[#allocation51_spill] sm:$0xff] %v11394_v52  ;;  %v3329_v58 = vcombine.high %v11390_v18, %v11394_v52  ;;  %2164 = vbcast.lane.b32.xlu1 %v2158_v59, 264  ;;  %v3056_v20 = vcombine.low %v2258_v45, %v2262_v4  ;;  %v3057_v34 = vcombine.high %v2258_v45, %v2262_v4  ;;  %v16566_v18 = vld [vmem:[#allocation74_spill] sm:$0xff]  ;;  %v16568_v52 = vld [vmem:[#allocation71_spill] sm:$0xff] }
 0x2c9   : > { %2160 = vbcast.lane.b32.xlu0 %v2158_v59, 256 }
 0x2ca   : > { %v3343_v13 = vrot.slane %v3329_v58, %v10191_v11  ;;  %v1857_v39 = vpop.permute.xlu1 %1856  ;;  %v3064_v1 = vrot.slane %v3056_v20, %v10191_v11  ;;  %v3071_v28 = vrot.slane %v3057_v34, %v10191_v11  ;;  %v11411_v58 = vrot.slane %v3072_v21, %v10210_v47 }
 0x2cb   : > { %v1853_v63 = vpop.permute.xlu0 %1852  ;;  %v2180_v20 = vrot.slane %v16519_v8, %v10358_v5 }
 0x2cc   : > { %v3392_v45 = vcombine.low %v3327_v9, %v3343_v13  ;;  %v3393_v4 = vcombine.high %v3327_v9, %v3343_v13  ;;  %2175 = vbcast.lane.b32.xlu1 %v2169_v50, 264  ;;  %v3104_v17 = vcombine.low %v3048_v10, %v3064_v1  ;;  %v3105_v44 = vcombine.high %v3048_v10, %v3064_v1 }
 0x2cd   : > { %v3120_v55 = vcombine.low %v3055_v23, %v3071_v28  ;;  %v3121_v59 = vcombine.high %v3055_v23, %v3071_v28  ;;  %2171 = vbcast.lane.b32.xlu0 %v2169_v50, 256  ;;  %16536 = vst [vmem:[#allocation52_spill] sm:$0xff] %v11411_v58  ;;  %v11434_v10 = vrot.slane %v3089_v42, %v10210_v47 }
 0x2ce   : > { %v1868_v54 = vpop.permute.xlu1 %1867  ;;  %v11419_v34 = vrot.slane %v3104_v17, %v10210_v47  ;;  %v11422_v9 = vrot.slane %v3105_v44, %v10210_v47  ;;  %v11437_v23 = vrot.slane %v3392_v45, %v10210_v47  ;;  %v2191_v1 = vrot.slane %v16519_v8, %v10381_v7  ;;  %v16544_v17 = vld [vmem:[#allocation60_spill] sm:$0xff]  ;;  %v16550_v7 = vld [vmem:[#allocation61_spill] sm:$0xff] }
 0x2cf   : > { %v11425_v13 = vrot.slane %v3120_v55, %v10210_v47  ;;  %v11428_v50 = vrot.slane %v3121_v59, %v10210_v47  ;;  %v1864_v21 = vpop.permute.xlu0 %1863  ;;  %16539 = vst [vmem:[#allocation57_spill] sm:$0xff] %v11434_v10  ;;  %v11442_v28 = vrot.slane %v3393_v4, %v10210_v47  ;;  %v16542_v59 = vcombine.low %v11347_v43, %v11350_v49  ;;  %v16546_v45 = vld [vmem:[#allocation64_spill] sm:$0xff] }
 0x2d0   : > { %16537 = vst [vmem:[#allocation53_spill] sm:$0xff] %v11419_v34  ;;  %16540 = vst [vmem:[#allocation54_spill] sm:$0xff] %v11437_v23  ;;  %2186 = vbcast.lane.b32.xlu1 %v2180_v20, 264  ;;  %v11466_v42 = vsel %vm2199_vm0, %v16544_v17, %v1857_v39  ;;  %v16548_v4 = vcombine.high %v11347_v43, %v11350_v49  ;;  %v2264_v5 = vsel %vm2199_vm0, %v16550_v7, %v1853_v63  ;;  %v16557_v63 = vld [vmem:[#allocation67_spill] sm:$0xff] }
 0x2d1   : > { %16538 = vst [vmem:[#allocation56_spill] sm:$0xff] %v11428_v50  ;;  %16541 = vst [vmem:[#allocation58_spill] sm:$0xff] %v11442_v28  ;;  %2182 = vbcast.lane.b32.xlu0 %v2180_v20, 256  ;;  %v11462_v20 = vrot.slane %v16542_v59, %v10210_v47  ;;  %v2457_v23 = vcombine.high %v10925_v27, %v10933_v41  ;;  %v16569_v50 = vld [vmem:[#allocation75_spill] sm:$0xff] }
 0x2d2   : > { %v1879_v44 = vpop.permute.xlu1 %1878  ;;  %16545 = vst [vmem:[#allocation59_spill] sm:$0xff] %v11466_v42  ;;  %v11476_v55 = vrot.slane %v16548_v4, %v10210_v47  ;;  %v16554_v4 = vld [vmem:[#allocation66_spill] sm:$0xff] }
 0x2d3   : > { %16543 = vst [vmem:[#allocation55_spill] sm:$0xff] %v11462_v20  ;;  %v11470_v26 = vsel %vm2199_vm0, %v16546_v45, %v1879_v44  ;;  %v1875_v8 = vpop.permute.xlu0 %1874  ;;  %v2593_v45 = vcombine.high %v11090_v62, %v11098_v6  ;;  %v16556_v6 = vld [vmem:[#allocation63_spill] sm:$0xff]  ;;  %v16564_v20 = vld [vmem:[#allocation70_spill] sm:$0xff] }
 0x2d4   : > { %16547 = vst [vmem:[#allocation60_spill] sm:$0xff] %v11470_v26  ;;  %16549 = vst [vmem:[#allocation64_spill] sm:$0xff] %v11476_v55  ;;  %v3689_v59 = vcombine.high %v11466_v42, %v11470_v26  ;;  %v2268_v39 = vsel %vm2199_vm0, %v16551_v24, %v1875_v8  ;;  %2197 = vbcast.lane.b32.xlu1 %v2191_v1, 264  ;;  %v16552_v24 = vld [vmem:[#allocation62_spill] sm:$0xff]  ;;  %v2266_v62 = vsel %vm2199_vm0, %v16556_v6, %v1864_v21 }
 0x2d5   : > { %v3417_v17 = vcombine.high %v2264_v5, %v2268_v39  ;;  %2193 = vbcast.lane.b32.xlu0 %v2191_v1, 256  ;;  %v11496_v8 = vsel %vm2199_vm0, %v16552_v24, %v1868_v54  ;;  %v3416_v1 = vcombine.low %v2264_v5, %v2268_v39  ;;  %v3001_v21 = vcombine.high %v11255_v48, %v11263_v60  ;;  %v16560_v60 = vld [vmem:[#allocation72_spill] sm:$0xff] }
 0x2d6   : > { %v1890_v49 = vpop.permute.xlu1 %1889  ;;  %16553 = vst [vmem:[#allocation61_spill] sm:$0xff] %v11496_v8  ;;  %v11513_v39 = vrot.slane %v3689_v59, %v10191_v11 }
 0x2d7   : > { %v11500_v44 = vsel %vm2199_vm0, %v16554_v4, %v1890_v49  ;;  %v1886_v43 = vpop.permute.xlu0 %1885 }
 0x2d8   : > { %16555 = vst [vmem:[#allocation65_spill] sm:$0xff] %v11500_v44  ;;  %v3705_v7 = vcombine.high %v11496_v8, %v11500_v44  ;;  %v2270_v28 = vsel %vm2199_vm0, %v16557_v63, %v1886_v43  ;;  %4514 = vrot.lane.b32.xlu1 %v2593_v45, %s10001_s13  ;;  %v3137_v43 = vcombine.high %v11411_v58, %v11419_v34  ;;  %v16595_v8 = vld [vmem:[#allocation86_spill] sm:$0xff] }
 0x2d9   : > { %v3432_v5 = vcombine.low %v2266_v62, %v2270_v28  ;;  %v3433_v54 = vcombine.high %v2266_v62, %v2270_v28  ;;  %4512 = vrot.lane.b32.xlu0 %v2457_v23, %s10001_s13  ;;  %v3424_v63 = vrot.slane %v3416_v1, %v10191_v11  ;;  %v3431_v45 = vrot.slane %v3417_v17, %v10191_v11  ;;  %v16597_v44 = vld [vmem:[#allocation90_spill] sm:$0xff] }
 0x2da   : > { %v11516_v49 = vrot.slane %v3705_v7, %v10191_v11  ;;  %v1901_v6 = vpop.permute.xlu1 %1900  ;;  %v16562_v7 = vld [vmem:[#allocation69_spill] sm:$0xff] }
 0x2db   : > { %v3440_v62 = vrot.slane %v3432_v5, %v10191_v11  ;;  %v3447_v23 = vrot.slane %v3433_v54, %v10191_v11  ;;  %v1897_v28 = vpop.permute.xlu0 %1896  ;;  %v16558_v5 = vld [vmem:[#allocation68_spill] sm:$0xff] }
 0x2dc   : > { %v3768_v59 = vcombine.low %v11513_v39, %v11516_v49  ;;  %4518 = vrot.lane.b32.xlu1 %v3137_v43, %s10001_s13  ;;  %v11534_v54 = vsel %vm2199_vm0, %v16558_v5, %v1901_v6  ;;  %v2272_v43 = vsel %vm2199_vm0, %v16562_v7, %v1897_v28 }
 0x2dd   : > { %v3481_v24 = vcombine.high %v3424_v63, %v3440_v62  ;;  %v3496_v4 = vcombine.low %v3431_v45, %v3447_v23  ;;  %v3497_v34 = vcombine.high %v3431_v45, %v3447_v23  ;;  %4516 = vrot.lane.b32.xlu0 %v3001_v21, %s10001_s13  ;;  %16559 = vst [vmem:[#allocation62_spill] sm:$0xff] %v11534_v54  ;;  %v16563_v23 = vld [vmem:[#allocation73_spill] sm:$0xff] }
 0x2de   : > { %v1912_v1 = vpop.permute.xlu1 %1911  ;;  %v3480_v42 = vcombine.low %v3424_v63, %v3440_v62 }
 0x2df   : > { %v1908_v17 = vpop.permute.xlu0 %1907  ;;  %v11548_v6 = vsel %vm2199_vm0, %v16564_v20, %v1912_v1 }
 0x2e0   : > { %16565 = vst [vmem:[#allocation63_spill] sm:$0xff] %v11548_v6  ;;  %v2274_v28 = vsel %vm2199_vm0, %v16568_v52, %v1908_v17  ;;  %v11567_v62 = vrot.slane %v3480_v42, %v10210_v47 }
 0x2e2   : > { %v1923_v58 = vpop.permute.xlu1 %1922  ;;  %16570 = vst [vmem:[#allocation68_spill] sm:$0xff] %v11567_v62 }
 0x2e3   : > { %v11538_v48 = vsel %vm2199_vm0, %v16560_v60, %v1923_v58  ;;  %v1919_v41 = vpop.permute.xlu0 %1918 }
 0x2e4   : > { %16561 = vst [vmem:[#allocation66_spill] sm:$0xff] %v11538_v48  ;;  %v3721_v45 = vcombine.high %v11534_v54, %v11538_v48  ;;  %v2276_v21 = vsel %vm2199_vm0, %v16563_v23, %v1919_v41 }
 0x2e5   : > { %v3449_v27 = vcombine.high %v2272_v43, %v2276_v21  ;;  %v3448_v5 = vcombine.low %v2272_v43, %v2276_v21 }
 0x2e6   : > { %v1934_v55 = vpop.permute.xlu1 %1933  ;;  %v3735_v20 = vrot.slane %v3721_v45, %v10191_v11  ;;  %v11570_v45 = vrot.slane %v3481_v24, %v10210_v47  ;;  %v11588_v24 = vrot.slane %v3768_v59, %v10210_v47 }
 0x2e7   : > { %v11552_v60 = vsel %vm2199_vm0, %v16566_v18, %v1934_v55  ;;  %v1930_v58 = vpop.permute.xlu0 %1929  ;;  %v3456_v18 = vrot.slane %v3448_v5, %v10191_v11  ;;  %v3463_v55 = vrot.slane %v3449_v27, %v10191_v11  ;;  %v11573_v5 = vrot.slane %v3496_v4, %v10210_v47 }
 0x2e8   : > { %16567 = vst [vmem:[#allocation67_spill] sm:$0xff] %v11552_v60  ;;  %v3737_v7 = vcombine.high %v11548_v6, %v11552_v60  ;;  %v2278_v41 = vsel %vm2199_vm0, %v16569_v50, %v1930_v58  ;;  %16572 = vst [vmem:[#allocation69_spill] sm:$0xff] %v11588_v24  ;;  %v11591_v4 = vrot.slane %v3497_v34, %v10210_v47  ;;  %v16599_v6 = vld [vmem:[#allocation87_spill] sm:$0xff] }
 0x2e9   : > { %v3464_v23 = vcombine.low %v2274_v28, %v2278_v41  ;;  %v3465_v10 = vcombine.high %v2274_v28, %v2278_v41 }
 0x2ea   : > { %v3751_v1 = vrot.slane %v3737_v7, %v10191_v11  ;;  %v1945_v43 = vpop.permute.xlu1 %1944 }
 0x2eb   : > { %v3472_v52 = vrot.slane %v3464_v23, %v10191_v11  ;;  %v3479_v17 = vrot.slane %v3465_v10, %v10191_v11  ;;  %v1941_v21 = vpop.permute.xlu0 %1940 }
 0x2ec   : > { %v3800_v26 = vcombine.low %v3735_v20, %v3751_v1  ;;  %v3801_v54 = vcombine.high %v3735_v20, %v3751_v1 }
 0x2ed   : > { %v3512_v50 = vcombine.low %v3456_v18, %v3472_v52  ;;  %v3513_v58 = vcombine.high %v3456_v18, %v3472_v52  ;;  %v3528_v28 = vcombine.low %v3463_v55, %v3479_v17  ;;  %v3529_v63 = vcombine.high %v3463_v55, %v3479_v17 }
 0x2ee   : > { %v1956_v27 = vpop.permute.xlu1 %1955  ;;  %v11594_v20 = vrot.slane %v3800_v26, %v10210_v47  ;;  %v11597_v1 = vrot.slane %v3801_v54, %v10210_v47  ;;  %v16579_v26 = vld [vmem:[#allocation80_spill] sm:$0xff]  ;;  %v16581_v54 = vld [vmem:[#allocation77_spill] sm:$0xff] }
 0x2ef   : > { %v11576_v7 = vrot.slane %v3512_v50, %v10210_v47  ;;  %v11579_v10 = vrot.slane %v3513_v58, %v10210_v47  ;;  %v11582_v41 = vrot.slane %v3528_v28, %v10210_v47  ;;  %v11585_v23 = vrot.slane %v3529_v63, %v10210_v47  ;;  %v1952_v42 = vpop.permute.xlu0 %1951  ;;  %v16577_v63 = vld [vmem:[#allocation76_spill] sm:$0xff] }
 0x2f0   : > { %16573 = vst [vmem:[#allocation73_spill] sm:$0xff] %v11594_v20  ;;  %16574 = vst [vmem:[#allocation70_spill] sm:$0xff] %v11597_v1  ;;  %v16575_v58 = vcombine.high %v11513_v39, %v11516_v49  ;;  %v11623_v59 = vsel %vm2199_vm0, %v16577_v63, %v1945_v43  ;;  %v2280_v50 = vsel %vm2199_vm0, %v16581_v54, %v1941_v21  ;;  %v16582_v39 = vld [vmem:[#allocation81_spill] sm:$0xff]  ;;  %v16583_v54 = vld [vmem:[#allocation78_spill] sm:$0xff] }
 0x2f1   : > { %16571 = vst [vmem:[#allocation72_spill] sm:$0xff] %v11576_v7  ;;  %v3545_v18 = vcombine.high %v11567_v62, %v11576_v7  ;;  %16578 = vst [vmem:[#allocation71_spill] sm:$0xff] %v11623_v59  ;;  %v11646_v63 = vsel %vm2199_vm0, %v16583_v54, %v1956_v27  ;;  %v16587_v62 = vld [vmem:[#allocation79_spill] sm:$0xff] }
 0x2f2   : > { %v1967_v34 = vpop.permute.xlu1 %1966  ;;  %v11619_v28 = vrot.slane %v16575_v58, %v10210_v47  ;;  %16584 = vst [vmem:[#allocation76_spill] sm:$0xff] %v11646_v63  ;;  %v16588_v20 = vld [vmem:[#allocation83_spill] sm:$0xff] }
 0x2f3   : > { %v11627_v52 = vsel %vm2199_vm0, %v16579_v26, %v1967_v34  ;;  %4520 = vrot.lane.b32.xlu0 %v3545_v18, %s10001_s13  ;;  %v1963_v17 = vpop.permute.xlu0 %1962  ;;  %v2282_v34 = vsel %vm2199_vm0, %v16587_v62, %v1952_v42 }
 0x2f4   : > { %16576 = vst [vmem:[#allocation74_spill] sm:$0xff] %v11619_v28  ;;  %16580 = vst [vmem:[#allocation75_spill] sm:$0xff] %v11627_v52  ;;  %v3825_v55 = vcombine.high %v11623_v59, %v11627_v52  ;;  %v2284_v49 = vsel %vm2199_vm0, %v16582_v39, %v1963_v17  ;;  %v16585_v17 = vld [vmem:[#allocation82_spill] sm:$0xff] }
 0x2f5   : > { %v3553_v58 = vcombine.high %v2280_v50, %v2284_v49  ;;  %v3552_v7 = vcombine.low %v2280_v50, %v2284_v49 }
 0x2f6   : > { %v1978_v26 = vpop.permute.xlu1 %1977  ;;  %v11659_v27 = vrot.slane %v3825_v55, %v10191_v11 }
 0x2f7   : > { %v11650_v39 = vsel %vm2199_vm0, %v16585_v17, %v1978_v26  ;;  %v1974_v43 = vpop.permute.xlu0 %1973  ;;  %v3560_v26 = vrot.slane %v3552_v7, %v10191_v11  ;;  %v3567_v54 = vrot.slane %v3553_v58, %v10191_v11  ;;  %v16589_v7 = vld [vmem:[#allocation84_spill] sm:$0xff] }
 0x2f8   : > { %16586 = vst [vmem:[#allocation80_spill] sm:$0xff] %v11650_v39  ;;  %v3841_v18 = vcombine.high %v11646_v63, %v11650_v39  ;;  %v2286_v24 = vsel %vm2199_vm0, %v16588_v20, %v1974_v43  ;;  %v16593_v63 = vld [vmem:[#allocation85_spill] sm:$0xff] }
 0x2f9   : > { %v3568_v21 = vcombine.low %v2282_v34, %v2286_v24  ;;  %v3569_v1 = vcombine.high %v2282_v34, %v2286_v24 }
 0x2fa   : > { %v11662_v50 = vrot.slane %v3841_v18, %v10191_v11  ;;  %v1989_v49 = vpop.permute.xlu1 %1988 }
 0x2fb   : > { %v3576_v62 = vrot.slane %v3568_v21, %v10191_v11  ;;  %v3583_v42 = vrot.slane %v3569_v1, %v10191_v11  ;;  %v1985_v17 = vpop.permute.xlu0 %1984  ;;  %v11674_v58 = vsel %vm2199_vm0, %v16589_v7, %v1989_v49  ;;  %v16591_v21 = vld [vmem:[#allocation88_spill] sm:$0xff] }
 0x2fc   : > { %v3904_v20 = vcombine.low %v11659_v27, %v11662_v50  ;;  %v3905_v24 = vcombine.high %v11659_v27, %v11662_v50  ;;  %16590 = vst [vmem:[#allocation77_spill] sm:$0xff] %v11674_v58  ;;  %v2288_v39 = vsel %vm2199_vm0, %v16593_v63, %v1985_v17  ;;  %v16594_v50 = vld [vmem:[#allocation89_spill] sm:$0xff] }
 0x2fd   : > { %v3617_v55 = vcombine.high %v3560_v26, %v3576_v62  ;;  %v3632_v43 = vcombine.low %v3567_v54, %v3583_v42  ;;  %v3633_v34 = vcombine.high %v3567_v54, %v3583_v42  ;;  %v3616_v60 = vcombine.low %v3560_v26, %v3576_v62 }
 0x2fe   : > { %v2000_v18 = vpop.permute.xlu1 %1999 }
 0x2ff   : > { %v1996_v28 = vpop.permute.xlu0 %1995  ;;  %v11688_v49 = vsel %vm2199_vm0, %v16595_v8, %v2000_v18  ;;  %v11707_v62 = vrot.slane %v3616_v60, %v10210_v47 }
 0x300   : > { %16596 = vst [vmem:[#allocation78_spill] sm:$0xff] %v11688_v49  ;;  %v2290_v63 = vsel %vm2199_vm0, %v16599_v6, %v1996_v28 }
 0x301   : > { %16601 = vst [vmem:[#allocation79_spill] sm:$0xff] %v11707_v62 }
 0x302   : > { %v2011_v59 = vpop.permute.xlu1 %2010 }
 0x303   : > { %v11678_v1 = vsel %vm2199_vm0, %v16591_v21, %v2011_v59  ;;  %v2007_v52 = vpop.permute.xlu0 %2006 }
 0x304   : > { %16592 = vst [vmem:[#allocation81_spill] sm:$0xff] %v11678_v1  ;;  %v3857_v27 = vcombine.high %v11674_v58, %v11678_v1  ;;  %v2292_v54 = vsel %vm2199_vm0, %v16594_v50, %v2007_v52  ;;  %v16600_v58 = vld [vmem:[#allocation91_spill] sm:$0xff] }
 0x305   : > { %v3585_v42 = vcombine.high %v2288_v39, %v2292_v54  ;;  %v3584_v7 = vcombine.low %v2288_v39, %v2292_v54 }
 0x306   : > { %v2022_v48 = vpop.permute.xlu1 %2021  ;;  %v3871_v8 = vrot.slane %v3857_v27, %v10191_v11  ;;  %v11710_v27 = vrot.slane %v3617_v55, %v10210_v47  ;;  %v11728_v55 = vrot.slane %v3904_v20, %v10210_v47  ;;  %v16613_v20 = vld [vmem:[#allocation96_spill] sm:$0xff] }
 0x307   : > { %v11692_v59 = vsel %vm2199_vm0, %v16597_v44, %v2022_v48  ;;  %v2018_v21 = vpop.permute.xlu0 %2017  ;;  %v3592_v48 = vrot.slane %v3584_v7, %v10191_v11  ;;  %v3599_v44 = vrot.slane %v3585_v42, %v10191_v11  ;;  %v11713_v7 = vrot.slane %v3632_v43, %v10210_v47 }
 0x308   : > { %16598 = vst [vmem:[#allocation82_spill] sm:$0xff] %v11692_v59  ;;  %v3873_v17 = vcombine.high %v11688_v49, %v11692_v59  ;;  %v2294_v52 = vsel %vm2199_vm0, %v16600_v58, %v2018_v21  ;;  %16606 = vst [vmem:[#allocation89_spill] sm:$0xff] %v11728_v55  ;;  %v11731_v43 = vrot.slane %v3633_v34, %v10210_v47 }
 0x309   : > { %v3600_v50 = vcombine.low %v2290_v63, %v2294_v52  ;;  %v3601_v1 = vcombine.high %v2290_v63, %v2294_v52  ;;  %16602 = vst [vmem:[#allocation83_spill] sm:$0xff] %v11713_v7  ;;  %v16662_v7 = vld [vmem:[#allocation118_spill] sm:$0xff] }
 0x30a   : > { %v3887_v39 = vrot.slane %v3873_v17, %v10191_v11  ;;  %v2033_v18 = vpop.permute.xlu1 %2032  ;;  %16607 = vst [vmem:[#allocation86_spill] sm:$0xff] %v11731_v43 }
 0x30b   : > { %v3608_v6 = vrot.slane %v3600_v50, %v10191_v11  ;;  %v3615_v28 = vrot.slane %v3601_v1, %v10191_v11  ;;  %v2029_v54 = vpop.permute.xlu0 %2028 }
 0x30c   : > { %v3936_v49 = vcombine.low %v3871_v8, %v3887_v39  ;;  %v3937_v59 = vcombine.high %v3871_v8, %v3887_v39 }
 0x30d   : > { %v3648_v58 = vcombine.low %v3592_v48, %v3608_v6  ;;  %v3649_v21 = vcombine.high %v3592_v48, %v3608_v6  ;;  %v3664_v63 = vcombine.low %v3599_v44, %v3615_v28  ;;  %v3665_v26 = vcombine.high %v3599_v44, %v3615_v28 }
 0x30e   : > { %v2044_v42 = vpop.permute.xlu1 %2043  ;;  %v11734_v8 = vrot.slane %v3936_v49, %v10210_v47  ;;  %v11737_v39 = vrot.slane %v3937_v59, %v10210_v47  ;;  %v16617_v59 = vld [vmem:[#allocation98_spill] sm:$0xff] }
 0x30f   : > { %v11716_v17 = vrot.slane %v3648_v58, %v10210_v47  ;;  %v11719_v1 = vrot.slane %v3649_v21, %v10210_v47  ;;  %v11722_v52 = vrot.slane %v3664_v63, %v10210_v47  ;;  %v11725_v50 = vrot.slane %v3665_v26, %v10210_v47  ;;  %v2040_v60 = vpop.permute.xlu0 %2039  ;;  %v16611_v63 = vld [vmem:[#allocation92_spill] sm:$0xff] }
 0x310   : > { %16608 = vst [vmem:[#allocation90_spill] sm:$0xff] %v11734_v8  ;;  %16609 = vst [vmem:[#allocation87_spill] sm:$0xff] %v11737_v39  ;;  %v11756_v21 = vrot.slane %v3905_v24, %v10210_v47  ;;  %v11760_v26 = vsel %vm2199_vm0, %v16611_v63, %v2033_v18 }
 0x311   : > { %16603 = vst [vmem:[#allocation84_spill] sm:$0xff] %v11716_v17  ;;  %16604 = vst [vmem:[#allocation88_spill] sm:$0xff] %v11722_v52  ;;  %v3681_v48 = vcombine.high %v11707_v62, %v11716_v17 }
 0x312   : > { %16605 = vst [vmem:[#allocation85_spill] sm:$0xff] %v11725_v50  ;;  %v2055_v34 = vpop.permute.xlu1 %2054  ;;  %16610 = vst [vmem:[#allocation91_spill] sm:$0xff] %v11756_v21  ;;  %v16621_v50 = vld [vmem:[#allocation97_spill] sm:$0xff] }
 0x313   : > { %16612 = vst [vmem:[#allocation92_spill] sm:$0xff] %v11760_v26  ;;  %v11764_v6 = vsel %vm2199_vm0, %v16613_v20, %v2055_v34  ;;  %4522 = vrot.lane.b32.xlu1 %v3681_v48, %s10001_s13  ;;  %v2051_v49 = vpop.permute.xlu0 %2050  ;;  %v16615_v34 = vld [vmem:[#allocation94_spill] sm:$0xff] }
 0x314   : > { %16614 = vst [vmem:[#allocation96_spill] sm:$0xff] %v11764_v6  ;;  %v4233_v28 = vcombine.high %v11760_v26, %v11764_v6  ;;  %v11779_v48 = vsel %vm2199_vm0, %v16615_v34, %v2044_v42  ;;  %v16619_v42 = vld [vmem:[#allocation99_spill] sm:$0xff]  ;;  %v11799_v43 = vsel %vm2199_vm0, %v16621_v50, %v2051_v49  ;;  %v16622_v26 = vld [vmem:[#allocation100_spill] sm:$0xff]  ;;  %v16626_v6 = vld [vmem:[#allocation93_spill] sm:$0xff] }
 0x315   : > { %16616 = vst [vmem:[#allocation94_spill] sm:$0xff] %v11779_v48  ;;  %v16627_v49 = vld [vmem:[#allocation105_spill] sm:$0xff] }
 0x316   : > { %v2066_v63 = vpop.permute.xlu1 %2065  ;;  %v4247_v24 = vrot.slane %v4233_v28, %v10191_v11 }
 0x317   : > { %v11783_v44 = vsel %vm2199_vm0, %v16617_v59, %v2066_v63  ;;  %v2062_v17 = vpop.permute.xlu0 %2061  ;;  %v16620_v59 = vld [vmem:[#allocation95_spill] sm:$0xff] }
 0x318   : > { %16618 = vst [vmem:[#allocation98_spill] sm:$0xff] %v11783_v44  ;;  %v4249_v58 = vcombine.high %v11779_v48, %v11783_v44  ;;  %v11791_v34 = vsel %vm2199_vm0, %v16619_v42, %v2062_v17  ;;  %v11795_v63 = vsel %vm2199_vm0, %v16620_v59, %v2040_v60  ;;  %v11813_v60 = vsel %vm2199_vm0, %v16626_v6, %v2029_v54  ;;  %v16629_v44 = vld [vmem:[#allocation102_spill] sm:$0xff] }
 0x31a   : > { %v4263_v18 = vrot.slane %v4249_v58, %v10191_v11  ;;  %v2077_v62 = vpop.permute.xlu1 %2076  ;;  %v3976_v58 = vcombine.low %v11795_v63, %v11791_v34 }
 0x31b   : > { %v2073_v8 = vpop.permute.xlu0 %2072 }
 0x31c   : > { %v4312_v55 = vcombine.low %v4247_v24, %v4263_v18  ;;  %v4313_v20 = vcombine.high %v4247_v24, %v4263_v18  ;;  %v11805_v24 = vsel %vm2199_vm0, %v16622_v26, %v2077_v62  ;;  %v16624_v18 = vld [vmem:[#allocation104_spill] sm:$0xff]  ;;  %v3960_v62 = vcombine.low %v11813_v60, %v11799_v43  ;;  %v16628_v26 = vld [vmem:[#allocation101_spill] sm:$0xff] }
 0x31d   : > { %16623 = vst [vmem:[#allocation99_spill] sm:$0xff] %v11805_v24  ;;  %v11825_v48 = vsel %vm2199_vm0, %v16628_v26, %v2073_v8 }
 0x31e   : > { %v2088_v39 = vpop.permute.xlu1 %2087 }
 0x31f   : > { %v2084_v21 = vpop.permute.xlu0 %2083  ;;  %v11830_v54 = vsel %vm2199_vm0, %v16629_v44, %v2088_v39  ;;  %v3968_v39 = vrot.slane %v3960_v62, %v10191_v11 }
 0x320   : > { %16630 = vst [vmem:[#allocation97_spill] sm:$0xff] %v11830_v54 }
 0x322   : > { %v2099_v28 = vpop.permute.xlu1 %2098 }
 0x323   : > { %v11809_v17 = vsel %vm2199_vm0, %v16624_v18, %v2099_v28  ;;  %v2095_v42 = vpop.permute.xlu0 %2094  ;;  %v3984_v18 = vrot.slane %v3976_v58, %v10191_v11  ;;  %v16634_v58 = vld [vmem:[#allocation107_spill] sm:$0xff] }
 0x324   : > { %16625 = vst [vmem:[#allocation95_spill] sm:$0xff] %v11809_v17  ;;  %v4265_v50 = vcombine.high %v11805_v24, %v11809_v17  ;;  %v11819_v59 = vsel %vm2199_vm0, %v16627_v49, %v2095_v42  ;;  %v16631_v24 = vld [vmem:[#allocation106_spill] sm:$0xff]  ;;  %v16633_v17 = vld [vmem:[#allocation103_spill] sm:$0xff] }
 0x325   : > { %v3992_v6 = vcombine.low %v11825_v48, %v11819_v59  ;;  %v11840_v40 = vsel %vm2199_vm0, %v16633_v17, %v2084_v21  ;;  %v4024_v46 = vcombine.low %v3968_v39, %v3984_v18 }
 0x326   : > { %v2110_v28 = vpop.permute.xlu1 %2109 }
 0x327   : > { %v11836_v42 = vsel %vm2199_vm0, %v16631_v24, %v2110_v28  ;;  %v2106_v49 = vpop.permute.xlu0 %2105  ;;  %v4279_v24 = vrot.slane %v4265_v50, %v10191_v11  ;;  %v4000_v21 = vrot.slane %v3992_v6, %v10191_v11  ;;  %v11856_v62 = vrot.slane %v4024_v46, %v10210_v47 }
 0x328   : > { %16632 = vst [vmem:[#allocation100_spill] sm:$0xff] %v11836_v42  ;;  %v4281_v8 = vcombine.high %v11830_v54, %v11836_v42  ;;  %v11846_v26 = vsel %vm2199_vm0, %v16634_v58, %v2106_v49 }
 0x329   : > { %v4008_v44 = vcombine.low %v11840_v40, %v11846_v26  ;;  %16635 = vst [vmem:[#allocation104_spill] sm:$0xff] %v11856_v62 }
 0x32a   : > { %v4295_v28 = vrot.slane %v4281_v8, %v10191_v11  ;;  %v2121_v51 = vpop.permute.xlu1 %2120 }
 0x32b   : > { %v4016_v17 = vrot.slane %v4008_v44, %v10191_v11  ;;  %v2117_v54 = vpop.permute.xlu0 %2116  ;;  %v11870_v44 = vrot.slane %v4312_v55, %v10210_v47 }
 0x32c   : > { %v4344_v42 = vcombine.low %v4279_v24, %v4295_v28  ;;  %v4345_v3 = vcombine.high %v4279_v24, %v4295_v28  ;;  %v11875_v28 = vrot.slane %v4313_v20, %v10210_v47  ;;  %v16649_v20 = vcombine.low %v10928_v14, %v10936_v57 }
 0x32d   : > { %v4056_v49 = vcombine.low %v4000_v21, %v4016_v17  ;;  %16639 = vst [vmem:[#allocation102_spill] sm:$0xff] %v11870_v44 }
 0x32e   : > { %v2132_v58 = vpop.permute.xlu1 %2131  ;;  %v11862_v8 = vrot.slane %v4344_v42, %v10210_v47  ;;  %v11865_v0 = vrot.slane %v4345_v3, %v10210_v47  ;;  %16640 = vst [vmem:[#allocation106_spill] sm:$0xff] %v11875_v28 }
 0x32f   : > { %v11859_v19 = vrot.slane %v4056_v49, %v10210_v47  ;;  %v2128_v50 = vpop.permute.xlu0 %2127  ;;  %v16641_v49 = vld [vmem:[#allocation108_spill] sm:$0xff] }
 0x330   : > { %16637 = vst [vmem:[#allocation105_spill] sm:$0xff] %v11862_v8  ;;  %16638 = vst [vmem:[#allocation101_spill] sm:$0xff] %v11865_v0  ;;  %v11879_v42 = vsel %vm2199_vm0, %v16641_v49, %v2121_v51  ;;  %v4057_v8 = vcombine.high %v4000_v21, %v4016_v17  ;;  %v4025_v0 = vcombine.high %v3968_v39, %v3984_v18  ;;  %v16652_v18 = vld [vmem:[#allocation115_spill] sm:$0xff] }
 0x331   : > { %16636 = vst [vmem:[#allocation93_spill] sm:$0xff] %v11859_v19  ;;  %v4089_v6 = vcombine.high %v11856_v62, %v11859_v19  ;;  %16642 = vst [vmem:[#allocation103_spill] sm:$0xff] %v11879_v42  ;;  %v16647_v19 = vld [vmem:[#allocation114_spill] sm:$0xff]  ;;  %v16651_v21 = vcombine.low %v11570_v45, %v11579_v10 }
 0x332   : > { %v2143_v24 = vpop.permute.xlu1 %2142 }
 0x333   : > { %v11883_v3 = vsel %vm2199_vm0, %v16643_v35, %v2143_v24  ;;  %4524 = vrot.lane.b32.xlu0 %v4089_v6, %s10001_s13  ;;  %v2139_v12 = vpop.permute.xlu0 %2138  ;;  %v16645_v24 = vld [vmem:[#allocation110_spill] sm:$0xff] }
 0x334   : > { %16644 = vst [vmem:[#allocation107_spill] sm:$0xff] %v11883_v3  ;;  %v4369_v55 = vcombine.high %v11879_v42, %v11883_v3  ;;  %v11898_v6 = vsel %vm2199_vm0, %v16645_v24, %v2132_v58  ;;  %v4039_v3 = vrot.slane %v4025_v0, %v10210_v47 }
 0x335   : > { %16646 = vst [vmem:[#allocation108_spill] sm:$0xff] %v11898_v6 }
 0x336   : > { %v2154_v49 = vpop.permute.xlu1 %2153  ;;  %v4383_v35 = vrot.slane %v4369_v55, %v10191_v11 }
 0x337   : > { %v11902_v62 = vsel %vm2199_vm0, %v16647_v19, %v2154_v49  ;;  %4544 = vrot.lane.b32.xlu0 %v16649_v20, %s10002_s15  ;;  %v2150_v46 = vpop.permute.xlu0 %2149  ;;  %v16650_v19 = vcombine.low %v11258_v53, %v11266_v29  ;;  %v4071_v20 = vrot.slane %v4057_v8, %v10210_v47 }
 0x338   : > { %16648 = vst [vmem:[#allocation112_spill] sm:$0xff] %v11902_v62  ;;  %v4385_v51 = vcombine.high %v11898_v6, %v11902_v62  ;;  %v11924_v39 = vsel %vm2199_vm0, %v16652_v18, %v2150_v46  ;;  %v16655_v6 = vld [vmem:[#allocation116_spill] sm:$0xff]  ;;  %v16659_v18 = vld [vmem:[#allocation109_spill] sm:$0xff] }
 0x339   : > { %v4090_v55 = vcombine.low %v4039_v3, %v4071_v20  ;;  %v16657_v62 = vld [vmem:[#allocation120_spill] sm:$0xff] }
 0x33a   : > { %v4399_v58 = vrot.slane %v4385_v51, %v10191_v11  ;;  %v2165_v24 = vpop.permute.xlu1 %2164  ;;  %v16653_v51 = vld [vmem:[#allocation111_spill] sm:$0xff] }
 0x33b   : > { %4548 = vrot.lane.b32.xlu0 %v16650_v19, %s10002_s15  ;;  %v2161_v49 = vpop.permute.xlu0 %2160  ;;  %v11928_v19 = vsel %vm2199_vm0, %v16653_v51, %v2128_v50  ;;  %v11947_v51 = vsel %vm2199_vm0, %v16659_v18, %v2117_v54 }
 0x33c   : > { %v4448_v28 = vcombine.low %v4383_v35, %v4399_v58  ;;  %v4449_v44 = vcombine.high %v4383_v35, %v4399_v58  ;;  %v16654_v35 = vld [vmem:[#allocation113_spill] sm:$0xff]  ;;  %v4112_v58 = vcombine.low %v11928_v19, %v11924_v39 }
 0x33d   : > { %v11932_v8 = vsel %vm2199_vm0, %v16654_v35, %v2139_v12  ;;  %v16660_v35 = vld [vmem:[#allocation121_spill] sm:$0xff] }
 0x33e   : > { %v2176_v42 = vpop.permute.xlu1 %2175 }
 0x33f   : > { %4552 = vrot.lane.b32.xlu0 %v16651_v21, %s10002_s15  ;;  %v2172_v17 = vpop.permute.xlu0 %2171  ;;  %v11938_v21 = vsel %vm2199_vm0, %v16655_v6, %v2165_v24  ;;  %v4096_v6 = vcombine.low %v11947_v51, %v11932_v8  ;;  %v16661_v24 = vld [vmem:[#allocation117_spill] sm:$0xff]  ;;  %v11964_v54 = vsel %vm2199_vm0, %v16662_v7, %v2176_v42  ;;  %v16668_v42 = vld [vmem:[#allocation123_spill] sm:$0xff] }
 0x340   : > { %16656 = vst [vmem:[#allocation110_spill] sm:$0xff] %v11938_v21  ;;  %16663 = vst [vmem:[#allocation115_spill] sm:$0xff] %v11964_v54 }
 0x342   : > { %v2187_v0 = vpop.permute.xlu1 %2186 }
 0x343   : > { %v11942_v46 = vsel %vm2199_vm0, %v16657_v62, %v2187_v0  ;;  %4556 = vrot.lane.b32.xlu0 %v4090_v55, %s10002_s15  ;;  %v2183_v50 = vpop.permute.xlu0 %2182  ;;  %v11959_v62 = vsel %vm2199_vm0, %v16661_v24, %v2161_v49  ;;  %v4120_v0 = vrot.slane %v4112_v58, %v10191_v11  ;;  %v16666_v49 = vcombine.high %v10928_v14, %v10936_v57  ;;  %v16667_v24 = vld [vmem:[#allocation119_spill] sm:$0xff] }
 0x344   : > { %16658 = vst [vmem:[#allocation114_spill] sm:$0xff] %v11942_v46  ;;  %v4401_v12 = vcombine.high %v11938_v21, %v11942_v46  ;;  %v11953_v52 = vsel %vm2199_vm0, %v16660_v35, %v2183_v50  ;;  %v16664_v21 = vld [vmem:[#allocation122_spill] sm:$0xff]  ;;  %v11978_v58 = vsel %vm2199_vm0, %v16667_v24, %v2172_v17 }
 0x345   : > { %v4128_v18 = vcombine.low %v11959_v62, %v11953_v52 }
 0x346   : > { %v2198_v55 = vpop.permute.xlu1 %2197  ;;  %v4415_v14 = vrot.slane %v4401_v12, %v10191_v11 }
 0x347   : > { %v11970_v50 = vsel %vm2199_vm0, %v16664_v21, %v2198_v55  ;;  %4576 = vrot.lane.b32.xlu0 %v16666_v49, %s10003_s16  ;;  %v2194_v35 = vpop.permute.xlu0 %2193  ;;  %v4104_v21 = vrot.slane %v4096_v6, %v10191_v11  ;;  %v4136_v17 = vrot.slane %v4128_v18, %v10191_v11  ;;  %v16672_v18 = vcombine.high %v11570_v45, %v11579_v10 }
 0x348   : > { %16665 = vst [vmem:[#allocation111_spill] sm:$0xff] %v11970_v50  ;;  %v4417_v7 = vcombine.high %v11964_v54, %v11970_v50  ;;  %v11984_v46 = vsel %vm2199_vm0, %v16668_v42, %v2194_v35  ;;  %v16669_v54 = vcombine.high %v11258_v53, %v11266_v29  ;;  %v4009_v29 = vcombine.high %v11840_v40, %v11846_v26  ;;  %v16848_v40 = vld [vmem:[#allocation90_spill] sm:$0xff] }
 0x349   : > { %v4144_v55 = vcombine.low %v11978_v58, %v11984_v46  ;;  %v4160_v49 = vcombine.low %v4104_v21, %v4120_v0  ;;  %v3977_v10 = vcombine.high %v11795_v63, %v11791_v34  ;;  %v3961_v34 = vcombine.high %v11813_v60, %v11799_v43 }
 0x34a   : > { %v4431_v57 = vrot.slane %v4417_v7, %v10191_v11 }
 0x34b   : > { %v4152_v24 = vrot.slane %v4144_v55, %v10191_v11  ;;  %4580 = vrot.lane.b32.xlu0 %v16669_v54, %s10003_s16  ;;  %v11998_v50 = vrot.slane %v4160_v49, %v10210_v47  ;;  %v4091_v54 = vcombine.high %v4039_v3, %v4071_v20  ;;  %v3993_v49 = vcombine.high %v11825_v48, %v11819_v59 }
 0x34c   : > { %v4480_v35 = vcombine.low %v4415_v14, %v4431_v57  ;;  %v4481_v42 = vcombine.high %v4415_v14, %v4431_v57  ;;  %v12018_v14 = vrot.slane %v4448_v28, %v10210_v47  ;;  %v12021_v57 = vrot.slane %v4449_v44, %v10210_v47 }
 0x34d   : > { %v4192_v6 = vcombine.low %v4136_v17, %v4152_v24  ;;  %16670 = vst [vmem:[#allocation113_spill] sm:$0xff] %v11998_v50  ;;  %v4023_v48 = vrot.slane %v4009_v29, %v10191_v11  ;;  %v3991_v63 = vrot.slane %v3977_v10, %v10191_v11  ;;  %v4007_v59 = vrot.slane %v3993_v49, %v10191_v11 }
 0x34e   : > { %v12008_v7 = vrot.slane %v4480_v35, %v10210_v47  ;;  %v12011_v53 = vrot.slane %v4481_v42, %v10210_v47  ;;  %v16673_v3 = vcombine.low %v10951_v36, %v10939_v15  ;;  %v16674_v20 = vcombine.low %v11093_v25, %v11101_v38 }
 0x34f   : > { %v12001_v12 = vrot.slane %v4192_v6, %v10210_v47  ;;  %4584 = vrot.lane.b32.xlu0 %v16672_v18, %s10003_s16  ;;  %v3975_v35 = vrot.slane %v3961_v34, %v10191_v11  ;;  %v4072_v43 = vcombine.low %v4007_v59, %v4023_v48  ;;  %v4193_v60 = vcombine.high %v4136_v17, %v4152_v24 }
 0x350   : > { %v4161_v6 = vcombine.high %v4104_v21, %v4120_v0  ;;  %v16675_v18 = vcombine.low %v11281_v33, %v11269_v31  ;;  %v16676_v29 = vcombine.low %v11414_v37, %v11422_v9  ;;  %v16677_v0 = vcombine.low %v11573_v5, %v11582_v41 }
 0x351   : > { %16671 = vst [vmem:[#allocation116_spill] sm:$0xff] %v12001_v12  ;;  %v4225_v55 = vcombine.high %v11998_v50, %v12001_v12  ;;  %v4040_v42 = vcombine.low %v3975_v35, %v3991_v63  ;;  %v16678_v21 = vcombine.low %v11710_v27, %v11719_v1  ;;  %v16679_v34 = vcombine.high %v10951_v36, %v10939_v15 }
 0x352   : > { %v4175_v17 = vrot.slane %v4161_v6, %v10210_v47  ;;  %v16683_v15 = vcombine.high %v11573_v5, %v11582_v41  ;;  %v16684_v36 = vcombine.high %v11710_v27, %v11719_v1  ;;  %v16685_v1 = vcombine.low %v10954_v2, %v10942_v30  ;;  %v16691_v6 = vld [vmem:[#allocation88_spill] sm:$0xff] }
 0x353   : > { %4588 = vrot.lane.b32.xlu0 %v4091_v54, %s10003_s16  ;;  %4526 = vrot.lane.b32.xlu1 %v4225_v55, %s10001_s13  ;;  %v4080_v54 = vrot.slane %v4072_v43, %v10210_v47  ;;  %v4207_v55 = vrot.slane %v4193_v60, %v10210_v47  ;;  %v4048_v10 = vrot.slane %v4040_v42, %v10210_v47  ;;  %v16690_v42 = vld [vmem:[#allocation83_spill] sm:$0xff] }
 0x354   : > { %v16682_v43 = vcombine.high %v11414_v37, %v11422_v9  ;;  %v4129_v37 = vcombine.high %v11959_v62, %v11953_v52  ;;  %v4097_v9 = vcombine.high %v11947_v51, %v11932_v8  ;;  %v16686_v52 = vcombine.low %v11116_v32, %v11104_v16 }
 0x355   : > { %v4092_v24 = vcombine.low %v4048_v10, %v4080_v54  ;;  %v4226_v49 = vcombine.low %v4175_v17, %v4207_v55  ;;  %v16687_v62 = vcombine.low %v11284_v22, %v11272_v61 }
 0x356   : > { %v12116_v27 = vrot.slane %v4129_v37, %v10191_v11 }
 0x357   : > { %4608 = vrot.lane.b32.xlu0 %v16673_v3, %s10004_s17  ;;  %4546 = vrot.lane.b32.xlu1 %v16674_v20, %s10002_s15  ;;  %v16680_v3 = vcombine.high %v11093_v25, %v11101_v38  ;;  %v16681_v20 = vcombine.high %v11281_v33, %v11269_v31  ;;  %v4145_v25 = vcombine.high %v11978_v58, %v11984_v46 }
 0x358   : > { %v4093_v38 = vcombine.high %v4048_v10, %v4080_v54  ;;  %v4227_v31 = vcombine.high %v4175_v17, %v4207_v55  ;;  %v4113_v33 = vcombine.high %v11928_v19, %v11924_v39  ;;  %v4073_v39 = vcombine.high %v4007_v59, %v4023_v48  ;;  %v16693_v55 = vld [vmem:[#allocation131_spill] sm:$0xff]  ;;  %v16694_v10 = vld [vmem:[#allocation130_spill] sm:$0xff] }
 0x359   : > { %v12110_v5 = vrot.slane %v4145_v25, %v10191_v11  ;;  %v12127_v19 = vrot.slane %v4097_v9, %v10191_v11  ;;  %v4041_v46 = vcombine.high %v3975_v35, %v3991_v63  ;;  %v16688_v58 = vcombine.low %v11431_v56, %v11425_v13 }
 0x35a   : > { %v12113_v41 = vrot.slane %v4113_v33, %v10191_v11  ;;  %v4087_v48 = vrot.slane %v4073_v39, %v10210_v47  ;;  %v16689_v35 = vcombine.low %v11591_v4, %v11585_v23  ;;  %v2648_v17 = vcombine.low %v16694_v10, %v16693_v55  ;;  %v16704_v33 = vld [vmem:[#allocation37_spill] sm:$0xff] }
 0x35b   : > { %4612 = vrot.lane.b32.xlu0 %v16675_v18, %s10004_s17  ;;  %4550 = vrot.lane.b32.xlu1 %v16676_v29, %s10002_s15  ;;  %v4208_v8 = vcombine.low %v12116_v27, %v12110_v5  ;;  %v4055_v60 = vrot.slane %v4041_v46, %v10210_v47  ;;  %v16692_v18 = vcombine.low %v16690_v42, %v16691_v6  ;;  %v16715_v10 = vld [vmem:[#allocation65_spill] sm:$0xff] }
 0x35c   : > { %v4176_v51 = vcombine.low %v12127_v19, %v12113_v41  ;;  %v16710_v46 = vcombine.high %v11431_v56, %v11425_v13 }
 0x35d   : > { %v4216_v59 = vrot.slane %v4208_v8, %v10210_v47  ;;  %v4094_v29 = vcombine.low %v4055_v60, %v4087_v48  ;;  %v16709_v8 = vcombine.high %v11284_v22, %v11272_v61  ;;  %v16714_v61 = vld [vmem:[#allocation63_spill] sm:$0xff] }
 0x35e   : > { %v4184_v63 = vrot.slane %v4176_v51, %v10210_v47 }
 0x35f   : > { %4616 = vrot.lane.b32.xlu0 %v16677_v0, %s10004_s17  ;;  %4554 = vrot.lane.b32.xlu1 %v16678_v21, %s10002_s15  ;;  %v16695_v0 = vld [vmem:[#allocation127_spill] sm:$0xff]  ;;  %v16696_v21 = vld [vmem:[#allocation126_spill] sm:$0xff] }
 0x360   : > { %v4228_v54 = vcombine.low %v4184_v63, %v4216_v59 }
 0x363   : > { %4620 = vrot.lane.b32.xlu0 %v4092_v24, %s10004_s17  ;;  %4558 = vrot.lane.b32.xlu1 %v4226_v49, %s10002_s15  ;;  %v2616_v24 = vcombine.low %v16696_v21, %v16695_v0  ;;  %v16697_v49 = vld [vmem:[#allocation129_spill] sm:$0xff]  ;;  %v16717_v21 = vld [vmem:[#allocation66_spill] sm:$0xff] }
 0x365   : > { %v12177_v9 = vrot.slane %v2616_v24, %v10191_v11  ;;  %v16718_v24 = vld [vmem:[#allocation62_spill] sm:$0xff] }
 0x367   : > { %4640 = vrot.lane.b32.xlu0 %v16679_v34, %s10005_s22  ;;  %4578 = vrot.lane.b32.xlu1 %v16680_v3, %s10003_s16  ;;  %v16698_v34 = vld [vmem:[#allocation128_spill] sm:$0xff] }
 0x368   : > { %v2632_v3 = vcombine.low %v16698_v34, %v16697_v49  ;;  %v3720_v49 = vcombine.low %v16718_v24, %v16717_v21  ;;  %v16719_v34 = vcombine.high %v11591_v4, %v11585_v23  ;;  %v16723_v23 = vld [vmem:[#allocation100_spill] sm:$0xff]  ;;  %v16724_v4 = vld [vmem:[#allocation97_spill] sm:$0xff]  ;;  %v16732_v21 = vld [vmem:[#allocation151_spill] sm:$0xff] }
 0x369   : > { %v16733_v24 = vld [vmem:[#allocation149_spill] sm:$0xff] }
 0x36b   : > { %4644 = vrot.lane.b32.xlu0 %v16681_v20, %s10005_s22  ;;  %4582 = vrot.lane.b32.xlu1 %v16682_v43, %s10003_s16  ;;  %v16699_v20 = vcombine.high %v10954_v2, %v10942_v30  ;;  %v16700_v43 = vcombine.high %v11116_v32, %v11104_v16  ;;  %v12180_v30 = vrot.slane %v2632_v3, %v10191_v11  ;;  %v16705_v2 = vld [vmem:[#allocation11_spill] sm:$0xff]  ;;  %v16707_v16 = vld [vmem:[#allocation36_spill] sm:$0xff] }
 0x36c   : > { %v16708_v32 = vld [vmem:[#allocation35_spill] sm:$0xff]  ;;  %v16720_v3 = vcombine.high %v16690_v42, %v16691_v6  ;;  %v4229_v42 = vcombine.high %v4184_v63, %v4216_v59 }
 0x36d   : > { %v3176_v39 = vcombine.low %v16708_v32, %v16707_v16  ;;  %v12246_v16 = vrot.slane %v3720_v49, %v10191_v11  ;;  %v16725_v32 = vld [vmem:[#allocation98_spill] sm:$0xff]  ;;  %v16734_v49 = vcombine.low %v16732_v21, %v16733_v24 }
 0x36f   : > { %4648 = vrot.lane.b32.xlu0 %v16683_v15, %s10005_s22  ;;  %4586 = vrot.lane.b32.xlu1 %v16684_v36, %s10003_s16  ;;  %v16701_v15 = vld [vmem:[#allocation125_spill] sm:$0xff]  ;;  %v16702_v36 = vld [vmem:[#allocation124_spill] sm:$0xff]  ;;  %v12212_v56 = vrot.slane %v3176_v39, %v10191_v11  ;;  %v16726_v39 = vld [vmem:[#allocation94_spill] sm:$0xff] }
 0x370   : > { %v2600_v25 = vcombine.low %v16702_v36, %v16701_v15  ;;  %v16721_v36 = vld [vmem:[#allocation60_spill] sm:$0xff] }
 0x372   : > { %v12195_v51 = vrot.slane %v2600_v25, %v10191_v11  ;;  %v16722_v25 = vld [vmem:[#allocation59_spill] sm:$0xff] }
 0x373   : > { %4652 = vrot.lane.b32.xlu0 %v4093_v38, %s10005_s22  ;;  %4590 = vrot.lane.b32.xlu1 %v4227_v31, %s10003_s16  ;;  %v12172_v38 = vrot.slane %v2648_v17, %v10191_v11  ;;  %v16703_v31 = vld [vmem:[#allocation38_spill] sm:$0xff]  ;;  %v16716_v17 = vld [vmem:[#allocation61_spill] sm:$0xff] }
 0x374   : > { %v3192_v37 = vcombine.low %v16704_v33, %v16703_v31  ;;  %v2664_v55 = vcombine.low %v12195_v51, %v12177_v9  ;;  %v3704_v0 = vcombine.low %v16716_v17, %v16715_v10  ;;  %v3688_v31 = vcombine.low %v16722_v25, %v16721_v36 }
 0x375   : > { %v4209_v25 = vcombine.high %v12116_v27, %v12110_v5 }
 0x376   : > { %v2672_v6 = vrot.slane %v2664_v55, %v10210_v47 }
 0x377   : > { %4672 = vrot.lane.b32.xlu0 %v16685_v1, %s10006_s23  ;;  %4610 = vrot.lane.b32.xlu1 %v16686_v52, %s10004_s17  ;;  %v16706_v1 = vld [vmem:[#allocation34_spill] sm:$0xff]  ;;  %v12303_v5 = vrot.slane %v4209_v25, %v10210_v47  ;;  %v16748_v25 = vld [vmem:[#allocation141_spill] sm:$0xff] }
 0x378   : > { %v3160_v52 = vcombine.low %v16706_v1, %v16705_v2  ;;  %v4095_v2 = vcombine.high %v4055_v60, %v4087_v48  ;;  %v12256_v60 = vrot.slane %v3688_v31, %v10191_v11 }
 0x37a   : > { %v12209_v13 = vrot.slane %v3160_v52, %v10191_v11  ;;  %v12243_v52 = vrot.slane %v3704_v0, %v10191_v11  ;;  %v12274_v0 = vpop.permute.xlu0 %4512 }
 0x37b   : > { %4676 = vrot.lane.b32.xlu0 %v16687_v62, %s10006_s23  ;;  %4614 = vrot.lane.b32.xlu1 %v16688_v58, %s10004_s17  ;;  %v2696_v62 = vcombine.low %v12180_v30, %v12172_v38  ;;  %v16711_v58 = vld [vmem:[#allocation155_spill] sm:$0xff]  ;;  %16731 = vst [vmem:[#allocation120_spill] sm:$0xff] %v12274_v0 }
 0x37c   : > { %v3752_v55 = vcombine.low %v12256_v60, %v12243_v52 }
 0x37e   : > { %v3760_v31 = vrot.slane %v3752_v55, %v10210_v47  ;;  %v12305_v27 = vpop.permute.xlu0 %4516  ;;  %v16746_v55 = vld [vmem:[#allocation142_spill] sm:$0xff] }
 0x37f   : > { %4680 = vrot.lane.b32.xlu0 %v16689_v35, %s10006_s23  ;;  %4618 = vrot.lane.b32.xlu1 %v16692_v18, %s10004_s17  ;;  %v16712_v35 = vld [vmem:[#allocation154_spill] sm:$0xff]  ;;  %16738 = vst [vmem:[#allocation109_spill] sm:$0xff] %v12305_v27 }
 0x380   : > { %v3144_v18 = vcombine.low %v16712_v35, %v16711_v58  ;;  %v16729_v35 = vld [vmem:[#allocation96_spill] sm:$0xff] }
 0x383   : > { %4684 = vrot.lane.b32.xlu0 %v4094_v29, %s10006_s23  ;;  %4622 = vrot.lane.b32.xlu1 %v4228_v54, %s10004_s17  ;;  %v12202_v29 = vrot.slane %v3192_v37, %v10191_v11  ;;  %v16713_v54 = vld [vmem:[#allocation67_spill] sm:$0xff]  ;;  %v4280_v37 = vcombine.low %v16724_v4, %v16723_v23  ;;  %v4177_v4 = vcombine.high %v12127_v19, %v12113_v41  ;;  %v16739_v19 = vld [vmem:[#allocation86_spill] sm:$0xff] }
 0x384   : > { %v3736_v22 = vcombine.low %v16714_v61, %v16713_v54 }
 0x385   : > { %v3240_v15 = vcombine.low %v12212_v56, %v12202_v29  ;;  %v12263_v61 = vrot.slane %v4280_v37, %v10191_v11  ;;  %v16735_v37 = vld [vmem:[#allocation57_spill] sm:$0xff]  ;;  %v12311_v41 = vrot.slane %v4177_v4, %v10210_v47 }
 0x386   : > { %v12235_v33 = vrot.slane %v3736_v22, %v10191_v11 }
 0x387   : > { %4704 = vrot.lane.b32.xlu0 %v16699_v20, %s10007_s24  ;;  %4642 = vrot.lane.b32.xlu1 %v16700_v43, %s10005_s22  ;;  %v2704_v20 = vrot.slane %v2696_v62, %v10210_v47  ;;  %v12228_v43 = vrot.slane %v3144_v18, %v10191_v11  ;;  %v16728_v62 = vld [vmem:[#allocation99_spill] sm:$0xff]  ;;  %v3248_v48 = vrot.slane %v3240_v15, %v10210_v47  ;;  %v16730_v18 = vld [vmem:[#allocation92_spill] sm:$0xff] }
 0x388   : > { %v3784_v63 = vcombine.low %v12246_v16, %v12235_v33  ;;  %v4232_v54 = vcombine.low %v16730_v18, %v16729_v35  ;;  %v16744_v35 = vld [vmem:[#allocation144_spill] sm:$0xff] }
 0x389   : > { %v3208_v1 = vcombine.low %v12228_v43, %v12209_v13  ;;  %v2728_v59 = vcombine.low %v2672_v6, %v2704_v20 }
 0x38a   : > { %v12283_v15 = vrot.slane %v4232_v54, %v10191_v11  ;;  %v16745_v54 = vld [vmem:[#allocation143_spill] sm:$0xff] }
 0x38b   : > { %4708 = vrot.lane.b32.xlu0 %v16709_v8, %s10007_s24  ;;  %4646 = vrot.lane.b32.xlu1 %v16710_v46, %s10005_s22  ;;  %v4248_v8 = vcombine.low %v16726_v39, %v16725_v32  ;;  %v16727_v46 = vld [vmem:[#allocation95_spill] sm:$0xff]  ;;  %v3216_v22 = vrot.slane %v3208_v1, %v10210_v47 }
 0x38c   : > { %v4264_v58 = vcombine.low %v16728_v62, %v16727_v46  ;;  %v12318_v62 = vpop.permute.xlu0 %4520 }
 0x38d   : > { %v12269_v10 = vrot.slane %v4248_v8, %v10191_v11  ;;  %v16740_v8 = vld [vmem:[#allocation85_spill] sm:$0xff]  ;;  %16742 = vst [vmem:[#allocation121_spill] sm:$0xff] %v12318_v62 }
 0x38e   : > { %v12272_v17 = vrot.slane %v4264_v58, %v10191_v11  ;;  %v16741_v46 = vcombine.low %v16739_v19, %v16740_v8 }
 0x38f   : > { %4712 = vrot.lane.b32.xlu0 %v16719_v34, %s10007_s24  ;;  %4650 = vrot.lane.b32.xlu1 %v16720_v3, %s10005_s22  ;;  %v3272_v34 = vcombine.low %v3216_v22, %v3248_v48  ;;  %v3792_v3 = vrot.slane %v3784_v63, %v10210_v47  ;;  %v4296_v23 = vcombine.low %v12283_v15, %v12269_v10  ;;  %v16743_v63 = vld [vmem:[#allocation145_spill] sm:$0xff] }
 0x390   : > { %v4328_v36 = vcombine.low %v12272_v17, %v12263_v61  ;;  %v2784_v18 = vcombine.low %v16744_v35, %v16743_v63  ;;  %v16754_v63 = vld [vmem:[#allocation50_spill] sm:$0xff] }
 0x391   : > { %v3816_v32 = vcombine.low %v3760_v31, %v3792_v3  ;;  %v12308_v39 = vrot.slane %v4296_v23, %v10210_v47  ;;  %v16749_v23 = vld [vmem:[#allocation140_spill] sm:$0xff] }
 0x392   : > { %v12300_v1 = vrot.slane %v4328_v36, %v10210_v47  ;;  %v2729_v36 = vcombine.high %v2672_v6, %v2704_v20  ;;  %v2752_v4 = vcombine.low %v16749_v23, %v16748_v25  ;;  %v16753_v6 = vld [vmem:[#allocation51_spill] sm:$0xff]  ;;  %v16758_v25 = vld [vmem:[#allocation49_spill] sm:$0xff] }
 0x393   : > { %4716 = vrot.lane.b32.xlu0 %v4095_v2, %s10007_s24  ;;  %4654 = vrot.lane.b32.xlu1 %v4229_v42, %s10005_s22  ;;  %v16736_v2 = vld [vmem:[#allocation56_spill] sm:$0xff]  ;;  %v3328_v35 = vcombine.low %v16754_v63, %v16753_v6  ;;  %v16759_v23 = vld [vmem:[#allocation31_spill] sm:$0xff]  ;;  %v16763_v6 = vld [vmem:[#allocation82_spill] sm:$0xff] }
 0x394   : > { %v16737_v42 = vcombine.low %v16735_v37, %v16736_v2  ;;  %v4360_v58 = vcombine.low %v12308_v39, %v12300_v1  ;;  %v16764_v63 = vld [vmem:[#allocation78_spill] sm:$0xff] }
 0x397   : > { %4736 = vrot.lane.b32.xlu0 %v2728_v59, %s9998_s12  ;;  %4674 = vrot.lane.b32.xlu1 %v16734_v49, %s10006_s23  ;;  %v4230_v59 = vcombine.low %v12311_v41, %v12303_v5  ;;  %v2768_v49 = vcombine.low %v16746_v55, %v16745_v54  ;;  %v3273_v54 = vcombine.high %v3216_v22, %v3248_v48  ;;  %v16761_v22 = vld [vmem:[#allocation46_spill] sm:$0xff] }
 0x398   : > { %v12356_v55 = vrot.slane %v2752_v4, %v10191_v11 }
 0x39b   : > { %4740 = vrot.lane.b32.xlu0 %v3272_v34, %s9998_s12  ;;  %4678 = vrot.lane.b32.xlu1 %v16737_v42, %s10006_s23  ;;  %v2697_v42 = vcombine.high %v12180_v30, %v12172_v38  ;;  %v2665_v38 = vcombine.high %v12195_v51, %v12177_v9  ;;  %v12351_v30 = vrot.slane %v2768_v49, %v10191_v11  ;;  %v16762_v49 = vld [vmem:[#allocation45_spill] sm:$0xff] }
 0x39c   : > { %v16760_v51 = vcombine.high %v16735_v37, %v16736_v2  ;;  %v3280_v4 = vcombine.low %v16762_v49, %v16761_v22  ;;  %v16769_v22 = vld [vmem:[#allocation77_spill] sm:$0xff] }
 0x39f   : > { %4744 = vrot.lane.b32.xlu0 %v3816_v32, %s9998_s12  ;;  %4682 = vrot.lane.b32.xlu1 %v16741_v46, %s10006_s23  ;;  %v12337_v32 = vrot.slane %v2784_v18, %v10191_v11  ;;  %v16750_v46 = vcombine.high %v16732_v21, %v16733_v24  ;;  %v16756_v21 = vld [vmem:[#allocation48_spill] sm:$0xff]  ;;  %v16757_v24 = vld [vmem:[#allocation47_spill] sm:$0xff] }
 0x3a1   : > { %v2832_v9 = vcombine.low %v12351_v30, %v12337_v32 }
 0x3a3   : > { %4748 = vrot.lane.b32.xlu0 %v4360_v58, %s9998_s12  ;;  %4686 = vrot.lane.b32.xlu1 %v4230_v59, %s10006_s23  ;;  %v16751_v58 = vld [vmem:[#allocation139_spill] sm:$0xff]  ;;  %v16752_v59 = vld [vmem:[#allocation138_spill] sm:$0xff] }
 0x3a4   : > { %v2736_v20 = vcombine.low %v16752_v59, %v16751_v58  ;;  %v12363_v58 = vrot.slane %v2697_v42, %v10210_v47  ;;  %v12378_v59 = vrot.slane %v3328_v35, %v10191_v11  ;;  %v12381_v42 = vrot.slane %v2665_v38, %v10210_v47  ;;  %v16766_v35 = vld [vmem:[#allocation80_spill] sm:$0xff] }
 0x3a5   : > { %v12330_v34 = vpop.permute.xlu0 %4524  ;;  %v12398_v38 = vrot.slane %v2832_v9, %v10210_v47 }
 0x3a6   : > { %16747 = vst [vmem:[#allocation117_spill] sm:$0xff] %v12330_v34  ;;  %v12373_v48 = vrot.slane %v2736_v20, %v10191_v11 }
 0x3a7   : > { %4768 = vrot.lane.b32.xlu0 %v2729_v36, %s10008_s25  ;;  %4706 = vrot.lane.b32.xlu1 %v16750_v46, %s10007_s24  ;;  %v3296_v36 = vcombine.low %v16757_v24, %v16756_v21  ;;  %v3312_v46 = vcombine.low %v16759_v23, %v16758_v25  ;;  %v3817_v24 = vcombine.high %v3760_v31, %v3792_v3  ;;  %v16767_v25 = vld [vmem:[#allocation76_spill] sm:$0xff] }
 0x3a8   : > { %v2800_v37 = vcombine.low %v12373_v48, %v12356_v55  ;;  %v3840_v23 = vcombine.low %v16767_v25, %v16766_v35  ;;  %v16770_v3 = vcombine.high %v16739_v19, %v16740_v8  ;;  %v2730_v31 = vcombine.low %v12381_v42, %v12363_v58  ;;  %v16773_v19 = vld [vmem:[#allocation111_spill] sm:$0xff] }
 0x3a9   : > { %v12353_v18 = vpop.permute.xlu0 %4544  ;;  %v12390_v2 = vrot.slane %v3296_v36, %v10191_v11  ;;  %v12393_v20 = vrot.slane %v3312_v46, %v10191_v11  ;;  %v3241_v36 = vcombine.high %v12212_v56, %v12202_v29  ;;  %v12412_v46 = vrot.slane %v3280_v4, %v10191_v11  ;;  %v16774_v8 = vld [vmem:[#allocation115_spill] sm:$0xff] }
 0x3aa   : > { %16755 = vst [vmem:[#allocation118_spill] sm:$0xff] %v12353_v18  ;;  %v4416_v25 = vcombine.low %v16774_v8, %v16773_v19  ;;  %v4361_v29 = vcombine.high %v12308_v39, %v12300_v1  ;;  %v4231_v56 = vcombine.high %v12311_v41, %v12303_v5  ;;  %v12430_v4 = vrot.slane %v2800_v37, %v10210_v47  ;;  %v16777_v1 = vld [vmem:[#allocation108_spill] sm:$0xff]  ;;  %v16778_v19 = vld [vmem:[#allocation114_spill] sm:$0xff] }
 0x3ab   : > { %4772 = vrot.lane.b32.xlu0 %v3273_v54, %s10008_s25  ;;  %4710 = vrot.lane.b32.xlu1 %v16760_v51, %s10007_s24  ;;  %v3872_v54 = vcombine.low %v16764_v63, %v16763_v6  ;;  %v16768_v51 = vld [vmem:[#allocation81_spill] sm:$0xff]  ;;  %v3376_v9 = vcombine.low %v12393_v20, %v12378_v59  ;;  %v16771_v6 = vld [vmem:[#allocation75_spill] sm:$0xff]  ;;  %v16779_v5 = vld [vmem:[#allocation110_spill] sm:$0xff]  ;;  %v3785_v37 = vcombine.high %v12246_v16, %v12235_v33 }
 0x3ac   : > { %v3856_v49 = vcombine.low %v16769_v22, %v16768_v51  ;;  %v16772_v63 = vld [vmem:[#allocation71_spill] sm:$0xff]  ;;  %v3209_v22 = vcombine.high %v12228_v43, %v12209_v13  ;;  %v4400_v41 = vcombine.low %v16779_v5, %v16778_v19  ;;  %v3255_v13 = vrot.slane %v3241_v36, %v10210_v47 }
 0x3ad   : > { %v12385_v21 = vpop.permute.xlu0 %4548  ;;  %v12419_v35 = vrot.slane %v3872_v54, %v10191_v11  ;;  %v3344_v54 = vcombine.low %v12412_v46, %v12390_v2  ;;  %v3384_v43 = vrot.slane %v3376_v9, %v10210_v47  ;;  %v3753_v16 = vcombine.high %v12256_v60, %v12243_v52 }
 0x3ae   : > { %16765 = vst [vmem:[#allocation122_spill] sm:$0xff] %v12385_v21  ;;  %v3223_v9 = vrot.slane %v3209_v22, %v10210_v47  ;;  %v12476_v5 = vrot.slane %v4400_v41, %v10191_v11  ;;  %v3799_v22 = vrot.slane %v3785_v37, %v10210_v47  ;;  %v4297_v37 = vcombine.high %v12283_v15, %v12269_v10  ;;  %v16969_v21 = vld [vmem:[#allocation12_spill] sm:$0xff] }
 0x3af   : > { %4776 = vrot.lane.b32.xlu0 %v3817_v24, %s10008_s25  ;;  %4714 = vrot.lane.b32.xlu1 %v16770_v3, %s10007_s24  ;;  %v3824_v24 = vcombine.low %v16772_v63, %v16771_v6  ;;  %v12437_v3 = vrot.slane %v3840_v23, %v10191_v11  ;;  %v12440_v6 = vrot.slane %v3856_v49, %v10191_v11  ;;  %v16776_v63 = vld [vmem:[#allocation112_spill] sm:$0xff] }
 0x3b0   : > { %v4384_v39 = vcombine.low %v16777_v1, %v16776_v63  ;;  %v2864_v23 = vcombine.low %v12430_v4, %v12398_v38  ;;  %v16780_v63 = vld [vmem:[#allocation107_spill] sm:$0xff]  ;;  %v3352_v33 = vrot.slane %v3344_v54, %v10210_v47  ;;  %v3274_v54 = vcombine.low %v3223_v9, %v3255_v13 }
 0x3b1   : > { %v12423_v51 = vpop.permute.xlu0 %4552  ;;  %v12455_v49 = vrot.slane %v3824_v24, %v10191_v11  ;;  %v3920_v8 = vcombine.low %v12440_v6, %v12419_v35  ;;  %v4311_v28 = vrot.slane %v4297_v37, %v10210_v47  ;;  %v2731_v37 = vcombine.high %v12381_v42, %v12363_v58 }
 0x3b2   : > { %16775 = vst [vmem:[#allocation119_spill] sm:$0xff] %v12423_v51  ;;  %v12473_v19 = vrot.slane %v4384_v39, %v10191_v11  ;;  %v3408_v52 = vcombine.low %v3352_v33, %v3384_v43  ;;  %v4329_v39 = vcombine.high %v12272_v17, %v12263_v61  ;;  %v2833_v58 = vcombine.high %v12351_v30, %v12337_v32 }
 0x3b3   : > { %4780 = vrot.lane.b32.xlu0 %v4361_v29, %s10008_s25  ;;  %4718 = vrot.lane.b32.xlu1 %v4231_v56, %s10007_s24  ;;  %v16781_v29 = vld [vmem:[#allocation103_spill] sm:$0xff]  ;;  %v12462_v56 = vrot.slane %v4416_v25, %v10191_v11  ;;  %v3888_v24 = vcombine.low %v12455_v49, %v12437_v3  ;;  %v12478_v25 = vpop.permute.xlu1 %4514  ;;  %v3928_v60 = vrot.slane %v3920_v8, %v10210_v47 }
 0x3b4   : > { %v4368_v1 = vcombine.low %v16781_v29, %v16780_v63  ;;  %16783 = vst [vmem:[#allocation83_spill] sm:$0xff] %v12478_v25  ;;  %v4343_v61 = vrot.slane %v4329_v39, %v10210_v47 }
 0x3b5   : > { %v12464_v36 = vpop.permute.xlu0 %4556  ;;  %v4464_v41 = vcombine.low %v12476_v5, %v12462_v56 }
 0x3b6   : > { %16782 = vst [vmem:[#allocation123_spill] sm:$0xff] %v12464_v36  ;;  %v12487_v63 = vrot.slane %v4368_v1, %v10191_v11  ;;  %v4363_v30 = vcombine.high %v4311_v28, %v4343_v61 }
 0x3b7   : > { %4800 = vrot.lane.b32.xlu0 %v2730_v31, %s10009_s3  ;;  %4738 = vrot.lane.b32.xlu1 %v2864_v23, %s9998_s12  ;;  %v3767_v31 = vrot.slane %v3753_v16, %v10210_v47  ;;  %v3896_v23 = vrot.slane %v3888_v24, %v10210_v47  ;;  %v4472_v17 = vrot.slane %v4464_v41, %v10210_v47  ;;  %v12503_v1 = vpop.permute.xlu1 %4518 }
 0x3b8   : > { %v4432_v8 = vcombine.low %v12487_v63, %v12473_v19  ;;  %16785 = vst [vmem:[#allocation131_spill] sm:$0xff] %v12503_v1 }
 0x3b9   : > { %v12491_v29 = vpop.permute.xlu0 %4576  ;;  %v3818_v16 = vcombine.low %v3767_v31, %v3799_v22  ;;  %v3952_v24 = vcombine.low %v3896_v23, %v3928_v60 }
 0x3ba   : > { %16784 = vst [vmem:[#allocation88_spill] sm:$0xff] %v12491_v29  ;;  %v4440_v10 = vrot.slane %v4432_v8, %v10210_v47  ;;  %v2865_v8 = vcombine.high %v12430_v4, %v12398_v38  ;;  %v3819_v4 = vcombine.high %v3767_v31, %v3799_v22 }
 0x3bb   : > { %4804 = vrot.lane.b32.xlu0 %v3274_v54, %s10009_s3  ;;  %4742 = vrot.lane.b32.xlu1 %v3408_v52, %s9998_s12  ;;  %v12511_v15 = vpop.permute.xlu1 %4522  ;;  %v4362_v52 = vcombine.low %v4311_v28, %v4343_v61 }
 0x3bc   : > { %16787 = vst [vmem:[#allocation127_spill] sm:$0xff] %v12511_v15  ;;  %v4496_v39 = vcombine.low %v4440_v10, %v4472_v17  ;;  %v16904_v15 = vld [vmem:[#allocation22_spill] sm:$0xff] }
 0x3bd   : > { %v12505_v45 = vpop.permute.xlu0 %4580  ;;  %v5705_v0 = vrot.slane %v16969_v21, %v16904_v15 }
 0x3be   : > { %16786 = vst [vmem:[#allocation130_spill] sm:$0xff] %v12505_v45 }
 0x3bf   : > { %4808 = vrot.lane.b32.xlu0 %v3818_v16, %s10009_s3  ;;  %4746 = vrot.lane.b32.xlu1 %v3952_v24, %s9998_s12 }
 0x3c1   : > { %v12513_v54 = vpop.permute.xlu0 %4584 }
 0x3c2   : > { %16788 = vst [vmem:[#allocation126_spill] sm:$0xff] %v12513_v54 }
 0x3c3   : > { %4812 = vrot.lane.b32.xlu0 %v4362_v52, %s10009_s3  ;;  %4750 = vrot.lane.b32.xlu1 %v4496_v39, %s9998_s12  ;;  %v3275_v52 = vcombine.high %v3223_v9, %v3255_v13  ;;  %v3409_v39 = vcombine.high %v3352_v33, %v3384_v43  ;;  %v2847_v13 = vrot.slane %v2833_v58, %v10210_v47  ;;  %v16805_v58 = vld [vmem:[#allocation41_spill] sm:$0xff] }
 0x3c4   : > { %v3377_v43 = vcombine.high %v12393_v20, %v12378_v59  ;;  %v4497_v33 = vcombine.high %v4440_v10, %v4472_v17  ;;  %v3921_v59 = vcombine.high %v12440_v6, %v12419_v35  ;;  %v4465_v6 = vcombine.high %v12476_v5, %v12462_v56 }
 0x3c5   : > { %v12517_v41 = vpop.permute.xlu1 %4526  ;;  %v12519_v44 = vpop.permute.xlu0 %4588 }
 0x3c6   : > { %16789 = vst [vmem:[#allocation129_spill] sm:$0xff] %v12517_v41  ;;  %16790 = vst [vmem:[#allocation128_spill] sm:$0xff] %v12519_v44  ;;  %v3935_v35 = vrot.slane %v3921_v59, %v10210_v47 }
 0x3c7   : > { %4832 = vrot.lane.b32.xlu0 %v2731_v37, %s10010_s4  ;;  %4770 = vrot.lane.b32.xlu1 %v2865_v8, %s10008_s25  ;;  %v3953_v37 = vcombine.high %v3896_v23, %v3928_v60  ;;  %v2801_v8 = vcombine.high %v12373_v48, %v12356_v55  ;;  %v3345_v55 = vcombine.high %v12412_v46, %v12390_v2  ;;  %v16799_v2 = vld [vmem:[#allocation132_spill] sm:$0xff] }
 0x3c8   : > { %v3391_v48 = vrot.slane %v3377_v43, %v10210_v47  ;;  %v3889_v23 = vcombine.high %v12455_v49, %v12437_v3  ;;  %v16800_v46 = vld [vmem:[#allocation136_spill] sm:$0xff]  ;;  %v4433_v49 = vcombine.high %v12487_v63, %v12473_v19 }
 0x3c9   : > { %v12527_v16 = vpop.permute.xlu1 %4546  ;;  %v12529_v24 = vpop.permute.xlu0 %4608  ;;  %v2815_v22 = vrot.slane %v2801_v8, %v10210_v47  ;;  %v3359_v31 = vrot.slane %v3345_v55, %v10210_v47  ;;  %v16801_v61 = vcombine.low %v16799_v2, %v16800_v46 }
 0x3ca   : > { %16791 = vst [vmem:[#allocation125_spill] sm:$0xff] %v12527_v16  ;;  %16792 = vst [vmem:[#allocation124_spill] sm:$0xff] %v12529_v24  ;;  %v3903_v3 = vrot.slane %v3889_v23, %v10210_v47  ;;  %v4447_v43 = vrot.slane %v4433_v49, %v10210_v47  ;;  %v16815_v23 = vld [vmem:[#allocation105_spill] sm:$0xff] }
 0x3cb   : > { %4836 = vrot.lane.b32.xlu0 %v3275_v52, %s10010_s4  ;;  %4774 = vrot.lane.b32.xlu1 %v3409_v39, %s10008_s25  ;;  %v2866_v28 = vcombine.low %v2815_v22, %v2847_v13  ;;  %v3410_v52 = vcombine.low %v3359_v31, %v3391_v48  ;;  %v16804_v39 = vld [vmem:[#allocation39_spill] sm:$0xff]  ;;  %v2867_v49 = vcombine.high %v2815_v22, %v2847_v13 }
 0x3cc   : > { %v3954_v8 = vcombine.low %v3903_v3, %v3935_v35 }
 0x3cd   : > { %v12535_v42 = vpop.permute.xlu1 %4550  ;;  %v12537_v38 = vpop.permute.xlu0 %4612 }
 0x3ce   : > { %16793 = vst [vmem:[#allocation38_spill] sm:$0xff] %v12535_v42  ;;  %16794 = vst [vmem:[#allocation37_spill] sm:$0xff] %v12537_v38  ;;  %v16857_v42 = vld [vmem:[#allocation101_spill] sm:$0xff] }
 0x3cf   : > { %4840 = vrot.lane.b32.xlu0 %v3819_v4, %s10010_s4  ;;  %4778 = vrot.lane.b32.xlu1 %v3953_v37, %s10008_s25  ;;  %v16806_v4 = vcombine.low %v16804_v39, %v16805_v58  ;;  %v4479_v37 = vrot.slane %v4465_v6, %v10210_v47 }
 0x3d1   : > { %v12546_v9 = vpop.permute.xlu1 %4554  ;;  %v12548_v32 = vpop.permute.xlu0 %4616  ;;  %v4498_v59 = vcombine.low %v4447_v43, %v4479_v37 }
 0x3d2   : > { %16795 = vst [vmem:[#allocation11_spill] sm:$0xff] %v12546_v9  ;;  %16796 = vst [vmem:[#allocation34_spill] sm:$0xff] %v12548_v32 }
 0x3d3   : > { %4844 = vrot.lane.b32.xlu0 %v4363_v30, %s10010_s4  ;;  %4782 = vrot.lane.b32.xlu1 %v4497_v33, %s10008_s25  ;;  %v16809_v30 = vld [vmem:[#allocation69_spill] sm:$0xff] }
 0x3d4   : > { %v16810_v33 = vld [vmem:[#allocation73_spill] sm:$0xff] }
 0x3d5   : > { %v12558_v20 = vpop.permute.xlu1 %4558  ;;  %v12560_v60 = vpop.permute.xlu0 %4620  ;;  %v16811_v19 = vcombine.low %v16809_v30, %v16810_v33 }
 0x3d6   : > { %16797 = vst [vmem:[#allocation36_spill] sm:$0xff] %v12558_v20  ;;  %16798 = vst [vmem:[#allocation35_spill] sm:$0xff] %v12560_v60 }
 0x3d7   : > { %4864 = vrot.lane.b32.xlu0 %v16801_v61, %s10011_s27  ;;  %4802 = vrot.lane.b32.xlu1 %v2866_v28, %s10009_s3  ;;  %v16814_v28 = vld [vmem:[#allocation102_spill] sm:$0xff] }
 0x3d8   : > { %v16816_v61 = vcombine.low %v16814_v28, %v16815_v23 }
 0x3d9   : > { %v12573_v17 = vpop.permute.xlu1 %4578  ;;  %v12575_v10 = vpop.permute.xlu0 %4640 }
 0x3da   : > { %16802 = vst [vmem:[#allocation155_spill] sm:$0xff] %v12573_v17  ;;  %16803 = vst [vmem:[#allocation154_spill] sm:$0xff] %v12575_v10  ;;  %v16900_v17 = vld [vmem:[#allocation21_spill] sm:$0xff] }
 0x3db   : > { %4868 = vrot.lane.b32.xlu0 %v16806_v4, %s10011_s27  ;;  %4806 = vrot.lane.b32.xlu1 %v3410_v52, %s10009_s3  ;;  %v16819_v4 = vcombine.high %v16799_v2, %v16800_v46  ;;  %v16825_v2 = vcombine.high %v16809_v30, %v16810_v33  ;;  %v4499_v46 = vcombine.high %v4447_v43, %v4479_v37  ;;  %v16832_v30 = vld [vmem:[#allocation152_spill] sm:$0xff]  ;;  %v16835_v37 = vld [vmem:[#allocation137_spill] sm:$0xff] }
 0x3dc   : > { %v5694_v18 = vrot.slane %v16969_v21, %v16900_v17 }
 0x3dd   : > { %v12586_v56 = vpop.permute.xlu1 %4582  ;;  %v12588_v5 = vpop.permute.xlu0 %4644 }
 0x3de   : > { %16807 = vst [vmem:[#allocation67_spill] sm:$0xff] %v12586_v56  ;;  %16808 = vst [vmem:[#allocation63_spill] sm:$0xff] %v12588_v5 }
 0x3df   : > { %4872 = vrot.lane.b32.xlu0 %v16811_v19, %s10011_s27  ;;  %4810 = vrot.lane.b32.xlu1 %v3954_v8, %s10009_s3 }
 0x3e1   : > { %v12596_v63 = vpop.permute.xlu1 %4586  ;;  %v12598_v55 = vpop.permute.xlu0 %4648 }
 0x3e2   : > { %16812 = vst [vmem:[#allocation65_spill] sm:$0xff] %v12596_v63  ;;  %16813 = vst [vmem:[#allocation61_spill] sm:$0xff] %v12598_v55 }
 0x3e3   : > { %4876 = vrot.lane.b32.xlu0 %v16816_v61, %s10011_s27  ;;  %4814 = vrot.lane.b32.xlu1 %v4498_v59, %s10009_s3  ;;  %v3411_v61 = vcombine.high %v3359_v31, %v3391_v48  ;;  %v16822_v59 = vcombine.high %v16804_v39, %v16805_v58  ;;  %v16828_v39 = vcombine.high %v16814_v28, %v16815_v23  ;;  %v16831_v58 = vld [vmem:[#allocation146_spill] sm:$0xff]  ;;  %v16839_v28 = vld [vmem:[#allocation55_spill] sm:$0xff] }
 0x3e4   : > { %v16833_v33 = vcombine.low %v16831_v58, %v16832_v30  ;;  %v16840_v23 = vld [vmem:[#allocation54_spill] sm:$0xff] }
 0x3e5   : > { %v12605_v6 = vpop.permute.xlu1 %4590  ;;  %v12607_v52 = vpop.permute.xlu0 %4652 }
 0x3e6   : > { %16817 = vst [vmem:[#allocation66_spill] sm:$0xff] %v12605_v6  ;;  %16818 = vst [vmem:[#allocation62_spill] sm:$0xff] %v12607_v52  ;;  %v16851_v6 = vld [vmem:[#allocation70_spill] sm:$0xff] }
 0x3e7   : > { %4834 = vrot.lane.b32.xlu1 %v2867_v49, %s10010_s4  ;;  %4896 = vrot.lane.b32.xlu0 %v16819_v4, %s10012_s29  ;;  %v3955_v49 = vcombine.high %v3903_v3, %v3935_v35  ;;  %v16834_v4 = vld [vmem:[#allocation135_spill] sm:$0xff] }
 0x3e8   : > { %v16836_v43 = vcombine.low %v16834_v4, %v16835_v37 }
 0x3e9   : > { %v12614_v8 = vpop.permute.xlu1 %4610  ;;  %v12616_v19 = vpop.permute.xlu0 %4672 }
 0x3ea   : > { %16820 = vst [vmem:[#allocation60_spill] sm:$0xff] %v12614_v8  ;;  %16821 = vst [vmem:[#allocation59_spill] sm:$0xff] %v12616_v19 }
 0x3eb   : > { %4838 = vrot.lane.b32.xlu1 %v3411_v61, %s10010_s4  ;;  %4900 = vrot.lane.b32.xlu0 %v16822_v59, %s10012_s29 }
 0x3ed   : > { %v12623_v13 = vpop.permute.xlu1 %4614  ;;  %v12625_v22 = vpop.permute.xlu0 %4676 }
 0x3ee   : > { %16823 = vst [vmem:[#allocation100_spill] sm:$0xff] %v12623_v13  ;;  %16824 = vst [vmem:[#allocation97_spill] sm:$0xff] %v12625_v22  ;;  %v16850_v13 = vld [vmem:[#allocation74_spill] sm:$0xff]  ;;  %v16968_v22 = vld [vmem:[#allocation29_spill] sm:$0xff] }
 0x3ef   : > { %4842 = vrot.lane.b32.xlu1 %v3955_v49, %s10010_s4  ;;  %4904 = vrot.lane.b32.xlu0 %v16825_v2, %s10012_s29  ;;  %v16841_v49 = vcombine.low %v16839_v28, %v16840_v23  ;;  %v16842_v2 = vld [vmem:[#allocation40_spill] sm:$0xff]  ;;  %v16852_v56 = vcombine.low %v16850_v13, %v16851_v6  ;;  %v5606_v38 = vrot.slane %v16968_v22, %v16900_v17 }
 0x3f1   : > { %v12632_v48 = vpop.permute.xlu1 %4618  ;;  %v12634_v31 = vpop.permute.xlu0 %4680 }
 0x3f2   : > { %16826 = vst [vmem:[#allocation98_spill] sm:$0xff] %v12632_v48  ;;  %16827 = vst [vmem:[#allocation94_spill] sm:$0xff] %v12634_v31  ;;  %v16896_v48 = vld [vmem:[#allocation20_spill] sm:$0xff]  ;;  %v5617_v31 = vrot.slane %v16968_v22, %v16904_v15 }
 0x3f3   : > { %4846 = vrot.lane.b32.xlu1 %v4499_v46, %s10010_s4  ;;  %4908 = vrot.lane.b32.xlu0 %v16828_v39, %s10012_s29  ;;  %v16843_v46 = vld [vmem:[#allocation44_spill] sm:$0xff]  ;;  %v5683_v29 = vrot.slane %v16969_v21, %v16896_v48 }
 0x3f4   : > { %v16844_v39 = vcombine.low %v16842_v2, %v16843_v46 }
 0x3f5   : > { %v12641_v35 = vpop.permute.xlu1 %4622  ;;  %v12643_v3 = vpop.permute.xlu0 %4684 }
 0x3f6   : > { %16829 = vst [vmem:[#allocation95_spill] sm:$0xff] %v12641_v35  ;;  %16830 = vst [vmem:[#allocation99_spill] sm:$0xff] %v12643_v3 }
 0x3f7   : > { %4866 = vrot.lane.b32.xlu1 %v16833_v33, %s10011_s27  ;;  %4928 = vrot.lane.b32.xlu0 %v16836_v43, %s10013_s30  ;;  %v16847_v43 = vld [vmem:[#allocation89_spill] sm:$0xff] }
 0x3f8   : > { %v16849_v35 = vcombine.low %v16847_v43, %v16848_v40 }
 0x3f9   : > { %v12653_v61 = vpop.permute.xlu1 %4642  ;;  %v12655_v59 = vpop.permute.xlu0 %4704 }
 0x3fa   : > { %16837 = vst [vmem:[#allocation96_spill] sm:$0xff] %v12653_v61  ;;  %16838 = vst [vmem:[#allocation92_spill] sm:$0xff] %v12655_v59 }
 0x3fb   : > { %4870 = vrot.lane.b32.xlu1 %v16841_v49, %s10011_s27  ;;  %4932 = vrot.lane.b32.xlu0 %v16844_v39, %s10013_s30  ;;  %v16855_v39 = vcombine.low %v12018_v14, %v12008_v7 }
 0x3fd   : > { %v12665_v33 = vpop.permute.xlu1 %4646  ;;  %v12667_v26 = vpop.permute.xlu0 %4708 }
 0x3fe   : > { %16845 = vst [vmem:[#allocation151_spill] sm:$0xff] %v12665_v33  ;;  %16846 = vst [vmem:[#allocation149_spill] sm:$0xff] %v12667_v26  ;;  %v16856_v33 = vld [vmem:[#allocation106_spill] sm:$0xff] }
 0x3ff   : > { %4874 = vrot.lane.b32.xlu1 %v16849_v35, %s10011_s27  ;;  %4936 = vrot.lane.b32.xlu0 %v16852_v56, %s10013_s30  ;;  %v16858_v61 = vcombine.low %v16856_v33, %v16857_v42  ;;  %v16861_v56 = vcombine.high %v16831_v58, %v16832_v30  ;;  %v16866_v58 = vcombine.high %v16842_v2, %v16843_v46 }
 0x400   : > { %v16873_v2 = vcombine.high %v12018_v14, %v12008_v7  ;;  %v16874_v46 = vcombine.high %v16856_v33, %v16857_v42  ;;  %v16885_v33 = vld [vmem:[#allocation64_spill] sm:$0xff] }
 0x401   : > { %v12677_v49 = vpop.permute.xlu1 %4650  ;;  %v12679_v20 = vpop.permute.xlu0 %4712 }
 0x402   : > { %16853 = vst [vmem:[#allocation57_spill] sm:$0xff] %v12677_v49  ;;  %16854 = vst [vmem:[#allocation56_spill] sm:$0xff] %v12679_v20  ;;  %v16862_v49 = vcombine.high %v16834_v4, %v16835_v37  ;;  %v16869_v4 = vcombine.high %v16847_v43, %v16848_v40  ;;  %v16870_v37 = vcombine.high %v16850_v13, %v16851_v6  ;;  %v16877_v6 = vld [vmem:[#allocation8_spill] sm:$0xff]  ;;  %v16878_v13 = vld [vmem:[#allocation14_spill] sm:$0xff] }
 0x403   : > { %4878 = vrot.lane.b32.xlu1 %v16855_v39, %s10011_s27  ;;  %4940 = vrot.lane.b32.xlu0 %v16858_v61, %s10013_s30  ;;  %v16865_v61 = vcombine.high %v16839_v28, %v16840_v23  ;;  %v5562_v52 = vrot.slane %v16968_v22, %v16877_v6  ;;  %v5595_v20 = vrot.slane %v16968_v22, %v16896_v48 }
 0x404   : > { %v5650_v34 = vrot.slane %v16969_v21, %v16877_v6 }
 0x405   : > { %v12689_v35 = vpop.permute.xlu1 %4654  ;;  %v12691_v12 = vpop.permute.xlu0 %4716 }
 0x406   : > { %16859 = vst [vmem:[#allocation86_spill] sm:$0xff] %v12689_v35  ;;  %16860 = vst [vmem:[#allocation85_spill] sm:$0xff] %v12691_v12  ;;  %v16890_v35 = vld [vmem:[#allocation19_spill] sm:$0xff] }
 0x407   : > { %4898 = vrot.lane.b32.xlu1 %v16861_v56, %s10012_s29  ;;  %4960 = vrot.lane.b32.xlu0 %v16862_v49, %s10014_s18  ;;  %v5122_v49 = vrot.slane %v16878_v13, %v16877_v6  ;;  %v5584_v5 = vrot.slane %v16968_v22, %v16890_v35  ;;  %v5672_v27 = vrot.slane %v16969_v21, %v16890_v35 }
 0x409   : > { %v12701_v39 = vpop.permute.xlu1 %4674  ;;  %v12703_v50 = vpop.permute.xlu0 %4736 }
 0x40a   : > { %16863 = vst [vmem:[#allocation145_spill] sm:$0xff] %v12701_v39  ;;  %16864 = vst [vmem:[#allocation144_spill] sm:$0xff] %v12703_v50 }
 0x40b   : > { %4902 = vrot.lane.b32.xlu1 %v16865_v61, %s10012_s29  ;;  %4964 = vrot.lane.b32.xlu0 %v16866_v58, %s10014_s18  ;;  %v16879_v61 = vld [vmem:[#allocation150_spill] sm:$0xff]  ;;  %v16880_v58 = vld [vmem:[#allocation153_spill] sm:$0xff] }
 0x40d   : > { %v12713_v30 = vpop.permute.xlu1 %4678  ;;  %v12715_v56 = vpop.permute.xlu0 %4740 }
 0x40e   : > { %16867 = vst [vmem:[#allocation143_spill] sm:$0xff] %v12713_v30  ;;  %16868 = vst [vmem:[#allocation142_spill] sm:$0xff] %v12715_v56 }
 0x40f   : > { %4906 = vrot.lane.b32.xlu1 %v16869_v4, %s10012_s29  ;;  %4968 = vrot.lane.b32.xlu0 %v16870_v37, %s10014_s18  ;;  %v16881_v4 = vcombine.low %v16879_v61, %v16880_v58  ;;  %v16884_v37 = vld [vmem:[#allocation18_spill] sm:$0xff] }
 0x410   : > { %v5133_v42 = vrot.slane %v16878_v13, %v16884_v37  ;;  %v5573_v50 = vrot.slane %v16968_v22, %v16884_v37  ;;  %v5661_v24 = vrot.slane %v16969_v21, %v16884_v37 }
 0x411   : > { %v12725_v28 = vpop.permute.xlu1 %4682  ;;  %v12727_v23 = vpop.permute.xlu0 %4744 }
 0x412   : > { %16871 = vst [vmem:[#allocation141_spill] sm:$0xff] %v12725_v28  ;;  %16872 = vst [vmem:[#allocation140_spill] sm:$0xff] %v12727_v23  ;;  %v16892_v28 = vld [vmem:[#allocation87_spill] sm:$0xff] }
 0x413   : > { %4910 = vrot.lane.b32.xlu1 %v16873_v2, %s10012_s29  ;;  %4972 = vrot.lane.b32.xlu0 %v16874_v46, %s10014_s18  ;;  %v16886_v2 = vld [vmem:[#allocation58_spill] sm:$0xff] }
 0x414   : > { %v16887_v46 = vcombine.low %v16885_v33, %v16886_v2 }
 0x415   : > { %v12737_v40 = vpop.permute.xlu1 %4686  ;;  %v12739_v43 = vpop.permute.xlu0 %4748 }
 0x416   : > { %16875 = vst [vmem:[#allocation139_spill] sm:$0xff] %v12737_v40  ;;  %16876 = vst [vmem:[#allocation138_spill] sm:$0xff] %v12739_v43 }
 0x417   : > { %4930 = vrot.lane.b32.xlu1 %v16881_v4, %s10013_s30  ;;  %5124 = vbcast.lane.b32.xlu0 %v5122_v49, 256  ;;  %v5144_v4 = vrot.slane %v16878_v13, %v16890_v35 }
 0x419   : > { %v12747_v7 = vpop.permute.xlu1 %4706  ;;  %v12749_v14 = vpop.permute.xlu0 %4768 }
 0x41a   : > { %16882 = vst [vmem:[#allocation51_spill] sm:$0xff] %v12747_v7  ;;  %16883 = vst [vmem:[#allocation50_spill] sm:$0xff] %v12749_v14  ;;  %v16891_v7 = vld [vmem:[#allocation91_spill] sm:$0xff] }
 0x41b   : > { %4934 = vrot.lane.b32.xlu1 %v16887_v46, %s10013_s30  ;;  %5135 = vbcast.lane.b32.xlu0 %v5133_v42, 256  ;;  %v16893_v39 = vcombine.low %v16891_v7, %v16892_v28  ;;  %v5155_v46 = vrot.slane %v16878_v13, %v16896_v48 }
 0x41d   : > { %v12757_v40 = vpop.permute.xlu1 %4710  ;;  %v12759_v30 = vpop.permute.xlu0 %4772 }
 0x41e   : > { %16888 = vst [vmem:[#allocation48_spill] sm:$0xff] %v12757_v40  ;;  %16889 = vst [vmem:[#allocation47_spill] sm:$0xff] %v12759_v30  ;;  %v16897_v40 = vcombine.low %v12021_v57, %v12011_v53 }
 0x41f   : > { %4938 = vrot.lane.b32.xlu1 %v16893_v39, %s10013_s30  ;;  %5146 = vbcast.lane.b32.xlu0 %v5144_v4, 256  ;;  %v5166_v39 = vrot.slane %v16878_v13, %v16900_v17 }
 0x421   : > { %v12767_v41 = vpop.permute.xlu1 %4714  ;;  %v12769_v1 = vpop.permute.xlu0 %4776 }
 0x422   : > { %16894 = vst [vmem:[#allocation49_spill] sm:$0xff] %v12767_v41  ;;  %16895 = vst [vmem:[#allocation31_spill] sm:$0xff] %v12769_v1  ;;  %v16901_v41 = vcombine.high %v16879_v61, %v16880_v58  ;;  %v16908_v61 = vld [vmem:[#allocation23_spill] sm:$0xff]  ;;  %v16909_v58 = vcombine.high %v16891_v7, %v16892_v28  ;;  %v16916_v28 = vld [vmem:[#allocation25_spill] sm:$0xff] }
 0x423   : > { %4942 = vrot.lane.b32.xlu1 %v16897_v40, %s10013_s30  ;;  %5157 = vbcast.lane.b32.xlu0 %v5155_v46, 256  ;;  %v5177_v40 = vrot.slane %v16878_v13, %v16904_v15  ;;  %v5210_v7 = vrot.slane %v16916_v28, %v16877_v6  ;;  %v5628_v45 = vrot.slane %v16968_v22, %v16908_v61 }
 0x425   : > { %v12777_v8 = vpop.permute.xlu1 %4718  ;;  %v12779_v63 = vpop.permute.xlu0 %4780 }
 0x426   : > { %16898 = vst [vmem:[#allocation46_spill] sm:$0xff] %v12777_v8  ;;  %16899 = vst [vmem:[#allocation45_spill] sm:$0xff] %v12779_v63  ;;  %v16905_v8 = vcombine.high %v16885_v33, %v16886_v2  ;;  %v16912_v33 = vld [vmem:[#allocation24_spill] sm:$0xff]  ;;  %v16913_v2 = vcombine.high %v12021_v57, %v12011_v53 }
 0x427   : > { %4962 = vrot.lane.b32.xlu1 %v16901_v41, %s10014_s18  ;;  %5168 = vbcast.lane.b32.xlu0 %v5166_v39, 256  ;;  %v5188_v41 = vrot.slane %v16878_v13, %v16908_v61  ;;  %v5639_v55 = vrot.slane %v16968_v22, %v16912_v33 }
 0x429   : > { %v12787_v9 = vpop.permute.xlu1 %4738  ;;  %v12789_v16 = vpop.permute.xlu0 %4800 }
 0x42a   : > { %16902 = vst [vmem:[#allocation82_spill] sm:$0xff] %v12787_v9  ;;  %16903 = vst [vmem:[#allocation78_spill] sm:$0xff] %v12789_v16 }
 0x42b   : > { %4966 = vrot.lane.b32.xlu1 %v16905_v8, %s10014_s18  ;;  %5179 = vbcast.lane.b32.xlu0 %v5177_v40, 256  ;;  %v5199_v8 = vrot.slane %v16878_v13, %v16912_v33  ;;  %v5221_v13 = vrot.slane %v16916_v28, %v16884_v37 }
 0x42d   : > { %v12797_v25 = vpop.permute.xlu1 %4742  ;;  %v12799_v63 = vpop.permute.xlu0 %4804 }
 0x42e   : > { %16906 = vst [vmem:[#allocation80_spill] sm:$0xff] %v12797_v25  ;;  %16907 = vst [vmem:[#allocation76_spill] sm:$0xff] %v12799_v63 }
 0x42f   : > { %4970 = vrot.lane.b32.xlu1 %v16909_v58, %s10014_s18  ;;  %5190 = vbcast.lane.b32.xlu0 %v5188_v41, 256 }
 0x431   : > { %v12807_v9 = vpop.permute.xlu1 %4746  ;;  %v12809_v30 = vpop.permute.xlu0 %4808 }
 0x432   : > { %16910 = vst [vmem:[#allocation81_spill] sm:$0xff] %v12807_v9  ;;  %16911 = vst [vmem:[#allocation77_spill] sm:$0xff] %v12809_v30 }
 0x433   : > { %4974 = vrot.lane.b32.xlu1 %v16913_v2, %s10014_s18  ;;  %5201 = vbcast.lane.b32.xlu0 %v5199_v8, 256  ;;  %v5232_v2 = vrot.slane %v16916_v28, %v16890_v35 }
 0x435   : > { %v12817_v25 = vpop.permute.xlu1 %4750  ;;  %v12819_v63 = vpop.permute.xlu0 %4812 }
 0x436   : > { %16914 = vst [vmem:[#allocation75_spill] sm:$0xff] %v12817_v25  ;;  %16915 = vst [vmem:[#allocation71_spill] sm:$0xff] %v12819_v63 }
 0x437   : > { %5128 = vbcast.lane.b32.xlu1 %v5122_v49, 264  ;;  %5212 = vbcast.lane.b32.xlu0 %v5210_v7, 256 }
 0x439   : > { %v12823_v58 = vpop.permute.xlu1 %4770  ;;  %v12825_v9 = vpop.permute.xlu0 %4832 }
 0x43a   : > { %16917 = vst [vmem:[#allocation111_spill] sm:$0xff] %v12823_v58  ;;  %16918 = vst [vmem:[#allocation115_spill] sm:$0xff] %v12825_v9  ;;  %v5243_v58 = vrot.slane %v16916_v28, %v16896_v48 }
 0x43b   : > { %5139 = vbcast.lane.b32.xlu1 %v5133_v42, 264  ;;  %5223 = vbcast.lane.b32.xlu0 %v5221_v13, 256 }
 0x43d   : > { %v12829_v53 = vpop.permute.xlu1 %4774  ;;  %v12831_v57 = vpop.permute.xlu0 %4836 }
 0x43e   : > { %16919 = vst [vmem:[#allocation112_spill] sm:$0xff] %v12829_v53  ;;  %16920 = vst [vmem:[#allocation108_spill] sm:$0xff] %v12831_v57  ;;  %v5254_v53 = vrot.slane %v16916_v28, %v16900_v17 }
 0x43f   : > { %5150 = vbcast.lane.b32.xlu1 %v5144_v4, 264  ;;  %5234 = vbcast.lane.b32.xlu0 %v5232_v2, 256 }
 0x441   : > { %v12835_v49 = vpop.permute.xlu1 %4778  ;;  %v12837_v25 = vpop.permute.xlu0 %4840 }
 0x442   : > { %16921 = vst [vmem:[#allocation114_spill] sm:$0xff] %v12835_v49  ;;  %16922 = vst [vmem:[#allocation110_spill] sm:$0xff] %v12837_v25  ;;  %v5265_v49 = vrot.slane %v16916_v28, %v16904_v15 }
 0x443   : > { %5161 = vbcast.lane.b32.xlu1 %v5155_v46, 264  ;;  %5245 = vbcast.lane.b32.xlu0 %v5243_v58, 256 }
 0x445   : > { %v12841_v42 = vpop.permute.xlu1 %4782  ;;  %v12843_v63 = vpop.permute.xlu0 %4844 }
 0x446   : > { %16923 = vst [vmem:[#allocation107_spill] sm:$0xff] %v12841_v42  ;;  %16924 = vst [vmem:[#allocation103_spill] sm:$0xff] %v12843_v63  ;;  %v5276_v42 = vrot.slane %v16916_v28, %v16908_v61 }
 0x447   : > { %5172 = vbcast.lane.b32.xlu1 %v5166_v39, 264  ;;  %5256 = vbcast.lane.b32.xlu0 %v5254_v53, 256 }
 0x449   : > { %v12847_v4 = vpop.permute.xlu1 %4802  ;;  %v12849_v57 = vpop.permute.xlu0 %4864 }
 0x44a   : > { %16925 = vst [vmem:[#allocation132_spill] sm:$0xff] %v12847_v4  ;;  %16926 = vst [vmem:[#allocation136_spill] sm:$0xff] %v12849_v57  ;;  %v5287_v4 = vrot.slane %v16916_v28, %v16912_v33 }
 0x44b   : > { %5183 = vbcast.lane.b32.xlu1 %v5177_v40, 264  ;;  %5267 = vbcast.lane.b32.xlu0 %v5265_v49, 256 }
 0x44d   : > { %v12853_v46 = vpop.permute.xlu1 %4806  ;;  %v12855_v43 = vpop.permute.xlu0 %4868 }
 0x44e   : > { %16927 = vst [vmem:[#allocation39_spill] sm:$0xff] %v12853_v46  ;;  %16928 = vst [vmem:[#allocation41_spill] sm:$0xff] %v12855_v43  ;;  %v16933_v46 = vld [vmem:[#allocation16_spill] sm:$0xff] }
 0x44f   : > { %5194 = vbcast.lane.b32.xlu1 %v5188_v41, 264  ;;  %5278 = vbcast.lane.b32.xlu0 %v5276_v42, 256  ;;  %v5298_v43 = vrot.slane %v16933_v46, %v16877_v6 }
 0x451   : > { %v12859_v39 = vpop.permute.xlu1 %4810  ;;  %v12861_v63 = vpop.permute.xlu0 %4872 }
 0x452   : > { %16929 = vst [vmem:[#allocation69_spill] sm:$0xff] %v12859_v39  ;;  %16930 = vst [vmem:[#allocation73_spill] sm:$0xff] %v12861_v63  ;;  %v5309_v39 = vrot.slane %v16933_v46, %v16884_v37 }
 0x453   : > { %5205 = vbcast.lane.b32.xlu1 %v5199_v8, 264  ;;  %5289 = vbcast.lane.b32.xlu0 %v5287_v4, 256 }
 0x455   : > { %v12865_v40 = vpop.permute.xlu1 %4814  ;;  %v12867_v57 = vpop.permute.xlu0 %4876 }
 0x456   : > { %16931 = vst [vmem:[#allocation102_spill] sm:$0xff] %v12865_v40  ;;  %16932 = vst [vmem:[#allocation105_spill] sm:$0xff] %v12867_v57  ;;  %v5320_v40 = vrot.slane %v16933_v46, %v16890_v35 }
 0x457   : > { %5216 = vbcast.lane.b32.xlu1 %v5210_v7, 264  ;;  %5300 = vbcast.lane.b32.xlu0 %v5298_v43, 256 }
 0x459   : > { %v12871_v41 = vpop.permute.xlu1 %4834  ;;  %v12873_v25 = vpop.permute.xlu0 %4896 }
 0x45a   : > { %16934 = vst [vmem:[#allocation146_spill] sm:$0xff] %v12871_v41  ;;  %16935 = vst [vmem:[#allocation152_spill] sm:$0xff] %v12873_v25  ;;  %v5331_v41 = vrot.slane %v16933_v46, %v16896_v48 }
 0x45b   : > { %5227 = vbcast.lane.b32.xlu1 %v5221_v13, 264  ;;  %5311 = vbcast.lane.b32.xlu0 %v5309_v39, 256 }
 0x45d   : > { %v12877_v8 = vpop.permute.xlu1 %4838  ;;  %v12879_v28 = vpop.permute.xlu0 %4900 }
 0x45e   : > { %16936 = vst [vmem:[#allocation135_spill] sm:$0xff] %v12877_v8  ;;  %16937 = vst [vmem:[#allocation137_spill] sm:$0xff] %v12879_v28  ;;  %v5342_v8 = vrot.slane %v16933_v46, %v16900_v17 }
 0x45f   : > { %5238 = vbcast.lane.b32.xlu1 %v5232_v2, 264  ;;  %5322 = vbcast.lane.b32.xlu0 %v5320_v40, 256 }
 0x461   : > { %v12883_v7 = vpop.permute.xlu1 %4842  ;;  %v12885_v57 = vpop.permute.xlu0 %4904 }
 0x462   : > { %16938 = vst [vmem:[#allocation55_spill] sm:$0xff] %v12883_v7  ;;  %16939 = vst [vmem:[#allocation54_spill] sm:$0xff] %v12885_v57  ;;  %v5353_v7 = vrot.slane %v16933_v46, %v16904_v15 }
 0x463   : > { %5249 = vbcast.lane.b32.xlu1 %v5243_v58, 264  ;;  %5333 = vbcast.lane.b32.xlu0 %v5331_v41, 256 }
 0x465   : > { %v12889_v13 = vpop.permute.xlu1 %4846  ;;  %v12891_v25 = vpop.permute.xlu0 %4908 }
 0x466   : > { %16940 = vst [vmem:[#allocation40_spill] sm:$0xff] %v12889_v13  ;;  %16941 = vst [vmem:[#allocation44_spill] sm:$0xff] %v12891_v25  ;;  %v5364_v13 = vrot.slane %v16933_v46, %v16908_v61 }
 0x467   : > { %5260 = vbcast.lane.b32.xlu1 %v5254_v53, 264  ;;  %5344 = vbcast.lane.b32.xlu0 %v5342_v8, 256 }
 0x469   : > { %v12895_v2 = vpop.permute.xlu1 %4866  ;;  %v12897_v28 = vpop.permute.xlu0 %4928 }
 0x46a   : > { %16942 = vst [vmem:[#allocation89_spill] sm:$0xff] %v12895_v2  ;;  %16943 = vst [vmem:[#allocation90_spill] sm:$0xff] %v12897_v28  ;;  %v5375_v2 = vrot.slane %v16933_v46, %v16912_v33 }
 0x46b   : > { %5271 = vbcast.lane.b32.xlu1 %v5265_v49, 264  ;;  %5355 = vbcast.lane.b32.xlu0 %v5353_v7, 256 }
 0x46d   : > { %v12901_v58 = vpop.permute.xlu1 %4870  ;;  %v12903_v57 = vpop.permute.xlu0 %4932 }
 0x46e   : > { %16944 = vst [vmem:[#allocation74_spill] sm:$0xff] %v12901_v58  ;;  %16945 = vst [vmem:[#allocation70_spill] sm:$0xff] %v12903_v57  ;;  %v16950_v58 = vld [vmem:[#allocation27_spill] sm:$0xff] }
 0x46f   : > { %5282 = vbcast.lane.b32.xlu1 %v5276_v42, 264  ;;  %5366 = vbcast.lane.b32.xlu0 %v5364_v13, 256  ;;  %v5386_v57 = vrot.slane %v16950_v58, %v16877_v6 }
 0x471   : > { %v12907_v53 = vpop.permute.xlu1 %4874  ;;  %v12909_v25 = vpop.permute.xlu0 %4936 }
 0x472   : > { %16946 = vst [vmem:[#allocation106_spill] sm:$0xff] %v12907_v53  ;;  %16947 = vst [vmem:[#allocation101_spill] sm:$0xff] %v12909_v25  ;;  %v5397_v53 = vrot.slane %v16950_v58, %v16884_v37 }
 0x473   : > { %5293 = vbcast.lane.b32.xlu1 %v5287_v4, 264  ;;  %5377 = vbcast.lane.b32.xlu0 %v5375_v2, 256 }
 0x475   : > { %v12913_v49 = vpop.permute.xlu1 %4878  ;;  %v12915_v28 = vpop.permute.xlu0 %4940 }
 0x476   : > { %16948 = vst [vmem:[#allocation8_spill] sm:$0xff] %v12913_v49  ;;  %16949 = vst [vmem:[#allocation14_spill] sm:$0xff] %v12915_v28  ;;  %v5408_v49 = vrot.slane %v16950_v58, %v16890_v35 }
 0x477   : > { %5304 = vbcast.lane.b32.xlu1 %v5298_v43, 264  ;;  %5388 = vbcast.lane.b32.xlu0 %v5386_v57, 256 }
 0x479   : > { %v12919_v42 = vpop.permute.xlu1 %4898  ;;  %v12921_v63 = vpop.permute.xlu0 %4960 }
 0x47a   : > { %16951 = vst [vmem:[#allocation150_spill] sm:$0xff] %v12919_v42  ;;  %16952 = vst [vmem:[#allocation153_spill] sm:$0xff] %v12921_v63  ;;  %v5419_v42 = vrot.slane %v16950_v58, %v16896_v48 }
 0x47b   : > { %5315 = vbcast.lane.b32.xlu1 %v5309_v39, 264  ;;  %5399 = vbcast.lane.b32.xlu0 %v5397_v53, 256 }
 0x47d   : > { %v12925_v4 = vpop.permute.xlu1 %4902  ;;  %v12927_v46 = vpop.permute.xlu0 %4964 }
 0x47e   : > { %16953 = vst [vmem:[#allocation18_spill] sm:$0xff] %v12925_v4  ;;  %16954 = vst [vmem:[#allocation64_spill] sm:$0xff] %v12927_v46  ;;  %v5430_v4 = vrot.slane %v16950_v58, %v16900_v17 }
 0x47f   : > { %5326 = vbcast.lane.b32.xlu1 %v5320_v40, 264  ;;  %5410 = vbcast.lane.b32.xlu0 %v5408_v49, 256 }
 0x481   : > { %v12931_v43 = vpop.permute.xlu1 %4906  ;;  %v12933_v28 = vpop.permute.xlu0 %4968 }
 0x482   : > { %16955 = vst [vmem:[#allocation58_spill] sm:$0xff] %v12931_v43  ;;  %16956 = vst [vmem:[#allocation19_spill] sm:$0xff] %v12933_v28  ;;  %v5441_v43 = vrot.slane %v16950_v58, %v16904_v15 }
 0x483   : > { %5337 = vbcast.lane.b32.xlu1 %v5331_v41, 264  ;;  %5421 = vbcast.lane.b32.xlu0 %v5419_v42, 256 }
 0x485   : > { %v12937_v39 = vpop.permute.xlu1 %4910  ;;  %v12939_v63 = vpop.permute.xlu0 %4972 }
 0x486   : > { %16957 = vst [vmem:[#allocation91_spill] sm:$0xff] %v12937_v39  ;;  %16958 = vst [vmem:[#allocation87_spill] sm:$0xff] %v12939_v63  ;;  %v5452_v39 = vrot.slane %v16950_v58, %v16908_v61 }
 0x487   : > { %5348 = vbcast.lane.b32.xlu1 %v5342_v8, 264  ;;  %5432 = vbcast.lane.b32.xlu0 %v5430_v4, 256 }
 0x489   : > { %v12943_v40 = vpop.permute.xlu1 %4930  ;;  %v12945_v46 = vpop.permute.xlu0 %5124 }
 0x48a   : > { %16959 = vst [vmem:[#allocation20_spill] sm:$0xff] %v12943_v40  ;;  %v5463_v40 = vrot.slane %v16950_v58, %v16912_v33 }
 0x48b   : > { %5359 = vbcast.lane.b32.xlu1 %v5353_v7, 264  ;;  %5443 = vbcast.lane.b32.xlu0 %v5441_v43, 256 }
 0x48d   : > { %v12949_v41 = vpop.permute.xlu1 %4934  ;;  %v12951_v28 = vpop.permute.xlu0 %5135 }
 0x48e   : > { %16960 = vst [vmem:[#allocation21_spill] sm:$0xff] %v12949_v41  ;;  %v16963_v41 = vld [vmem:[#allocation9_spill] sm:$0xff] }
 0x48f   : > { %5370 = vbcast.lane.b32.xlu1 %v5364_v13, 264  ;;  %5454 = vbcast.lane.b32.xlu0 %v5452_v39, 256  ;;  %v5474_v9 = vrot.slane %v16963_v41, %v16877_v6  ;;  %v5551_v1 = vrot.slane %v16963_v41, %v16912_v33 }
 0x491   : > { %v12955_v8 = vpop.permute.xlu1 %4938  ;;  %v12957_v63 = vpop.permute.xlu0 %5146 }
 0x492   : > { %16961 = vst [vmem:[#allocation22_spill] sm:$0xff] %v12955_v8  ;;  %v5485_v8 = vrot.slane %v16963_v41, %v16884_v37 }
 0x493   : > { %5381 = vbcast.lane.b32.xlu1 %v5375_v2, 264  ;;  %5465 = vbcast.lane.b32.xlu0 %v5463_v40, 256 }
 0x495   : > { %v12961_v7 = vpop.permute.xlu1 %4942  ;;  %v12963_v25 = vpop.permute.xlu0 %5157 }
 0x496   : > { %16962 = vst [vmem:[#allocation23_spill] sm:$0xff] %v12961_v7  ;;  %v5496_v7 = vrot.slane %v16963_v41, %v16890_v35 }
 0x497   : > { %5392 = vbcast.lane.b32.xlu1 %v5386_v57, 264  ;;  %5476 = vbcast.lane.b32.xlu0 %v5474_v9, 256 }
 0x499   : > { %v12967_v13 = vpop.permute.xlu1 %4962  ;;  %v12969_v56 = vpop.permute.xlu0 %5168 }
 0x49a   : > { %16964 = vst [vmem:[#allocation24_spill] sm:$0xff] %v12967_v13  ;;  %v5507_v13 = vrot.slane %v16963_v41, %v16896_v48 }
 0x49b   : > { %5403 = vbcast.lane.b32.xlu1 %v5397_v53, 264  ;;  %5487 = vbcast.lane.b32.xlu0 %v5485_v8, 256 }
 0x49d   : > { %v12973_v2 = vpop.permute.xlu1 %4966  ;;  %v12975_v58 = vpop.permute.xlu0 %5179 }
 0x49e   : > { %16965 = vst [vmem:[#allocation25_spill] sm:$0xff] %v12973_v2  ;;  %v5518_v2 = vrot.slane %v16963_v41, %v16900_v17 }
 0x49f   : > { %5414 = vbcast.lane.b32.xlu1 %v5408_v49, 264  ;;  %5498 = vbcast.lane.b32.xlu0 %v5496_v7, 256 }
 0x4a1   : > { %v12979_v57 = vpop.permute.xlu1 %4970  ;;  %v12981_v12 = vpop.permute.xlu0 %5190 }
 0x4a2   : > { %16966 = vst [vmem:[#allocation16_spill] sm:$0xff] %v12979_v57  ;;  %v5529_v57 = vrot.slane %v16963_v41, %v16904_v15 }
 0x4a3   : > { %5425 = vbcast.lane.b32.xlu1 %v5419_v42, 264  ;;  %5509 = vbcast.lane.b32.xlu0 %v5507_v13, 256 }
 0x4a5   : > { %v12985_v53 = vpop.permute.xlu1 %4974  ;;  %v12987_v30 = vpop.permute.xlu0 %5201 }
 0x4a6   : > { %16967 = vst [vmem:[#allocation27_spill] sm:$0xff] %v12985_v53  ;;  %v5540_v53 = vrot.slane %v16963_v41, %v16908_v61 }
 0x4a7   : > { %5436 = vbcast.lane.b32.xlu1 %v5430_v4, 264  ;;  %5520 = vbcast.lane.b32.xlu0 %v5518_v2, 256 }
 0x4a9   : > { %v12991_v49 = vpop.permute.xlu1 %5128  ;;  %v12993_v16 = vpop.permute.xlu0 %5212 }
 0x4ab   : > { %5447 = vbcast.lane.b32.xlu1 %v5441_v43, 264  ;;  %5531 = vbcast.lane.b32.xlu0 %v5529_v57, 256 }
 0x4ad   : > { %v12997_v42 = vpop.permute.xlu1 %5139  ;;  %v12999_v26 = vpop.permute.xlu0 %5223 }
 0x4af   : > { %5458 = vbcast.lane.b32.xlu1 %v5452_v39, 264  ;;  %5542 = vbcast.lane.b32.xlu0 %v5540_v53, 256 }
 0x4b1   : > { %v13003_v4 = vpop.permute.xlu1 %5150  ;;  %v13005_v3 = vpop.permute.xlu0 %5234 }
 0x4b3   : > { %5469 = vbcast.lane.b32.xlu1 %v5463_v40, 264  ;;  %5553 = vbcast.lane.b32.xlu0 %v5551_v1, 256 }
 0x4b5   : > { %v13009_v43 = vpop.permute.xlu1 %5161  ;;  %v13011_v14 = vpop.permute.xlu0 %5245 }
 0x4b7   : > { %5480 = vbcast.lane.b32.xlu1 %v5474_v9, 264  ;;  %5564 = vbcast.lane.b32.xlu0 %v5562_v52, 256 }
 0x4b9   : > { %v13015_v39 = vpop.permute.xlu1 %5172  ;;  %v13017_v23 = vpop.permute.xlu0 %5256 }
 0x4bb   : > { %5491 = vbcast.lane.b32.xlu1 %v5485_v8, 264  ;;  %5575 = vbcast.lane.b32.xlu0 %v5573_v50, 256 }
 0x4bd   : > { %v13021_v40 = vpop.permute.xlu1 %5183  ;;  %v13023_v41 = vpop.permute.xlu0 %5267 }
 0x4bf   : > { %5502 = vbcast.lane.b32.xlu1 %v5496_v7, 264  ;;  %5586 = vbcast.lane.b32.xlu0 %v5584_v5, 256 }
 0x4c1   : > { %v13027_v9 = vpop.permute.xlu1 %5194  ;;  %v13029_v60 = vpop.permute.xlu0 %5278 }
 0x4c3   : > { %5513 = vbcast.lane.b32.xlu1 %v5507_v13, 264  ;;  %5597 = vbcast.lane.b32.xlu0 %v5595_v20, 256 }
 0x4c5   : > { %v13033_v8 = vpop.permute.xlu1 %5205  ;;  %v13035_v59 = vpop.permute.xlu0 %5289 }
 0x4c7   : > { %5524 = vbcast.lane.b32.xlu1 %v5518_v2, 264  ;;  %5608 = vbcast.lane.b32.xlu0 %v5606_v38, 256 }
 0x4c9   : > { %v13039_v7 = vpop.permute.xlu1 %5216  ;;  %v13041_v44 = vpop.permute.xlu0 %5300 }
 0x4cb   : > { %5535 = vbcast.lane.b32.xlu1 %v5529_v57, 264  ;;  %5619 = vbcast.lane.b32.xlu0 %v5617_v31, 256 }
 0x4cd   : > { %v13045_v13 = vpop.permute.xlu1 %5227  ;;  %v13047_v19 = vpop.permute.xlu0 %5311 }
 0x4cf   : > { %5546 = vbcast.lane.b32.xlu1 %v5540_v53, 264  ;;  %5630 = vbcast.lane.b32.xlu0 %v5628_v45, 256 }
 0x4d1   : > { %v13051_v2 = vpop.permute.xlu1 %5238  ;;  %v13053_v36 = vpop.permute.xlu0 %5322 }
 0x4d3   : > { %5557 = vbcast.lane.b32.xlu1 %v5551_v1, 264  ;;  %5641 = vbcast.lane.b32.xlu0 %v5639_v55, 256 }
 0x4d5   : > { %v13057_v57 = vpop.permute.xlu1 %5249  ;;  %v13059_v10 = vpop.permute.xlu0 %5333 }
 0x4d7   : > { %5568 = vbcast.lane.b32.xlu1 %v5562_v52, 264  ;;  %5652 = vbcast.lane.b32.xlu0 %v5650_v34, 256 }
 0x4d9   : > { %v13063_v53 = vpop.permute.xlu1 %5260  ;;  %v13065_v32 = vpop.permute.xlu0 %5344 }
 0x4da   : > { %16970 = vst [vmem:[#allocation9_spill] sm:$0xff] %v13063_v53  ;;  %16971 = vst [vmem:[#allocation29_spill] sm:$0xff] %v13065_v32 }
 0x4db   : > { %5579 = vbcast.lane.b32.xlu1 %v5573_v50, 264  ;;  %5663 = vbcast.lane.b32.xlu0 %v5661_v24, 256 }
 0x4dd   : > { %v13069_v1 = vpop.permute.xlu1 %5271  ;;  %v13071_v22 = vpop.permute.xlu0 %5355 }
 0x4de   : > { %16972 = vst [vmem:[#allocation12_spill] sm:$0xff] %v13069_v1  ;;  %16973 = vst [vmem:[#allocation156_spill] sm:$0xff] %v13071_v22 }
 0x4df   : > { %5590 = vbcast.lane.b32.xlu1 %v5584_v5, 264  ;;  %5674 = vbcast.lane.b32.xlu0 %v5672_v27, 256 }
 0x4e1   : > { %v13075_v52 = vpop.permute.xlu1 %5282  ;;  %v13077_v54 = vpop.permute.xlu0 %5366 }
 0x4e2   : > { %16974 = vst [vmem:[#allocation157_spill] sm:$0xff] %v13075_v52  ;;  %16975 = vst [vmem:[#allocation158_spill] sm:$0xff] %v13077_v54 }
 0x4e3   : > { %5601 = vbcast.lane.b32.xlu1 %v5595_v20, 264  ;;  %5685 = vbcast.lane.b32.xlu0 %v5683_v29, 256 }
 0x4e5   : > { %v13081_v50 = vpop.permute.xlu1 %5293  ;;  %v13083_v51 = vpop.permute.xlu0 %5377 }
 0x4e6   : > { %16976 = vst [vmem:[#allocation159_spill] sm:$0xff] %v13081_v50  ;;  %16977 = vst [vmem:[#allocation160_spill] sm:$0xff] %v13083_v51  ;;  %v5716_v51 = vrot.slane %v16969_v21, %v16908_v61 }
 0x4e7   : > { %5612 = vbcast.lane.b32.xlu1 %v5606_v38, 264  ;;  %5696 = vbcast.lane.b32.xlu0 %v5694_v18, 256 }
 0x4e9   : > { %v13087_v5 = vpop.permute.xlu1 %5304  ;;  %v13089_v62 = vpop.permute.xlu0 %5388 }
 0x4ea   : > { %16978 = vst [vmem:[#allocation161_spill] sm:$0xff] %v13087_v5  ;;  %16979 = vst [vmem:[#allocation162_spill] sm:$0xff] %v13089_v62  ;;  %v5727_v62 = vrot.slane %v16969_v21, %v16912_v33 }
 0x4eb   : > { %5623 = vbcast.lane.b32.xlu1 %v5617_v31, 264  ;;  %5707 = vbcast.lane.b32.xlu0 %v5705_v0, 256 }
 0x4ed   : > { %v13093_v20 = vpop.permute.xlu1 %5315  ;;  %v13095_v22 = vpop.permute.xlu0 %5399 }
 0x4ee   : > { %16980 = vst [vmem:[#allocation163_spill] sm:$0xff] %v13093_v20  ;;  %16981 = vst [vmem:[#allocation164_spill] sm:$0xff] %v13095_v22  ;;  %v16986_v22 = vld [vmem:[#allocation32_spill] sm:$0xff] }
 0x4ef   : > { %5634 = vbcast.lane.b32.xlu1 %v5628_v45, 264  ;;  %5718 = vbcast.lane.b32.xlu0 %v5716_v51, 256  ;;  %v5738_v20 = vrot.slane %v16986_v22, %v16877_v6 }
 0x4f1   : > { %v13099_v38 = vpop.permute.xlu1 %5326  ;;  %v13101_v50 = vpop.permute.xlu0 %5410 }
 0x4f2   : > { %16982 = vst [vmem:[#allocation165_spill] sm:$0xff] %v13099_v38  ;;  %16983 = vst [vmem:[#allocation166_spill] sm:$0xff] %v13101_v50  ;;  %v5749_v50 = vrot.slane %v16986_v22, %v16884_v37 }
 0x4f3   : > { %5645 = vbcast.lane.b32.xlu1 %v5639_v55, 264  ;;  %5729 = vbcast.lane.b32.xlu0 %v5727_v62, 256 }
 0x4f5   : > { %v13105_v31 = vpop.permute.xlu1 %5337  ;;  %v13107_v5 = vpop.permute.xlu0 %5421 }
 0x4f6   : > { %16984 = vst [vmem:[#allocation167_spill] sm:$0xff] %v13105_v31  ;;  %16985 = vst [vmem:[#allocation168_spill] sm:$0xff] %v13107_v5  ;;  %v5760_v5 = vrot.slane %v16986_v22, %v16890_v35 }
 0x4f7   : > { %5656 = vbcast.lane.b32.xlu1 %v5650_v34, 264  ;;  %5740 = vbcast.lane.b32.xlu0 %v5738_v20, 256 }
 0x4f9   : > { %v13111_v45 = vpop.permute.xlu1 %5348  ;;  %v13113_v1 = vpop.permute.xlu0 %5432 }
 0x4fa   : > { %16987 = vst [vmem:[#allocation32_spill] sm:$0xff] %v13111_v45  ;;  %16988 = vst [vmem:[#allocation169_spill] sm:$0xff] %v13113_v1  ;;  %v5771_v1 = vrot.slane %v16986_v22, %v16896_v48 }
 0x4fb   : > { %5667 = vbcast.lane.b32.xlu1 %v5661_v24, 264  ;;  %5751 = vbcast.lane.b32.xlu0 %v5749_v50, 256 }
 0x4fd   : > { %v13117_v21 = vpop.permute.xlu1 %5359  ;;  %v13119_v55 = vpop.permute.xlu0 %5443 }
 0x4fe   : > { %16989 = vst [vmem:[#allocation170_spill] sm:$0xff] %v13117_v21  ;;  %16990 = vst [vmem:[#allocation171_spill] sm:$0xff] %v13119_v55  ;;  %v5782_v55 = vrot.slane %v16986_v22, %v16900_v17 }
 0x4ff   : > { %5678 = vbcast.lane.b32.xlu1 %v5672_v27, 264  ;;  %5762 = vbcast.lane.b32.xlu0 %v5760_v5, 256 }
 0x501   : > { %v13123_v34 = vpop.permute.xlu1 %5370  ;;  %v13125_v31 = vpop.permute.xlu0 %5454 }
 0x502   : > { %16991 = vst [vmem:[#allocation172_spill] sm:$0xff] %v13123_v34  ;;  %16992 = vst [vmem:[#allocation173_spill] sm:$0xff] %v13125_v31  ;;  %v5793_v31 = vrot.slane %v16986_v22, %v16904_v15 }
 0x503   : > { %5689 = vbcast.lane.b32.xlu1 %v5683_v29, 264  ;;  %5773 = vbcast.lane.b32.xlu0 %v5771_v1, 256 }
 0x505   : > { %v13129_v24 = vpop.permute.xlu1 %5381  ;;  %v13131_v45 = vpop.permute.xlu0 %5465 }
 0x506   : > { %16993 = vst [vmem:[#allocation174_spill] sm:$0xff] %v13129_v24  ;;  %16994 = vst [vmem:[#allocation175_spill] sm:$0xff] %v13131_v45  ;;  %v5804_v45 = vrot.slane %v16986_v22, %v16908_v61 }
 0x507   : > { %5700 = vbcast.lane.b32.xlu1 %v5694_v18, 264  ;;  %5784 = vbcast.lane.b32.xlu0 %v5782_v55, 256 }
 0x509   : > { %v13135_v27 = vpop.permute.xlu1 %5392  ;;  %v13137_v21 = vpop.permute.xlu0 %5476 }
 0x50a   : > { %16995 = vst [vmem:[#allocation176_spill] sm:$0xff] %v13135_v27  ;;  %16996 = vst [vmem:[#allocation177_spill] sm:$0xff] %v13137_v21  ;;  %v5815_v21 = vrot.slane %v16986_v22, %v16912_v33 }
 0x50b   : > { %5711 = vbcast.lane.b32.xlu1 %v5705_v0, 264  ;;  %5795 = vbcast.lane.b32.xlu0 %v5793_v31, 256 }
 0x50d   : > { %v13141_v29 = vpop.permute.xlu1 %5403  ;;  %v13143_v34 = vpop.permute.xlu0 %5487 }
 0x50e   : > { %16997 = vst [vmem:[#allocation178_spill] sm:$0xff] %v13141_v29  ;;  %16998 = vst [vmem:[#allocation179_spill] sm:$0xff] %v13143_v34  ;;  %v17003_v34 = vld [vmem:[#allocation15_spill] sm:$0xff] }
 0x50f   : > { %5722 = vbcast.lane.b32.xlu1 %v5716_v51, 264  ;;  %5806 = vbcast.lane.b32.xlu0 %v5804_v45, 256  ;;  %v5826_v29 = vrot.slane %v17003_v34, %v16877_v6 }
 0x511   : > { %v13147_v18 = vpop.permute.xlu1 %5414  ;;  %v13149_v24 = vpop.permute.xlu0 %5498 }
 0x512   : > { %16999 = vst [vmem:[#allocation180_spill] sm:$0xff] %v13147_v18  ;;  %17000 = vst [vmem:[#allocation181_spill] sm:$0xff] %v13149_v24  ;;  %v5837_v24 = vrot.slane %v17003_v34, %v16884_v37 }
 0x513   : > { %5733 = vbcast.lane.b32.xlu1 %v5727_v62, 264  ;;  %5817 = vbcast.lane.b32.xlu0 %v5815_v21, 256 }
 0x515   : > { %v13153_v0 = vpop.permute.xlu1 %5425  ;;  %v13155_v27 = vpop.permute.xlu0 %5509 }
 0x516   : > { %17001 = vst [vmem:[#allocation182_spill] sm:$0xff] %v13153_v0  ;;  %17002 = vst [vmem:[#allocation183_spill] sm:$0xff] %v13155_v27  ;;  %v5848_v27 = vrot.slane %v17003_v34, %v16890_v35 }
 0x517   : > { %5744 = vbcast.lane.b32.xlu1 %v5738_v20, 264  ;;  %5828 = vbcast.lane.b32.xlu0 %v5826_v29, 256 }
 0x519   : > { %v13159_v51 = vpop.permute.xlu1 %5436  ;;  %v13161_v38 = vpop.permute.xlu0 %5520 }
 0x51a   : > { %17004 = vst [vmem:[#allocation15_spill] sm:$0xff] %v13159_v51  ;;  %17005 = vst [vmem:[#allocation184_spill] sm:$0xff] %v13161_v38  ;;  %v5859_v38 = vrot.slane %v17003_v34, %v16896_v48 }
 0x51b   : > { %5755 = vbcast.lane.b32.xlu1 %v5749_v50, 264  ;;  %5839 = vbcast.lane.b32.xlu0 %v5837_v24, 256 }
 0x51d   : > { %v13165_v62 = vpop.permute.xlu1 %5447  ;;  %v13167_v22 = vpop.permute.xlu0 %5531 }
 0x51e   : > { %17006 = vst [vmem:[#allocation185_spill] sm:$0xff] %v13165_v62  ;;  %17007 = vst [vmem:[#allocation186_spill] sm:$0xff] %v13167_v22  ;;  %v5870_v22 = vrot.slane %v17003_v34, %v16900_v17 }
 0x51f   : > { %5766 = vbcast.lane.b32.xlu1 %v5760_v5, 264  ;;  %5850 = vbcast.lane.b32.xlu0 %v5848_v27, 256 }
 0x521   : > { %v13171_v20 = vpop.permute.xlu1 %5458  ;;  %v13173_v0 = vpop.permute.xlu0 %5542 }
 0x522   : > { %17008 = vst [vmem:[#allocation187_spill] sm:$0xff] %v13171_v20  ;;  %17009 = vst [vmem:[#allocation188_spill] sm:$0xff] %v13173_v0  ;;  %v5881_v0 = vrot.slane %v17003_v34, %v16904_v15 }
 0x523   : > { %5777 = vbcast.lane.b32.xlu1 %v5771_v1, 264  ;;  %5861 = vbcast.lane.b32.xlu0 %v5859_v38, 256 }
 0x525   : > { %v13177_v50 = vpop.permute.xlu1 %5469  ;;  %v13179_v51 = vpop.permute.xlu0 %5553 }
 0x526   : > { %17010 = vst [vmem:[#allocation189_spill] sm:$0xff] %v13177_v50  ;;  %17011 = vst [vmem:[#allocation190_spill] sm:$0xff] %v13179_v51  ;;  %v5892_v51 = vrot.slane %v17003_v34, %v16908_v61 }
 0x527   : > { %5788 = vbcast.lane.b32.xlu1 %v5782_v55, 264  ;;  %5872 = vbcast.lane.b32.xlu0 %v5870_v22, 256 }
 0x529   : > { %v13183_v5 = vpop.permute.xlu1 %5480  ;;  %v13185_v62 = vpop.permute.xlu0 %5564 }
 0x52a   : > { %17012 = vst [vmem:[#allocation191_spill] sm:$0xff] %v13183_v5  ;;  %17013 = vst [vmem:[#allocation192_spill] sm:$0xff] %v13185_v62  ;;  %v5903_v62 = vrot.slane %v17003_v34, %v16912_v33 }
 0x52b   : > { %5799 = vbcast.lane.b32.xlu1 %v5793_v31, 264  ;;  %5883 = vbcast.lane.b32.xlu0 %v5881_v0, 256 }
 0x52d   : > { %v13189_v1 = vpop.permute.xlu1 %5491  ;;  %v13191_v20 = vpop.permute.xlu0 %5575 }
 0x52e   : > { %17014 = vst [vmem:[#allocation193_spill] sm:$0xff] %v13189_v1  ;;  %17015 = vst [vmem:[#allocation194_spill] sm:$0xff] %v13191_v20  ;;  %v17020_v20 = vld [vmem:[#allocation26_spill] sm:$0xff] }
 0x52f   : > { %5810 = vbcast.lane.b32.xlu1 %v5804_v45, 264  ;;  %5894 = vbcast.lane.b32.xlu0 %v5892_v51, 256  ;;  %v5914_v1 = vrot.slane %v17020_v20, %v16877_v6 }
 0x531   : > { %v13195_v55 = vpop.permute.xlu1 %5502  ;;  %v13197_v50 = vpop.permute.xlu0 %5586 }
 0x532   : > { %17016 = vst [vmem:[#allocation195_spill] sm:$0xff] %v13195_v55  ;;  %17017 = vst [vmem:[#allocation196_spill] sm:$0xff] %v13197_v50  ;;  %v5925_v50 = vrot.slane %v17020_v20, %v16884_v37 }
 0x533   : > { %5821 = vbcast.lane.b32.xlu1 %v5815_v21, 264  ;;  %5905 = vbcast.lane.b32.xlu0 %v5903_v62, 256 }
 0x535   : > { %v13201_v31 = vpop.permute.xlu1 %5513  ;;  %v13203_v5 = vpop.permute.xlu0 %5597 }
 0x536   : > { %17018 = vst [vmem:[#allocation197_spill] sm:$0xff] %v13201_v31  ;;  %17019 = vst [vmem:[#allocation198_spill] sm:$0xff] %v13203_v5  ;;  %v5936_v5 = vrot.slane %v17020_v20, %v16890_v35 }
 0x537   : > { %5832 = vbcast.lane.b32.xlu1 %v5826_v29, 264  ;;  %5916 = vbcast.lane.b32.xlu0 %v5914_v1, 256 }
 0x539   : > { %v13207_v45 = vpop.permute.xlu1 %5524  ;;  %v13209_v18 = vpop.permute.xlu0 %5608 }
 0x53a   : > { %17021 = vst [vmem:[#allocation26_spill] sm:$0xff] %v13207_v45  ;;  %17022 = vst [vmem:[#allocation199_spill] sm:$0xff] %v13209_v18  ;;  %v5947_v18 = vrot.slane %v17020_v20, %v16896_v48 }
 0x53b   : > { %5843 = vbcast.lane.b32.xlu1 %v5837_v24, 264  ;;  %5927 = vbcast.lane.b32.xlu0 %v5925_v50, 256 }
 0x53d   : > { %v13213_v21 = vpop.permute.xlu1 %5535  ;;  %v13215_v34 = vpop.permute.xlu0 %5619 }
 0x53e   : > { %17023 = vst [vmem:[#allocation200_spill] sm:$0xff] %v13213_v21  ;;  %17024 = vst [vmem:[#allocation201_spill] sm:$0xff] %v13215_v34  ;;  %v5958_v34 = vrot.slane %v17020_v20, %v16900_v17 }
 0x53f   : > { %5854 = vbcast.lane.b32.xlu1 %v5848_v27, 264  ;;  %5938 = vbcast.lane.b32.xlu0 %v5936_v5, 256 }
 0x541   : > { %v13219_v29 = vpop.permute.xlu1 %5546  ;;  %v13221_v31 = vpop.permute.xlu0 %5630 }
 0x542   : > { %17025 = vst [vmem:[#allocation202_spill] sm:$0xff] %v13219_v29  ;;  %17026 = vst [vmem:[#allocation203_spill] sm:$0xff] %v13221_v31  ;;  %v5969_v31 = vrot.slane %v17020_v20, %v16904_v15 }
 0x543   : > { %5865 = vbcast.lane.b32.xlu1 %v5859_v38, 264  ;;  %5949 = vbcast.lane.b32.xlu0 %v5947_v18, 256 }
 0x545   : > { %v13225_v24 = vpop.permute.xlu1 %5557  ;;  %v13227_v45 = vpop.permute.xlu0 %5641 }
 0x546   : > { %17027 = vst [vmem:[#allocation204_spill] sm:$0xff] %v13225_v24  ;;  %17028 = vst [vmem:[#allocation205_spill] sm:$0xff] %v13227_v45  ;;  %v5980_v45 = vrot.slane %v17020_v20, %v16908_v61 }
 0x547   : > { %5876 = vbcast.lane.b32.xlu1 %v5870_v22, 264  ;;  %5960 = vbcast.lane.b32.xlu0 %v5958_v34, 256 }
 0x549   : > { %v13231_v27 = vpop.permute.xlu1 %5568  ;;  %v13233_v21 = vpop.permute.xlu0 %5652 }
 0x54a   : > { %17029 = vst [vmem:[#allocation206_spill] sm:$0xff] %v13231_v27  ;;  %17030 = vst [vmem:[#allocation207_spill] sm:$0xff] %v13233_v21  ;;  %v5991_v21 = vrot.slane %v17020_v20, %v16912_v33 }
 0x54b   : > { %5887 = vbcast.lane.b32.xlu1 %v5881_v0, 264  ;;  %5971 = vbcast.lane.b32.xlu0 %v5969_v31, 256 }
 0x54d   : > { %v13237_v38 = vpop.permute.xlu1 %5579  ;;  %v13239_v29 = vpop.permute.xlu0 %5663 }
 0x54e   : > { %17031 = vst [vmem:[#allocation208_spill] sm:$0xff] %v13237_v38  ;;  %17032 = vst [vmem:[#allocation209_spill] sm:$0xff] %v13239_v29  ;;  %v17037_v29 = vld [vmem:[#allocation17_spill] sm:$0xff] }
 0x54f   : > { %5898 = vbcast.lane.b32.xlu1 %v5892_v51, 264  ;;  %5982 = vbcast.lane.b32.xlu0 %v5980_v45, 256  ;;  %v6002_v38 = vrot.slane %v17037_v29, %v16877_v6 }
 0x551   : > { %v13243_v22 = vpop.permute.xlu1 %5590  ;;  %v13245_v24 = vpop.permute.xlu0 %5674 }
 0x552   : > { %17033 = vst [vmem:[#allocation210_spill] sm:$0xff] %v13243_v22  ;;  %17034 = vst [vmem:[#allocation211_spill] sm:$0xff] %v13245_v24  ;;  %v6013_v24 = vrot.slane %v17037_v29, %v16884_v37 }
 0x553   : > { %5909 = vbcast.lane.b32.xlu1 %v5903_v62, 264  ;;  %5993 = vbcast.lane.b32.xlu0 %v5991_v21, 256 }
 0x555   : > { %v13249_v0 = vpop.permute.xlu1 %5601  ;;  %v13251_v27 = vpop.permute.xlu0 %5685 }
 0x556   : > { %17035 = vst [vmem:[#allocation212_spill] sm:$0xff] %v13249_v0  ;;  %17036 = vst [vmem:[#allocation213_spill] sm:$0xff] %v13251_v27  ;;  %v6024_v27 = vrot.slane %v17037_v29, %v16890_v35 }
 0x557   : > { %5920 = vbcast.lane.b32.xlu1 %v5914_v1, 264  ;;  %6004 = vbcast.lane.b32.xlu0 %v6002_v38, 256 }
 0x559   : > { %v13255_v51 = vpop.permute.xlu1 %5612  ;;  %v13257_v55 = vpop.permute.xlu0 %5696 }
 0x55a   : > { %17038 = vst [vmem:[#allocation17_spill] sm:$0xff] %v13255_v51  ;;  %17039 = vst [vmem:[#allocation214_spill] sm:$0xff] %v13257_v55  ;;  %v6035_v55 = vrot.slane %v17037_v29, %v16896_v48 }
 0x55b   : > { %5931 = vbcast.lane.b32.xlu1 %v5925_v50, 264  ;;  %6015 = vbcast.lane.b32.xlu0 %v6013_v24, 256 }
 0x55d   : > { %v13261_v62 = vpop.permute.xlu1 %5623  ;;  %v13263_v20 = vpop.permute.xlu0 %5707 }
 0x55e   : > { %17040 = vst [vmem:[#allocation215_spill] sm:$0xff] %v13261_v62  ;;  %17041 = vst [vmem:[#allocation216_spill] sm:$0xff] %v13263_v20  ;;  %v6046_v20 = vrot.slane %v17037_v29, %v16900_v17 }
 0x55f   : > { %5942 = vbcast.lane.b32.xlu1 %v5936_v5, 264  ;;  %6026 = vbcast.lane.b32.xlu0 %v6024_v27, 256 }
 0x561   : > { %v13267_v1 = vpop.permute.xlu1 %5634  ;;  %v13269_v0 = vpop.permute.xlu0 %5718 }
 0x562   : > { %17042 = vst [vmem:[#allocation217_spill] sm:$0xff] %v13267_v1  ;;  %17043 = vst [vmem:[#allocation218_spill] sm:$0xff] %v13269_v0  ;;  %v6057_v0 = vrot.slane %v17037_v29, %v16904_v15 }
 0x563   : > { %5953 = vbcast.lane.b32.xlu1 %v5947_v18, 264  ;;  %6037 = vbcast.lane.b32.xlu0 %v6035_v55, 256 }
 0x565   : > { %v13273_v50 = vpop.permute.xlu1 %5645  ;;  %v13275_v51 = vpop.permute.xlu0 %5729 }
 0x566   : > { %17044 = vst [vmem:[#allocation219_spill] sm:$0xff] %v13273_v50  ;;  %17045 = vst [vmem:[#allocation220_spill] sm:$0xff] %v13275_v51  ;;  %v6068_v51 = vrot.slane %v17037_v29, %v16908_v61 }
 0x567   : > { %5964 = vbcast.lane.b32.xlu1 %v5958_v34, 264  ;;  %6048 = vbcast.lane.b32.xlu0 %v6046_v20, 256 }
 0x569   : > { %v13279_v5 = vpop.permute.xlu1 %5656  ;;  %v13281_v62 = vpop.permute.xlu0 %5740 }
 0x56a   : > { %17046 = vst [vmem:[#allocation221_spill] sm:$0xff] %v13279_v5  ;;  %17047 = vst [vmem:[#allocation222_spill] sm:$0xff] %v13281_v62  ;;  %v6079_v62 = vrot.slane %v17037_v29, %v16912_v33 }
 0x56b   : > { %5975 = vbcast.lane.b32.xlu1 %v5969_v31, 264  ;;  %6059 = vbcast.lane.b32.xlu0 %v6057_v0, 256 }
 0x56d   : > { %v13285_v18 = vpop.permute.xlu1 %5667  ;;  %v13287_v1 = vpop.permute.xlu0 %5751 }
 0x56e   : > { %17048 = vst [vmem:[#allocation223_spill] sm:$0xff] %v13285_v18  ;;  %17049 = vst [vmem:[#allocation224_spill] sm:$0xff] %v13287_v1  ;;  %v17054_v1 = vld [vmem:[#allocation28_spill] sm:$0xff] }
 0x56f   : > { %5986 = vbcast.lane.b32.xlu1 %v5980_v45, 264  ;;  %6070 = vbcast.lane.b32.xlu0 %v6068_v51, 256  ;;  %v6090_v18 = vrot.slane %v17054_v1, %v16877_v6 }
 0x571   : > { %v13291_v34 = vpop.permute.xlu1 %5678  ;;  %v13293_v50 = vpop.permute.xlu0 %5762 }
 0x572   : > { %17050 = vst [vmem:[#allocation225_spill] sm:$0xff] %v13291_v34  ;;  %17051 = vst [vmem:[#allocation226_spill] sm:$0xff] %v13293_v50  ;;  %v6101_v50 = vrot.slane %v17054_v1, %v16884_v37 }
 0x573   : > { %5997 = vbcast.lane.b32.xlu1 %v5991_v21, 264  ;;  %6081 = vbcast.lane.b32.xlu0 %v6079_v62, 256 }
 0x575   : > { %v13297_v31 = vpop.permute.xlu1 %5689  ;;  %v13299_v5 = vpop.permute.xlu0 %5773 }
 0x576   : > { %17052 = vst [vmem:[#allocation227_spill] sm:$0xff] %v13297_v31  ;;  %17053 = vst [vmem:[#allocation228_spill] sm:$0xff] %v13299_v5  ;;  %v6112_v5 = vrot.slane %v17054_v1, %v16890_v35 }
 0x577   : > { %6008 = vbcast.lane.b32.xlu1 %v6002_v38, 264  ;;  %6092 = vbcast.lane.b32.xlu0 %v6090_v18, 256 }
 0x579   : > { %v13303_v45 = vpop.permute.xlu1 %5700  ;;  %v13305_v22 = vpop.permute.xlu0 %5784 }
 0x57a   : > { %17055 = vst [vmem:[#allocation28_spill] sm:$0xff] %v13303_v45  ;;  %17056 = vst [vmem:[#allocation229_spill] sm:$0xff] %v13305_v22  ;;  %v6123_v22 = vrot.slane %v17054_v1, %v16896_v48 }
 0x57b   : > { %6019 = vbcast.lane.b32.xlu1 %v6013_v24, 264  ;;  %6103 = vbcast.lane.b32.xlu0 %v6101_v50, 256 }
 0x57d   : > { %v13309_v21 = vpop.permute.xlu1 %5711  ;;  %v13311_v29 = vpop.permute.xlu0 %5795 }
 0x57e   : > { %17057 = vst [vmem:[#allocation230_spill] sm:$0xff] %v13309_v21  ;;  %17058 = vst [vmem:[#allocation231_spill] sm:$0xff] %v13311_v29  ;;  %v13327_v29 = vrot.slane %v17054_v1, %v16900_v17 }
 0x57f   : > { %6030 = vbcast.lane.b32.xlu1 %v6024_v27, 264  ;;  %6114 = vbcast.lane.b32.xlu0 %v6112_v5, 256 }
 0x581   : > { %v13315_v38 = vpop.permute.xlu1 %5722  ;;  %v13317_v31 = vpop.permute.xlu0 %5806 }
 0x582   : > { %17059 = vst [vmem:[#allocation232_spill] sm:$0xff] %v13315_v38  ;;  %17060 = vst [vmem:[#allocation233_spill] sm:$0xff] %v13317_v31  ;;  %v13334_v31 = vrot.slane %v17054_v1, %v16904_v15  ;;  %v13348_v38 = vrot.slane %v17054_v1, %v16912_v33 }
 0x583   : > { %6041 = vbcast.lane.b32.xlu1 %v6035_v55, 264  ;;  %6125 = vbcast.lane.b32.xlu0 %v6123_v22, 256 }
 0x585   : > { %v13321_v24 = vpop.permute.xlu1 %5733  ;;  %v13323_v45 = vpop.permute.xlu0 %5817 }
 0x586   : > { %17061 = vst [vmem:[#allocation234_spill] sm:$0xff] %v13321_v24  ;;  %17062 = vst [vmem:[#allocation235_spill] sm:$0xff] %v13323_v45  ;;  %v13341_v24 = vrot.slane %v17054_v1, %v16908_v61 }
 0x587   : > { %6052 = vbcast.lane.b32.xlu1 %v6046_v20, 264  ;;  %6136 = vbcast.lane.b32.xlu0 %v13327_v29, 256 }
 0x589   : > { %v13330_v27 = vpop.permute.xlu1 %5744  ;;  %v5829_v21 = vpop.permute.xlu0 %5828 }
 0x58a   : > { %17063 = vst [vmem:[#allocation236_spill] sm:$0xff] %v13330_v27 }
 0x58b   : > { %6063 = vbcast.lane.b32.xlu1 %v6057_v0, 264  ;;  %6147 = vbcast.lane.b32.xlu0 %v13334_v31, 256  ;;  %v6527_v0 = vsel %vm2199_vm0, %v12945_v46, %v5829_v21 }
 0x58d   : > { %v13337_v55 = vpop.permute.xlu1 %5755  ;;  %v5840_v45 = vpop.permute.xlu0 %5839 }
 0x58e   : > { %17064 = vst [vmem:[#allocation237_spill] sm:$0xff] %v13337_v55  ;;  %v6529_v1 = vsel %vm2199_vm0, %v12951_v28, %v5840_v45 }
 0x58f   : > { %6074 = vbcast.lane.b32.xlu1 %v6068_v51, 264  ;;  %6158 = vbcast.lane.b32.xlu0 %v13341_v24, 256 }
 0x591   : > { %v13344_v20 = vpop.permute.xlu1 %5766  ;;  %v5851_v27 = vpop.permute.xlu0 %5850 }
 0x592   : > { %17065 = vst [vmem:[#allocation238_spill] sm:$0xff] %v13344_v20  ;;  %v6531_v55 = vsel %vm2199_vm0, %v12957_v63, %v5851_v27  ;;  %v17067_v20 = vld [vmem:[#allocation10_spill] sm:$0xff] }
 0x593   : > { %v6656_v34 = vcombine.high %v6527_v0, %v6531_v55  ;;  %6085 = vbcast.lane.b32.xlu1 %v6079_v62, 264  ;;  %6169 = vbcast.lane.b32.xlu0 %v13348_v38, 256  ;;  %v6655_v51 = vcombine.low %v6527_v0, %v6531_v55  ;;  %v13359_v32 = vrot.slane %v17067_v20, %v16877_v6 }
 0x594   : > { %v13374_v28 = vrot.slane %v17067_v20, %v16884_v37 }
 0x595   : > { %v13355_v54 = vpop.permute.xlu1 %5777  ;;  %v5862_v52 = vpop.permute.xlu0 %5861  ;;  %v6663_v62 = vrot.slane %v6655_v51, %v10191_v11  ;;  %v6670_v27 = vrot.slane %v6656_v34, %v10191_v11  ;;  %v13381_v51 = vrot.slane %v17067_v20, %v16890_v35 }
 0x596   : > { %17066 = vst [vmem:[#allocation239_spill] sm:$0xff] %v13355_v54  ;;  %v6533_v46 = vsel %vm2199_vm0, %v12963_v25, %v5862_v52 }
 0x597   : > { %v6671_v21 = vcombine.low %v6529_v1, %v6533_v46  ;;  %v6672_v63 = vcombine.high %v6529_v1, %v6533_v46  ;;  %6096 = vbcast.lane.b32.xlu1 %v6090_v18, 264  ;;  %6180 = vbcast.lane.b32.xlu0 %v13359_v32, 256 }
 0x599   : > { %v6679_v55 = vrot.slane %v6671_v21, %v10191_v11  ;;  %v6686_v0 = vrot.slane %v6672_v63, %v10191_v11  ;;  %v13370_v54 = vpop.permute.xlu1 %5788  ;;  %v5873_v53 = vpop.permute.xlu0 %5872  ;;  %v13392_v63 = vrot.slane %v17067_v20, %v16896_v48 }
 0x59a   : > { %v6535_v21 = vsel %vm2199_vm0, %v12969_v56, %v5873_v53 }
 0x59b   : > { %v6720_v25 = vcombine.high %v6663_v62, %v6679_v55  ;;  %v6735_v52 = vcombine.low %v6670_v27, %v6686_v0  ;;  %v6736_v18 = vcombine.high %v6670_v27, %v6686_v0  ;;  %6107 = vbcast.lane.b32.xlu1 %v6101_v50, 264  ;;  %6191 = vbcast.lane.b32.xlu0 %v13374_v28, 256 }
 0x59d   : > { %v13377_v45 = vpop.permute.xlu1 %5799  ;;  %v5884_v34 = vpop.permute.xlu0 %5883 }
 0x59e   : > { %17068 = vst [vmem:[#allocation10_spill] sm:$0xff] %v13377_v45 }
 0x59f   : > { %6118 = vbcast.lane.b32.xlu1 %v6112_v5, 264  ;;  %6202 = vbcast.lane.b32.xlu0 %v13381_v51, 256 }
 0x5a1   : > { %v13384_v1 = vpop.permute.xlu1 %5810  ;;  %v5895_v46 = vpop.permute.xlu0 %5894 }
 0x5a2   : > { %17069 = vst [vmem:[#allocation240_spill] sm:$0xff] %v13384_v1  ;;  %v6539_v50 = vsel %vm2199_vm0, %v12981_v12, %v5895_v46  ;;  %v6537_v1 = vsel %vm2199_vm0, %v12975_v58, %v5884_v34  ;;  %v13403_v12 = vrot.slane %v17067_v20, %v16900_v17 }
 0x5a3   : > { %v6688_v27 = vcombine.high %v6535_v21, %v6539_v50  ;;  %6129 = vbcast.lane.b32.xlu1 %v6123_v22, 264  ;;  %6213 = vbcast.lane.b32.xlu0 %v13392_v63, 256  ;;  %v6687_v5 = vcombine.low %v6535_v21, %v6539_v50  ;;  %v6719_v22 = vcombine.low %v6663_v62, %v6679_v55 }
 0x5a5   : > { %v13395_v0 = vpop.permute.xlu1 %5821  ;;  %v5906_v45 = vpop.permute.xlu0 %5905  ;;  %v6695_v21 = vrot.slane %v6687_v5, %v10191_v11  ;;  %v6702_v50 = vrot.slane %v6688_v27, %v10191_v11  ;;  %v13417_v55 = vrot.slane %v6719_v22, %v10210_v47  ;;  %v13420_v27 = vrot.slane %v6720_v25, %v10210_v47 }
 0x5a6   : > { %17070 = vst [vmem:[#allocation241_spill] sm:$0xff] %v13395_v0  ;;  %v6541_v56 = vsel %vm2199_vm0, %v12987_v30, %v5906_v45  ;;  %v13413_v0 = vrot.slane %v17067_v20, %v16904_v15  ;;  %v13439_v25 = vrot.slane %v6736_v18, %v10210_v47 }
 0x5a7   : > { %v6703_v53 = vcombine.low %v6537_v1, %v6541_v56  ;;  %v6704_v46 = vcombine.high %v6537_v1, %v6541_v56  ;;  %6140 = vbcast.lane.b32.xlu1 %v13327_v29, 264  ;;  %6224 = vbcast.lane.b32.xlu0 %v13403_v12, 256  ;;  %17071 = vst [vmem:[#allocation242_spill] sm:$0xff] %v13417_v55 }
 0x5a9   : > { %v6711_v58 = vrot.slane %v6703_v53, %v10191_v11  ;;  %v6718_v34 = vrot.slane %v6704_v46, %v10191_v11  ;;  %v5833_v30 = vpop.permute.xlu1 %5832  ;;  %v5917_v45 = vpop.permute.xlu0 %5916 }
 0x5ab   : > { %v6751_v1 = vcombine.low %v6695_v21, %v6711_v58  ;;  %v6752_v56 = vcombine.high %v6695_v21, %v6711_v58  ;;  %v6767_v29 = vcombine.low %v6702_v50, %v6718_v34  ;;  %v6768_v62 = vcombine.high %v6702_v50, %v6718_v34  ;;  %6151 = vbcast.lane.b32.xlu1 %v13334_v31, 264 }
 0x5ac   : > { %6235 = vbcast.lane.b32.xlu0 %v13413_v0, 256  ;;  %v13436_v50 = vrot.slane %v6735_v52, %v10210_v47  ;;  %v13443_v58 = vrot.slane %v17067_v20, %v16908_v61  ;;  %v6543_v52 = vsel %vm2199_vm0, %v12993_v16, %v5917_v45 }
 0x5ad   : > { %v13424_v5 = vrot.slane %v6751_v1, %v10210_v47  ;;  %v13427_v53 = vrot.slane %v6752_v56, %v10210_v47  ;;  %v13430_v46 = vrot.slane %v6767_v29, %v10210_v47  ;;  %v13433_v21 = vrot.slane %v6768_v62, %v10210_v47  ;;  %v5844_v31 = vpop.permute.xlu1 %5843  ;;  %v5928_v22 = vpop.permute.xlu0 %5927 }
 0x5ae   : > { %v13463_v1 = vrot.slane %v17067_v20, %v16912_v33  ;;  %v13467_v56 = vsel %vm2199_vm0, %v12991_v49, %v5833_v30  ;;  %v13483_v49 = vsel %vm2199_vm0, %v12997_v42, %v5844_v31 }
 0x5af   : > { %17072 = vst [vmem:[#allocation243_spill] sm:$0xff] %v13424_v5  ;;  %17073 = vst [vmem:[#allocation244_spill] sm:$0xff] %v13433_v21  ;;  %6162 = vbcast.lane.b32.xlu1 %v13341_v24, 264 }
 0x5b0   : > { %6246 = vbcast.lane.b32.xlu0 %v13443_v58, 256  ;;  %17074 = vst [vmem:[#allocation245_spill] sm:$0xff] %v13467_v56  ;;  %17076 = vst [vmem:[#allocation247_spill] sm:$0xff] %v13483_v49 }
 0x5b1   : > { %v5855_v62 = vpop.permute.xlu1 %5854  ;;  %v5939_v34 = vpop.permute.xlu0 %5938 }
 0x5b2   : > { %v13473_v18 = vsel %vm2199_vm0, %v13003_v4, %v5855_v62  ;;  %v6547_v29 = vsel %vm2199_vm0, %v13005_v3, %v5939_v34  ;;  %v17077_v4 = vld [vmem:[#allocation30_spill] sm:$0xff]  ;;  %v6545_v3 = vsel %vm2199_vm0, %v12999_v26, %v5928_v22 }
 0x5b3   : > { %17075 = vst [vmem:[#allocation246_spill] sm:$0xff] %v13473_v18  ;;  %v6928_v24 = vcombine.high %v13467_v56, %v13473_v18  ;;  %v6792_v21 = vcombine.high %v6543_v52, %v6547_v29  ;;  %6173 = vbcast.lane.b32.xlu1 %v13348_v38, 264  ;;  %v13487_v30 = vrot.slane %v17077_v4, %v16877_v6 }
 0x5b4   : > { %6257 = vbcast.lane.b32.xlu0 %v13463_v1, 256  ;;  %v6791_v45 = vcombine.low %v6543_v52, %v6547_v29 }
 0x5b5   : > { %v5866_v16 = vpop.permute.xlu1 %5865  ;;  %v5950_v20 = vpop.permute.xlu0 %5949  ;;  %v13502_v56 = vrot.slane %v6928_v24, %v10191_v11  ;;  %v13519_v24 = vrot.slane %v17077_v4, %v16884_v37 }
 0x5b6   : > { %v13493_v34 = vsel %vm2199_vm0, %v13009_v43, %v5866_v16  ;;  %v6549_v38 = vsel %vm2199_vm0, %v13011_v14, %v5950_v20  ;;  %v6799_v29 = vrot.slane %v6791_v45, %v10191_v11  ;;  %v13540_v20 = vrot.slane %v17077_v4, %v16896_v48 }
 0x5b7   : > { %17078 = vst [vmem:[#allocation30_spill] sm:$0xff] %v13493_v34  ;;  %v6944_v42 = vcombine.high %v13483_v49, %v13493_v34  ;;  %v6807_v31 = vcombine.low %v6545_v3, %v6549_v38  ;;  %v6808_v62 = vcombine.high %v6545_v3, %v6549_v38  ;;  %6184 = vbcast.lane.b32.xlu1 %v13359_v32, 264 }
 0x5b8   : > { %6268 = vbcast.lane.b32.xlu0 %v13487_v30, 256  ;;  %v13515_v32 = vrot.slane %v6792_v21, %v10191_v11 }
 0x5b9   : > { %v13505_v26 = vrot.slane %v6944_v42, %v10191_v11  ;;  %v13508_v43 = vrot.slane %v6807_v31, %v10191_v11  ;;  %v13511_v14 = vrot.slane %v6808_v62, %v10191_v11  ;;  %v5877_v22 = vpop.permute.xlu1 %5876  ;;  %v5961_v52 = vpop.permute.xlu0 %5960  ;;  %v13534_v31 = vrot.slane %v17077_v4, %v16890_v35 }
 0x5bb   : > { %v7007_v16 = vcombine.low %v13502_v56, %v13505_v26  ;;  %6195 = vbcast.lane.b32.xlu1 %v13374_v28, 264  ;;  %v6856_v3 = vcombine.high %v6799_v29, %v13508_v43  ;;  %v6871_v45 = vcombine.low %v13515_v32, %v13511_v14  ;;  %v6872_v21 = vcombine.high %v13515_v32, %v13511_v14 }
 0x5bc   : > { %6279 = vbcast.lane.b32.xlu0 %v13519_v24, 256  ;;  %v13544_v14 = vsel %vm2199_vm0, %v13015_v39, %v5877_v22  ;;  %v6551_v32 = vsel %vm2199_vm0, %v13017_v23, %v5961_v52 }
 0x5bd   : > { %v5888_v38 = vpop.permute.xlu1 %5887  ;;  %v5972_v42 = vpop.permute.xlu0 %5971  ;;  %17079 = vst [vmem:[#allocation248_spill] sm:$0xff] %v13544_v14 }
 0x5be   : > { %v13560_v39 = vsel %vm2199_vm0, %v13021_v40, %v5888_v38 }
 0x5bf   : > { %6206 = vbcast.lane.b32.xlu1 %v13381_v51, 264  ;;  %17081 = vst [vmem:[#allocation250_spill] sm:$0xff] %v13560_v39 }
 0x5c0   : > { %6290 = vbcast.lane.b32.xlu0 %v13534_v31, 256 }
 0x5c1   : > { %v5899_v28 = vpop.permute.xlu1 %5898  ;;  %v5983_v62 = vpop.permute.xlu0 %5982 }
 0x5c2   : > { %v13550_v18 = vsel %vm2199_vm0, %v13027_v9, %v5899_v28  ;;  %v6555_v51 = vsel %vm2199_vm0, %v13029_v60, %v5983_v62  ;;  %v13564_v9 = vrot.slane %v17077_v4, %v16900_v17  ;;  %v6553_v60 = vsel %vm2199_vm0, %v13023_v41, %v5972_v42 }
 0x5c3   : > { %17080 = vst [vmem:[#allocation249_spill] sm:$0xff] %v13550_v18  ;;  %v6960_v49 = vcombine.high %v13544_v14, %v13550_v18  ;;  %v6824_v34 = vcombine.high %v6551_v32, %v6555_v51  ;;  %6217 = vbcast.lane.b32.xlu1 %v13392_v63, 264  ;;  %v6823_v52 = vcombine.low %v6551_v32, %v6555_v51 }
 0x5c4   : > { %6301 = vbcast.lane.b32.xlu0 %v13540_v20, 256  ;;  %v6855_v14 = vcombine.low %v6799_v29, %v13508_v43 }
 0x5c5   : > { %v5910_v23 = vpop.permute.xlu1 %5909  ;;  %v5994_v22 = vpop.permute.xlu0 %5993  ;;  %v6974_v41 = vrot.slane %v6960_v49, %v10191_v11  ;;  %v13592_v49 = vrot.slane %v17077_v4, %v16908_v61 }
 0x5c6   : > { %v13570_v28 = vsel %vm2199_vm0, %v13033_v8, %v5910_v23  ;;  %v6557_v63 = vsel %vm2199_vm0, %v13035_v59, %v5994_v22  ;;  %v6831_v23 = vrot.slane %v6823_v52, %v10191_v11  ;;  %v6838_v22 = vrot.slane %v6824_v34, %v10191_v11 }
 0x5c7   : > { %17082 = vst [vmem:[#allocation251_spill] sm:$0xff] %v13570_v28  ;;  %v6976_v40 = vcombine.high %v13560_v39, %v13570_v28  ;;  %v6839_v38 = vcombine.low %v6553_v60, %v6557_v63  ;;  %v6840_v62 = vcombine.high %v6553_v60, %v6557_v63  ;;  %6228 = vbcast.lane.b32.xlu1 %v13403_v12, 264 }
 0x5c8   : > { %6312 = vbcast.lane.b32.xlu0 %v13564_v9, 256  ;;  %v13587_v12 = vrot.slane %v17077_v4, %v16904_v15  ;;  %v13596_v34 = vrot.slane %v7007_v16, %v10210_v47  ;;  %v13599_v52 = vrot.slane %v6855_v14, %v10210_v47 }
 0x5c9   : > { %v6990_v42 = vrot.slane %v6976_v40, %v10191_v11  ;;  %v6847_v8 = vrot.slane %v6839_v38, %v10191_v11  ;;  %v6854_v32 = vrot.slane %v6840_v62, %v10191_v11  ;;  %v5921_v59 = vpop.permute.xlu1 %5920  ;;  %v6005_v51 = vpop.permute.xlu0 %6004  ;;  %v13602_v62 = vrot.slane %v6856_v3, %v10210_v47 }
 0x5ca   : > { %17083 = vst [vmem:[#allocation252_spill] sm:$0xff] %v13596_v34  ;;  %17084 = vst [vmem:[#allocation253_spill] sm:$0xff] %v13599_v52  ;;  %v17087_v3 = vcombine.high %v13502_v56, %v13505_v26 }
 0x5cb   : > { %v7039_v43 = vcombine.low %v6974_v41, %v6990_v42  ;;  %v7040_v29 = vcombine.high %v6974_v41, %v6990_v42  ;;  %6239 = vbcast.lane.b32.xlu1 %v13413_v0, 264  ;;  %v6887_v60 = vcombine.low %v6831_v23, %v6847_v8  ;;  %v6888_v63 = vcombine.high %v6831_v23, %v6847_v8 }
 0x5cc   : > { %v6903_v40 = vcombine.low %v6838_v22, %v6854_v32  ;;  %v6904_v38 = vcombine.high %v6838_v22, %v6854_v32  ;;  %6323 = vbcast.lane.b32.xlu0 %v13587_v12, 256  ;;  %v13606_v42 = vrot.slane %v17077_v4, %v16912_v33  ;;  %v13624_v23 = vrot.slane %v17087_v3, %v10210_v47 }
 0x5cd   : > { %v5932_v0 = vpop.permute.xlu1 %5931  ;;  %v6016_v41 = vpop.permute.xlu0 %6015  ;;  %v13609_v8 = vrot.slane %v6887_v60, %v10210_v47  ;;  %v13612_v32 = vrot.slane %v6888_v63, %v10210_v47  ;;  %v13627_v4 = vrot.slane %v6871_v45, %v10210_v47  ;;  %v13630_v22 = vrot.slane %v6872_v21, %v10210_v47 }
 0x5ce   : > { %v13615_v16 = vrot.slane %v6903_v40, %v10210_v47  ;;  %v13618_v14 = vrot.slane %v6904_v38, %v10210_v47  ;;  %17088 = vst [vmem:[#allocation256_spill] sm:$0xff] %v13624_v23  ;;  %v13633_v60 = vrot.slane %v7039_v43, %v10210_v47  ;;  %v13637_v63 = vrot.slane %v7040_v29, %v10210_v47 }
 0x5cf   : > { %17085 = vst [vmem:[#allocation254_spill] sm:$0xff] %v13609_v8  ;;  %17089 = vst [vmem:[#allocation257_spill] sm:$0xff] %v13630_v22  ;;  %6250 = vbcast.lane.b32.xlu1 %v13443_v58, 264  ;;  %v13656_v3 = vsel %vm2199_vm0, %v13039_v7, %v5921_v59  ;;  %v6559_v45 = vsel %vm2199_vm0, %v13041_v44, %v6005_v51  ;;  %v13680_v59 = vsel %vm2199_vm0, %v13045_v13, %v5932_v0 }
 0x5d0   : > { %17086 = vst [vmem:[#allocation255_spill] sm:$0xff] %v13618_v14  ;;  %17090 = vst [vmem:[#allocation258_spill] sm:$0xff] %v13633_v60  ;;  %6334 = vbcast.lane.b32.xlu0 %v13592_v49, 256  ;;  %v6561_v7 = vsel %vm2199_vm0, %v13047_v19, %v6016_v41  ;;  %v17100_v60 = vld [vmem:[#allocation157_spill] sm:$0xff] }
 0x5d1   : > { %17091 = vst [vmem:[#allocation259_spill] sm:$0xff] %v13637_v63  ;;  %v5943_v21 = vpop.permute.xlu1 %5942  ;;  %v6027_v40 = vpop.permute.xlu0 %6026  ;;  %17092 = vst [vmem:[#allocation260_spill] sm:$0xff] %v13656_v3  ;;  %v17097_v63 = vld [vmem:[#allocation9_spill] sm:$0xff] }
 0x5d2   : > { %v13662_v26 = vsel %vm2199_vm0, %v13051_v2, %v5943_v21  ;;  %v6563_v58 = vsel %vm2199_vm0, %v13053_v36, %v6027_v40  ;;  %17094 = vst [vmem:[#allocation262_spill] sm:$0xff] %v13680_v59  ;;  %v17095_v21 = vld [vmem:[#allocation13_spill] sm:$0xff] }
 0x5d3   : > { %17093 = vst [vmem:[#allocation261_spill] sm:$0xff] %v13662_v26  ;;  %v7064_v29 = vcombine.high %v13656_v3, %v13662_v26  ;;  %v7200_v43 = vcombine.high %v6559_v45, %v6563_v58  ;;  %6261 = vbcast.lane.b32.xlu1 %v13463_v1, 264  ;;  %v13684_v40 = vrot.slane %v17095_v21, %v16877_v6 }
 0x5d4   : > { %6345 = vbcast.lane.b32.xlu0 %v13606_v42, 256  ;;  %v7199_v44 = vcombine.low %v6559_v45, %v6563_v58 }
 0x5d5   : > { %v5954_v51 = vpop.permute.xlu1 %5953  ;;  %v6038_v1 = vpop.permute.xlu0 %6037  ;;  %v13699_v56 = vrot.slane %v7064_v29, %v10191_v11  ;;  %v13716_v29 = vrot.slane %v17095_v21, %v16884_v37 }
 0x5d6   : > { %v13690_v2 = vsel %vm2199_vm0, %v13057_v57, %v5954_v51  ;;  %v6565_v36 = vsel %vm2199_vm0, %v13059_v10, %v6038_v1  ;;  %v7207_v58 = vrot.slane %v7199_v44, %v10191_v11 }
 0x5d7   : > { %17096 = vst [vmem:[#allocation13_spill] sm:$0xff] %v13690_v2  ;;  %v7080_v13 = vcombine.high %v13680_v59, %v13690_v2  ;;  %v7215_v0 = vcombine.low %v6561_v7, %v6565_v36  ;;  %v7216_v38 = vcombine.high %v6561_v7, %v6565_v36  ;;  %6272 = vbcast.lane.b32.xlu1 %v13487_v30, 264  ;;  %v17106_v2 = vld [vmem:[#allocation159_spill] sm:$0xff] }
 0x5d8   : > { %6356 = vbcast.lane.b32.xlu0 %v13684_v40, 256  ;;  %v13712_v30 = vrot.slane %v7200_v43, %v10191_v11  ;;  %v13737_v36 = vrot.slane %v17095_v21, %v16896_v48 }
 0x5d9   : > { %v13702_v19 = vrot.slane %v7080_v13, %v10191_v11  ;;  %v13705_v57 = vrot.slane %v7215_v0, %v10191_v11  ;;  %v13708_v10 = vrot.slane %v7216_v38, %v10191_v11  ;;  %v5965_v41 = vpop.permute.xlu1 %5964  ;;  %v6049_v45 = vpop.permute.xlu0 %6048  ;;  %v13731_v13 = vrot.slane %v17095_v21, %v16890_v35 }
 0x5db   : > { %v7143_v7 = vcombine.low %v13699_v56, %v13702_v19  ;;  %6283 = vbcast.lane.b32.xlu1 %v13519_v24, 264  ;;  %v7264_v38 = vcombine.high %v7207_v58, %v13705_v57  ;;  %v7279_v44 = vcombine.low %v13712_v30, %v13708_v10  ;;  %v7280_v43 = vcombine.high %v13712_v30, %v13708_v10  ;;  %v17099_v30 = vld [vmem:[#allocation29_spill] sm:$0xff] }
 0x5dc   : > { %6367 = vbcast.lane.b32.xlu0 %v13716_v29, 256  ;;  %v13741_v10 = vsel %vm2199_vm0, %v17097_v63, %v5965_v41  ;;  %v6567_v23 = vsel %vm2199_vm0, %v17099_v30, %v6049_v45  ;;  %v17103_v63 = vld [vmem:[#allocation12_spill] sm:$0xff]  ;;  %v7263_v22 = vcombine.low %v7207_v58, %v13705_v57 }
 0x5dd   : > { %v5976_v51 = vpop.permute.xlu1 %5975  ;;  %v6060_v1 = vpop.permute.xlu0 %6059  ;;  %17098 = vst [vmem:[#allocation9_spill] sm:$0xff] %v13741_v10 }
 0x5de   : > { %v13757_v41 = vsel %vm2199_vm0, %v17103_v63, %v5976_v51 }
 0x5df   : > { %6294 = vbcast.lane.b32.xlu1 %v13534_v31, 264  ;;  %v17102_v31 = vld [vmem:[#allocation158_spill] sm:$0xff]  ;;  %17104 = vst [vmem:[#allocation157_spill] sm:$0xff] %v13757_v41 }
 0x5e0   : > { %6378 = vbcast.lane.b32.xlu0 %v13731_v13, 256 }
 0x5e1   : > { %v5987_v24 = vpop.permute.xlu1 %5986  ;;  %v6071_v0 = vpop.permute.xlu0 %6070 }
 0x5e2   : > { %v13747_v34 = vsel %vm2199_vm0, %v17100_v60, %v5987_v24  ;;  %v6571_v3 = vsel %vm2199_vm0, %v17102_v31, %v6071_v0  ;;  %v13761_v60 = vrot.slane %v17095_v21, %v16900_v17  ;;  %v17105_v24 = vld [vmem:[#allocation156_spill] sm:$0xff] }
 0x5e3   : > { %17101 = vst [vmem:[#allocation29_spill] sm:$0xff] %v13747_v34  ;;  %v7096_v26 = vcombine.high %v13741_v10, %v13747_v34  ;;  %v7232_v59 = vcombine.high %v6567_v23, %v6571_v3  ;;  %6305 = vbcast.lane.b32.xlu1 %v13540_v20, 264  ;;  %v6569_v0 = vsel %vm2199_vm0, %v17105_v24, %v6060_v1  ;;  %v17108_v20 = vld [vmem:[#allocation160_spill] sm:$0xff] }
 0x5e4   : > { %6389 = vbcast.lane.b32.xlu0 %v13737_v36, 256  ;;  %v7231_v31 = vcombine.low %v6567_v23, %v6571_v3 }
 0x5e5   : > { %v5998_v45 = vpop.permute.xlu1 %5997  ;;  %v6082_v30 = vpop.permute.xlu0 %6081  ;;  %v7110_v23 = vrot.slane %v7096_v26, %v10191_v11  ;;  %v13789_v26 = vrot.slane %v17095_v21, %v16908_v61 }
 0x5e6   : > { %v13767_v10 = vsel %vm2199_vm0, %v17106_v2, %v5998_v45  ;;  %v6573_v34 = vsel %vm2199_vm0, %v17108_v20, %v6082_v30  ;;  %v7239_v24 = vrot.slane %v7231_v31, %v10191_v11  ;;  %v13796_v31 = vrot.slane %v7263_v22, %v10210_v47 }
 0x5e7   : > { %17107 = vst [vmem:[#allocation158_spill] sm:$0xff] %v13767_v10  ;;  %v7112_v51 = vcombine.high %v13757_v41, %v13767_v10  ;;  %v7247_v63 = vcombine.low %v6569_v0, %v6573_v34  ;;  %v7248_v14 = vcombine.high %v6569_v0, %v6573_v34  ;;  %6316 = vbcast.lane.b32.xlu1 %v13564_v9, 264  ;;  %v17119_v41 = vld [vmem:[#allocation165_spill] sm:$0xff] }
 0x5e8   : > { %6400 = vbcast.lane.b32.xlu0 %v13761_v60, 256  ;;  %v7246_v34 = vrot.slane %v7232_v59, %v10191_v11  ;;  %v13784_v9 = vrot.slane %v17095_v21, %v16904_v15  ;;  %v13793_v59 = vrot.slane %v7143_v7, %v10210_v47  ;;  %17110 = vst [vmem:[#allocation156_spill] sm:$0xff] %v13796_v31 }
 0x5e9   : > { %v7126_v3 = vrot.slane %v7112_v51, %v10191_v11  ;;  %v7255_v2 = vrot.slane %v7247_v63, %v10191_v11  ;;  %v7262_v1 = vrot.slane %v7248_v14, %v10191_v11  ;;  %v6009_v45 = vpop.permute.xlu1 %6008  ;;  %v6093_v30 = vpop.permute.xlu0 %6092  ;;  %v13799_v63 = vrot.slane %v7264_v38, %v10210_v47 }
 0x5ea   : > { %17109 = vst [vmem:[#allocation12_spill] sm:$0xff] %v13793_v59  ;;  %v17112_v38 = vcombine.high %v13699_v56, %v13702_v19  ;;  %v17118_v56 = vld [vmem:[#allocation162_spill] sm:$0xff]  ;;  %v17128_v59 = vld [vmem:[#allocation168_spill] sm:$0xff] }
 0x5eb   : > { %v7175_v57 = vcombine.low %v7110_v23, %v7126_v3  ;;  %v7176_v58 = vcombine.high %v7110_v23, %v7126_v3  ;;  %6327 = vbcast.lane.b32.xlu1 %v13587_v12, 264  ;;  %v7295_v0 = vcombine.low %v7239_v24, %v7255_v2  ;;  %v7296_v14 = vcombine.high %v7239_v24, %v7255_v2 }
 0x5ec   : > { %v7311_v20 = vcombine.low %v7246_v34, %v7262_v1  ;;  %v7312_v51 = vcombine.high %v7246_v34, %v7262_v1  ;;  %6411 = vbcast.lane.b32.xlu0 %v13784_v9, 256  ;;  %v13803_v3 = vrot.slane %v17095_v21, %v16912_v33  ;;  %v13821_v24 = vrot.slane %v17112_v38, %v10210_v47  ;;  %v17116_v38 = vld [vmem:[#allocation161_spill] sm:$0xff] }
 0x5ed   : > { %v6020_v12 = vpop.permute.xlu1 %6019  ;;  %v6104_v23 = vpop.permute.xlu0 %6103  ;;  %v13806_v2 = vrot.slane %v7295_v0, %v10210_v47  ;;  %v13809_v1 = vrot.slane %v7296_v14, %v10210_v47  ;;  %v13824_v21 = vrot.slane %v7279_v44, %v10210_v47  ;;  %v13827_v34 = vrot.slane %v7280_v43, %v10210_v47 }
 0x5ee   : > { %v13812_v7 = vrot.slane %v7311_v20, %v10210_v47  ;;  %v13815_v22 = vrot.slane %v7312_v51, %v10210_v47  ;;  %17113 = vst [vmem:[#allocation160_spill] sm:$0xff] %v13821_v24  ;;  %v13830_v0 = vrot.slane %v7175_v57, %v10210_v47  ;;  %v13834_v14 = vrot.slane %v7176_v58, %v10210_v47  ;;  %v17121_v57 = vld [vmem:[#allocation166_spill] sm:$0xff]  ;;  %v17132_v24 = vld [vmem:[#allocation172_spill] sm:$0xff] }
 0x5ef   : > { %17111 = vst [vmem:[#allocation159_spill] sm:$0xff] %v13806_v2  ;;  %6338 = vbcast.lane.b32.xlu1 %v13592_v49, 264  ;;  %v13853_v19 = vsel %vm2199_vm0, %v17116_v38, %v6009_v45  ;;  %v6575_v44 = vsel %vm2199_vm0, %v17118_v56, %v6093_v30  ;;  %v17124_v38 = vld [vmem:[#allocation33_spill] sm:$0xff]  ;;  %v17125_v45 = vld [vmem:[#allocation164_spill] sm:$0xff] }
 0x5f0   : > { %17114 = vst [vmem:[#allocation263_spill] sm:$0xff] %v13830_v0  ;;  %17115 = vst [vmem:[#allocation264_spill] sm:$0xff] %v13834_v14  ;;  %6422 = vbcast.lane.b32.xlu0 %v13789_v26, 256  ;;  %v13881_v51 = vrot.slane %v17124_v38, %v16877_v6  ;;  %v17126_v0 = vld [vmem:[#allocation167_spill] sm:$0xff] }
 0x5f1   : > { %v6031_v43 = vpop.permute.xlu1 %6030  ;;  %v6115_v20 = vpop.permute.xlu0 %6114  ;;  %17117 = vst [vmem:[#allocation161_spill] sm:$0xff] %v13853_v19 }
 0x5f2   : > { %v13859_v10 = vsel %vm2199_vm0, %v17119_v41, %v6031_v43  ;;  %v6579_v49 = vsel %vm2199_vm0, %v17121_v57, %v6115_v20  ;;  %v17122_v43 = vld [vmem:[#allocation163_spill] sm:$0xff] }
 0x5f3   : > { %17120 = vst [vmem:[#allocation162_spill] sm:$0xff] %v13859_v10  ;;  %v7472_v58 = vcombine.high %v13853_v19, %v13859_v10  ;;  %v7336_v18 = vcombine.high %v6575_v44, %v6579_v49  ;;  %6349 = vbcast.lane.b32.xlu1 %v13606_v42, 264  ;;  %v13877_v20 = vsel %vm2199_vm0, %v17122_v43, %v6020_v12 }
 0x5f4   : > { %6433 = vbcast.lane.b32.xlu0 %v13803_v3, 256  ;;  %17123 = vst [vmem:[#allocation165_spill] sm:$0xff] %v13877_v20  ;;  %v6577_v19 = vsel %vm2199_vm0, %v17125_v45, %v6104_v23  ;;  %v7335_v30 = vcombine.low %v6575_v44, %v6579_v49 }
 0x5f5   : > { %v6042_v57 = vpop.permute.xlu1 %6041  ;;  %v6126_v42 = vpop.permute.xlu0 %6125  ;;  %v13896_v6 = vrot.slane %v7472_v58, %v10191_v11  ;;  %v13913_v58 = vrot.slane %v17124_v38, %v16884_v37 }
 0x5f6   : > { %v13887_v41 = vsel %vm2199_vm0, %v17126_v0, %v6042_v57  ;;  %v6581_v56 = vsel %vm2199_vm0, %v17128_v59, %v6126_v42  ;;  %v13928_v42 = vrot.slane %v17124_v38, %v16890_v35 }
 0x5f7   : > { %17127 = vst [vmem:[#allocation166_spill] sm:$0xff] %v13887_v41  ;;  %v7488_v12 = vcombine.high %v13877_v20, %v13887_v41  ;;  %v7351_v43 = vcombine.low %v6577_v19, %v6581_v56  ;;  %v7352_v14 = vcombine.high %v6577_v19, %v6581_v56  ;;  %6360 = vbcast.lane.b32.xlu1 %v13684_v40, 264  ;;  %v17129_v56 = vld [vmem:[#allocation32_spill] sm:$0xff] }
 0x5f8   : > { %6444 = vbcast.lane.b32.xlu0 %v13881_v51, 256  ;;  %v7343_v19 = vrot.slane %v7335_v30, %v10191_v11  ;;  %v13909_v40 = vrot.slane %v7336_v18, %v10191_v11 }
 0x5f9   : > { %v13899_v23 = vrot.slane %v7488_v12, %v10191_v11  ;;  %v13902_v0 = vrot.slane %v7351_v43, %v10191_v11  ;;  %v13905_v59 = vrot.slane %v7352_v14, %v10191_v11  ;;  %v6053_v44 = vpop.permute.xlu1 %6052  ;;  %v6137_v49 = vpop.permute.xlu0 %6136  ;;  %v13934_v43 = vrot.slane %v17124_v38, %v16896_v48  ;;  %v17135_v48 = vld [vmem:[#allocation170_spill] sm:$0xff] }
 0x5fb   : > { %6371 = vbcast.lane.b32.xlu1 %v13716_v29, 264  ;;  %v7400_v14 = vcombine.high %v7343_v19, %v13902_v0  ;;  %v7415_v30 = vcombine.low %v13909_v40, %v13905_v59  ;;  %v7416_v18 = vcombine.high %v13909_v40, %v13905_v59  ;;  %v13938_v59 = vsel %vm2199_vm0, %v17129_v56, %v6053_v44  ;;  %v17131_v40 = vld [vmem:[#allocation169_spill] sm:$0xff] }
 0x5fc   : > { %6455 = vbcast.lane.b32.xlu0 %v13913_v58, 256  ;;  %17130 = vst [vmem:[#allocation163_spill] sm:$0xff] %v13938_v59  ;;  %v6583_v45 = vsel %vm2199_vm0, %v17131_v40, %v6137_v49 }
 0x5fd   : > { %v6064_v37 = vpop.permute.xlu1 %6063  ;;  %v6148_v57 = vpop.permute.xlu0 %6147 }
 0x5fe   : > { %v13954_v44 = vsel %vm2199_vm0, %v17135_v48, %v6064_v37 }
 0x5ff   : > { %6382 = vbcast.lane.b32.xlu1 %v13731_v13, 264  ;;  %v17134_v13 = vld [vmem:[#allocation173_spill] sm:$0xff]  ;;  %17136 = vst [vmem:[#allocation164_spill] sm:$0xff] %v13954_v44 }
 0x600   : > { %6466 = vbcast.lane.b32.xlu0 %v13928_v42, 256 }
 0x601   : > { %v6075_v29 = vpop.permute.xlu1 %6074  ;;  %v6159_v12 = vpop.permute.xlu0 %6158 }
 0x602   : > { %v13944_v35 = vsel %vm2199_vm0, %v17132_v24, %v6075_v29  ;;  %v6587_v10 = vsel %vm2199_vm0, %v17134_v13, %v6159_v12  ;;  %v13958_v24 = vrot.slane %v17124_v38, %v16900_v17  ;;  %v17137_v29 = vld [vmem:[#allocation171_spill] sm:$0xff]  ;;  %v17138_v13 = vld [vmem:[#allocation174_spill] sm:$0xff]  ;;  %v7399_v17 = vcombine.low %v7343_v19, %v13902_v0 }
 0x603   : > { %17133 = vst [vmem:[#allocation33_spill] sm:$0xff] %v13944_v35  ;;  %v7504_v20 = vcombine.high %v13938_v59, %v13944_v35  ;;  %v7368_v41 = vcombine.high %v6583_v45, %v6587_v10  ;;  %6393 = vbcast.lane.b32.xlu1 %v13737_v36, 264  ;;  %v6585_v12 = vsel %vm2199_vm0, %v17137_v29, %v6148_v57  ;;  %v17140_v36 = vld [vmem:[#allocation175_spill] sm:$0xff] }
 0x604   : > { %6477 = vbcast.lane.b32.xlu0 %v13934_v43, 256  ;;  %v7367_v40 = vcombine.low %v6583_v45, %v6587_v10 }
 0x605   : > { %v6086_v49 = vpop.permute.xlu1 %6085  ;;  %v6170_v56 = vpop.permute.xlu0 %6169  ;;  %v7518_v10 = vrot.slane %v7504_v20, %v10191_v11 }
 0x606   : > { %v13964_v59 = vsel %vm2199_vm0, %v17138_v13, %v6086_v49  ;;  %v6589_v35 = vsel %vm2199_vm0, %v17140_v36, %v6170_v56  ;;  %v7375_v13 = vrot.slane %v7367_v40, %v10191_v11  ;;  %v13989_v40 = vrot.slane %v7400_v14, %v10210_v47 }
 0x607   : > { %17139 = vst [vmem:[#allocation167_spill] sm:$0xff] %v13964_v59  ;;  %v7520_v37 = vcombine.high %v13954_v44, %v13964_v59  ;;  %v7383_v48 = vcombine.low %v6585_v12, %v6589_v35  ;;  %v7384_v39 = vcombine.high %v6585_v12, %v6589_v35  ;;  %6404 = vbcast.lane.b32.xlu1 %v13761_v60, 264  ;;  %v17249_v59 = vld [vmem:[#allocation225_spill] sm:$0xff] }
 0x608   : > { %6488 = vbcast.lane.b32.xlu0 %v13958_v24, 256  ;;  %v7382_v35 = vrot.slane %v7368_v41, %v10191_v11  ;;  %v13981_v60 = vrot.slane %v17124_v38, %v16904_v15 }
 0x609   : > { %v7534_v45 = vrot.slane %v7520_v37, %v10191_v11  ;;  %v7391_v57 = vrot.slane %v7383_v48, %v10191_v11  ;;  %v7398_v49 = vrot.slane %v7384_v39, %v10191_v11  ;;  %v6097_v56 = vpop.permute.xlu1 %6096  ;;  %v6181_v29 = vpop.permute.xlu0 %6180  ;;  %v13986_v39 = vrot.slane %v7399_v17, %v10210_v47 }
 0x60a   : > { %v13996_v48 = vrot.slane %v17124_v38, %v16908_v61  ;;  %v14017_v61 = vrot.slane %v7415_v30, %v10210_v47 }
 0x60b   : > { %v7583_v0 = vcombine.low %v7518_v10, %v7534_v45  ;;  %v7584_v19 = vcombine.high %v7518_v10, %v7534_v45  ;;  %6415 = vbcast.lane.b32.xlu1 %v13784_v9, 264  ;;  %v7431_v20 = vcombine.low %v7375_v13, %v7391_v57  ;;  %v7432_v12 = vcombine.high %v7375_v13, %v7391_v57 }
 0x60c   : > { %v7447_v36 = vcombine.low %v7382_v35, %v7398_v49  ;;  %v7448_v37 = vcombine.high %v7382_v35, %v7398_v49  ;;  %6499 = vbcast.lane.b32.xlu0 %v13981_v60, 256  ;;  %17141 = vst [vmem:[#allocation168_spill] sm:$0xff] %v13986_v39  ;;  %v17145_v57 = vcombine.low %v13896_v6, %v13899_v23 }
 0x60d   : > { %v13992_v41 = vrot.slane %v7583_v0, %v10210_v47  ;;  %v6108_v15 = vpop.permute.xlu1 %6107  ;;  %v13999_v9 = vrot.slane %v7431_v20, %v10210_v47  ;;  %v14002_v10 = vrot.slane %v7432_v12, %v10210_v47  ;;  %v6192_v45 = vpop.permute.xlu0 %6191  ;;  %v14020_v13 = vrot.slane %v7416_v18, %v10210_v47  ;;  %v17155_v20 = vld [vmem:[#allocation177_spill] sm:$0xff] }
 0x60e   : > { %v14005_v17 = vrot.slane %v7447_v36, %v10210_v47  ;;  %v14008_v14 = vrot.slane %v7448_v37, %v10210_v47  ;;  %v14014_v49 = vrot.slane %v17145_v57, %v10210_v47  ;;  %v14025_v35 = vrot.slane %v17124_v38, %v16912_v33  ;;  %v17151_v57 = vld [vmem:[#allocation176_spill] sm:$0xff] }
 0x60f   : > { %17142 = vst [vmem:[#allocation32_spill] sm:$0xff] %v13992_v41  ;;  %17143 = vst [vmem:[#allocation169_spill] sm:$0xff] %v13999_v9  ;;  %6426 = vbcast.lane.b32.xlu1 %v13789_v26, 264  ;;  %v14028_v0 = vrot.slane %v7584_v19, %v10210_v47  ;;  %v17149_v36 = vcombine.high %v13896_v6, %v13899_v23  ;;  %v14053_v18 = vsel %vm2199_vm0, %v17151_v57, %v6097_v56  ;;  %v17153_v26 = vld [vmem:[#allocation180_spill] sm:$0xff]  ;;  %v17156_v23 = vld [vmem:[#allocation181_spill] sm:$0xff] }
 0x610   : > { %17144 = vst [vmem:[#allocation172_spill] sm:$0xff] %v14008_v14  ;;  %17146 = vst [vmem:[#allocation173_spill] sm:$0xff] %v14014_v49  ;;  %6510 = vbcast.lane.b32.xlu0 %v13996_v48, 256  ;;  %v6591_v19 = vsel %vm2199_vm0, %v17155_v20, %v6181_v29  ;;  %v17157_v57 = vld [vmem:[#allocation178_spill] sm:$0xff]  ;;  %v6784_v41 = vcombine.high %v13417_v55, %v13424_v5  ;;  %v17161_v49 = vld [vmem:[#allocation179_spill] sm:$0xff] }
 0x611   : > { %17147 = vst [vmem:[#allocation170_spill] sm:$0xff] %v14020_v13  ;;  %17148 = vst [vmem:[#allocation171_spill] sm:$0xff] %v14028_v0  ;;  %v6119_v12 = vpop.permute.xlu1 %6118  ;;  %v14049_v37 = vrot.slane %v17149_v36, %v10210_v47  ;;  %v6203_v33 = vpop.permute.xlu0 %6202  ;;  %v14077_v38 = vsel %vm2199_vm0, %v17157_v57, %v6108_v15  ;;  %v17162_v0 = vld [vmem:[#allocation183_spill] sm:$0xff]  ;;  %v17206_v14 = vld [vmem:[#allocation205_spill] sm:$0xff] }
 0x612   : > { %17152 = vst [vmem:[#allocation175_spill] sm:$0xff] %v14053_v18  ;;  %v14057_v30 = vsel %vm2199_vm0, %v17153_v26, %v6119_v12  ;;  %v6595_v36 = vsel %vm2199_vm0, %v17156_v23, %v6203_v33  ;;  %17158 = vst [vmem:[#allocation180_spill] sm:$0xff] %v14077_v38  ;;  %v17159_v23 = vld [vmem:[#allocation182_spill] sm:$0xff]  ;;  %v6593_v26 = vsel %vm2199_vm0, %v17161_v49, %v6192_v45 }
 0x613   : > { %17150 = vst [vmem:[#allocation174_spill] sm:$0xff] %v14049_v37  ;;  %17154 = vst [vmem:[#allocation176_spill] sm:$0xff] %v14057_v30  ;;  %v7608_v6 = vcombine.high %v14053_v18, %v14057_v30  ;;  %6437 = vbcast.lane.b32.xlu1 %v13803_v3, 264  ;;  %v7744_v12 = vcombine.high %v6591_v19, %v6595_v36  ;;  %v7743_v33 = vcombine.low %v6591_v19, %v6595_v36 }
 0x614   : > { %6521 = vbcast.lane.b32.xlu0 %v14025_v35, 256  ;;  %v7328_v45 = vcombine.high %v13796_v31, %v13806_v2  ;;  %v17165_v31 = vld [vmem:[#allocation187_spill] sm:$0xff] }
 0x615   : > { %v6130_v20 = vpop.permute.xlu1 %6129  ;;  %v6214_v56 = vpop.permute.xlu0 %6213  ;;  %v14094_v36 = vrot.slane %v7608_v6, %v10191_v11  ;;  %v7751_v49 = vrot.slane %v7743_v33, %v10191_v11 }
 0x616   : > { %v14081_v3 = vsel %vm2199_vm0, %v17159_v23, %v6130_v20  ;;  %v6597_v37 = vsel %vm2199_vm0, %v17162_v0, %v6214_v56  ;;  %v7758_v0 = vrot.slane %v7744_v12, %v10191_v11 }
 0x617   : > { %17160 = vst [vmem:[#allocation177_spill] sm:$0xff] %v14081_v3  ;;  %v7624_v29 = vcombine.high %v14077_v38, %v14081_v3  ;;  %6448 = vbcast.lane.b32.xlu1 %v13881_v51, 264  ;;  %v7759_v15 = vcombine.low %v6593_v26, %v6597_v37  ;;  %v7760_v19 = vcombine.high %v6593_v26, %v6597_v37 }
 0x618   : > { %8839 = vrot.lane.b32.xlu0 %v6784_v41, %s10001_s13 }
 0x619   : > { %v14097_v20 = vrot.slane %v7624_v29, %v10191_v11  ;;  %v6141_v57 = vpop.permute.xlu1 %6140  ;;  %v7767_v51 = vrot.slane %v7759_v15, %v10191_v11  ;;  %v7774_v37 = vrot.slane %v7760_v19, %v10191_v11  ;;  %v6225_v56 = vpop.permute.xlu0 %6224  ;;  %v17163_v19 = vld [vmem:[#allocation15_spill] sm:$0xff] }
 0x61a   : > { %v14114_v2 = vsel %vm2199_vm0, %v17163_v19, %v6141_v57  ;;  %v17169_v57 = vld [vmem:[#allocation185_spill] sm:$0xff] }
 0x61b   : > { %v7687_v41 = vcombine.low %v14094_v36, %v14097_v20  ;;  %6459 = vbcast.lane.b32.xlu1 %v13913_v58, 264  ;;  %v7808_v26 = vcombine.high %v7751_v49, %v7767_v51  ;;  %v7823_v29 = vcombine.low %v7758_v0, %v7774_v37  ;;  %v7824_v23 = vcombine.high %v7758_v0, %v7774_v37  ;;  %v17167_v58 = vld [vmem:[#allocation184_spill] sm:$0xff] }
 0x61c   : > { %8843 = vrot.lane.b32.xlu0 %v7328_v45, %s10001_s13  ;;  %17164 = vst [vmem:[#allocation181_spill] sm:$0xff] %v14114_v2  ;;  %v6599_v55 = vsel %vm2199_vm0, %v17167_v58, %v6225_v56  ;;  %v17168_v0 = vld [vmem:[#allocation188_spill] sm:$0xff]  ;;  %v17173_v58 = vld [vmem:[#allocation186_spill] sm:$0xff] }
 0x61d   : > { %v6152_v33 = vpop.permute.xlu1 %6151 }
 0x61e   : > { %v6236_v12 = vpop.permute.xlu0 %6235  ;;  %v14129_v19 = vsel %vm2199_vm0, %v17169_v57, %v6152_v33  ;;  %v7807_v57 = vcombine.low %v7751_v49, %v7767_v51 }
 0x61f   : > { %6470 = vbcast.lane.b32.xlu1 %v13928_v42, 264  ;;  %17170 = vst [vmem:[#allocation182_spill] sm:$0xff] %v14129_v19 }
 0x621   : > { %v6163_v15 = vpop.permute.xlu1 %6162 }
 0x622   : > { %v14118_v5 = vsel %vm2199_vm0, %v17165_v31, %v6163_v15  ;;  %v6247_v6 = vpop.permute.xlu0 %6246  ;;  %v17171_v15 = vld [vmem:[#allocation189_spill] sm:$0xff] }
 0x623   : > { %17166 = vst [vmem:[#allocation178_spill] sm:$0xff] %v14118_v5  ;;  %v7640_v45 = vcombine.high %v14114_v2, %v14118_v5  ;;  %v6603_v37 = vsel %vm2199_vm0, %v17168_v0, %v6247_v6  ;;  %6481 = vbcast.lane.b32.xlu1 %v13934_v43, 264  ;;  %v6601_v2 = vsel %vm2199_vm0, %v17173_v58, %v6236_v12  ;;  %v17174_v0 = vld [vmem:[#allocation190_spill] sm:$0xff] }
 0x624   : > { %v7776_v42 = vcombine.high %v6599_v55, %v6603_v37  ;;  %v7775_v31 = vcombine.low %v6599_v55, %v6603_v37 }
 0x625   : > { %v6174_v18 = vpop.permute.xlu1 %6173  ;;  %v7654_v55 = vrot.slane %v7640_v45, %v10191_v11  ;;  %v14150_v45 = vrot.slane %v7807_v57, %v10210_v47 }
 0x626   : > { %v14133_v30 = vsel %vm2199_vm0, %v17171_v15, %v6174_v18  ;;  %v6258_v56 = vpop.permute.xlu0 %6257  ;;  %v7783_v15 = vrot.slane %v7775_v31, %v10191_v11  ;;  %v7790_v12 = vrot.slane %v7776_v42, %v10191_v11  ;;  %v14153_v31 = vrot.slane %v7808_v26, %v10210_v47 }
 0x627   : > { %17172 = vst [vmem:[#allocation179_spill] sm:$0xff] %v14133_v30  ;;  %v7656_v6 = vcombine.high %v14129_v19, %v14133_v30  ;;  %v6605_v43 = vsel %vm2199_vm0, %v17174_v0, %v6258_v56  ;;  %6492 = vbcast.lane.b32.xlu1 %v13958_v24, 264  ;;  %17175 = vst [vmem:[#allocation183_spill] sm:$0xff] %v14150_v45  ;;  %v14156_v42 = vrot.slane %v7823_v29, %v10210_v47  ;;  %v17203_v19 = vld [vmem:[#allocation204_spill] sm:$0xff]  ;;  %v17205_v30 = vld [vmem:[#allocation201_spill] sm:$0xff] }
 0x628   : > { %v7791_v5 = vcombine.low %v6601_v2, %v6605_v43  ;;  %v7792_v33 = vcombine.high %v6601_v2, %v6605_v43  ;;  %v14171_v26 = vrot.slane %v7687_v41, %v10210_v47  ;;  %v14174_v29 = vrot.slane %v7824_v23, %v10210_v47 }
 0x629   : > { %v7670_v18 = vrot.slane %v7656_v6, %v10191_v11  ;;  %v6185_v37 = vpop.permute.xlu1 %6184 }
 0x62a   : > { %v7799_v58 = vrot.slane %v7791_v5, %v10191_v11  ;;  %v7806_v38 = vrot.slane %v7792_v33, %v10191_v11  ;;  %v6269_v3 = vpop.permute.xlu0 %6268  ;;  %17178 = vst [vmem:[#allocation184_spill] sm:$0xff] %v14171_v26  ;;  %v17199_v26 = vld [vmem:[#allocation199_spill] sm:$0xff] }
 0x62b   : > { %v7719_v56 = vcombine.low %v7654_v55, %v7670_v18  ;;  %v7720_v0 = vcombine.high %v7654_v55, %v7670_v18  ;;  %6503 = vbcast.lane.b32.xlu1 %v13981_v60, 264 }
 0x62c   : > { %v7839_v2 = vcombine.low %v7783_v15, %v7799_v58  ;;  %v7840_v24 = vcombine.high %v7783_v15, %v7799_v58  ;;  %v7855_v49 = vcombine.low %v7790_v12, %v7806_v38  ;;  %v7856_v51 = vcombine.high %v7790_v12, %v7806_v38  ;;  %v17185_v58 = vld [vmem:[#allocation195_spill] sm:$0xff]  ;;  %v17193_v15 = vld [vmem:[#allocation194_spill] sm:$0xff] }
 0x62d   : > { %v6196_v5 = vpop.permute.xlu1 %6195  ;;  %v14177_v57 = vrot.slane %v7719_v56, %v10210_v47  ;;  %v14180_v55 = vrot.slane %v7720_v0, %v10210_v47  ;;  %v17187_v56 = vld [vmem:[#allocation192_spill] sm:$0xff] }
 0x62e   : > { %v14159_v6 = vrot.slane %v7839_v2, %v10210_v47  ;;  %v14162_v43 = vrot.slane %v7840_v24, %v10210_v47  ;;  %v14165_v60 = vrot.slane %v7855_v49, %v10210_v47  ;;  %v14168_v38 = vrot.slane %v7856_v51, %v10210_v47  ;;  %v6280_v33 = vpop.permute.xlu0 %6279  ;;  %v17183_v49 = vld [vmem:[#allocation191_spill] sm:$0xff] }
 0x62f   : > { %17179 = vst [vmem:[#allocation188_spill] sm:$0xff] %v14177_v57  ;;  %17180 = vst [vmem:[#allocation185_spill] sm:$0xff] %v14180_v55  ;;  %6514 = vbcast.lane.b32.xlu1 %v13996_v48, 264  ;;  %v17181_v2 = vcombine.high %v14094_v36, %v14097_v20  ;;  %v14207_v51 = vsel %vm2199_vm0, %v17183_v49, %v6185_v37  ;;  %v6607_v0 = vsel %vm2199_vm0, %v17187_v56, %v6269_v3  ;;  %v17188_v36 = vld [vmem:[#allocation196_spill] sm:$0xff] }
 0x630   : > { %17176 = vst [vmem:[#allocation15_spill] sm:$0xff] %v14159_v6  ;;  %17177 = vst [vmem:[#allocation187_spill] sm:$0xff] %v14168_v38  ;;  %v7872_v18 = vcombine.high %v14150_v45, %v14159_v6  ;;  %v6920_v3 = vcombine.high %v13599_v52, %v13609_v8  ;;  %v17194_v8 = vld [vmem:[#allocation198_spill] sm:$0xff]  ;;  %v17201_v45 = vld [vmem:[#allocation200_spill] sm:$0xff] }
 0x631   : > { %v6207_v12 = vpop.permute.xlu1 %6206  ;;  %v14203_v24 = vrot.slane %v17181_v2, %v10210_v47  ;;  %17184 = vst [vmem:[#allocation186_spill] sm:$0xff] %v14207_v51 }
 0x632   : > { %v14211_v23 = vsel %vm2199_vm0, %v17185_v58, %v6207_v12  ;;  %8847 = vrot.lane.b32.xlu0 %v7872_v18, %s10001_s13  ;;  %v6291_v48 = vpop.permute.xlu0 %6290  ;;  %v6609_v18 = vsel %vm2199_vm0, %v17193_v15, %v6280_v33  ;;  %v7464_v33 = vcombine.high %v13986_v39, %v13999_v9 }
 0x633   : > { %17182 = vst [vmem:[#allocation189_spill] sm:$0xff] %v14203_v24  ;;  %17186 = vst [vmem:[#allocation190_spill] sm:$0xff] %v14211_v23  ;;  %v8016_v41 = vcombine.high %v14207_v51, %v14211_v23  ;;  %v6611_v20 = vsel %vm2199_vm0, %v17188_v36, %v6291_v48  ;;  %6525 = vbcast.lane.b32.xlu1 %v14025_v35, 264  ;;  %v17189_v48 = vld [vmem:[#allocation193_spill] sm:$0xff] }
 0x634   : > { %v7880_v2 = vcombine.high %v6607_v0, %v6611_v20  ;;  %v14233_v35 = vsel %vm2199_vm0, %v17189_v48, %v6196_v5  ;;  %v7879_v49 = vcombine.low %v6607_v0, %v6611_v20  ;;  %v17191_v36 = vld [vmem:[#allocation197_spill] sm:$0xff] }
 0x635   : > { %v6218_v58 = vpop.permute.xlu1 %6217  ;;  %17190 = vst [vmem:[#allocation191_spill] sm:$0xff] %v14233_v35  ;;  %v14247_v0 = vrot.slane %v8016_v41, %v10191_v11 }
 0x636   : > { %v14237_v37 = vsel %vm2199_vm0, %v17191_v36, %v6218_v58  ;;  %v6302_v12 = vpop.permute.xlu0 %6301  ;;  %v7887_v15 = vrot.slane %v7879_v49, %v10191_v11  ;;  %v7894_v48 = vrot.slane %v7880_v2, %v10191_v11  ;;  %v17195_v2 = vld [vmem:[#allocation26_spill] sm:$0xff] }
 0x637   : > { %17192 = vst [vmem:[#allocation195_spill] sm:$0xff] %v14237_v37  ;;  %v8032_v57 = vcombine.high %v14233_v35, %v14237_v37  ;;  %v6613_v52 = vsel %vm2199_vm0, %v17194_v8, %v6302_v12  ;;  %8841 = vrot.lane.b32.xlu1 %v6920_v3, %s10001_s13 }
 0x638   : > { %v7895_v56 = vcombine.low %v6609_v18, %v6613_v52  ;;  %v7896_v5 = vcombine.high %v6609_v18, %v6613_v52 }
 0x639   : > { %v14250_v20 = vrot.slane %v8032_v57, %v10191_v11  ;;  %v6229_v58 = vpop.permute.xlu1 %6228 }
 0x63a   : > { %v7903_v8 = vrot.slane %v7895_v56, %v10191_v11  ;;  %v7910_v12 = vrot.slane %v7896_v5, %v10191_v11  ;;  %v6313_v3 = vpop.permute.xlu0 %6312  ;;  %v14265_v56 = vsel %vm2199_vm0, %v17195_v2, %v6229_v58  ;;  %v17197_v5 = vld [vmem:[#allocation202_spill] sm:$0xff] }
 0x63b   : > { %v8095_v52 = vcombine.low %v14247_v0, %v14250_v20  ;;  %v8096_v57 = vcombine.high %v14247_v0, %v14250_v20  ;;  %8845 = vrot.lane.b32.xlu1 %v7464_v33, %s10001_s13  ;;  %17196 = vst [vmem:[#allocation192_spill] sm:$0xff] %v14265_v56  ;;  %v6615_v0 = vsel %vm2199_vm0, %v17199_v26, %v6313_v3  ;;  %v17200_v33 = vld [vmem:[#allocation203_spill] sm:$0xff] }
 0x63c   : > { %v7944_v41 = vcombine.high %v7887_v15, %v7903_v8  ;;  %v7959_v18 = vcombine.low %v7894_v48, %v7910_v12  ;;  %v7960_v36 = vcombine.high %v7894_v48, %v7910_v12  ;;  %v7943_v51 = vcombine.low %v7887_v15, %v7903_v8 }
 0x63d   : > { %v6240_v55 = vpop.permute.xlu1 %6239 }
 0x63e   : > { %v6324_v49 = vpop.permute.xlu0 %6323  ;;  %v14279_v58 = vsel %vm2199_vm0, %v17201_v45, %v6240_v55  ;;  %v14298_v8 = vrot.slane %v7943_v51, %v10210_v47 }
 0x63f   : > { %17202 = vst [vmem:[#allocation193_spill] sm:$0xff] %v14279_v58  ;;  %v6617_v26 = vsel %vm2199_vm0, %v17205_v30, %v6324_v49 }
 0x640   : > { %17207 = vst [vmem:[#allocation194_spill] sm:$0xff] %v14298_v8 }
 0x641   : > { %v6251_v24 = vpop.permute.xlu1 %6250 }
 0x642   : > { %v14269_v9 = vsel %vm2199_vm0, %v17197_v5, %v6251_v24  ;;  %v6335_v39 = vpop.permute.xlu0 %6334 }
 0x643   : > { %17198 = vst [vmem:[#allocation196_spill] sm:$0xff] %v14269_v9  ;;  %v8048_v20 = vcombine.high %v14265_v56, %v14269_v9  ;;  %v6619_v48 = vsel %vm2199_vm0, %v17200_v33, %v6335_v39 }
 0x644   : > { %v7912_v12 = vcombine.high %v6615_v0, %v6619_v48  ;;  %v7911_v2 = vcombine.low %v6615_v0, %v6619_v48 }
 0x645   : > { %v6262_v6 = vpop.permute.xlu1 %6261  ;;  %v8062_v45 = vrot.slane %v8048_v20, %v10191_v11  ;;  %v14301_v20 = vrot.slane %v7944_v41, %v10210_v47  ;;  %v14319_v41 = vrot.slane %v7960_v36, %v10210_v47  ;;  %v14336_v36 = vrot.slane %v8095_v52, %v10210_v47 }
 0x646   : > { %v14283_v24 = vsel %vm2199_vm0, %v17203_v19, %v6262_v6  ;;  %v6346_v5 = vpop.permute.xlu0 %6345  ;;  %v7919_v19 = vrot.slane %v7911_v2, %v10191_v11  ;;  %v7926_v6 = vrot.slane %v7912_v12, %v10191_v11  ;;  %v14304_v2 = vrot.slane %v7959_v18, %v10210_v47 }
 0x647   : > { %17204 = vst [vmem:[#allocation197_spill] sm:$0xff] %v14283_v24  ;;  %v8064_v3 = vcombine.high %v14279_v58, %v14283_v24  ;;  %v6621_v39 = vsel %vm2199_vm0, %v17206_v14, %v6346_v5  ;;  %17212 = vst [vmem:[#allocation203_spill] sm:$0xff] %v14319_v41  ;;  %v17235_v41 = vld [vmem:[#allocation215_spill] sm:$0xff] }
 0x648   : > { %v7927_v33 = vcombine.low %v6617_v26, %v6621_v39  ;;  %v7928_v13 = vcombine.high %v6617_v26, %v6621_v39  ;;  %17208 = vst [vmem:[#allocation198_spill] sm:$0xff] %v14304_v2  ;;  %17215 = vst [vmem:[#allocation201_spill] sm:$0xff] %v14336_v36 }
 0x649   : > { %v8078_v55 = vrot.slane %v8064_v3, %v10191_v11  ;;  %v6273_v0 = vpop.permute.xlu1 %6272 }
 0x64a   : > { %v7935_v30 = vrot.slane %v7927_v33, %v10191_v11  ;;  %v7942_v49 = vrot.slane %v7928_v13, %v10191_v11  ;;  %v6357_v48 = vpop.permute.xlu0 %6356 }
 0x64b   : > { %v8127_v23 = vcombine.low %v8062_v45, %v8078_v55  ;;  %v8128_v56 = vcombine.high %v8062_v45, %v8078_v55 }
 0x64c   : > { %v7975_v14 = vcombine.low %v7919_v19, %v7935_v30  ;;  %v7976_v5 = vcombine.high %v7919_v19, %v7935_v30  ;;  %v7991_v26 = vcombine.low %v7926_v6, %v7942_v49  ;;  %v7992_v15 = vcombine.high %v7926_v6, %v7942_v49  ;;  %v17219_v30 = vld [vmem:[#allocation210_spill] sm:$0xff]  ;;  %v17223_v49 = vld [vmem:[#allocation212_spill] sm:$0xff] }
 0x64d   : > { %v6284_v12 = vpop.permute.xlu1 %6283  ;;  %v14322_v18 = vrot.slane %v8127_v23, %v10210_v47  ;;  %v14325_v45 = vrot.slane %v8128_v56, %v10210_v47 }
 0x64e   : > { %v14307_v3 = vrot.slane %v7975_v14, %v10210_v47  ;;  %v14310_v13 = vrot.slane %v7976_v5, %v10210_v47  ;;  %v14313_v39 = vrot.slane %v7991_v26, %v10210_v47  ;;  %v14316_v33 = vrot.slane %v7992_v15, %v10210_v47  ;;  %v6368_v51 = vpop.permute.xlu0 %6367  ;;  %v17217_v26 = vld [vmem:[#allocation206_spill] sm:$0xff] }
 0x64f   : > { %17213 = vst [vmem:[#allocation200_spill] sm:$0xff] %v14322_v18  ;;  %17214 = vst [vmem:[#allocation204_spill] sm:$0xff] %v14325_v45  ;;  %v14345_v5 = vrot.slane %v8096_v57, %v10210_v47  ;;  %v14349_v15 = vsel %vm2199_vm0, %v17217_v26, %v6273_v0 }
 0x650   : > { %17209 = vst [vmem:[#allocation26_spill] sm:$0xff] %v14307_v3  ;;  %17210 = vst [vmem:[#allocation202_spill] sm:$0xff] %v14313_v39  ;;  %v8008_v55 = vcombine.high %v14298_v8, %v14307_v3 }
 0x651   : > { %17211 = vst [vmem:[#allocation199_spill] sm:$0xff] %v14316_v33  ;;  %v6295_v23 = vpop.permute.xlu1 %6294  ;;  %17216 = vst [vmem:[#allocation205_spill] sm:$0xff] %v14345_v5 }
 0x652   : > { %17218 = vst [vmem:[#allocation206_spill] sm:$0xff] %v14349_v15  ;;  %v14353_v52 = vsel %vm2199_vm0, %v17219_v30, %v6295_v23  ;;  %8849 = vrot.lane.b32.xlu1 %v8008_v55, %s10001_s13  ;;  %v6379_v56 = vpop.permute.xlu0 %6378  ;;  %v17221_v23 = vld [vmem:[#allocation208_spill] sm:$0xff] }
 0x653   : > { %17220 = vst [vmem:[#allocation210_spill] sm:$0xff] %v14353_v52  ;;  %v8152_v14 = vcombine.high %v14349_v15, %v14353_v52  ;;  %v14370_v6 = vsel %vm2199_vm0, %v17221_v23, %v6284_v12  ;;  %v17225_v12 = vld [vmem:[#allocation213_spill] sm:$0xff]  ;;  %v17227_v15 = vld [vmem:[#allocation211_spill] sm:$0xff] }
 0x654   : > { %17222 = vst [vmem:[#allocation208_spill] sm:$0xff] %v14370_v6  ;;  %v14390_v52 = vsel %vm2199_vm0, %v17227_v15, %v6379_v56  ;;  %v17233_v15 = vld [vmem:[#allocation218_spill] sm:$0xff] }
 0x655   : > { %v6306_v30 = vpop.permute.xlu1 %6305  ;;  %v8166_v0 = vrot.slane %v8152_v14, %v10191_v11 }
 0x656   : > { %v14374_v19 = vsel %vm2199_vm0, %v17223_v49, %v6306_v30  ;;  %v6390_v3 = vpop.permute.xlu0 %6389  ;;  %v17226_v49 = vld [vmem:[#allocation209_spill] sm:$0xff] }
 0x657   : > { %17224 = vst [vmem:[#allocation212_spill] sm:$0xff] %v14374_v19  ;;  %v8168_v57 = vcombine.high %v14370_v6, %v14374_v19  ;;  %v14382_v23 = vsel %vm2199_vm0, %v17225_v12, %v6390_v3  ;;  %v14386_v30 = vsel %vm2199_vm0, %v17226_v49, %v6368_v51  ;;  %v17228_v6 = vld [vmem:[#allocation17_spill] sm:$0xff]  ;;  %v17232_v19 = vld [vmem:[#allocation207_spill] sm:$0xff] }
 0x658   : > { %v14404_v51 = vsel %vm2199_vm0, %v17232_v19, %v6357_v48 }
 0x659   : > { %v8182_v26 = vrot.slane %v8168_v57, %v10191_v11  ;;  %v6317_v8 = vpop.permute.xlu1 %6316  ;;  %v8303_v57 = vcombine.low %v14386_v30, %v14382_v23 }
 0x65a   : > { %v6401_v18 = vpop.permute.xlu0 %6400 }
 0x65b   : > { %v8231_v36 = vcombine.low %v8166_v0, %v8182_v26  ;;  %v8232_v55 = vcombine.high %v8166_v0, %v8182_v26  ;;  %v14396_v0 = vsel %vm2199_vm0, %v17228_v6, %v6317_v8  ;;  %v17230_v26 = vld [vmem:[#allocation217_spill] sm:$0xff]  ;;  %v8287_v8 = vcombine.low %v14404_v51, %v14390_v52  ;;  %v17234_v6 = vld [vmem:[#allocation214_spill] sm:$0xff] }
 0x65c   : > { %17229 = vst [vmem:[#allocation213_spill] sm:$0xff] %v14396_v0  ;;  %v14416_v33 = vsel %vm2199_vm0, %v17234_v6, %v6401_v18 }
 0x65d   : > { %v6328_v45 = vpop.permute.xlu1 %6327 }
 0x65e   : > { %v6412_v5 = vpop.permute.xlu0 %6411  ;;  %v14421_v48 = vsel %vm2199_vm0, %v17235_v41, %v6328_v45  ;;  %v8295_v41 = vrot.slane %v8287_v8, %v10191_v11 }
 0x65f   : > { %17236 = vst [vmem:[#allocation211_spill] sm:$0xff] %v14421_v48 }
 0x661   : > { %v6339_v14 = vpop.permute.xlu1 %6338 }
 0x662   : > { %v14400_v3 = vsel %vm2199_vm0, %v17230_v26, %v6339_v14  ;;  %v6423_v12 = vpop.permute.xlu0 %6422  ;;  %v8311_v26 = vrot.slane %v8303_v57, %v10191_v11  ;;  %v17240_v57 = vld [vmem:[#allocation220_spill] sm:$0xff] }
 0x663   : > { %17231 = vst [vmem:[#allocation209_spill] sm:$0xff] %v14400_v3  ;;  %v8184_v56 = vcombine.high %v14396_v0, %v14400_v3  ;;  %v14410_v49 = vsel %vm2199_vm0, %v17233_v15, %v6423_v12  ;;  %v17237_v0 = vld [vmem:[#allocation219_spill] sm:$0xff]  ;;  %v17239_v3 = vld [vmem:[#allocation216_spill] sm:$0xff] }
 0x664   : > { %v8319_v19 = vcombine.low %v14416_v33, %v14410_v49  ;;  %v14431_v9 = vsel %vm2199_vm0, %v17239_v3, %v6412_v5  ;;  %v8351_v37 = vcombine.low %v8295_v41, %v8311_v26 }
 0x665   : > { %v6350_v14 = vpop.permute.xlu1 %6349 }
 0x666   : > { %v14427_v12 = vsel %vm2199_vm0, %v17237_v0, %v6350_v14  ;;  %v6434_v15 = vpop.permute.xlu0 %6433  ;;  %v8198_v0 = vrot.slane %v8184_v56, %v10191_v11  ;;  %v8327_v5 = vrot.slane %v8319_v19, %v10191_v11  ;;  %v14447_v8 = vrot.slane %v8351_v37, %v10210_v47 }
 0x667   : > { %17238 = vst [vmem:[#allocation17_spill] sm:$0xff] %v14427_v12  ;;  %v8200_v18 = vcombine.high %v14421_v48, %v14427_v12  ;;  %v14437_v6 = vsel %vm2199_vm0, %v17240_v57, %v6434_v15  ;;  %v17255_v37 = vcombine.low %v13420_v27, %v13427_v53 }
 0x668   : > { %v8335_v45 = vcombine.low %v14431_v9, %v14437_v6  ;;  %17241 = vst [vmem:[#allocation217_spill] sm:$0xff] %v14447_v8 }
 0x669   : > { %v8214_v14 = vrot.slane %v8200_v18, %v10191_v11  ;;  %v6361_v35 = vpop.permute.xlu1 %6360 }
 0x66a   : > { %v8343_v3 = vrot.slane %v8335_v45, %v10191_v11  ;;  %v6445_v48 = vpop.permute.xlu0 %6444  ;;  %v14461_v45 = vrot.slane %v8231_v36, %v10210_v47 }
 0x66b   : > { %v8263_v12 = vcombine.low %v8198_v0, %v8214_v14  ;;  %v8264_v58 = vcombine.high %v8198_v0, %v8214_v14  ;;  %v14466_v14 = vrot.slane %v8232_v55, %v10210_v47 }
 0x66c   : > { %v8383_v15 = vcombine.low %v8327_v5, %v8343_v3  ;;  %17245 = vst [vmem:[#allocation215_spill] sm:$0xff] %v14461_v45 }
 0x66d   : > { %v6372_v57 = vpop.permute.xlu1 %6371  ;;  %v14453_v18 = vrot.slane %v8263_v12, %v10210_v47  ;;  %v14456_v44 = vrot.slane %v8264_v58, %v10210_v47  ;;  %17246 = vst [vmem:[#allocation219_spill] sm:$0xff] %v14466_v14 }
 0x66e   : > { %v14450_v24 = vrot.slane %v8383_v15, %v10210_v47  ;;  %v6456_v56 = vpop.permute.xlu0 %6455  ;;  %v17247_v15 = vld [vmem:[#allocation221_spill] sm:$0xff] }
 0x66f   : > { %17243 = vst [vmem:[#allocation218_spill] sm:$0xff] %v14453_v18  ;;  %17244 = vst [vmem:[#allocation214_spill] sm:$0xff] %v14456_v44  ;;  %v14470_v12 = vsel %vm2199_vm0, %v17247_v15, %v6361_v35  ;;  %v8384_v18 = vcombine.high %v8327_v5, %v8343_v3  ;;  %v8352_v44 = vcombine.high %v8295_v41, %v8311_v26  ;;  %v17258_v41 = vld [vmem:[#allocation228_spill] sm:$0xff] }
 0x670   : > { %17242 = vst [vmem:[#allocation207_spill] sm:$0xff] %v14450_v24  ;;  %v8416_v19 = vcombine.high %v14447_v8, %v14450_v24  ;;  %17248 = vst [vmem:[#allocation216_spill] sm:$0xff] %v14470_v12  ;;  %v17253_v24 = vld [vmem:[#allocation227_spill] sm:$0xff] }
 0x671   : > { %v6383_v0 = vpop.permute.xlu1 %6382  ;;  %v8398_v45 = vrot.slane %v8384_v18, %v10210_v47  ;;  %v8366_v3 = vrot.slane %v8352_v44, %v10210_v47 }
 0x672   : > { %v14474_v58 = vsel %vm2199_vm0, %v17249_v59, %v6383_v0  ;;  %8851 = vrot.lane.b32.xlu0 %v8416_v19, %s10001_s13  ;;  %v6467_v28 = vpop.permute.xlu0 %6466  ;;  %v17251_v0 = vld [vmem:[#allocation223_spill] sm:$0xff] }
 0x673   : > { %17250 = vst [vmem:[#allocation220_spill] sm:$0xff] %v14474_v58  ;;  %v8560_v36 = vcombine.high %v14470_v12, %v14474_v58  ;;  %v14489_v19 = vsel %vm2199_vm0, %v17251_v0, %v6372_v57  ;;  %v17259_v12 = vld [vmem:[#allocation224_spill] sm:$0xff] }
 0x674   : > { %17252 = vst [vmem:[#allocation221_spill] sm:$0xff] %v14489_v19  ;;  %v14523_v58 = vsel %vm2199_vm0, %v17259_v12, %v6456_v56  ;;  %v17265_v12 = vld [vmem:[#allocation222_spill] sm:$0xff] }
 0x675   : > { %v6394_v15 = vpop.permute.xlu1 %6393  ;;  %v14502_v59 = vrot.slane %v8560_v36, %v10191_v11  ;;  %v17257_v36 = vcombine.low %v14153_v31, %v14162_v43 }
 0x676   : > { %v14493_v8 = vsel %vm2199_vm0, %v17253_v24, %v6394_v15  ;;  %8871 = vrot.lane.b32.xlu0 %v17255_v37, %s10002_s15  ;;  %v6478_v55 = vpop.permute.xlu0 %6477  ;;  %v17256_v24 = vcombine.low %v13799_v63, %v13809_v1 }
 0x677   : > { %17254 = vst [vmem:[#allocation225_spill] sm:$0xff] %v14493_v8  ;;  %v8576_v35 = vcombine.high %v14489_v19, %v14493_v8  ;;  %v17261_v19 = vld [vmem:[#allocation28_spill] sm:$0xff] }
 0x678   : > { %v17263_v8 = vld [vmem:[#allocation232_spill] sm:$0xff] }
 0x679   : > { %v8590_v57 = vrot.slane %v8576_v35, %v10191_v11  ;;  %v6405_v0 = vpop.permute.xlu1 %6404  ;;  %v14519_v35 = vsel %vm2199_vm0, %v17258_v41, %v6478_v55  ;;  %v14542_v41 = vsel %vm2199_vm0, %v17265_v12, %v6445_v48  ;;  %v17268_v48 = vld [vmem:[#allocation230_spill] sm:$0xff] }
 0x67a   : > { %8875 = vrot.lane.b32.xlu0 %v17256_v24, %s10002_s15  ;;  %v6489_v15 = vpop.permute.xlu0 %6488  ;;  %v8417_v24 = vcombine.low %v8366_v3, %v8398_v45 }
 0x67b   : > { %v8639_v37 = vcombine.low %v14502_v59, %v8590_v57  ;;  %v8640_v14 = vcombine.high %v14502_v59, %v8590_v57  ;;  %v17260_v59 = vld [vmem:[#allocation226_spill] sm:$0xff]  ;;  %v8439_v57 = vcombine.low %v14523_v58, %v14519_v35 }
 0x67c   : > { %v14527_v18 = vsel %vm2199_vm0, %v17260_v59, %v6467_v28  ;;  %v17266_v59 = vld [vmem:[#allocation233_spill] sm:$0xff] }
 0x67d   : > { %v6416_v5 = vpop.permute.xlu1 %6415 }
 0x67e   : > { %8879 = vrot.lane.b32.xlu0 %v17257_v36, %s10002_s15  ;;  %v6500_v26 = vpop.permute.xlu0 %6499  ;;  %v14533_v36 = vsel %vm2199_vm0, %v17261_v19, %v6405_v0  ;;  %v8423_v19 = vcombine.low %v14542_v41, %v14527_v18  ;;  %v17267_v0 = vld [vmem:[#allocation229_spill] sm:$0xff]  ;;  %v14561_v12 = vsel %vm2199_vm0, %v17268_v48, %v6416_v5  ;;  %v17274_v48 = vld [vmem:[#allocation235_spill] sm:$0xff] }
 0x67f   : > { %17262 = vst [vmem:[#allocation223_spill] sm:$0xff] %v14533_v36  ;;  %17269 = vst [vmem:[#allocation228_spill] sm:$0xff] %v14561_v12 }
 0x681   : > { %v6427_v44 = vpop.permute.xlu1 %6426 }
 0x682   : > { %v14537_v55 = vsel %vm2199_vm0, %v17263_v8, %v6427_v44  ;;  %8883 = vrot.lane.b32.xlu0 %v8417_v24, %s10002_s15  ;;  %v6511_v56 = vpop.permute.xlu0 %6510  ;;  %v14554_v8 = vsel %vm2199_vm0, %v17267_v0, %v6489_v15  ;;  %v14557_v44 = vrot.slane %v8439_v57, %v10191_v11  ;;  %v17272_v15 = vcombine.high %v13420_v27, %v13427_v53 }
 0x683   : > { %17264 = vst [vmem:[#allocation227_spill] sm:$0xff] %v14537_v55  ;;  %v8592_v28 = vcombine.high %v14533_v36, %v14537_v55  ;;  %v14548_v39 = vsel %vm2199_vm0, %v17266_v59, %v6511_v56  ;;  %v17270_v56 = vld [vmem:[#allocation234_spill] sm:$0xff]  ;;  %v17273_v55 = vld [vmem:[#allocation231_spill] sm:$0xff] }
 0x684   : > { %v8455_v36 = vcombine.low %v14554_v8, %v14548_v39  ;;  %v14575_v57 = vsel %vm2199_vm0, %v17273_v55, %v6500_v26 }
 0x685   : > { %v6438_v24 = vpop.permute.xlu1 %6437  ;;  %v8606_v27 = vrot.slane %v8592_v28, %v10191_v11 }
 0x686   : > { %v14567_v59 = vsel %vm2199_vm0, %v17270_v56, %v6438_v24  ;;  %8903 = vrot.lane.b32.xlu0 %v17272_v15, %s10003_s16  ;;  %v6522_v0 = vpop.permute.xlu0 %6521  ;;  %v14584_v24 = vrot.slane %v8423_v19, %v10191_v11  ;;  %v8463_v55 = vrot.slane %v8455_v36, %v10191_v11  ;;  %v17275_v19 = vcombine.high %v13799_v63, %v13809_v1 }
 0x687   : > { %17271 = vst [vmem:[#allocation224_spill] sm:$0xff] %v14567_v59  ;;  %v8608_v5 = vcombine.high %v14561_v12, %v14567_v59  ;;  %v14581_v2 = vsel %vm2199_vm0, %v17274_v48, %v6522_v0  ;;  %v17276_v36 = vcombine.high %v14153_v31, %v14162_v43  ;;  %v8336_v63 = vcombine.high %v14431_v9, %v14437_v6  ;;  %v17279_v6 = vld [vmem:[#allocation236_spill] sm:$0xff] }
 0x688   : > { %v8471_v56 = vcombine.low %v14575_v57, %v14581_v2  ;;  %v8487_v26 = vcombine.low %v14584_v24, %v14557_v44  ;;  %v8320_v31 = vcombine.high %v14416_v33, %v14410_v49  ;;  %v14623_v43 = vrot.slane %v8639_v37, %v10210_v47  ;;  %v17291_v49 = vld [vmem:[#allocation241_spill] sm:$0xff] }
 0x689   : > { %v8622_v53 = vrot.slane %v8608_v5, %v10191_v11  ;;  %v6449_v15 = vpop.permute.xlu1 %6448 }
 0x68a   : > { %v8479_v12 = vrot.slane %v8471_v56, %v10191_v11  ;;  %8907 = vrot.lane.b32.xlu0 %v17275_v19, %s10003_s16  ;;  %v14599_v28 = vrot.slane %v8487_v26, %v10210_v47  ;;  %v14626_v26 = vrot.slane %v8640_v14, %v10210_v47  ;;  %v14630_v19 = vsel %vm2199_vm0, %v17279_v6, %v6449_v15 }
 0x68b   : > { %v8671_v0 = vcombine.low %v8606_v27, %v8622_v53  ;;  %v8672_v48 = vcombine.high %v8606_v27, %v8622_v53  ;;  %v8418_v27 = vcombine.high %v8366_v3, %v8398_v45  ;;  %v17280_v45 = vld [vmem:[#allocation238_spill] sm:$0xff]  ;;  %v14647_v14 = vrot.slane %v8336_v63, %v10191_v11 }
 0x68c   : > { %v8519_v59 = vcombine.low %v8463_v55, %v8479_v12  ;;  %17278 = vst [vmem:[#allocation28_spill] sm:$0xff] %v14626_v26 }
 0x68d   : > { %v6460_v38 = vpop.permute.xlu1 %6459  ;;  %v14609_v56 = vrot.slane %v8671_v0, %v10210_v47  ;;  %v14614_v1 = vrot.slane %v8672_v48, %v10210_v47  ;;  %v14659_v48 = vrot.slane %v8320_v31, %v10191_v11 }
 0x68e   : > { %v14602_v5 = vrot.slane %v8519_v59, %v10210_v47  ;;  %8911 = vrot.lane.b32.xlu0 %v17276_v36, %s10003_s16  ;;  %v8304_v59 = vcombine.high %v14386_v30, %v14382_v23  ;;  %v8288_v23 = vcombine.high %v14404_v51, %v14390_v52  ;;  %v17281_v36 = vld [vmem:[#allocation237_spill] sm:$0xff] }
 0x68f   : > { %17277 = vst [vmem:[#allocation226_spill] sm:$0xff] %v14614_v1  ;;  %v14663_v63 = vsel %vm2199_vm0, %v17281_v36, %v6460_v38  ;;  %v8399_v6 = vcombine.low %v14659_v48, %v14647_v14  ;;  %v17364_v1 = vld [vmem:[#allocation262_spill] sm:$0xff] }
 0x690   : > { %v8552_v53 = vcombine.high %v14599_v28, %v14602_v5  ;;  %v14656_v52 = vrot.slane %v8304_v59, %v10191_v11  ;;  %v17284_v59 = vcombine.low %v13602_v62, %v13612_v32  ;;  %v14680_v38 = vrot.slane %v8288_v23, %v10191_v11 }
 0x691   : > { %v6471_v9 = vpop.permute.xlu1 %6470  ;;  %v17285_v23 = vcombine.low %v13824_v21, %v13812_v7 }
 0x692   : > { %v14634_v3 = vsel %vm2199_vm0, %v17280_v45, %v6471_v9  ;;  %8915 = vrot.lane.b32.xlu0 %v8418_v27, %s10003_s16  ;;  %8853 = vrot.lane.b32.xlu1 %v8552_v53, %s10001_s13  ;;  %v17282_v27 = vld [vmem:[#allocation239_spill] sm:$0xff]  ;;  %v17283_v9 = vcombine.low %v13436_v50, %v13430_v46  ;;  %v8520_v45 = vcombine.high %v8463_v55, %v8479_v12 }
 0x693   : > { %v8696_v30 = vcombine.high %v14630_v19, %v14634_v3  ;;  %v17286_v12 = vcombine.low %v13989_v40, %v14002_v10 }
 0x694   : > { %v8534_v0 = vrot.slane %v8520_v45, %v10210_v47 }
 0x695   : > { %v6482_v51 = vpop.permute.xlu1 %6481 }
 0x696   : > { %v14667_v53 = vsel %vm2199_vm0, %v17282_v27, %v6482_v51  ;;  %8935 = vrot.lane.b32.xlu0 %v17283_v9, %s10004_s17  ;;  %8873 = vrot.lane.b32.xlu1 %v17284_v59, %s10002_s15  ;;  %v8710_v51 = vrot.slane %v8696_v30, %v10191_v11  ;;  %v8367_v9 = vcombine.low %v14680_v38, %v14656_v52 }
 0x697   : > { %v8712_v31 = vcombine.high %v14663_v63, %v14667_v53  ;;  %v8488_v59 = vcombine.high %v14584_v24, %v14557_v44  ;;  %v17287_v24 = vcombine.low %v14156_v42, %v14165_v60 }
 0x698   : > { %v8375_v33 = vrot.slane %v8367_v9, %v10210_v47  ;;  %v17289_v9 = vld [vmem:[#allocation240_spill] sm:$0xff] }
 0x699   : > { %v8726_v36 = vrot.slane %v8712_v31, %v10191_v11  ;;  %v6493_v27 = vpop.permute.xlu1 %6492  ;;  %v8407_v31 = vrot.slane %v8399_v6, %v10210_v47  ;;  %v8502_v44 = vrot.slane %v8488_v59, %v10210_v47 }
 0x69a   : > { %8939 = vrot.lane.b32.xlu0 %v17285_v23, %s10004_s17  ;;  %8877 = vrot.lane.b32.xlu1 %v17286_v12, %s10002_s15  ;;  %v17288_v23 = vcombine.low %v14301_v20, %v14310_v13  ;;  %v14712_v45 = vsel %vm2199_vm0, %v13370_v54, %v6493_v27  ;;  %v17292_v27 = vcombine.high %v13436_v50, %v13430_v46 }
 0x69b   : > { %v8775_v55 = vcombine.low %v8710_v51, %v8726_v36  ;;  %v8776_v30 = vcombine.high %v8710_v51, %v8726_v36  ;;  %v8419_v51 = vcombine.low %v8375_v33, %v8407_v31  ;;  %v8553_v36 = vcombine.low %v8502_v44, %v8534_v0 }
 0x69c   : > { %v17295_v46 = vcombine.high %v13989_v40, %v14002_v10  ;;  %v8472_v40 = vcombine.high %v14575_v57, %v14581_v2  ;;  %v8420_v10 = vcombine.high %v8375_v33, %v8407_v31  ;;  %v8456_v2 = vcombine.high %v14554_v8, %v14548_v39 }
 0x69d   : > { %v6504_v15 = vpop.permute.xlu1 %6503  ;;  %v8368_v31 = vcombine.high %v14680_v38, %v14656_v52  ;;  %v17307_v38 = vld [vmem:[#allocation187_spill] sm:$0xff] }
 0x69e   : > { %8943 = vrot.lane.b32.xlu0 %v17287_v24, %s10004_s17  ;;  %8881 = vrot.lane.b32.xlu1 %v17288_v23, %s10002_s15  ;;  %v17290_v23 = vld [vmem:[#allocation10_spill] sm:$0xff]  ;;  %v14789_v57 = vrot.slane %v8472_v40, %v10191_v11 }
 0x69f   : > { %v14724_v37 = vsel %vm2199_vm0, %v17290_v23, %v6504_v15  ;;  %v8554_v23 = vcombine.high %v8502_v44, %v8534_v0  ;;  %v14795_v0 = vrot.slane %v8456_v2, %v10191_v11  ;;  %v17316_v2 = vld [vmem:[#allocation249_spill] sm:$0xff] }
 0x6a1   : > { %v6515_v6 = vpop.permute.xlu1 %6514  ;;  %v8535_v8 = vcombine.low %v14795_v0, %v14789_v57 }
 0x6a2   : > { %v14716_v59 = vsel %vm2199_vm0, %v17289_v9, %v6515_v6  ;;  %8947 = vrot.lane.b32.xlu0 %v8419_v51, %s10004_s17  ;;  %8885 = vrot.lane.b32.xlu1 %v8553_v36, %s10002_s15  ;;  %v17293_v51 = vcombine.high %v13602_v62, %v13612_v32 }
 0x6a3   : > { %v8728_v12 = vcombine.high %v14712_v45, %v14716_v59 }
 0x6a5   : > { %v6526_v24 = vpop.permute.xlu1 %6525  ;;  %v8742_v15 = vrot.slane %v8728_v12, %v10191_v11  ;;  %v14757_v12 = vrot.slane %v8775_v55, %v10210_v47 }
 0x6a6   : > { %v14728_v54 = vsel %vm2199_vm0, %v17291_v49, %v6526_v24  ;;  %8967 = vrot.lane.b32.xlu0 %v17292_v27, %s10005_s22  ;;  %8905 = vrot.lane.b32.xlu1 %v17293_v51, %s10003_s16  ;;  %v17294_v49 = vcombine.high %v13824_v21, %v13812_v7  ;;  %v14760_v24 = vrot.slane %v8776_v30, %v10210_v47  ;;  %vm9463_vm0 = vcmask 261120  }
 0x6a7   : > { %v8744_v36 = vcombine.high %v14724_v37, %v14728_v54  ;;  %17298 = vst [vmem:[#allocation233_spill] sm:$0xff] %v14757_v12  ;;  %v17300_v7 = vcombine.high %v14156_v42, %v14165_v60  ;;  %v17301_v21 = vcombine.high %v14301_v20, %v14310_v13  ;;  %v8440_v20 = vcombine.high %v14523_v58, %v14519_v35  ;;  %v17302_v58 = vld [vmem:[#allocation244_spill] sm:$0xff]  ;;  %v17360_v42 = vld [vmem:[#allocation157_spill] sm:$0xff] }
 0x6a8   : > { %17299 = vst [vmem:[#allocation229_spill] sm:$0xff] %v14760_v24  ;;  %v8424_v13 = vcombine.high %v14542_v41, %v14527_v18  ;;  %v17303_v39 = vcombine.low %v13439_v25, %v17302_v58  ;;  %v17304_v35 = vcombine.low %v13627_v4, %v13615_v16  ;;  %v8400_v18 = vcombine.high %v14659_v48, %v14647_v14  ;;  %v17363_v24 = vld [vmem:[#allocation13_spill] sm:$0xff] }
 0x6a9   : > { %v8758_v6 = vrot.slane %v8744_v36, %v10191_v11  ;;  %v14792_v33 = vrot.slane %v8440_v20, %v10191_v11  ;;  %v17305_v27 = vcombine.low %v13827_v34, %v13815_v22  ;;  %v17306_v14 = vcombine.low %v14017_v61, %v14005_v17 }
 0x6aa   : > { %8971 = vrot.lane.b32.xlu0 %v17294_v49, %s10005_s22  ;;  %8909 = vrot.lane.b32.xlu1 %v17295_v46, %s10003_s16  ;;  %v14808_v41 = vrot.slane %v8424_v13, %v10191_v11  ;;  %v8414_v48 = vrot.slane %v8400_v18, %v10210_v47  ;;  %v8543_v51 = vrot.slane %v8535_v8, %v10210_v47  ;;  %v17310_v49 = vld [vmem:[#allocation202_spill] sm:$0xff]  ;;  %v17317_v13 = vld [vmem:[#allocation248_spill] sm:$0xff] }
 0x6ab   : > { %v8807_v50 = vcombine.low %v8742_v15, %v8758_v6  ;;  %v8808_v62 = vcombine.high %v8742_v15, %v8758_v6  ;;  %v8382_v36 = vrot.slane %v8368_v31, %v10210_v47  ;;  %v17308_v15 = vcombine.low %v14174_v29, %v17307_v38  ;;  %v17309_v6 = vld [vmem:[#allocation198_spill] sm:$0xff]  ;;  %v17321_v31 = vld [vmem:[#allocation245_spill] sm:$0xff] }
 0x6ac   : > { %v8503_v44 = vcombine.low %v14808_v41, %v14792_v33  ;;  %v17311_v46 = vcombine.low %v17309_v6, %v17310_v49  ;;  %v17319_v18 = vcombine.high %v13627_v4, %v13615_v16  ;;  %v17320_v8 = vld [vmem:[#allocation246_spill] sm:$0xff]  ;;  %v17326_v16 = vld [vmem:[#allocation33_spill] sm:$0xff]  ;;  %v17327_v4 = vld [vmem:[#allocation163_spill] sm:$0xff]  ;;  %v7079_v26 = vcombine.low %v17364_v1, %v17363_v24 }
 0x6ad   : > { %v14751_v32 = vrot.slane %v8807_v50, %v10210_v47  ;;  %v14754_v9 = vrot.slane %v8808_v62, %v10210_v47  ;;  %v8421_v50 = vcombine.low %v8382_v36, %v8414_v48 }
 0x6ae   : > { %8975 = vrot.lane.b32.xlu0 %v17300_v7, %s10005_s22  ;;  %8913 = vrot.lane.b32.xlu1 %v17301_v21, %s10003_s16  ;;  %v8511_v52 = vrot.slane %v8503_v44, %v10210_v47  ;;  %v17312_v7 = vld [vmem:[#allocation251_spill] sm:$0xff]  ;;  %v17313_v21 = vld [vmem:[#allocation250_spill] sm:$0xff]  ;;  %v6927_v44 = vcombine.low %v17321_v31, %v17320_v8 }
 0x6af   : > { %17296 = vst [vmem:[#allocation232_spill] sm:$0xff] %v14751_v32  ;;  %17297 = vst [vmem:[#allocation222_spill] sm:$0xff] %v14754_v9  ;;  %v6975_v40 = vcombine.low %v17313_v21, %v17312_v7  ;;  %v7503_v21 = vcombine.low %v17327_v4, %v17326_v16  ;;  %v17334_v31 = vld [vmem:[#allocation195_spill] sm:$0xff]  ;;  %v17339_v16 = vcombine.high %v17309_v6, %v17310_v49 }
 0x6b0   : > { %v8555_v62 = vcombine.low %v8511_v52, %v8543_v51  ;;  %v8556_v6 = vcombine.high %v8511_v52, %v8543_v51 }
 0x6b2   : > { %8979 = vrot.lane.b32.xlu0 %v8420_v10, %s10005_s22  ;;  %8917 = vrot.lane.b32.xlu1 %v8554_v23, %s10003_s16  ;;  %v17314_v10 = vld [vmem:[#allocation30_spill] sm:$0xff]  ;;  %v17315_v23 = vld [vmem:[#allocation247_spill] sm:$0xff] }
 0x6b3   : > { %v6943_v20 = vcombine.low %v17315_v23, %v17314_v10  ;;  %v17329_v10 = vcombine.high %v14017_v61, %v14005_v17  ;;  %v14878_v23 = vrot.slane %v6927_v44, %v10191_v11  ;;  %v14895_v61 = vrot.slane %v7503_v21, %v10191_v11  ;;  %v17335_v44 = vld [vmem:[#allocation191_spill] sm:$0xff] }
 0x6b6   : > { %8999 = vrot.lane.b32.xlu0 %v17303_v39, %s10006_s23  ;;  %8937 = vrot.lane.b32.xlu1 %v17304_v35, %s10004_s17  ;;  %v6959_v39 = vcombine.low %v17317_v13, %v17316_v2  ;;  %v17318_v35 = vcombine.high %v13439_v25, %v17302_v58  ;;  %v17324_v58 = vld [vmem:[#allocation166_spill] sm:$0xff]  ;;  %v17331_v13 = vld [vmem:[#allocation161_spill] sm:$0xff] }
 0x6b7   : > { %v17330_v2 = vld [vmem:[#allocation162_spill] sm:$0xff] }
 0x6b8   : > { %v14863_v25 = vrot.slane %v6959_v39, %v10191_v11  ;;  %v7471_v39 = vcombine.low %v17331_v13, %v17330_v2 }
 0x6ba   : > { %9003 = vrot.lane.b32.xlu0 %v17305_v27, %s10006_s23  ;;  %8941 = vrot.lane.b32.xlu1 %v17306_v14, %s10004_s17  ;;  %v14855_v27 = vrot.slane %v6975_v40, %v10191_v11  ;;  %v17322_v14 = vld [vmem:[#allocation167_spill] sm:$0xff]  ;;  %v17328_v40 = vcombine.high %v13827_v34, %v13815_v22  ;;  %v17333_v22 = vld [vmem:[#allocation193_spill] sm:$0xff]  ;;  %v14911_v4 = vrot.slane %v7471_v39, %v10191_v11 }
 0x6bc   : > { %v7024_v32 = vcombine.high %v14863_v25, %v14855_v27 }
 0x6be   : > { %9007 = vrot.lane.b32.xlu0 %v17308_v15, %s10006_s23  ;;  %8945 = vrot.lane.b32.xlu1 %v17311_v46, %s10004_s17  ;;  %v17323_v15 = vld [vmem:[#allocation164_spill] sm:$0xff] }
 0x6bf   : > { %v7519_v46 = vcombine.low %v17323_v15, %v17322_v14  ;;  %v8031_v14 = vcombine.low %v17335_v44, %v17334_v31  ;;  %v17336_v15 = vld [vmem:[#allocation196_spill] sm:$0xff]  ;;  %v17344_v44 = vld [vmem:[#allocation225_spill] sm:$0xff] }
 0x6c1   : > { %v14926_v39 = vrot.slane %v8031_v14, %v10191_v11  ;;  %v17349_v14 = vld [vmem:[#allocation216_spill] sm:$0xff] }
 0x6c2   : > { %9011 = vrot.lane.b32.xlu0 %v8421_v50, %s10006_s23  ;;  %8949 = vrot.lane.b32.xlu1 %v8555_v62, %s10004_s17  ;;  %v14860_v50 = vrot.slane %v6943_v20, %v10191_v11  ;;  %v17325_v62 = vld [vmem:[#allocation165_spill] sm:$0xff]  ;;  %v7023_v20 = vcombine.low %v14863_v25, %v14855_v27  ;;  %v15039_v25 = vrot.slane %v7079_v26, %v10191_v11  ;;  %s10016_s17 = smov [#allocation5]  }
 0x6c3   : > { %v7487_v7 = vcombine.low %v17325_v62, %v17324_v58  ;;  %v17337_v58 = vld [vmem:[#allocation192_spill] sm:$0xff] }
 0x6c4   : > { %v6991_v8 = vcombine.low %v14878_v23, %v14860_v50  ;;  %v8047_v62 = vcombine.low %v17337_v58, %v17336_v15  ;;  %v17345_v15 = vld [vmem:[#allocation221_spill] sm:$0xff]  ;;  %v17346_v58 = vld [vmem:[#allocation227_spill] sm:$0xff]  ;;  %v6992_v1 = vcombine.high %v14878_v23, %v14860_v50  ;;  %v17375_v23 = vld [vmem:[#allocation176_spill] sm:$0xff] }
 0x6c5   : > { %v14892_v17 = vrot.slane %v7487_v7, %v10191_v11  ;;  %v7031_v7 = vrot.slane %v7023_v20, %v10210_v47 }
 0x6c6   : > { %9031 = vrot.lane.b32.xlu0 %v17318_v35, %s10007_s24  ;;  %8969 = vrot.lane.b32.xlu1 %v17319_v18, %s10005_s22  ;;  %v14885_v35 = vrot.slane %v7519_v46, %v10191_v11  ;;  %v17332_v18 = vld [vmem:[#allocation197_spill] sm:$0xff]  ;;  %v17338_v46 = vcombine.high %v14174_v29, %v17307_v38  ;;  %v17342_v29 = vld [vmem:[#allocation224_spill] sm:$0xff]  ;;  %v6999_v49 = vrot.slane %v6991_v8, %v10210_v47 }
 0x6c7   : > { %v8063_v34 = vcombine.low %v17333_v22, %v17332_v18  ;;  %v17343_v38 = vld [vmem:[#allocation228_spill] sm:$0xff]  ;;  %v8422_v22 = vcombine.high %v8382_v36, %v8414_v48  ;;  %v7535_v20 = vcombine.low %v14911_v4, %v14892_v17  ;;  %v14929_v31 = vrot.slane %v8047_v62, %v10191_v11 }
 0x6c8   : > { %v7567_v21 = vcombine.low %v14895_v61, %v14885_v35  ;;  %v8607_v18 = vcombine.low %v17343_v38, %v17342_v29  ;;  %v7055_v51 = vcombine.low %v6999_v49, %v7031_v7  ;;  %v17348_v8 = vld [vmem:[#allocation220_spill] sm:$0xff]  ;;  %v14957_v38 = vpop.permute.xlu0 %8839 }
 0x6c9   : > { %v14918_v13 = vrot.slane %v8063_v34, %v10191_v11  ;;  %v8575_v34 = vcombine.low %v17345_v15, %v17344_v44  ;;  %v8559_v62 = vcombine.low %v17349_v14, %v17348_v8  ;;  %v17354_v8 = vld [vmem:[#allocation172_spill] sm:$0xff] }
 0x6ca   : > { %9035 = vrot.lane.b32.xlu0 %v17328_v40, %s10007_s24  ;;  %8973 = vrot.lane.b32.xlu1 %v17329_v10, %s10005_s22  ;;  %v17340_v40 = vld [vmem:[#allocation190_spill] sm:$0xff]  ;;  %v7575_v48 = vrot.slane %v7567_v21, %v10210_v47 }
 0x6cb   : > { %v17341_v10 = vld [vmem:[#allocation186_spill] sm:$0xff]  ;;  %v8111_v52 = vcombine.low %v14929_v31, %v14918_v13  ;;  %v14952_v21 = vrot.slane %v8575_v34, %v10191_v11  ;;  %v14966_v15 = vrot.slane %v8559_v62, %v10191_v11 }
 0x6cc   : > { %v8015_v2 = vcombine.low %v17341_v10, %v17340_v40  ;;  %v14946_v40 = vrot.slane %v8607_v18, %v10191_v11  ;;  %v7543_v10 = vrot.slane %v7535_v20, %v10210_v47 }
 0x6cd   : > { %v8119_v20 = vrot.slane %v8111_v52, %v10210_v47  ;;  %v17353_v52 = vld [vmem:[#allocation170_spill] sm:$0xff] }
 0x6ce   : > { %9039 = vrot.lane.b32.xlu0 %v17338_v46, %s10007_s24  ;;  %8977 = vrot.lane.b32.xlu1 %v17339_v16, %s10005_s22  ;;  %v17347_v46 = vld [vmem:[#allocation223_spill] sm:$0xff]  ;;  %v14939_v36 = vrot.slane %v8015_v2, %v10191_v11  ;;  %v7599_v44 = vcombine.low %v7543_v10, %v7575_v48  ;;  %v17355_v14 = vcombine.low %v17353_v52, %v17354_v8 }
 0x6cf   : > { %v8591_v16 = vcombine.low %v17347_v46, %v17346_v58  ;;  %v8536_v58 = vcombine.high %v14795_v0, %v14789_v57  ;;  %v14988_v0 = vpop.permute.xlu0 %8843  ;;  %v7600_v27 = vcombine.high %v7543_v10, %v7575_v48  ;;  %v17376_v48 = vld [vmem:[#allocation175_spill] sm:$0xff] }
 0x6d0   : > { %v8079_v29 = vcombine.low %v14939_v36, %v14926_v39  ;;  %v7607_v10 = vcombine.low %v17376_v48, %v17375_v23  ;;  %v17381_v23 = vld [vmem:[#allocation209_spill] sm:$0xff] }
 0x6d1   : > { %v14955_v2 = vrot.slane %v8591_v16, %v10191_v11  ;;  %v8623_v16 = vcombine.low %v14966_v15, %v14952_v21  ;;  %v14986_v57 = vrot.slane %v8536_v58, %v10210_v47  ;;  %v17382_v48 = vld [vmem:[#allocation213_spill] sm:$0xff] }
 0x6d2   : > { %9043 = vrot.lane.b32.xlu0 %v8422_v22, %s10007_s24  ;;  %8981 = vrot.lane.b32.xlu1 %v8556_v6, %s10005_s22  ;;  %v17350_v22 = vld [vmem:[#allocation257_spill] sm:$0xff]  ;;  %v17351_v6 = vld [vmem:[#allocation255_spill] sm:$0xff]  ;;  %v8087_v46 = vrot.slane %v8079_v29, %v10210_v47  ;;  %s9909_s22 = sshll.u32 %s10016_s17, 4  ;;  %s9910_s22 = int_to_ptr.vmem [resolvable:$false] %s9909_s22 }
 0x6d3   : > { %v17352_v18 = vcombine.low %v17350_v22, %v17351_v6  ;;  %v8655_v34 = vcombine.low %v14955_v2, %v14946_v40 }
 0x6d4   : > { %v8143_v29 = vcombine.low %v8087_v46, %v8119_v20 }
 0x6d5   : > { %v14983_v62 = vrot.slane %v8655_v34, %v10210_v47  ;;  %v15001_v34 = vpop.permute.xlu0 %8847 }
 0x6d6   : > { %9063 = vrot.lane.b32.xlu0 %v7055_v51, %s9998_s12  ;;  %9001 = vrot.lane.b32.xlu1 %v17352_v18, %s10006_s23  ;;  %v8504_v51 = vcombine.high %v14808_v41, %v14792_v33  ;;  %v14991_v18 = vrot.slane %v8623_v16, %v10210_v47  ;;  %v17356_v41 = vld [vmem:[#allocation203_spill] sm:$0xff]  ;;  %v17359_v16 = vld [vmem:[#allocation158_spill] sm:$0xff] }
 0x6d7   : > { %v7111_v30 = vcombine.low %v17360_v42, %v17359_v16  ;;  %v17365_v42 = vcombine.high %v17350_v22, %v17351_v6  ;;  %v17370_v22 = vld [vmem:[#allocation177_spill] sm:$0xff]  ;;  %v17371_v6 = vld [vmem:[#allocation180_spill] sm:$0xff] }
 0x6d8   : > { %v14994_v33 = vrot.slane %v8504_v51, %v10210_v47  ;;  %v8687_v58 = vcombine.low %v14991_v18, %v14983_v62  ;;  %v17361_v51 = vld [vmem:[#allocation29_spill] sm:$0xff] }
 0x6d9   : > { %v15020_v12 = vrot.slane %v7111_v30, %v10191_v11 }
 0x6da   : > { %9067 = vrot.lane.b32.xlu0 %v7599_v44, %s9998_s12  ;;  %9005 = vrot.lane.b32.xlu1 %v17355_v14, %s10006_s23  ;;  %v17357_v44 = vld [vmem:[#allocation199_spill] sm:$0xff]  ;;  %v8557_v60 = vcombine.low %v14994_v33, %v14986_v57 }
 0x6db   : > { %v17358_v14 = vcombine.low %v17356_v41, %v17357_v44 }
 0x6de   : > { %9071 = vrot.lane.b32.xlu0 %v8143_v29, %s9998_s12  ;;  %9009 = vrot.lane.b32.xlu1 %v17358_v14, %s10006_s23  ;;  %v17362_v29 = vld [vmem:[#allocation9_spill] sm:$0xff]  ;;  %v7056_v14 = vcombine.high %v6999_v49, %v7031_v7  ;;  %v17368_v7 = vld [vmem:[#allocation179_spill] sm:$0xff]  ;;  %v17369_v49 = vld [vmem:[#allocation182_spill] sm:$0xff] }
 0x6df   : > { %v7095_v55 = vcombine.low %v17362_v29, %v17361_v51  ;;  %v7655_v51 = vcombine.low %v17369_v49, %v17368_v7  ;;  %v7623_v29 = vcombine.low %v17371_v6, %v17370_v22  ;;  %v17377_v49 = vld [vmem:[#allocation17_spill] sm:$0xff]  ;;  %v17378_v22 = vld [vmem:[#allocation211_spill] sm:$0xff] }
 0x6e1   : > { %v15034_v24 = vrot.slane %v7095_v55, %v10191_v11  ;;  %v17374_v55 = vcombine.high %v17353_v52, %v17354_v8  ;;  %v15061_v7 = vrot.slane %v7655_v51, %v10191_v11  ;;  %v15073_v8 = vrot.slane %v7623_v29, %v10191_v11  ;;  %v17379_v51 = vld [vmem:[#allocation212_spill] sm:$0xff] }
 0x6e2   : > { %9075 = vrot.lane.b32.xlu0 %v8687_v58, %s9998_s12  ;;  %9013 = vrot.lane.b32.xlu1 %v8557_v60, %s10006_s23  ;;  %v17366_v60 = vld [vmem:[#allocation261_spill] sm:$0xff]  ;;  %v17367_v58 = vld [vmem:[#allocation260_spill] sm:$0xff]  ;;  %v7568_v29 = vcombine.high %v14895_v61, %v14885_v35  ;;  %v8688_v35 = vcombine.high %v14991_v18, %v14983_v62  ;;  %v8558_v61 = vcombine.high %v14994_v33, %v14986_v57  ;;  %s9911_s23 = scalar_lea.vmem %s9910_s22, 1024 }
 0x6e3   : > { %v7063_v16 = vcombine.low %v17367_v58, %v17366_v60  ;;  %v15046_v58 = vrot.slane %v7024_v32, %v10210_v47  ;;  %v7159_v50 = vcombine.low %v15034_v24, %v15020_v12  ;;  %v15064_v32 = vrot.slane %v6992_v1, %v10210_v47 }
 0x6e4   : > { %v15013_v9 = vpop.permute.xlu0 %8851  ;;  %v8727_v62 = vcombine.low %v14712_v45, %v14716_v59  ;;  %v8112_v57 = vcombine.high %v14929_v31, %v14918_v13  ;;  %v8080_v31 = vcombine.high %v14939_v36, %v14926_v39  ;;  %v8656_v36 = vcombine.high %v14955_v2, %v14946_v40 }
 0x6e5   : > { %v15056_v26 = vrot.slane %v7063_v16, %v10191_v11  ;;  %v15081_v1 = vrot.slane %v7159_v50, %v10210_v47 }
 0x6e6   : > { %9095 = vrot.lane.b32.xlu0 %v7056_v14, %s10008_s25  ;;  %9033 = vrot.lane.b32.xlu1 %v17365_v42, %s10007_s24  ;;  %v17372_v14 = vld [vmem:[#allocation178_spill] sm:$0xff]  ;;  %v17373_v42 = vld [vmem:[#allocation181_spill] sm:$0xff]  ;;  %v8670_v40 = vrot.slane %v8656_v36, %v10210_v47 }
 0x6e7   : > { %v7639_v60 = vcombine.low %v17373_v42, %v17372_v14  ;;  %v8144_v14 = vcombine.high %v8087_v46, %v8119_v20  ;;  %v7127_v52 = vcombine.low %v15056_v26, %v15039_v25  ;;  %v17380_v42 = vld [vmem:[#allocation208_spill] sm:$0xff]  ;;  %v17383_v20 = vcombine.high %v17356_v41, %v17357_v44 }
 0x6e8   : > { %v15036_v30 = vpop.permute.xlu0 %8871  ;;  %v7057_v46 = vcombine.low %v15064_v32, %v15046_v58  ;;  %v8743_v41 = vcombine.low %v14724_v37, %v14728_v54  ;;  %v8711_v54 = vcombine.low %v14663_v63, %v14667_v53  ;;  %v8695_v53 = vcombine.low %v14630_v19, %v14634_v3  ;;  %v15158_v3 = vpop.permute.xlu1 %8841 }
 0x6e9   : > { %v15076_v16 = vrot.slane %v7639_v60, %v10191_v11  ;;  %v15095_v60 = vrot.slane %v7607_v10, %v10191_v11  ;;  %v7135_v10 = vrot.slane %v7127_v52, %v10210_v47  ;;  %v15156_v19 = vrot.slane %v8727_v62, %v10191_v11 }
 0x6ea   : > { %9099 = vrot.lane.b32.xlu0 %v7600_v27, %s10008_s25  ;;  %9037 = vrot.lane.b32.xlu1 %v17374_v55, %s10007_s24  ;;  %v8199_v27 = vcombine.low %v17378_v22, %v17377_v49  ;;  %v8167_v55 = vcombine.low %v17380_v42, %v17379_v51  ;;  %v8183_v49 = vcombine.low %v17382_v48, %v17381_v23  ;;  %v17384_v22 = vld [vmem:[#allocation210_spill] sm:$0xff] }
 0x6eb   : > { %v7703_v50 = vcombine.low %v15076_v16, %v15061_v7  ;;  %v17385_v51 = vld [vmem:[#allocation206_spill] sm:$0xff]  ;;  %v7536_v23 = vcombine.high %v14911_v4, %v14892_v17  ;;  %v7582_v17 = vrot.slane %v7568_v29, %v10210_v47  ;;  %v7191_v18 = vcombine.low %v7135_v10, %v15081_v1 }
 0x6ec   : > { %v15068_v6 = vpop.permute.xlu0 %8875  ;;  %v15102_v42 = vrot.slane %v8199_v27, %v10191_v11  ;;  %v7671_v27 = vcombine.low %v15095_v60, %v15073_v8  ;;  %v15118_v48 = vrot.slane %v8167_v55, %v10191_v11  ;;  %v15121_v37 = vrot.slane %v8183_v49, %v10191_v11 }
 0x6ed   : > { %v7711_v4 = vrot.slane %v7703_v50, %v10210_v47  ;;  %v15142_v45 = vrot.slane %v8743_v41, %v10191_v11  ;;  %v7550_v52 = vrot.slane %v7536_v23, %v10210_v47  ;;  %v15153_v49 = vrot.slane %v8711_v54, %v10191_v11  ;;  %v15183_v23 = vpop.permute.xlu1 %8845 }
 0x6ee   : > { %9103 = vrot.lane.b32.xlu0 %v8144_v14, %s10008_s25  ;;  %9041 = vrot.lane.b32.xlu1 %v17383_v20, %s10007_s24  ;;  %v8151_v14 = vcombine.low %v17385_v51, %v17384_v22  ;;  %v8247_v63 = vcombine.low %v15121_v37, %v15102_v42  ;;  %v7679_v13 = vrot.slane %v7671_v27, %v10210_v47 }
 0x6ef   : > { %v8126_v20 = vrot.slane %v8112_v57, %v10210_v47  ;;  %v7601_v29 = vcombine.low %v7550_v52, %v7582_v17  ;;  %v15167_v22 = vrot.slane %v8695_v53, %v10191_v11  ;;  %v8791_v51 = vcombine.low %v15156_v19, %v15142_v45 }
 0x6f0   : > { %v15106_v44 = vpop.permute.xlu0 %8879  ;;  %v15135_v33 = vrot.slane %v8151_v14, %v10191_v11  ;;  %v7735_v50 = vcombine.low %v7679_v13, %v7711_v4  ;;  %v8255_v39 = vrot.slane %v8247_v63, %v10210_v47 }
 0x6f1   : > { %v8799_v2 = vrot.slane %v8791_v51, %v10210_v47 }
 0x6f2   : > { %9107 = vrot.lane.b32.xlu0 %v8688_v35, %s10008_s25  ;;  %9045 = vrot.lane.b32.xlu1 %v8558_v61, %s10007_s24  ;;  %v8215_v55 = vcombine.low %v15135_v33, %v15118_v48  ;;  %v8624_v35 = vcombine.high %v14966_v15, %v14952_v21  ;;  %v8759_v61 = vcombine.low %v15167_v22, %v15153_v49  ;;  %v15191_v15 = vpop.permute.xlu1 %8849 }
 0x6f4   : > { %v15144_v59 = vpop.permute.xlu0 %8883  ;;  %v8223_v41 = vrot.slane %v8215_v55, %v10210_v47  ;;  %v8638_v57 = vrot.slane %v8624_v35, %v10210_v47  ;;  %v8767_v21 = vrot.slane %v8759_v61, %v10210_v47  ;;  %v7602_v35 = vcombine.high %v7550_v52, %v7582_v17 }
 0x6f5   : > { %v7736_v61 = vcombine.high %v7679_v13, %v7711_v4  ;;  %v7704_v4 = vcombine.high %v15076_v16, %v15061_v7  ;;  %v8248_v7 = vcombine.high %v15121_v37, %v15102_v42  ;;  %v8792_v42 = vcombine.high %v15156_v19, %v15142_v45 }
 0x6f6   : > { %9127 = vrot.lane.b32.xlu0 %v7057_v46, %s10009_s3  ;;  %9065 = vrot.lane.b32.xlu1 %v7191_v18, %s9998_s12  ;;  %v8094_v46 = vrot.slane %v8080_v31, %v10210_v47  ;;  %v8279_v62 = vcombine.low %v8223_v41, %v8255_v39  ;;  %v8689_v63 = vcombine.low %v8638_v57, %v8670_v40 }
 0x6f7   : > { %v8823_v53 = vcombine.low %v8767_v21, %v8799_v2  ;;  %v8824_v13 = vcombine.high %v8767_v21, %v8799_v2 }
 0x6f8   : > { %v15171_v14 = vpop.permute.xlu0 %8903  ;;  %v8145_v54 = vcombine.low %v8094_v46, %v8126_v20 }
 0x6fa   : > { %9131 = vrot.lane.b32.xlu0 %v7601_v29, %s10009_s3  ;;  %9069 = vrot.lane.b32.xlu1 %v7735_v50, %s9998_s12  ;;  %v7058_v29 = vcombine.high %v15064_v32, %v15046_v58  ;;  %v7192_v50 = vcombine.high %v7135_v10, %v15081_v1  ;;  %v8146_v1 = vcombine.high %v8094_v46, %v8126_v20 }
 0x6fb   : > { %v8280_v10 = vcombine.high %v8223_v41, %v8255_v39 }
 0x6fc   : > { %v15185_v27 = vpop.permute.xlu0 %8907 }
 0x6fe   : > { %9135 = vrot.lane.b32.xlu0 %v8145_v54, %s10009_s3  ;;  %9073 = vrot.lane.b32.xlu1 %v8279_v62, %s9998_s12  ;;  %v7160_v54 = vcombine.high %v15034_v24, %v15020_v12  ;;  %v7128_v62 = vcombine.high %v15056_v26, %v15039_v25  ;;  %v8690_v24 = vcombine.high %v8638_v57, %v8670_v40 }
 0x6ff   : > { %v7672_v25 = vcombine.high %v15095_v60, %v15073_v8  ;;  %v7718_v26 = vrot.slane %v7704_v4, %v10210_v47  ;;  %v8216_v40 = vcombine.high %v15135_v33, %v15118_v48  ;;  %v17386_v8 = vld [vmem:[#allocation252_spill] sm:$0xff]  ;;  %v17387_v60 = vld [vmem:[#allocation258_spill] sm:$0xff]  ;;  %v8262_v57 = vrot.slane %v8248_v7, %v10210_v47  ;;  %v17389_v33 = vld [vmem:[#allocation173_spill] sm:$0xff] }
 0x700   : > { %v15193_v18 = vpop.permute.xlu0 %8911  ;;  %v7174_v17 = vrot.slane %v7160_v54, %v10210_v47  ;;  %v7142_v20 = vrot.slane %v7128_v62, %v10210_v47  ;;  %v17388_v2 = vcombine.low %v17386_v8, %v17387_v60  ;;  %v8760_v48 = vcombine.high %v15167_v22, %v15153_v49 }
 0x701   : > { %v7686_v41 = vrot.slane %v7672_v25, %v10210_v47 }
 0x702   : > { %9139 = vrot.lane.b32.xlu0 %v8689_v63, %s10009_s3  ;;  %9077 = vrot.lane.b32.xlu1 %v8823_v53, %s9998_s12  ;;  %v7193_v46 = vcombine.low %v7142_v20, %v7174_v17  ;;  %v8230_v53 = vrot.slane %v8216_v40, %v10210_v47  ;;  %v8774_v54 = vrot.slane %v8760_v48, %v10210_v47 }
 0x703   : > { %v7737_v63 = vcombine.low %v7686_v41, %v7718_v26  ;;  %v17398_v40 = vcombine.low %v14623_v43, %v14609_v56 }
 0x704   : > { %v15197_v31 = vpop.permute.xlu1 %8853  ;;  %v15199_v55 = vpop.permute.xlu0 %8915  ;;  %v8281_v19 = vcombine.low %v8230_v53, %v8262_v57 }
 0x706   : > { %9159 = vrot.lane.b32.xlu0 %v7058_v29, %s10010_s4  ;;  %9097 = vrot.lane.b32.xlu1 %v7192_v50, %s10008_s25  ;;  %v17390_v29 = vld [vmem:[#allocation32_spill] sm:$0xff] }
 0x707   : > { %v17391_v50 = vcombine.low %v17389_v33, %v17390_v29 }
 0x708   : > { %v15206_v36 = vpop.permute.xlu1 %8873  ;;  %v15208_v51 = vpop.permute.xlu0 %8935 }
 0x70a   : > { %9163 = vrot.lane.b32.xlu0 %v7602_v35, %s10010_s4  ;;  %9101 = vrot.lane.b32.xlu1 %v7736_v61, %s10008_s25  ;;  %v8806_v35 = vrot.slane %v8792_v42, %v10210_v47  ;;  %v17399_v42 = vld [vmem:[#allocation242_spill] sm:$0xff] }
 0x70c   : > { %v15214_v58 = vpop.permute.xlu1 %8877  ;;  %v15216_v32 = vpop.permute.xlu0 %8939  ;;  %v8825_v4 = vcombine.low %v8774_v54, %v8806_v35 }
 0x70e   : > { %9167 = vrot.lane.b32.xlu0 %v8146_v1, %s10010_s4  ;;  %9105 = vrot.lane.b32.xlu1 %v8280_v10, %s10008_s25  ;;  %v17392_v1 = vld [vmem:[#allocation201_spill] sm:$0xff]  ;;  %v17393_v10 = vld [vmem:[#allocation200_spill] sm:$0xff] }
 0x70f   : > { %v17394_v62 = vcombine.low %v17392_v1, %v17393_v10 }
 0x710   : > { %v15225_v52 = vpop.permute.xlu1 %8881  ;;  %v15227_v12 = vpop.permute.xlu0 %8943 }
 0x712   : > { %9171 = vrot.lane.b32.xlu0 %v8690_v24, %s10010_s4  ;;  %9109 = vrot.lane.b32.xlu1 %v8824_v13, %s10008_s25  ;;  %v17395_v24 = vld [vmem:[#allocation217_spill] sm:$0xff]  ;;  %v17396_v13 = vld [vmem:[#allocation207_spill] sm:$0xff] }
 0x713   : > { %v17397_v25 = vcombine.low %v17395_v24, %v17396_v13 }
 0x714   : > { %v15237_v16 = vpop.permute.xlu1 %8885  ;;  %v8948_v39 = vpop.permute.xlu0 %8947 }
 0x715   : > { %v9317_v7 = vsel %vm4984_vm1, %v17397_v25, %v15013_v9 }
 0x716   : > { %9191 = vrot.lane.b32.xlu0 %v17388_v2, %s10011_s27  ;;  %9129 = vrot.lane.b32.xlu1 %v7193_v46, %s10009_s3  ;;  %v9325_v46 = vsel %vm4993_vm2, %v9317_v7, %v15144_v59 }
 0x717   : > { %v9333_v2 = vsel %vm5002_vm3, %v9325_v46, %v15199_v55  ;;  %v7738_v46 = vcombine.high %v7686_v41, %v7718_v26  ;;  %v17407_v26 = vld [vmem:[#allocation183_spill] sm:$0xff] }
 0x718   : > { %v15250_v37 = vpop.permute.xlu1 %8905  ;;  %v8968_v21 = vpop.permute.xlu0 %8967  ;;  %v9341_v59 = vsel %vm5011_vm4, %v9333_v2, %v8948_v39  ;;  %v17408_v41 = vld [vmem:[#allocation15_spill] sm:$0xff] }
 0x71a   : > { %9195 = vrot.lane.b32.xlu0 %v17391_v50, %s10011_s27  ;;  %9133 = vrot.lane.b32.xlu1 %v7737_v63, %s10009_s3  ;;  %v17400_v63 = vld [vmem:[#allocation243_spill] sm:$0xff] }
 0x71b   : > { %v17401_v9 = vcombine.low %v17399_v42, %v17400_v63  ;;  %v8282_v63 = vcombine.high %v8230_v53, %v8262_v57 }
 0x71c   : > { %v15261_v61 = vpop.permute.xlu1 %8909  ;;  %v8972_v45 = vpop.permute.xlu0 %8971 }
 0x71d   : > { %v9311_v48 = vsel %vm4984_vm1, %v17401_v9, %v14957_v38  ;;  %v17402_v38 = vcombine.high %v17386_v8, %v17387_v60  ;;  %v17406_v60 = vcombine.high %v17389_v33, %v17390_v29 }
 0x71e   : > { %9199 = vrot.lane.b32.xlu0 %v17394_v62, %s10011_s27  ;;  %9137 = vrot.lane.b32.xlu1 %v8281_v19, %s10009_s3  ;;  %v7194_v62 = vcombine.high %v7142_v20, %v7174_v17  ;;  %v17403_v17 = vld [vmem:[#allocation156_spill] sm:$0xff]  ;;  %v17404_v20 = vld [vmem:[#allocation159_spill] sm:$0xff] }
 0x720   : > { %v15269_v49 = vpop.permute.xlu1 %8913  ;;  %v8976_v22 = vpop.permute.xlu0 %8975 }
 0x722   : > { %9203 = vrot.lane.b32.xlu0 %v17398_v40, %s10011_s27  ;;  %9141 = vrot.lane.b32.xlu1 %v8825_v4, %s10009_s3  ;;  %v9319_v4 = vsel %vm4993_vm2, %v9311_v48, %v15036_v30  ;;  %v17405_v30 = vcombine.low %v17403_v17, %v17404_v20  ;;  %v17422_v17 = vld [vmem:[#allocation171_spill] sm:$0xff] }
 0x723   : > { %v9327_v55 = vsel %vm5002_vm3, %v9319_v4, %v15171_v14 }
 0x724   : > { %v15291_v50 = vpop.permute.xlu1 %8917  ;;  %v8980_v19 = vpop.permute.xlu0 %8979  ;;  %v9335_v39 = vsel %vm5011_vm4, %v9327_v55, %v15208_v51  ;;  %v9313_v13 = vsel %vm4984_vm1, %v17405_v30, %v14988_v0 }
 0x725   : > { %v9349_v24 = vsel %vm5020_vm5, %v9341_v59, %v8980_v19  ;;  %v9343_v25 = vsel %vm5020_vm5, %v9335_v39, %v8968_v21  ;;  %v9321_v40 = vsel %vm4993_vm2, %v9313_v13, %v15068_v6  ;;  %v17409_v21 = vcombine.low %v17407_v26, %v17408_v41 }
 0x726   : > { %9161 = vrot.lane.b32.xlu1 %v7194_v62, %s10010_s4  ;;  %9223 = vrot.lane.b32.xlu0 %v17402_v38, %s10012_s29  ;;  %v9329_v51 = vsel %vm5002_vm3, %v9321_v40, %v15185_v27  ;;  %v17419_v38 = vld [vmem:[#allocation188_spill] sm:$0xff]  ;;  %v17430_v41 = vcombine.low %v14599_v28, %v14602_v5  ;;  %v17437_v5 = vld [vmem:[#allocation253_spill] sm:$0xff] }
 0x727   : > { %v9337_v0 = vsel %vm5011_vm4, %v9329_v51, %v15216_v32  ;;  %v9315_v6 = vsel %vm4984_vm1, %v17409_v21, %v15001_v34  ;;  %v17410_v34 = vcombine.high %v17392_v1, %v17393_v10  ;;  %v17428_v51 = vld [vmem:[#allocation204_spill] sm:$0xff] }
 0x728   : > { %v8938_v14 = vpop.permute.xlu1 %8937  ;;  %v9000_v7 = vpop.permute.xlu0 %8999  ;;  %v9345_v2 = vsel %vm5020_vm5, %v9337_v0, %v8972_v45  ;;  %v9323_v9 = vsel %vm4993_vm2, %v9315_v6, %v15106_v44  ;;  %v8826_v45 = vcombine.high %v8774_v54, %v8806_v35  ;;  %v17415_v35 = vld [vmem:[#allocation256_spill] sm:$0xff]  ;;  %v17416_v54 = vld [vmem:[#allocation259_spill] sm:$0xff]  ;;  %v9318_v21 = vsel %vm4984_vm1, %v17430_v41, %v15197_v31  ;;  %v17438_v31 = vld [vmem:[#allocation254_spill] sm:$0xff] }
 0x729   : > { %v9351_v8 = vsel %vm5029_vm6, %v9343_v25, %v9000_v7  ;;  %v9331_v32 = vsel %vm5002_vm3, %v9323_v9, %v15193_v18  ;;  %v17411_v18 = vcombine.high %v14623_v43, %v14609_v56  ;;  %v17417_v62 = vcombine.low %v17415_v35, %v17416_v54  ;;  %v17418_v43 = vld [vmem:[#allocation184_spill] sm:$0xff]  ;;  %v17424_v7 = vld [vmem:[#allocation215_spill] sm:$0xff] }
 0x72a   : > { %9165 = vrot.lane.b32.xlu1 %v7738_v46, %s10010_s4  ;;  %9227 = vrot.lane.b32.xlu0 %v17406_v60, %s10012_s29  ;;  %v9339_v29 = vsel %vm5011_vm4, %v9331_v32, %v15227_v12  ;;  %v17412_v12 = vld [vmem:[#allocation12_spill] sm:$0xff]  ;;  %v17420_v39 = vcombine.low %v17418_v43, %v17419_v38  ;;  %v17425_v46 = vld [vmem:[#allocation218_spill] sm:$0xff] }
 0x72b   : > { %v9347_v57 = vsel %vm5020_vm5, %v9339_v29, %v8976_v22  ;;  %v17413_v22 = vld [vmem:[#allocation263_spill] sm:$0xff]  ;;  %v17426_v40 = vcombine.low %v17424_v7, %v17425_v46  ;;  %v17435_v32 = vld [vmem:[#allocation226_spill] sm:$0xff]  ;;  %v17439_v29 = vcombine.low %v17437_v5, %v17438_v31 }
 0x72c   : > { %v15329_v42 = vpop.permute.xlu1 %8941  ;;  %v9004_v27 = vpop.permute.xlu0 %9003  ;;  %v17414_v19 = vcombine.low %v17412_v12, %v17413_v22 }
 0x72d   : > { %v9353_v33 = vsel %vm5029_vm6, %v9345_v2, %v9004_v27  ;;  %v9326_v2 = vsel %vm4993_vm2, %v9318_v21, %v15237_v16  ;;  %v17431_v27 = vld [vmem:[#allocation233_spill] sm:$0xff] }
 0x72e   : > { %9169 = vrot.lane.b32.xlu1 %v8282_v63, %s10010_s4  ;;  %9231 = vrot.lane.b32.xlu0 %v17410_v34, %s10012_s29  ;;  %v17432_v63 = vld [vmem:[#allocation232_spill] sm:$0xff]  ;;  %v9334_v28 = vsel %vm5002_vm3, %v9326_v2, %v15291_v50 }
 0x72f   : > { %v17433_v9 = vcombine.low %v17431_v27, %v17432_v63  ;;  %v17454_v2 = vld [vmem:[#allocation160_spill] sm:$0xff] }
 0x730   : > { %v15344_v53 = vpop.permute.xlu1 %8945  ;;  %v9008_v44 = vpop.permute.xlu0 %9007 }
 0x731   : > { %v9355_v48 = vsel %vm5029_vm6, %v9347_v57, %v9008_v44  ;;  %v9312_v57 = vsel %vm4984_vm1, %v17439_v29, %v15158_v3  ;;  %v17441_v3 = vcombine.high %v17415_v35, %v17416_v54  ;;  %v17445_v54 = vcombine.high %v17418_v43, %v17419_v38 }
 0x732   : > { %9173 = vrot.lane.b32.xlu1 %v8826_v45, %s10010_s4  ;;  %9235 = vrot.lane.b32.xlu0 %v17411_v18, %s10012_s29 }
 0x734   : > { %v8950_v1 = vpop.permute.xlu1 %8949  ;;  %v9012_v10 = vpop.permute.xlu0 %9011 }
 0x735   : > { %v9357_v59 = vsel %vm5029_vm6, %v9349_v24, %v9012_v10  ;;  %v17421_v24 = vld [vmem:[#allocation174_spill] sm:$0xff]  ;;  %v9342_v16 = vsel %vm5011_vm4, %v9334_v28, %v8950_v1 }
 0x736   : > { %9193 = vrot.lane.b32.xlu1 %v17414_v19, %s10011_s27  ;;  %9255 = vrot.lane.b32.xlu0 %v17417_v62, %s10013_s30  ;;  %v17423_v20 = vcombine.low %v17421_v24, %v17422_v17  ;;  %v17440_v19 = vcombine.high %v17412_v12, %v17413_v22  ;;  %v17443_v62 = vld [vmem:[#allocation169_spill] sm:$0xff] }
 0x738   : > { %v8970_v4 = vpop.permute.xlu1 %8969  ;;  %v9032_v55 = vpop.permute.xlu0 %9031 }
 0x739   : > { %v9359_v56 = vsel %vm5038_vm7, %v9351_v8, %v9032_v55  ;;  %v17427_v8 = vld [vmem:[#allocation205_spill] sm:$0xff] }
 0x73a   : > { %9197 = vrot.lane.b32.xlu1 %v17420_v39, %s10011_s27  ;;  %9259 = vrot.lane.b32.xlu0 %v17423_v20, %s10013_s30  ;;  %v17429_v60 = vcombine.low %v17427_v8, %v17428_v51 }
 0x73c   : > { %v8974_v30 = vpop.permute.xlu1 %8973  ;;  %v9036_v13 = vpop.permute.xlu0 %9035 }
 0x73d   : > { %v9361_v25 = vsel %vm5038_vm7, %v9353_v33, %v9036_v13  ;;  %v17434_v33 = vld [vmem:[#allocation28_spill] sm:$0xff]  ;;  %v17448_v13 = vld [vmem:[#allocation26_spill] sm:$0xff] }
 0x73e   : > { %9201 = vrot.lane.b32.xlu1 %v17426_v40, %s10011_s27  ;;  %9263 = vrot.lane.b32.xlu0 %v17429_v60, %s10013_s30  ;;  %v17436_v34 = vcombine.low %v17434_v33, %v17435_v32 }
 0x740   : > { %v8978_v0 = vpop.permute.xlu1 %8977  ;;  %v9040_v26 = vpop.permute.xlu0 %9039 }
 0x741   : > { %v9363_v6 = vsel %vm5038_vm7, %v9355_v48, %v9040_v26  ;;  %v9320_v48 = vsel %vm4993_vm2, %v9312_v57, %v15206_v36  ;;  %v17442_v36 = vld [vmem:[#allocation168_spill] sm:$0xff] }
 0x742   : > { %9205 = vrot.lane.b32.xlu1 %v17433_v9, %s10011_s27  ;;  %9267 = vrot.lane.b32.xlu0 %v17436_v34, %s10013_s30  ;;  %v9328_v50 = vsel %vm5002_vm3, %v9320_v48, %v15250_v37  ;;  %v17455_v9 = vld [vmem:[#allocation264_spill] sm:$0xff] }
 0x743   : > { %v9336_v1 = vsel %vm5011_vm4, %v9328_v50, %v8938_v14 }
 0x744   : > { %v8982_v44 = vpop.permute.xlu1 %8981  ;;  %v9044_v45 = vpop.permute.xlu0 %9043  ;;  %v9344_v37 = vsel %vm5020_vm5, %v9336_v1, %v8970_v4  ;;  %v17447_v4 = vld [vmem:[#allocation194_spill] sm:$0xff] }
 0x745   : > { %v9350_v18 = vsel %vm5020_vm5, %v9342_v16, %v8982_v44  ;;  %v9365_v10 = vsel %vm5038_vm7, %v9357_v59, %v9044_v45  ;;  %v17444_v59 = vcombine.low %v17442_v36, %v17443_v62  ;;  %v17460_v44 = vld [vmem:[#allocation219_spill] sm:$0xff]  ;;  %v17461_v45 = vld [vmem:[#allocation214_spill] sm:$0xff] }
 0x746   : > { %9225 = vrot.lane.b32.xlu1 %v17440_v19, %s10012_s29  ;;  %9287 = vrot.lane.b32.xlu0 %v17441_v3, %s10014_s18  ;;  %v17462_v48 = vcombine.low %v17460_v44, %v17461_v45  ;;  %v17463_v3 = vld [vmem:[#allocation229_spill] sm:$0xff]  ;;  %v17464_v1 = vld [vmem:[#allocation222_spill] sm:$0xff] }
 0x747   : > { %v9314_v55 = vsel %vm4984_vm1, %v17444_v59, %v15183_v23  ;;  %v17446_v23 = vcombine.high %v17421_v24, %v17422_v17  ;;  %v17450_v17 = vcombine.high %v17424_v7, %v17425_v46  ;;  %v17452_v7 = vcombine.high %v17431_v27, %v17432_v63 }
 0x748   : > { %v9002_v39 = vpop.permute.xlu1 %9001  ;;  %v9064_v20 = vpop.permute.xlu0 %9063  ;;  %v9322_v12 = vsel %vm4993_vm2, %v9314_v55, %v15214_v58  ;;  %v17453_v46 = vcombine.high %v17434_v33, %v17435_v32  ;;  %v17457_v33 = vld [vmem:[#allocation189_spill] sm:$0xff]  ;;  %v17465_v36 = vcombine.low %v17463_v3, %v17464_v1 }
 0x749   : > { %v9352_v22 = vsel %vm5029_vm6, %v9344_v37, %v9002_v39  ;;  %v9367_v35 = vsel %vm5047_vm8, %v9359_v56, %v9064_v20  ;;  %v9330_v14 = vsel %vm5002_vm3, %v9322_v12, %v15261_v61  ;;  %v17449_v56 = vcombine.low %v17447_v4, %v17448_v13  ;;  %v17458_v32 = vld [vmem:[#allocation185_spill] sm:$0xff] }
 0x74a   : > { %9229 = vrot.lane.b32.xlu1 %v17445_v54, %s10012_s29  ;;  %9291 = vrot.lane.b32.xlu0 %v17446_v23, %s10014_s18  ;;  %v9338_v58 = vsel %vm5011_vm4, %v9330_v14, %v15329_v42  ;;  %v17459_v5 = vcombine.low %v17457_v33, %v17458_v32  ;;  %v17466_v39 = vcombine.high %v17454_v2, %v17455_v9 }
 0x74b   : > { %v9316_v40 = vsel %vm4984_vm1, %v17449_v56, %v15191_v15  ;;  %v9346_v61 = vsel %vm5020_vm5, %v9338_v58, %v8974_v30  ;;  %v17451_v15 = vcombine.high %v17427_v8, %v17428_v51  ;;  %v17467_v14 = vcombine.high %v17457_v33, %v17458_v32 }
 0x74c   : > { %v9006_v60 = vpop.permute.xlu1 %9005  ;;  %v9068_v26 = vpop.permute.xlu0 %9067  ;;  %v9324_v43 = vsel %vm4993_vm2, %v9316_v40, %v15225_v52  ;;  %v17468_v13 = vcombine.high %v17460_v44, %v17461_v45 }
 0x74d   : > { %v9354_v38 = vsel %vm5029_vm6, %v9346_v61, %v9006_v60  ;;  %v9369_v24 = vsel %vm5047_vm8, %v9361_v25, %v9068_v26  ;;  %v9332_v42 = vsel %vm5002_vm3, %v9324_v43, %v15269_v49  ;;  %v17469_v26 = vcombine.high %v17463_v3, %v17464_v1 }
 0x74e   : > { %9233 = vrot.lane.b32.xlu1 %v17450_v17, %s10012_s29  ;;  %9295 = vrot.lane.b32.xlu0 %v17451_v15, %s10014_s18  ;;  %v9340_v52 = vsel %vm5011_vm4, %v9332_v42, %v15344_v53 }
 0x74f   : > { %v9348_v30 = vsel %vm5020_vm5, %v9340_v52, %v8978_v0 }
 0x750   : > { %v9010_v41 = vpop.permute.xlu1 %9009  ;;  %v9072_v25 = vpop.permute.xlu0 %9071 }
 0x751   : > { %v9356_v21 = vsel %vm5029_vm6, %v9348_v30, %v9010_v41  ;;  %v9371_v49 = vsel %vm5047_vm8, %v9363_v6, %v9072_v25  ;;  %v17456_v6 = vcombine.low %v17454_v2, %v17455_v9 }
 0x752   : > { %9237 = vrot.lane.b32.xlu1 %v17452_v7, %s10012_s29  ;;  %9299 = vrot.lane.b32.xlu0 %v17453_v46, %s10014_s18 }
 0x754   : > { %v9014_v8 = vpop.permute.xlu1 %9013  ;;  %v9076_v53 = vpop.permute.xlu0 %9075 }
 0x755   : > { %v9358_v51 = vsel %vm5029_vm6, %v9350_v18, %v9014_v8  ;;  %v9373_v0 = vsel %vm5047_vm8, %v9365_v10, %v9076_v53 }
 0x756   : > { %9257 = vrot.lane.b32.xlu1 %v17456_v6, %s10013_s30 }
 0x758   : > { %v9034_v34 = vpop.permute.xlu1 %9033  ;;  %v9096_v27 = vpop.permute.xlu0 %9095 }
 0x759   : > { %v9360_v63 = vsel %vm5038_vm7, %v9352_v22, %v9034_v34  ;;  %v9375_v28 = vsel %vm5056_vm9, %v9367_v35, %v9096_v27 }
 0x75a   : > { %9261 = vrot.lane.b32.xlu1 %v17459_v5, %s10013_s30 }
 0x75c   : > { %v9038_v31 = vpop.permute.xlu1 %9037  ;;  %v9100_v29 = vpop.permute.xlu0 %9099 }
 0x75d   : > { %v9362_v57 = vsel %vm5038_vm7, %v9354_v38, %v9038_v31  ;;  %v9377_v16 = vsel %vm5056_vm9, %v9369_v24, %v9100_v29 }
 0x75e   : > { %9265 = vrot.lane.b32.xlu1 %v17462_v48, %s10013_s30 }
 0x760   : > { %v9042_v18 = vpop.permute.xlu1 %9041  ;;  %v9104_v10 = vpop.permute.xlu0 %9103 }
 0x761   : > { %v9364_v50 = vsel %vm5038_vm7, %v9356_v21, %v9042_v18  ;;  %v9379_v19 = vsel %vm5056_vm9, %v9371_v49, %v9104_v10 }
 0x762   : > { %9269 = vrot.lane.b32.xlu1 %v17465_v36, %s10013_s30 }
 0x764   : > { %v9046_v62 = vpop.permute.xlu1 %9045  ;;  %v9108_v59 = vpop.permute.xlu0 %9107 }
 0x765   : > { %v9366_v55 = vsel %vm5038_vm7, %v9358_v51, %v9046_v62  ;;  %v9381_v37 = vsel %vm5056_vm9, %v9373_v0, %v9108_v59 }
 0x766   : > { %9289 = vrot.lane.b32.xlu1 %v17466_v39, %s10014_s18 }
 0x768   : > { %v9066_v20 = vpop.permute.xlu1 %9065  ;;  %v9128_v12 = vpop.permute.xlu0 %9127 }
 0x769   : > { %v9368_v22 = vsel %vm5047_vm8, %v9360_v63, %v9066_v20  ;;  %v9383_v35 = vsel %vm5065_vm10, %v9375_v28, %v9128_v12 }
 0x76a   : > { %9293 = vrot.lane.b32.xlu1 %v17467_v14, %s10014_s18 }
 0x76c   : > { %v9070_v54 = vpop.permute.xlu1 %9069  ;;  %v9132_v23 = vpop.permute.xlu0 %9131 }
 0x76d   : > { %v9370_v58 = vsel %vm5047_vm8, %v9362_v57, %v9070_v54  ;;  %v15511_v4 = vsel %vm5065_vm10, %v9377_v16, %v9132_v23 }
 0x76e   : > { %9297 = vrot.lane.b32.xlu1 %v17468_v13, %s10014_s18 }
 0x770   : > { %v9074_v56 = vpop.permute.xlu1 %9073  ;;  %v9136_v40 = vpop.permute.xlu0 %9135 }
 0x771   : > { %v9372_v61 = vsel %vm5047_vm8, %v9364_v50, %v9074_v56  ;;  %v15519_v60 = vsel %vm5065_vm10, %v9379_v19, %v9136_v40 }
 0x772   : > { %9301 = vrot.lane.b32.xlu1 %v17469_v26, %s10014_s18 }
 0x774   : > { %v9078_v43 = vpop.permute.xlu1 %9077  ;;  %v9140_v38 = vpop.permute.xlu0 %9139 }
 0x775   : > { %v9374_v24 = vsel %vm5047_vm8, %v9366_v55, %v9078_v43  ;;  %v15527_v42 = vsel %vm5065_vm10, %v9381_v37, %v9140_v38 }
 0x778   : > { %v9098_v17 = vpop.permute.xlu1 %9097  ;;  %v9160_v15 = vpop.permute.xlu0 %9159 }
 0x779   : > { %v9376_v52 = vsel %vm5056_vm9, %v9368_v22, %v9098_v17  ;;  %v9391_v55 = vsel %vm5074_vm11, %v9383_v35, %v9160_v15 }
 0x77c   : > { %v9102_v30 = vpop.permute.xlu1 %9101  ;;  %v9164_v41 = vpop.permute.xlu0 %9163 }
 0x77d   : > { %v9378_v25 = vsel %vm5056_vm9, %v9370_v58, %v9102_v30  ;;  %v9393_v14 = vsel %vm5074_vm11, %v15511_v4, %v9164_v41 }
 0x780   : > { %v9106_v21 = vpop.permute.xlu1 %9105  ;;  %v9168_v49 = vpop.permute.xlu0 %9167 }
 0x781   : > { %v9380_v7 = vsel %vm5056_vm9, %v9372_v61, %v9106_v21  ;;  %v9395_v40 = vsel %vm5074_vm11, %v15519_v60, %v9168_v49 }
 0x784   : > { %v9110_v46 = vpop.permute.xlu1 %9109  ;;  %v9172_v8 = vpop.permute.xlu0 %9171 }
 0x785   : > { %v9382_v53 = vsel %vm5056_vm9, %v9374_v24, %v9110_v46  ;;  %v9397_v17 = vsel %vm5074_vm11, %v15527_v42, %v9172_v8 }
 0x788   : > { %v9130_v51 = vpop.permute.xlu1 %9129  ;;  %v9192_v0 = vpop.permute.xlu0 %9191 }
 0x789   : > { %v15534_v2 = vsel %vm5065_vm10, %v9376_v52, %v9130_v51  ;;  %v9399_v37 = vsel %vm5083_vm12, %v9391_v55, %v9192_v0  ;;  %v17474_v55 = vld [vmem:[#allocation121_spill] sm:$0xff] }
 0x78c   : > { %v9134_v9 = vpop.permute.xlu1 %9133  ;;  %v9196_v6 = vpop.permute.xlu0 %9195 }
 0x78d   : > { %v15537_v34 = vsel %vm5065_vm10, %v9378_v25, %v9134_v9  ;;  %v9401_v23 = vsel %vm5083_vm12, %v9393_v14, %v9196_v6  ;;  %v17479_v14 = vld [vmem:[#allocation119_spill] sm:$0xff] }
 0x790   : > { %v9138_v27 = vpop.permute.xlu1 %9137  ;;  %v9200_v63 = vpop.permute.xlu0 %9199 }
 0x791   : > { %v15540_v28 = vsel %vm5065_vm10, %v9380_v7, %v9138_v27  ;;  %v9403_v26 = vsel %vm5083_vm12, %v9395_v40, %v9200_v63  ;;  %v17483_v40 = vld [vmem:[#allocation42_spill] sm:$0xff] }
 0x794   : > { %v9142_v33 = vpop.permute.xlu1 %9141  ;;  %v9204_v32 = vpop.permute.xlu0 %9203 }
 0x795   : > { %v15543_v5 = vsel %vm5065_vm10, %v9382_v53, %v9142_v33  ;;  %v9405_v52 = vsel %vm5083_vm12, %v9397_v17, %v9204_v32 }
 0x798   : > { %v9162_v31 = vpop.permute.xlu1 %9161  ;;  %v9224_v29 = vpop.permute.xlu0 %9223 }
 0x799   : > { %v9407_v39 = vsel %vm5092_vm13, %v9399_v37, %v9224_v29  ;;  %v9392_v8 = vsel %vm5074_vm11, %v15534_v2, %v9162_v31  ;;  %v17475_v37 = vld [vmem:[#allocation68_spill] sm:$0xff] }
 0x79c   : > { %v9166_v57 = vpop.permute.xlu1 %9165  ;;  %v9228_v16 = vpop.permute.xlu0 %9227 }
 0x79d   : > { %v9409_v35 = vsel %vm5092_vm13, %v9401_v23, %v9228_v16  ;;  %v9394_v6 = vsel %vm5074_vm11, %v15537_v34, %v9166_v57  ;;  %v17480_v23 = vld [vmem:[#allocation88_spill] sm:$0xff] }
 0x7a0   : > { %v15545_v44 = vpop.permute.xlu1 %9169  ;;  %v9232_v45 = vpop.permute.xlu0 %9231 }
 0x7a1   : > { %v9411_v4 = vsel %vm5092_vm13, %v9403_v26, %v9232_v45  ;;  %v9396_v31 = vsel %vm5074_vm11, %v15540_v28, %v15545_v44 }
 0x7a4   : > { %v15547_v48 = vpop.permute.xlu1 %9173  ;;  %v9236_v18 = vpop.permute.xlu0 %9235 }
 0x7a5   : > { %v9413_v60 = vsel %vm5092_vm13, %v9405_v52, %v9236_v18  ;;  %v9398_v18 = vsel %vm5074_vm11, %v15543_v5, %v15547_v48  ;;  %v17489_v52 = vld [vmem:[#allocation104_spill] sm:$0xff] }
 0x7a8   : > { %v9194_v10 = vpop.permute.xlu1 %9193  ;;  %v9256_v50 = vpop.permute.xlu0 %9255 }
 0x7a9   : > { %v9415_v20 = vsel %vm5101_vm14, %v9407_v39, %v9256_v50  ;;  %v9400_v53 = vsel %vm5083_vm12, %v9392_v8, %v9194_v10  ;;  %v17495_v8 = vld [vmem:[#allocation123_spill] sm:$0xff] }
 0x7ac   : > { %v9198_v19 = vpop.permute.xlu1 %9197  ;;  %v9260_v3 = vpop.permute.xlu0 %9259 }
 0x7ad   : > { %v9417_v58 = vsel %vm5101_vm14, %v9409_v35, %v9260_v3  ;;  %v9402_v63 = vsel %vm5083_vm12, %v9394_v6, %v9198_v19 }
 0x7b0   : > { %v9202_v1 = vpop.permute.xlu1 %9201  ;;  %v9264_v36 = vpop.permute.xlu0 %9263 }
 0x7b1   : > { %v9419_v43 = vsel %vm5101_vm14, %v9411_v4, %v9264_v36  ;;  %v9404_v16 = vsel %vm5083_vm12, %v9396_v31, %v9202_v1  ;;  %v17470_v1 = vld [vmem:[#allocation120_spill] sm:$0xff]  ;;  %v17471_v36 = vld [vmem:[#allocation133_spill] sm:$0xff] }
 0x7b4   : > { %v15549_v62 = vpop.permute.xlu1 %9205  ;;  %v9268_v59 = vpop.permute.xlu0 %9267 }
 0x7b5   : > { %v9421_v30 = vsel %vm5101_vm14, %v9413_v60, %v9268_v59  ;;  %v9406_v28 = vsel %vm5083_vm12, %v9398_v18, %v15549_v62  ;;  %v17472_v59 = vld [vmem:[#allocation134_spill] sm:$0xff]  ;;  %v17476_v62 = vld [vmem:[#allocation72_spill] sm:$0xff]  ;;  %v17490_v60 = vld [vmem:[#allocation93_spill] sm:$0xff] }
 0x7b6   : > { %v17473_v5 = vcombine.low %v17471_v36, %v17472_v59  ;;  %v17477_v39 = vcombine.low %v17475_v37, %v17476_v62  ;;  %v17503_v18 = vld [vmem:[#allocation35_spill] sm:$0xff]  ;;  %v17507_v36 = vld [vmem:[#allocation62_spill] sm:$0xff] }
 0x7b7   : > { %v17510_v62 = vld [vmem:[#allocation31_spill] sm:$0xff] }
 0x7b8   : > { %v9226_v12 = vpop.permute.xlu1 %9225  ;;  %v9288_v22 = vpop.permute.xlu0 %9287  ;;  %v4985_v48 = vsel %vm4984_vm1, %v17473_v5, %v17470_v1  ;;  %v17508_v5 = vld [vmem:[#allocation97_spill] sm:$0xff] }
 0x7b9   : > { %v9423_v54 = vsel %vm5110_vm15, %v9415_v20, %v9288_v22  ;;  %v9408_v51 = vsel %vm5092_vm13, %v9400_v53, %v9226_v12  ;;  %v4989_v20 = vsel %vm4984_vm1, %v17477_v39, %v17474_v55  ;;  %v17478_v12 = vld [vmem:[#allocation118_spill] sm:$0xff] }
 0x7ba   : > { %9439 = vrot.lane.b32.xlu0 %v9423_v54, %s9997_s5  ;;  %v4994_v22 = vsel %vm4993_vm2, %v4985_v48, %v17478_v12  ;;  %v4998_v54 = vsel %vm4993_vm2, %v4989_v20, %v17479_v14  ;;  %v17509_v55 = vld [vmem:[#allocation50_spill] sm:$0xff]  ;;  %v17511_v20 = vld [vmem:[#allocation99_spill] sm:$0xff] }
 0x7bb   : > { %v5003_v35 = vsel %vm5002_vm3, %v4994_v22, %v17480_v23  ;;  %v17512_v22 = vld [vmem:[#allocation149_spill] sm:$0xff] }
 0x7bc   : > { %v9230_v13 = vpop.permute.xlu1 %9229  ;;  %v9292_v56 = vpop.permute.xlu0 %9291 }
 0x7bd   : > { %v9425_v61 = vsel %vm5110_vm15, %v9417_v58, %v9292_v56  ;;  %v9410_v33 = vsel %vm5092_vm13, %v9402_v63, %v9230_v13  ;;  %v17481_v58 = vld [vmem:[#allocation126_spill] sm:$0xff]  ;;  %v17482_v56 = vld [vmem:[#allocation109_spill] sm:$0xff] }
 0x7be   : > { %9443 = vrot.lane.b32.xlu0 %v9425_v61, %s9997_s5  ;;  %v5007_v13 = vsel %vm5002_vm3, %v4998_v54, %v17481_v58  ;;  %v17484_v61 = vld [vmem:[#allocation43_spill] sm:$0xff]  ;;  %v17513_v54 = vld [vmem:[#allocation78_spill] sm:$0xff] }
 0x7bf   : > { %v17485_v26 = vcombine.low %v17483_v40, %v17484_v61  ;;  %v17516_v40 = vld [vmem:[#allocation142_spill] sm:$0xff] }
 0x7c0   : > { %v9234_v38 = vpop.permute.xlu1 %9233  ;;  %v9296_v24 = vpop.permute.xlu0 %9295 }
 0x7c1   : > { %v9427_v15 = vsel %vm5110_vm15, %v9419_v43, %v9296_v24  ;;  %v9412_v34 = vsel %vm5092_vm13, %v9404_v16, %v9234_v38  ;;  %v4987_v4 = vsel %vm4984_vm1, %v17485_v26, %v17482_v56  ;;  %v17486_v43 = vld [vmem:[#allocation124_spill] sm:$0xff]  ;;  %v17487_v24 = vld [vmem:[#allocation34_spill] sm:$0xff]  ;;  %v17517_v26 = vld [vmem:[#allocation115_spill] sm:$0xff] }
 0x7c2   : > { %9447 = vrot.lane.b32.xlu0 %v9427_v15, %s9997_s5  ;;  %v5012_v38 = vsel %vm5011_vm4, %v5003_v35, %v17486_v43  ;;  %v5016_v17 = vsel %vm5011_vm4, %v5007_v13, %v17487_v24  ;;  %v17488_v15 = vld [vmem:[#allocation117_spill] sm:$0xff]  ;;  %v17518_v43 = vld [vmem:[#allocation110_spill] sm:$0xff] }
 0x7c3   : > { %v17514_v35 = vld [vmem:[#allocation77_spill] sm:$0xff] }
 0x7c4   : > { %v9238_v41 = vpop.permute.xlu1 %9237  ;;  %v9300_v25 = vpop.permute.xlu0 %9299  ;;  %v17515_v13 = vld [vmem:[#allocation85_spill] sm:$0xff] }
 0x7c5   : > { %v9429_v21 = vsel %vm5110_vm15, %v9421_v30, %v9300_v25  ;;  %v9414_v44 = vsel %vm5092_vm13, %v9406_v28, %v9238_v41  ;;  %v17491_v30 = vcombine.low %v17489_v52, %v17490_v60  ;;  %v17492_v25 = vld [vmem:[#allocation122_spill] sm:$0xff]  ;;  %v17504_v28 = vld [vmem:[#allocation63_spill] sm:$0xff] }
 0x7c6   : > { %9451 = vrot.lane.b32.xlu0 %v9429_v21, %s9997_s5  ;;  %v4996_v21 = vsel %vm4993_vm2, %v4987_v4, %v17492_v25  ;;  %v17520_v52 = vld [vmem:[#allocation47_spill] sm:$0xff]  ;;  %v17522_v25 = vld [vmem:[#allocation73_spill] sm:$0xff] }
 0x7c7   : > { %v4991_v41 = vsel %vm4984_vm1, %v17491_v30, %v17488_v15  ;;  %v17521_v30 = vld [vmem:[#allocation136_spill] sm:$0xff] }
 0x7c8   : > { %v9258_v49 = vpop.permute.xlu1 %9257  ;;  %v5000_v53 = vsel %vm4993_vm2, %v4991_v41, %v17495_v8  ;;  %v17525_v8 = vld [vmem:[#allocation54_spill] sm:$0xff] }
 0x7c9   : > { %v9416_v0 = vsel %vm5101_vm14, %v9408_v51, %v9258_v49  ;;  %v17493_v49 = vld [vmem:[#allocation154_spill] sm:$0xff] }
 0x7ca   : > { %v17496_v51 = vld [vmem:[#allocation130_spill] sm:$0xff] }
 0x7cc   : > { %v9262_v7 = vpop.permute.xlu1 %9261 }
 0x7cd   : > { %v9418_v2 = vsel %vm5101_vm14, %v9410_v33, %v9262_v7  ;;  %v5021_v7 = vsel %vm5020_vm5, %v5012_v38, %v17493_v49  ;;  %v17499_v33 = vld [vmem:[#allocation128_spill] sm:$0xff]  ;;  %v17523_v49 = vld [vmem:[#allocation45_spill] sm:$0xff] }
 0x7d0   : > { %v9266_v46 = vpop.permute.xlu1 %9265 }
 0x7d1   : > { %v9420_v57 = vsel %vm5101_vm14, %v9412_v34, %v9266_v46  ;;  %v17494_v46 = vld [vmem:[#allocation61_spill] sm:$0xff]  ;;  %v17502_v34 = vld [vmem:[#allocation56_spill] sm:$0xff] }
 0x7d4   : > { %v9270_v42 = vpop.permute.xlu1 %9269 }
 0x7d5   : > { %v9422_v50 = vsel %vm5101_vm14, %v9414_v44, %v9270_v42  ;;  %v5025_v42 = vsel %vm5020_vm5, %v5016_v17, %v17494_v46  ;;  %v17519_v17 = vld [vmem:[#allocation138_spill] sm:$0xff]  ;;  %v17524_v46 = vld [vmem:[#allocation152_spill] sm:$0xff] }
 0x7d8   : > { %v9290_v9 = vpop.permute.xlu1 %9289 }
 0x7d9   : > { %v9424_v27 = vsel %vm5110_vm15, %v9416_v0, %v9290_v9  ;;  %v5005_v0 = vsel %vm5002_vm3, %v4996_v21, %v17496_v51  ;;  %v17497_v9 = vld [vmem:[#allocation59_spill] sm:$0xff]  ;;  %v17526_v51 = vld [vmem:[#allocation76_spill] sm:$0xff] }
 0x7da   : > { %9441 = vrot.lane.b32.xlu1 %v9424_v27, %s9997_s5  ;;  %v5030_v6 = vsel %vm5029_vm6, %v5021_v7, %v17497_v9  ;;  %v17498_v27 = vld [vmem:[#allocation94_spill] sm:$0xff]  ;;  %v17527_v9 = vld [vmem:[#allocation71_spill] sm:$0xff] }
 0x7db   : > { %v5034_v63 = vsel %vm5029_vm6, %v5025_v42, %v17498_v27  ;;  %v17528_v27 = vld [vmem:[#allocation90_spill] sm:$0xff] }
 0x7dc   : > { %v9294_v32 = vpop.permute.xlu1 %9293 }
 0x7dd   : > { %v9426_v29 = vsel %vm5110_vm15, %v9418_v2, %v9294_v32  ;;  %v5009_v2 = vsel %vm5002_vm3, %v5000_v53, %v17499_v33  ;;  %v17500_v32 = vld [vmem:[#allocation37_spill] sm:$0xff] }
 0x7de   : > { %9445 = vrot.lane.b32.xlu1 %v9426_v29, %s9997_s5  ;;  %v5014_v31 = vsel %vm5011_vm4, %v5005_v0, %v17500_v32  ;;  %v17501_v29 = vld [vmem:[#allocation92_spill] sm:$0xff]  ;;  %v17529_v33 = vld [vmem:[#allocation101_spill] sm:$0xff] }
 0x7df   : > { %v5039_v16 = vsel %vm5038_vm7, %v5030_v6, %v17501_v29  ;;  %v5023_v44 = vsel %vm5020_vm5, %v5014_v31, %v17504_v28  ;;  %v17530_v32 = vld [vmem:[#allocation108_spill] sm:$0xff]  ;;  %v17531_v29 = vld [vmem:[#allocation103_spill] sm:$0xff] }
 0x7e0   : > { %v9298_v45 = vpop.permute.xlu1 %9297  ;;  %v5032_v48 = vsel %vm5029_vm6, %v5023_v44, %v17508_v5  ;;  %v17534_v44 = vld [vmem:[#allocation41_spill] sm:$0xff] }
 0x7e1   : > { %v9428_v10 = vsel %vm5110_vm15, %v9420_v57, %v9298_v45  ;;  %v5043_v57 = vsel %vm5038_vm7, %v5034_v63, %v17502_v34  ;;  %v5041_v14 = vsel %vm5038_vm7, %v5032_v48, %v17512_v22  ;;  %v17532_v34 = vld [vmem:[#allocation153_spill] sm:$0xff]  ;;  %v17537_v48 = vld [vmem:[#allocation44_spill] sm:$0xff] }
 0x7e2   : > { %9449 = vrot.lane.b32.xlu1 %v9428_v10, %s9997_s5  ;;  %v5018_v10 = vsel %vm5011_vm4, %v5009_v2, %v17503_v18  ;;  %v5050_v61 = vsel %vm5047_vm8, %v5041_v14, %v17516_v40  ;;  %v17533_v18 = vld [vmem:[#allocation19_spill] sm:$0xff]  ;;  %v17540_v14 = vld [vmem:[#allocation64_spill] sm:$0xff] }
 0x7e3   : > { %v5027_v59 = vsel %vm5020_vm5, %v5018_v10, %v17507_v36  ;;  %v5059_v60 = vsel %vm5056_vm9, %v5050_v61, %v17520_v52 }
 0x7e4   : > { %v9302_v19 = vpop.permute.xlu1 %9301  ;;  %v5036_v12 = vsel %vm5029_vm6, %v5027_v59, %v17511_v20  ;;  %v5068_v0 = vsel %vm5065_vm10, %v5059_v60, %v17526_v51  ;;  %v17536_v59 = vld [vmem:[#allocation137_spill] sm:$0xff]  ;;  %v17546_v51 = vld [vmem:[#allocation127_spill] sm:$0xff] }
 0x7e5   : > { %v9430_v3 = vsel %vm5110_vm15, %v9422_v50, %v9302_v19  ;;  %v17505_v50 = vld [vmem:[#allocation144_spill] sm:$0xff]  ;;  %v5045_v56 = vsel %vm5038_vm7, %v5036_v12, %v17515_v13  ;;  %v5077_v31 = vsel %vm5074_vm11, %v5068_v0, %v17530_v32  ;;  %v17539_v12 = vld [vmem:[#allocation14_spill] sm:$0xff]  ;;  %v17547_v0 = vld [vmem:[#allocation79_spill] sm:$0xff] }
 0x7e6   : > { %9453 = vrot.lane.b32.xlu1 %v9430_v3, %s9997_s5  ;;  %v5048_v19 = vsel %vm5047_vm8, %v5039_v16, %v17505_v50  ;;  %v17506_v3 = vld [vmem:[#allocation140_spill] sm:$0xff]  ;;  %v5054_v15 = vsel %vm5047_vm8, %v5045_v56, %v17519_v17  ;;  %v5086_v50 = vsel %vm5083_vm12, %v5077_v31, %v17534_v44  ;;  %v17551_v31 = vld [vmem:[#allocation11_spill] sm:$0xff]  ;;  %v17555_v44 = vld [vmem:[#allocation98_spill] sm:$0xff]  ;;  %s153_s5 = scalar_lea.vmem [#allocation5], %s9778_s28  ;;  %s9786_s28 = sshll.u32 %s9979_s9, 9 }
 0x7e7   : > { %v5052_v1 = vsel %vm5047_vm8, %v5043_v57, %v17506_v3  ;;  %v5057_v37 = vsel %vm5056_vm9, %v5048_v19, %v17509_v55  ;;  %v5063_v7 = vsel %vm5056_vm9, %v5054_v15, %v17523_v49  ;;  %v17535_v19 = vld [vmem:[#allocation105_spill] sm:$0xff]  ;;  %v5095_v5 = vsel %vm5092_vm13, %v5086_v50, %v17536_v59  ;;  %s15943_s15 = scalar_lea.hbm %s15993_s1, %s9786_s28  ;;  %s9670_s9 = scalar_lea.sflag [#allocation4], %s10139_s26 }
 0x7e8   : > { %v5061_v39 = vsel %vm5056_vm9, %v5052_v1, %v17510_v62  ;;  %v5066_v23 = vsel %vm5065_vm10, %v5057_v37, %v17513_v54  ;;  %v5072_v6 = vsel %vm5065_vm10, %v5063_v7, %v17527_v9  ;;  %v17542_v7 = vld [vmem:[#allocation83_spill] sm:$0xff]  ;;  %v17548_v9 = vld [vmem:[#allocation84_spill] sm:$0xff] }
 0x7e9   : > { %v5070_v58 = vsel %vm5065_vm10, %v5061_v39, %v17514_v35  ;;  %v5075_v4 = vsel %vm5074_vm11, %v5066_v23, %v17517_v26  ;;  %v5081_v16 = vsel %vm5074_vm11, %v5072_v6, %v17531_v29  ;;  %v17538_v39 = vld [vmem:[#allocation70_spill] sm:$0xff]  ;;  %v17549_v6 = vcombine.low %v17547_v0, %v17548_v9  ;;  %v17578_v0 = vld [vmem:[#allocation151_spill] sm:$0xff] }
 0x7ea   : > { %v5079_v38 = vsel %vm5074_vm11, %v5070_v58, %v17518_v43  ;;  %v5084_v41 = vsel %vm5083_vm12, %v5075_v4, %v17521_v30  ;;  %v5090_v3 = vsel %vm5083_vm12, %v5081_v16, %v17535_v19  ;;  %v5104_v20 = vsel %vm5101_vm14, %v5095_v5, %v17538_v39  ;;  %v17552_v16 = vld [vmem:[#allocation155_spill] sm:$0xff]  ;;  %v17560_v5 = vld [vmem:[#allocation129_spill] sm:$0xff]  ;;  %v17564_v39 = vld [vmem:[#allocation96_spill] sm:$0xff] }
 0x7eb   : > { %v5088_v21 = vsel %vm5083_vm12, %v5079_v38, %v17522_v25  ;;  %v5093_v42 = vsel %vm5092_vm13, %v5084_v41, %v17524_v46  ;;  %v5099_v55 = vsel %vm5092_vm13, %v5090_v3, %v17537_v48  ;;  %v5113_v54 = vsel %vm5110_vm15, %v5104_v20, %v17540_v14  ;;  %v17543_v46 = vld [vmem:[#allocation147_spill] sm:$0xff]  ;;  %v17557_v3 = vld [vmem:[#allocation52_spill] sm:$0xff]  ;;  %v17561_v48 = vld [vmem:[#allocation113_spill] sm:$0xff] }
 0x7ec   : > { %v5097_v53 = vsel %vm5092_vm13, %v5088_v21, %v17525_v8  ;;  %v5102_v63 = vsel %vm5101_vm14, %v5093_v42, %v17528_v27  ;;  %v5108_v22 = vsel %vm5101_vm14, %v5099_v55, %v17539_v12  ;;  %v10015_v25 = vmov 0.0   ;;  %v17544_v42 = vld [vmem:[#allocation148_spill] sm:$0xff]  ;;  %v17556_v19 = vld [vmem:[#allocation131_spill] sm:$0xff]  ;;  %v17565_v12 = vld [vmem:[#allocation57_spill] sm:$0xff] }
 0x7ed   : > { %v5106_v2 = vsel %vm5101_vm14, %v5097_v53, %v17529_v33  ;;  %v5111_v57 = vsel %vm5110_vm15, %v5102_v63, %v17532_v34  ;;  %v17545_v8 = vcombine.low %v17543_v46, %v17544_v42  ;;  %v4990_v27 = vsel %vm4984_vm1, %v17549_v6, %v17546_v51  ;;  %v17562_v55 = vld [vmem:[#allocation116_spill] sm:$0xff]  ;;  %v17566_v14 = vld [vmem:[#allocation38_spill] sm:$0xff] }
 0x7ee   : > { %v5115_v10 = vsel %vm5110_vm15, %v5106_v2, %v17533_v18  ;;  %v17550_v2 = vld [vmem:[#allocation125_spill] sm:$0xff]  ;;  %v4999_v29 = vsel %vm4993_vm2, %v4990_v27, %v17551_v31  ;;  %v17576_v42 = vld [vmem:[#allocation82_spill] sm:$0xff]  ;;  %v17582_v31 = vld [vmem:[#allocation143_spill] sm:$0xff] }
 0x7ef   : > { %v4986_v53 = vsel %vm4984_vm1, %v17545_v8, %v17542_v7  ;;  %v17575_v7 = vld [vmem:[#allocation95_spill] sm:$0xff]  ;;  %v17579_v6 = vld [vmem:[#allocation86_spill] sm:$0xff] }
 0x7f0   : > { %v4995_v32 = vsel %vm4993_vm2, %v4986_v53, %v17550_v2  ;;  %v17577_v53 = vld [vmem:[#allocation81_spill] sm:$0xff]  ;;  %v17581_v2 = vld [vmem:[#allocation114_spill] sm:$0xff] }
 0x7f1   : > { %v5004_v34 = vsel %vm5002_vm3, %v4995_v32, %v17552_v16  ;;  %v17583_v16 = vld [vmem:[#allocation139_spill] sm:$0xff] }
 0x82c   : > { %v9440_v45 = vpop.permute.xlu0 %9439 }
 0x82d   : > { %v9464_v1 = vsel %vm9463_vm0, %v5111_v57, %v9440_v45  ;;  %v17541_v45 = vld [vmem:[#allocation87_spill] sm:$0xff]  ;;  %v17553_v57 = vld [vmem:[#allocation65_spill] sm:$0xff] }
 0x82e   : > { %v5117_v23 = vsel %vm5110_vm15, %v5108_v22, %v17541_v45  ;;  %v5008_v18 = vsel %vm5002_vm3, %v4999_v29, %v17553_v57  ;;  %v17567_v45 = vld [vmem:[#allocation36_spill] sm:$0xff] }
 0x82f   : > { %v5017_v50 = vsel %vm5011_vm4, %v5008_v18, %v17555_v44  ;;  %v17584_v57 = vld [vmem:[#allocation132_spill] sm:$0xff] }
 0x830   : > { %v9444_v24 = vpop.permute.xlu0 %9443  ;;  %v5026_v22 = vsel %vm5020_vm5, %v5017_v50, %v17565_v12  ;;  %v17586_v44 = vld [vmem:[#allocation48_spill] sm:$0xff] }
 0x831   : > { %v9466_v58 = vsel %vm9463_vm0, %v5113_v54, %v9444_v24 }
 0x834   : > { %v9448_v28 = vpop.permute.xlu0 %9447 }
 0x835   : > { %v9468_v36 = vsel %vm9463_vm0, %v5115_v10, %v9448_v28  ;;  %v17554_v10 = vld [vmem:[#allocation60_spill] sm:$0xff] }
 0x836   : > { %v9472_v37 = vcombine.low %v9464_v1, %v9468_v36  ;;  %v9473_v62 = vcombine.high %v9464_v1, %v9468_v36  ;;  %v5013_v28 = vsel %vm5011_vm4, %v5004_v34, %v17554_v10  ;;  %v17558_v1 = vld [vmem:[#allocation53_spill] sm:$0xff] }
 0x837   : > { %v17559_v36 = vcombine.low %v17557_v3, %v17558_v1  ;;  %v5022_v20 = vsel %vm5020_vm5, %v5013_v28, %v17564_v39  ;;  %v17585_v10 = vld [vmem:[#allocation69_spill] sm:$0xff]  ;;  %v17588_v1 = vld [vmem:[#allocation146_spill] sm:$0xff] }
 0x838   : > { %v9452_v35 = vpop.permute.xlu0 %9451  ;;  %v9480_v61 = vrot.slane %v9472_v37, %v10191_v11  ;;  %v9487_v26 = vrot.slane %v9473_v62, %v10191_v11  ;;  %v17563_v37 = vcombine.low %v17561_v48, %v17562_v55  ;;  %v17590_v55 = vld [vmem:[#allocation80_spill] sm:$0xff] }
 0x839   : > { %v9470_v13 = vsel %vm9463_vm0, %v5117_v23, %v9452_v35  ;;  %v4988_v59 = vsel %vm4984_vm1, %v17559_v36, %v17556_v19  ;;  %v17568_v35 = vld [vmem:[#allocation145_spill] sm:$0xff]  ;;  %v17587_v19 = vld [vmem:[#allocation46_spill] sm:$0xff] }
 0x83a   : > { %v9488_v56 = vcombine.low %v9466_v58, %v9470_v13  ;;  %v9489_v40 = vcombine.high %v9466_v58, %v9470_v13  ;;  %v4992_v62 = vsel %vm4984_vm1, %v17563_v37, %v17560_v5  ;;  %v4997_v54 = vsel %vm4993_vm2, %v4988_v59, %v17566_v14  ;;  %v17569_v13 = vld [vmem:[#allocation141_spill] sm:$0xff]  ;;  %v17589_v59 = vld [vmem:[#allocation55_spill] sm:$0xff] }
 0x83b   : > { %v5001_v23 = vsel %vm4993_vm2, %v4992_v62, %v17567_v45  ;;  %v5031_v58 = vsel %vm5029_vm6, %v5022_v20, %v17568_v35  ;;  %v17591_v62 = vld [vmem:[#allocation75_spill] sm:$0xff]  ;;  %v17592_v20 = vld [vmem:[#allocation89_spill] sm:$0xff]  ;;  %vm9640_vm1 = vcmask 523264  }
 0x83c   : > { %v9496_v4 = vrot.slane %v9488_v56, %v10191_v11  ;;  %v9503_v43 = vrot.slane %v9489_v40, %v10191_v11  ;;  %v5035_v56 = vsel %vm5029_vm6, %v5026_v22, %v17569_v13  ;;  %v17570_v40 = vld [vmem:[#allocation67_spill] sm:$0xff]  ;;  %v17593_v22 = vld [vmem:[#allocation106_spill] sm:$0xff] }
 0x83e   : > { %v9504_v38 = vcombine.low %v9480_v61, %v9496_v4  ;;  %v9505_v17 = vcombine.high %v9480_v61, %v9496_v4  ;;  %v9520_v15 = vcombine.low %v9487_v26, %v9503_v43  ;;  %v9521_v52 = vcombine.high %v9487_v26, %v9503_v43  ;;  %v17571_v26 = vld [vmem:[#allocation66_spill] sm:$0xff]  ;;  %v17572_v43 = vld [vmem:[#allocation51_spill] sm:$0xff] }
 0x83f   : > { %v5006_v61 = vsel %vm5002_vm3, %v4997_v54, %v17570_v40  ;;  %v5010_v4 = vsel %vm5002_vm3, %v5001_v23, %v17571_v26  ;;  %v17594_v54 = vld [vmem:[#allocation112_spill] sm:$0xff]  ;;  %v17595_v23 = vld [vmem:[#allocation107_spill] sm:$0xff] }
 0x840   : > { %v15750_v60 = vrot.slane %v9504_v38, %v10210_v47  ;;  %v15753_v24 = vrot.slane %v9505_v17, %v10210_v47  ;;  %v15756_v30 = vrot.slane %v9520_v15, %v10210_v47  ;;  %v15759_v41 = vrot.slane %v9521_v52, %v10210_v47  ;;  %v17573_v17 = vld [vmem:[#allocation49_spill] sm:$0xff] }
 0x841   : > { %v5040_v38 = vsel %vm5038_vm7, %v5031_v58, %v17572_v43  ;;  %v5044_v15 = vsel %vm5038_vm7, %v5035_v56, %v17573_v17  ;;  %v5019_v46 = vsel %vm5011_vm4, %v5010_v4, %v17575_v7  ;;  %v17596_v58 = vld [vmem:[#allocation150_spill] sm:$0xff] }
 0x842   : > { %v9537_v21 = vcombine.high %v15753_v24, %v10015_v25  ;;  %v9536_v49 = vcombine.high %v15750_v60, %v10015_v25  ;;  %v9539_v63 = vcombine.high %v15759_v41, %v10015_v25  ;;  %v9538_v33 = vcombine.high %v15756_v30, %v10015_v25  ;;  %v17597_v56 = vld [vmem:[#allocation58_spill] sm:$0xff] }
 0x843   : > { %v5049_v8 = vsel %vm5047_vm8, %v5040_v38, %v17576_v42  ;;  %v5053_v51 = vsel %vm5047_vm8, %v5044_v15, %v17577_v53  ;;  %v5028_v27 = vsel %vm5020_vm5, %v5019_v46, %v17579_v6  ;;  %v17599_v4 = vld [vmem:[#allocation102_spill] sm:$0xff]  ;;  %v17600_v38 = vld [vmem:[#allocation20_spill] sm:$0xff] }
 0x844   : > { %9613 = vrot.lane.b32.xlu1 %v9537_v21, %s9995_s2  ;;  %9609 = vrot.lane.b32.xlu0 %v9536_v49, %s9995_s2  ;;  %v17574_v21 = vld [vmem:[#allocation100_spill] sm:$0xff]  ;;  %v5062_v32 = vsel %vm5056_vm9, %v5053_v51, %v17581_v2  ;;  %v5037_v34 = vsel %vm5029_vm6, %v5028_v27, %v17583_v16  ;;  %v17601_v15 = vld [vmem:[#allocation22_spill] sm:$0xff]  ;;  %v17609_v16 = vld [vmem:[#allocation91_spill] sm:$0xff] }
 0x845   : > { %v5015_v49 = vsel %vm5011_vm4, %v5006_v61, %v17574_v21  ;;  %v5071_v28 = vsel %vm5065_vm10, %v5062_v32, %v17585_v10  ;;  %v5046_v3 = vsel %vm5038_vm7, %v5037_v34, %v17587_v19  ;;  %v17598_v61 = vld [vmem:[#allocation39_spill] sm:$0xff]  ;;  %v17603_v46 = vld [vmem:[#allocation40_spill] sm:$0xff]  ;;  %v17606_v6 = vld [vmem:[#allocation74_spill] sm:$0xff] }
 0x846   : > { %v5024_v9 = vsel %vm5020_vm5, %v5015_v49, %v17578_v0  ;;  %v5080_v5 = vsel %vm5074_vm11, %v5071_v28, %v17589_v59  ;;  %v5055_v39 = vsel %vm5047_vm8, %v5046_v3, %v17591_v62  ;;  %v17602_v49 = vld [vmem:[#allocation135_spill] sm:$0xff]  ;;  %v17605_v51 = vld [vmem:[#allocation16_spill] sm:$0xff]  ;;  %v17610_v10 = vld [vmem:[#allocation21_spill] sm:$0xff] }
 0x847   : > { %v5033_v29 = vsel %vm5029_vm6, %v5024_v9, %v17582_v31  ;;  %v5089_v14 = vsel %vm5083_vm12, %v5080_v5, %v17593_v22  ;;  %v5064_v35 = vsel %vm5056_vm9, %v5055_v39, %v17595_v23  ;;  %v17608_v31 = vld [vmem:[#allocation18_spill] sm:$0xff]  ;;  %v17612_v19 = vld [vmem:[#allocation25_spill] sm:$0xff] }
 0x848   : > { %9621 = vrot.lane.b32.xlu1 %v9539_v63, %s9995_s2  ;;  %9617 = vrot.lane.b32.xlu0 %v9538_v33, %s9995_s2  ;;  %v17580_v63 = vld [vmem:[#allocation111_spill] sm:$0xff]  ;;  %v5042_v50 = vsel %vm5038_vm7, %v5033_v29, %v17586_v44  ;;  %v5098_v40 = vsel %vm5092_vm13, %v5089_v14, %v17597_v56  ;;  %v5073_v43 = vsel %vm5065_vm10, %v5064_v35, %v17599_v4 }
 0x849   : > { %v5058_v33 = vsel %vm5056_vm9, %v5049_v8, %v17580_v63  ;;  %v5051_v37 = vsel %vm5047_vm8, %v5042_v50, %v17590_v55  ;;  %v5107_v21 = vsel %vm5101_vm14, %v5098_v40, %v17601_v15  ;;  %v5082_v42 = vsel %vm5074_vm11, %v5073_v43, %v17603_v46  ;;  %v17604_v8 = vld [vmem:[#allocation24_spill] sm:$0xff]  ;;  %v17611_v44 = vld [vmem:[#allocation23_spill] sm:$0xff] }
 0x84a   : > { %v5067_v18 = vsel %vm5065_vm10, %v5058_v33, %v17584_v57  ;;  %v5060_v45 = vsel %vm5056_vm9, %v5051_v37, %v17594_v54  ;;  %v5116_v0 = vsel %vm5110_vm15, %v5107_v21, %v17605_v51  ;;  %v17607_v63 = vld [vmem:[#allocation8_spill] sm:$0xff] }
 0x84b   : > { %v5076_v36 = vsel %vm5074_vm11, %v5067_v18, %v17588_v1  ;;  %v5069_v26 = vsel %vm5065_vm10, %v5060_v45, %v17598_v61  ;;  %v5091_v33 = vsel %vm5083_vm12, %v5082_v42, %v17607_v63 }
 0x84c   : > { %v9442_v52 = vpop.permute.xlu1 %9441  ;;  %v5085_v12 = vsel %vm5083_vm12, %v5076_v36, %v17592_v20  ;;  %v5078_v7 = vsel %vm5074_vm11, %v5069_v26, %v17602_v49  ;;  %v5100_v34 = vsel %vm5092_vm13, %v5091_v33, %v17609_v16 }
 0x84d   : > { %v5094_v13 = vsel %vm5092_vm13, %v5085_v12, %v17596_v58  ;;  %v5087_v27 = vsel %vm5083_vm12, %v5078_v7, %v17606_v6  ;;  %v5109_v50 = vsel %vm5101_vm14, %v5100_v34, %v17611_v44 }
 0x84e   : > { %v5103_v17 = vsel %vm5101_vm14, %v5094_v13, %v17600_v38  ;;  %v5096_v29 = vsel %vm5092_vm13, %v5087_v27, %v17608_v31 }
 0x84f   : > { %v5112_v53 = vsel %vm5110_vm15, %v5103_v17, %v17604_v8  ;;  %v5105_v28 = vsel %vm5101_vm14, %v5096_v29, %v17610_v10 }
 0x850   : > { %v9446_v48 = vpop.permute.xlu1 %9445  ;;  %v9465_v2 = vsel %vm9463_vm0, %v5112_v53, %v9442_v52  ;;  %v5114_v3 = vsel %vm5110_vm15, %v5105_v28, %v17612_v19  ;;  %v17613_v52 = vld [vmem:[#allocation27_spill] sm:$0xff] }
 0x851   : > { %v5118_v1 = vsel %vm5110_vm15, %v5109_v50, %v17613_v52  ;;  %v9467_v59 = vsel %vm9463_vm0, %v5114_v3, %v9446_v48 }
 0x854   : > { %v9450_v9 = vpop.permute.xlu1 %9449 }
 0x855   : > { %v9469_v32 = vsel %vm9463_vm0, %v5116_v0, %v9450_v9 }
 0x856   : > { %v9540_v57 = vcombine.low %v9465_v2, %v9469_v32  ;;  %v9541_v18 = vcombine.high %v9465_v2, %v9469_v32 }
 0x858   : > { %v9454_v36 = vpop.permute.xlu1 %9453  ;;  %v9548_v62 = vrot.slane %v9540_v57, %v10191_v11  ;;  %v9555_v39 = vrot.slane %v9541_v18, %v10191_v11 }
 0x859   : > { %v9471_v5 = vsel %vm9463_vm0, %v5118_v1, %v9454_v36 }
 0x85a   : > { %v9556_v55 = vcombine.low %v9467_v59, %v9471_v5  ;;  %v9557_v37 = vcombine.high %v9467_v59, %v9471_v5 }
 0x85c   : > { %v9564_v20 = vrot.slane %v9556_v55, %v10191_v11  ;;  %v9571_v12 = vrot.slane %v9557_v37, %v10191_v11 }
 0x85e   : > { %v9572_v22 = vcombine.low %v9548_v62, %v9564_v20  ;;  %v9573_v14 = vcombine.high %v9548_v62, %v9564_v20  ;;  %v9588_v54 = vcombine.low %v9555_v39, %v9571_v12  ;;  %v9589_v45 = vcombine.high %v9555_v39, %v9571_v12 }
 0x860   : > { %v9580_v23 = vrot.slane %v9572_v22, %v10210_v47  ;;  %v9587_v48 = vrot.slane %v9573_v14, %v10210_v47  ;;  %v9596_v35 = vrot.slane %v9588_v54, %v10210_v47  ;;  %v9603_v58 = vrot.slane %v9589_v45, %v10210_v47 }
 0x862   : > { %v9605_v13 = vcombine.high %v9587_v48, %v10015_v25  ;;  %v9604_v56 = vcombine.high %v9580_v23, %v10015_v25  ;;  %v9607_v11 = vcombine.high %v9603_v58, %v10015_v25  ;;  %v9606_v40 = vcombine.high %v9596_v35, %v10015_v25 }
 0x864   : > { %9629 = vrot.lane.b32.xlu1 %v9605_v13, %s9995_s2  ;;  %9625 = vrot.lane.b32.xlu0 %v9604_v56, %s9995_s2 }
 0x868   : > { %9637 = vrot.lane.b32.xlu1 %v9607_v11, %s9995_s2  ;;  %9633 = vrot.lane.b32.xlu0 %v9606_v40, %s9995_s2  ;;  %s9686_s2 = sshll.u32 %s153_s5, 4  ;;  %s15945_s2 = int_to_ptr.vmem [resolvable:$true] %s9686_s2 }
 0x869   : > { %s9905_s16 = scalar_lea.vmem %s15945_s2, 512  ;;  %p9912_p6 = scmp.lt.s32.totalorder %s15945_s2, %s9910_s22 }
 0x86a   : > { %p9906_p8 = scmp.ne.s32.totalorder %s15945_s2, %s9905_s16  ;;  %p9913_p13 = scmp.lt.s32.totalorder %s9911_s23, %s9905_s16 }
 0x86c   : > { %p9907_p11 = pnand %p9906_p8, %p17614_p9  ;;  %p9914_p2 = por %p9913_p13, %p9912_p6 }
 0x86e   : > { %p9908_p0 = pneg %p9907_p11 }
 0x870   : > { %p9915_p5 = pnand %p9914_p2, %p9908_p0 }
 0x8b6   : > { %v9614_v61 = vpop.permute.xlu1 %9613  ;;  %v9610_v26 = vpop.permute.xlu0 %9609 }
 0x8b7   : > { %v9642_v47 = vsel %vm9640_vm1, %v15753_v24, %v9614_v61  ;;  %v9641_v4 = vsel %vm9640_vm1, %v15750_v60, %v9610_v26 }
 0x8b8   : > { %v9657_v43 = vcombine.low %v9641_v4, %v9642_v47 }
 0x8ba   : > { %9665 = vst [vmem:[%s153_s5] sm:$0xff] %v9657_v43  ;;  %v9622_v38 = vpop.permute.xlu1 %9621  ;;  %v9618_v25 = vpop.permute.xlu0 %9617 }
 0x8bb   : > { %v9644_v17 = vsel %vm9640_vm1, %v15759_v41, %v9622_v38  ;;  %v9643_v15 = vsel %vm9640_vm1, %v15756_v30, %v9618_v25 }
 0x8bc   : > { %v9658_v21 = vcombine.low %v9643_v15, %v9644_v17 }
 0x8be   : > { %9666 = vst [vmem:[%s153_s5 + $0x8] sm:$0xff] %v9658_v21 }
 0x8d6   : > { %v9630_v49 = vpop.permute.xlu1 %9629  ;;  %v9626_v24 = vpop.permute.xlu0 %9625 }
 0x8d7   : > { %v9646_v7 = vsel %vm9640_vm1, %v9587_v48, %v9630_v49  ;;  %v9645_v60 = vsel %vm9640_vm1, %v9580_v23, %v9626_v24 }
 0x8d8   : > { %v9659_v46 = vcombine.low %v9645_v60, %v9646_v7 }
 0x8da   : > { %9667 = vst [vmem:[%s153_s5 + $0x10] sm:$0xff] %v9659_v46  ;;  %v9638_v42 = vpop.permute.xlu1 %9637  ;;  %v9634_v8 = vpop.permute.xlu0 %9633 }
 0x8db   : > { %v9648_v41 = vsel %vm9640_vm1, %v9603_v58, %v9638_v42  ;;  %v9647_v30 = vsel %vm9640_vm1, %v9596_v35, %v9634_v8 }
 0x8dc   : > { %v9660_v53 = vcombine.low %v9647_v30, %v9648_v41 }
 0x8de   : > { %9668 = vst [vmem:[%s153_s5 + $0x18] sm:$0xff] %v9660_v53 }
 0x8df   : > { %9918 = shalt.err (!%p9915_p5)
}
 0x8e0   : > { %s9919_s26 = scalar_lea.hbm %s15943_s15, 512  ;;  %s9923_s3 = scalar_lea.hbm %s15993_s1, 1024 }
 0x8e1   : > { %p9920_p4 = scmp.ne.s32.totalorder %s15943_s15, %s9919_s26  ;;  %p9924_p12 = scmp.lt.u32.totalorder %s15943_s15, %s15993_s1 }
 0x8e2   : > { %p9925_p1 = scmp.lt.u32.totalorder %s9923_s3, %s9919_s26  ;;  %p9927_p8 = scmp.lt.u32.totalorder %s9919_s26, %s15943_s15 }
 0x8e3   : > { %p9921_p7 = pnand %p9920_p4, %p17614_p9 }
 0x8e4   : > { %p9926_p3 = por %p9925_p1, %p9924_p12 }
 0x8e5   : > { %p9922_p10 = pneg %p9921_p7 }
 0x8e6   : > { %p9928_p11 = por %p9927_p8, %p9926_p3 }
 0x8e8   : > { %p9929_p0 = pnand %p9928_p11, %p9922_p10 }
 0x8ea   : > { %9932 = shalt.err (!%p9929_p0)
}
 0x8eb   : > { %9789 = dma.vmem_to_hbm [thread:$0]  (%p17614_p9), %s15945_s2, 512, %s15943_s15, %s9670_s9  }
 0x8ec PF: > { %s9698_s29 = sand.u32 1, %s9967_s6   ;;  %p17615_p6 = scmp.ne.s32.totalorder %s16334_s21, 0 }
 0x8ed   : > { %p17616_p13 = scmp.ge.s32.totalorder %s9987_s11, 2  ;;  %s9699_s30 = scalar_lea.sflag [#allocation4], %s9698_s29 }
 0x8ef   : > { %p9796_p2 = pnand %p17616_p13, %p17615_p6 }
 0x8f1   : > { %9962 = dma.done.wait (!%p9796_p2), %s9699_s30, 512  }
 0x8f2   : > { %9964 = vsyncadd (!%p9796_p2), %s9699_s30, 4294966784  ;;  %s17_s11 = sadd.s32 1, %s9987_s11   ;;  %s17617_s6 = smov %s9971_s7 }
 0x8f3   : > { %p14_p5 = scmp.ge.s32.totalorder %s17_s11, 4   ;;  %s17618_s7 = smov %s9975_s8 }
 0x8f4   : > { %s17619_s8 = smov %s10083_s20  ;;  %s17620_s9 = smov %s9983_s10 }
 0x8f5   : > { %s17621_s10 = smov %s17623_s14  ;;  %16 = sbr.rel (!%p14_p5) target bundleno = 6 (0x6), region = 69 }
 0x8fc   :  { %9704 = vsyncpa [#allocation3], 1 }
 0x8fd   :  { %9706 = vsyncpa [#allocation3 + $0x1], 1 }
 0x8fe   :  { %9707 = vsyncpa [#allocation4], 1 }
 0x8ff   :  { %9709 = vsyncpa [#allocation4 + $0x1], 1 }

</bundles_post_ra>
